<compile_context>
chip_gen: v7x
topology: tpu7x:2x2x1
jax: 0.10.0
libtpu: 0.0.40
codegen_flags: <defaults>
</compile_context>

<pallas_src>
import numpy as np
import jax
import jax.numpy as jnp
from jax import lax
from jax.experimental import pallas as pl
from jax.experimental.pallas import tpu as pltpu

VMEM = pl.BlockSpec(memory_space=pltpu.MemorySpace.VMEM)


def _sigmoid(x):
    # sigmoid(x) = 0.5*(tanh(x/2)+1): single EUP pass, robust for large |x|.
    return 0.5 * (jnp.tanh(0.5 * x) + 1.0)


# ------------------------------ kernel bodies -------------------------------

def _encoder_core(ewidx, ecidx, wordgates_ref, tdnn_comb_ref, tdnngates_ref,
                  whh_ref, b_ref, wml_ref, bml_ref, eps, gx_ref):
    """Fused char-TDNN + bidirectional LSTM + reparameterisation + KLD.

    ewidx: [S*2B, 1] int32  word ids in stacked (time, fwd|bwd) row order
    ecidx: [S*2B, W] int32  char ids, same row order
    wordgates: [Vw, 8H]  word_embed @ Wih_word  (gate order i,f,o,g per direction)
    tdnn_comb: [W*Vc, W*OC]  char-embed-folded block-Toeplitz conv (mask folded in)
    tdnngates: [OC, 8H]  Wih rows for the TDNN features
    whh: [H, 8H], b: [1, 8H], wml: [2H, 2L], bml: [1, 2L], eps: [B, L]
    gx_ref: [S, 2B, 4H] scratch (pre-stacked per-direction gate inputs)
    """
    S, B2, H4 = gx_ref.shape
    B = B2 // 2
    H = whh_ref.shape[0]
    H8 = 2 * H4
    R = ewidx.shape[0]
    Vw = wordgates_ref.shape[0]
    WVc, POC = tdnn_comb_ref.shape
    OC = tdnngates_ref.shape[0]
    P = POC // OC
    W = ecidx.shape[1]
    Vc = WVc // W
    L = eps.shape[1]

    # --- hoisted input projection: word one-hot @ (embed-folded gate weights) ---
    oh_w = (lax.broadcasted_iota(jnp.int32, (R, Vw), 1) == ewidx).astype(jnp.float32)
    g_all = jnp.dot(oh_w, wordgates_ref[...], preferred_element_type=jnp.float32)

    # --- char TDNN: flat one-hot @ embed-folded block-Toeplitz (K = W*Vc) ---
    lane = lax.broadcasted_iota(jnp.int32, (R, WVc), 1)
    oh_c = (lane == ecidx[:, 0:1]).astype(jnp.float32)
    for w in range(1, W):                       # one-time, unrolled at trace time
        oh_c = oh_c + (lane == (w * Vc + ecidx[:, w:w + 1])).astype(jnp.float32)
    conv = jnp.maximum(
        jnp.dot(oh_c, tdnn_comb_ref[...], preferred_element_type=jnp.float32), 0.0)
    # max-over-time; invalid positions were zeroed in the weights (relu >= 0, safe).
    tdnn = conv[:, 0:OC]
    for pos in range(1, P):
        tdnn = jnp.maximum(tdnn, conv[:, pos * OC:(pos + 1) * OC])
    g_all = (g_all
             + jnp.dot(tdnn, tdnngates_ref[...], preferred_element_type=jnp.float32)
             + b_ref[...])                                              # [R, 8H]

    # --- pre-stack direction gate inputs: rows 0:B fwd, B:2B bwd (one-time) ---
    is_fwd = lax.broadcasted_iota(jnp.int32, (B2, H4), 0) < B
    g3 = g_all.reshape(S, B2, H8)
    gx_ref[...] = jnp.where(is_fwd[None], g3[:, :, 0:H4], g3[:, :, H4:H8])

    whh = whh_ref[...]

    def step(ti, carry):
        h, c = carry                                            # [2B, H] loop carries
        hh = jnp.dot(h, whh, preferred_element_type=jnp.float32)        # [2B, 8H]
        gates = gx_ref[ti] + jnp.where(is_fwd, hh[:, 0:H4], hh[:, H4:H8])
        sig = _sigmoid(gates[:, 0:3 * H])       # gate order (i, f, o, g)
        g_g = jnp.tanh(gates[:, 3 * H:4 * H])
        c_new = sig[:, H:2 * H] * c + sig[:, 0:H] * g_g
        h_new = sig[:, 2 * H:3 * H] * jnp.tanh(c_new)
        return h_new, c_new

    zeros = jnp.zeros((B2, H), jnp.float32)
    _, c_T = lax.fori_loop(0, S, step, (zeros, zeros))

    # context = [c_fwd | c_bwd]; fused mu/logvar projection without a lane concat.
    wml = wml_ref[...]
    ml = (jnp.dot(c_T[0:B], wml[0:H], preferred_element_type=jnp.float32)
          + jnp.dot(c_T[B:B2], wml[H:2 * H], preferred_element_type=jnp.float32)
          + bml_ref[...])                                               # [B, 2L]
    mu = ml[:, 0:L]
    logvar = ml[:, L:2 * L]
    z = eps * jnp.exp(0.5 * logvar) + mu
    per_ex = -0.5 * jnp.sum(logvar - mu * mu - jnp.exp(logvar) + 1.0,
                            axis=1, keepdims=True)
    kld = jnp.mean(per_ex, axis=0, keepdims=True)
    return z, kld


def _decoder_core(dwidx, mask, z, h0, c0,
                  wemb_ref, wih_e_ref, wih_z_ref, whh_ref, b_ref, wfc_ref, bfc_ref,
                  logits_ref, hT_ref, cT_ref, gx_ref, hs_ref):
    """Decoder LSTM with hoisted input/vocab projections.

    dwidx: [T*B, 1] int32  (time-major row order t*B+b)
    mask:  [T*B, E] pre-scaled dropout mask (ones when drop_prob == 0)
    z: [B, L]; h0/c0: [B, H]
    wemb: [Vw, E], wih_e: [E, 4H], wih_z: [L, 4H], whh: [H, 4H], b: [1, 4H]
    wfc/bfc: [H, Vp]/[1, Vp] (Vp multiple of 128 -> lane-dense stores)
    logits_ref: [B, T, Vp]; gx_ref: [T, B, 4H]; hs_ref: [T, B, H]
    """
    T, B, H4 = gx_ref.shape
    H = whh_ref.shape[0]
    Vw = wemb_ref.shape[0]
    Vp = wfc_ref.shape[1]
    TB = T * B

    # --- hoisted input projection (embedding via one-hot matmul; dropout on emb) ---
    oh = (lax.broadcasted_iota(jnp.int32, (TB, Vw), 1) == dwidx).astype(jnp.float32)
    emb = jnp.dot(oh, wemb_ref[...], preferred_element_type=jnp.float32) * mask
    gz = jnp.dot(z, wih_z_ref[...], preferred_element_type=jnp.float32)      # [B, 4H]
    gx = jnp.dot(emb, wih_e_ref[...], preferred_element_type=jnp.float32) + b_ref[...]
    gx_ref[...] = gx.reshape(T, B, H4) + gz[None]

    whh = whh_ref[...]

    def step(ti, carry):
        h, c = carry                                            # loop-carried vregs
        gates = gx_ref[ti] + jnp.dot(h, whh, preferred_element_type=jnp.float32)
        sig = _sigmoid(gates[:, 0:3 * H])       # gate order (i, f, o, g)
        g_g = jnp.tanh(gates[:, 3 * H:4 * H])
        c_new = sig[:, H:2 * H] * c + sig[:, 0:H] * g_g
        h_new = sig[:, 2 * H:3 * H] * jnp.tanh(c_new)
        hs_ref[ti] = h_new                      # only h stored in-loop (fc hoisted)
        return h_new, c_new

    h_T, c_T = lax.fori_loop(0, T, step, (h0, c0))
    hT_ref[...] = h_T
    cT_ref[...] = c_T

    # --- hoisted vocab projection: ONE [T*B, H] @ [H, Vp] matmul, lane-dense ---
    logits = (jnp.dot(hs_ref[...].reshape(TB, H), wfc_ref[...],
                      preferred_element_type=jnp.float32) + bfc_ref[...])
    logits3 = logits.reshape(T, B, Vp)
    for t in range(T):                          # static stores of full [B, Vp] rows
        logits_ref[:, t, :] = logits3[t]


def _rvae_fused_kernel(
        ew_ref, ec_ref, dw_ref, mask_ref, eps_ref, h0_ref, c0_ref,
        enc_wg_ref, tdnn_ref, enc_tg_ref, enc_whh_ref, enc_b_ref, wml_ref, bml_ref,
        wemb_ref, dwe_ref, dwz_ref, dec_whh_ref, dec_b_ref, wfc_ref, bfc_ref,
        logits_ref, hT_ref, cT_ref, kld_ref,
        enc_gx_ref, dec_gx_ref, dec_hs_ref):
    z, kld = _encoder_core(ew_ref[...], ec_ref[...], enc_wg_ref, tdnn_ref, enc_tg_ref,
                           enc_whh_ref, enc_b_ref, wml_ref, bml_ref, eps_ref[...],
                           enc_gx_ref)
    kld_ref[...] = kld
    _decoder_core(dw_ref[...], mask_ref[...], z, h0_ref[...], c0_ref[...],
                  wemb_ref, dwe_ref, dwz_ref, dec_whh_ref, dec_b_ref, wfc_ref, bfc_ref,
                  logits_ref, hT_ref, cT_ref, dec_gx_ref, dec_hs_ref)


def _decoder_only_kernel(dw_ref, mask_ref, z_ref, h0_ref, c0_ref,
                         wemb_ref, dwe_ref, dwz_ref, dec_whh_ref, dec_b_ref,
                         wfc_ref, bfc_ref,
                         logits_ref, hT_ref, cT_ref, dec_gx_ref, dec_hs_ref):
    _decoder_core(dw_ref[...], mask_ref[...], z_ref[...], h0_ref[...], c0_ref[...],
                  wemb_ref, dwe_ref, dwz_ref, dec_whh_ref, dec_b_ref, wfc_ref, bfc_ref,
                  logits_ref, hT_ref, cT_ref, dec_gx_ref, dec_hs_ref)


# ----------------------------- model definition -----------------------------

class Params:
    word_vocab_size = 64
    char_vocab_size = 32
    word_embed_size = 16
    char_embed_size = 8
    max_word_len = 10
    kernels = ((1, 4), (2, 4), (3, 8))      # (kernel_width, out_channels)
    sum_depth = 16
    encoder_rnn_size = 32
    encoder_num_layers = 1
    latent_variable_size = 16
    decoder_rnn_size = 32
    decoder_num_layers = 1


def init_rvae_params(key, p):
    ks = iter(jax.random.split(key, 64))

    def nrm(shape, scale=0.05):
        return (scale * jax.random.normal(next(ks), shape)).astype(jnp.float32)

    params = {}
    params["word_embed"] = nrm((p.word_vocab_size, p.word_embed_size), 0.1)
    params["char_embed"] = nrm((p.char_vocab_size, p.char_embed_size), 0.1)
    # TDNN conv kernels stored pre-flattened as [kw*char_embed, oc]
    params["tdnn"] = [nrm((kw * p.char_embed_size, oc)) for kw, oc in p.kernels]
    enc_in = p.word_embed_size + p.sum_depth
    H = p.encoder_rnn_size
    for d in ("fwd", "bwd"):
        params[f"enc_{d}_wih"] = nrm((enc_in, 4 * H))
        params[f"enc_{d}_whh"] = nrm((H, 4 * H))
        params[f"enc_{d}_b"] = nrm((1, 4 * H))
    L = p.latent_variable_size
    params["wmu"], params["bmu"] = nrm((2 * H, L)), nrm((1, L))
    params["wlv"], params["blv"] = nrm((2 * H, L)), nrm((1, L))
    dec_in = p.word_embed_size + L
    Hd = p.decoder_rnn_size
    params["dec_wih"] = nrm((dec_in, 4 * Hd))
    params["dec_whh"] = nrm((Hd, 4 * Hd))
    params["dec_b"] = nrm((1, 4 * Hd))
    params["fc_w"] = nrm((Hd, p.word_vocab_size))
    params["fc_b"] = nrm((1, p.word_vocab_size))
    return params


def fuse_params(params, p):
    """One-time rearrangement into the fused / folded / padded kernel layouts."""
    H = p.encoder_rnn_size
    Hd = p.decoder_rnn_size
    E = p.word_embed_size
    OC = p.sum_depth
    C = p.char_embed_size
    W = p.max_word_len
    Vc = p.char_vocab_size
    L = p.latent_variable_size

    def ifog(w, h):
        # reorder last-axis gate blocks (i, f, g, o) -> (i, f, o, g)
        return jnp.concatenate([w[..., 0:2 * h], w[..., 3 * h:4 * h],
                                w[..., 2 * h:3 * h]], axis=-1)

    f = {}
    # Encoder weights: fwd|bwd stacked on the gate axis, gate-reordered.
    enc_wih = jnp.concatenate([ifog(params["enc_fwd_wih"], H),
                               ifog(params["enc_bwd_wih"], H)], axis=1)   # [D, 8H]
    f["enc_whh"] = jnp.concatenate([ifog(params["enc_fwd_whh"], H),
                                    ifog(params["enc_bwd_whh"], H)], axis=1)
    f["enc_b"] = jnp.concatenate([ifog(params["enc_fwd_b"], H),
                                  ifog(params["enc_bwd_b"], H)], axis=1)
    # Fold the word embedding into the hoisted encoder input projection.
    f["enc_wordgates"] = jnp.dot(params["word_embed"], enc_wih[0:E])      # [Vw, 8H]
    f["enc_tdnngates"] = enc_wih[E:E + OC]                                # [OC, 8H]

    # Char-embedding-folded block-Toeplitz TDNN matrix [W*Vc, W*OC]; invalid conv
    # positions per kernel width are simply never written (relu>=0 keeps max correct).
    ce = np.asarray(params["char_embed"])                                 # [Vc, C]
    comb = np.zeros((W * Vc, W * OC), np.float32)
    oc_off = 0
    for (kw, oc), wk in zip(p.kernels, params["tdnn"]):
        wk3 = np.asarray(wk).reshape(kw, C, oc)
        for pos in range(W - kw + 1):
            for j in range(kw):
                w_abs = pos + j
                cols = slice(pos * OC + oc_off, pos * OC + oc_off + oc)
                comb[w_abs * Vc:(w_abs + 1) * Vc, cols] += ce @ wk3[j]
        oc_off += oc
    f["tdnn_comb"] = jnp.asarray(comb)

    f["wml"] = jnp.concatenate([params["wmu"], params["wlv"]], axis=1)
    f["bml"] = jnp.concatenate([params["bmu"], params["blv"]], axis=1)

    dec_wih = ifog(params["dec_wih"], Hd)                                 # [E+L, 4Hd]
    f["dec_wih_e"] = dec_wih[0:E]
    f["dec_wih_z"] = dec_wih[E:E + L]
    f["dec_whh"] = ifog(params["dec_whh"], Hd)
    f["dec_b"] = ifog(params["dec_b"], Hd)
    f["word_embed"] = params["word_embed"]

    V = p.word_vocab_size
    Vp = ((V + 127) // 128) * 128
    f["fc_w"] = jnp.pad(params["fc_w"], ((0, 0), (0, Vp - V)))
    f["fc_b"] = jnp.pad(params["fc_b"], ((0, 0), (0, Vp - V)))
    f["Vp"] = Vp
    return f


def rvae_forward(fused, p, drop_prob, encoder_word_input=None,
                 encoder_character_input=None, decoder_word_input=None,
                 *, rng, z=None, initial_state=None):
    assert (z is None and encoder_word_input is not None
            and encoder_character_input is not None
            and decoder_word_input is not None) or \
           (z is not None and decoder_word_input is not None), "invalid input"

    B, T = decoder_word_input.shape
    E = p.word_embed_size
    Hd = p.decoder_rnn_size
    L = p.latent_variable_size
    He = p.encoder_rnn_size
    Vp = fused["Vp"]

    # ---- tiny per-call glue (index rearrangement / dropout mask / init state) ----
    dw = decoder_word_input.astype(jnp.int32).T.reshape(T * B, 1)
    if drop_prob > 0.0:
        rng, k_drop = jax.random.split(rng)
        keep = 1.0 - drop_prob
        mask = jax.random.bernoulli(k_drop, keep, (T * B, E)).astype(jnp.float32) / keep
    else:
        mask = jnp.ones((T * B, E), jnp.float32)
    if initial_state is None:
        h0 = jnp.zeros((B, Hd), jnp.float32)
        c0 = jnp.zeros((B, Hd), jnp.float32)
    else:
        h0, c0 = initial_state[0][0], initial_state[1][0]

    if z is None:
        S = encoder_word_input.shape[1]
        W = p.max_word_len
        # Stacked (time, fwd|bwd) row order: row s*2B + r, r<B fwd (time s),
        # r>=B bwd (time S-1-s).
        ewi_t = encoder_word_input.astype(jnp.int32).T                       # [S, B]
        ew = jnp.concatenate([ewi_t, ewi_t[::-1]], axis=1).reshape(2 * B * S, 1)
        eci_t = encoder_character_input.astype(jnp.int32).transpose(1, 0, 2)  # [S,B,W]
        ec = jnp.concatenate([eci_t, eci_t[::-1]], axis=1).reshape(2 * B * S, W)
        rng, k_eps = jax.random.split(rng)
        eps = jax.random.normal(k_eps, (B, L), jnp.float32)

        logits_p, h_T, c_T, kld11 = pl.pallas_call(
            _rvae_fused_kernel,
            out_shape=(jax.ShapeDtypeStruct((B, T, Vp), jnp.float32),
                       jax.ShapeDtypeStruct((B, Hd), jnp.float32),
                       jax.ShapeDtypeStruct((B, Hd), jnp.float32),
                       jax.ShapeDtypeStruct((1, 1), jnp.float32)),
            in_specs=[VMEM] * 21,
            out_specs=(VMEM, VMEM, VMEM, VMEM),
            scratch_shapes=[pltpu.VMEM((S, 2 * B, 4 * He), jnp.float32),
                            pltpu.VMEM((T, B, 4 * Hd), jnp.float32),
                            pltpu.VMEM((T, B, Hd), jnp.float32)],
        )(ew, ec, dw, mask, eps, h0, c0,
          fused["enc_wordgates"], fused["tdnn_comb"], fused["enc_tdnngates"],
          fused["enc_whh"], fused["enc_b"], fused["wml"], fused["bml"],
          fused["word_embed"], fused["dec_wih_e"], fused["dec_wih_z"],
          fused["dec_whh"], fused["dec_b"], fused["fc_w"], fused["fc_b"])
        kld = kld11[0, 0]
    else:
        kld = None
        logits_p, h_T, c_T = pl.pallas_call(
            _decoder_only_kernel,
            out_shape=(jax.ShapeDtypeStruct((B, T, Vp), jnp.float32),
                       jax.ShapeDtypeStruct((B, Hd), jnp.float32),
                       jax.ShapeDtypeStruct((B, Hd), jnp.float32)),
            in_specs=[VMEM] * 12,
            out_specs=(VMEM, VMEM, VMEM),
            scratch_shapes=[pltpu.VMEM((T, B, 4 * Hd), jnp.float32),
                            pltpu.VMEM((T, B, Hd), jnp.float32)],
        )(dw, mask, z, h0, c0,
          fused["word_embed"], fused["dec_wih_e"], fused["dec_wih_z"],
          fused["dec_whh"], fused["dec_b"], fused["fc_w"], fused["fc_b"])

    logits = logits_p[:, :, :p.word_vocab_size]       # kernel stays lane-dense at Vp
    final_state = (h_T[None], c_T[None])              # [num_layers=1, B, Hd] each
    return logits, final_state, kld


if __name__ == "__main__":
    p = Params()
    key = jax.random.PRNGKey(0)
    k_param, k_ew, k_ec, k_dw, k_rng, k_rng2, k_z = jax.random.split(key, 7)
    params = init_rvae_params(k_param, p)
    fused = fuse_params(params, p)            # one-time, hoisted out of the forward

    # batch >= 8 so [B, .] tiles fill all 8 vreg sublanes.
    B, S_enc, T_dec = 8, 8, 9
    enc_word = jax.random.randint(k_ew, (B, S_enc), 0, p.word_vocab_size)
    enc_char = jax.random.randint(k_ec, (B, S_enc, p.max_word_len), 0,
                                  p.char_vocab_size)
    dec_word = jax.random.randint(k_dw, (B, T_dec), 0, p.word_vocab_size)

    # --- training path (z = None): single fused pallas_call, whole forward jitted ---
    fwd = jax.jit(lambda ew, ec, dw, k: rvae_forward(fused, p, 0.0, ew, ec, dw, rng=k))
    logits, (h_n, c_n), kld = fwd(enc_word, enc_char, dec_word, k_rng)
    jax.block_until_ready((logits, h_n, c_n, kld))

    assert logits.shape == (B, T_dec, p.word_vocab_size)
    assert h_n.shape == (1, B, p.decoder_rnn_size)
    assert c_n.shape == (1, B, p.decoder_rnn_size)
    assert kld.shape == ()
    assert bool(jnp.all(jnp.isfinite(logits)))
    assert bool(jnp.isfinite(kld))

    # --- sampling path (z given, carries the decoder rnn state) ---
    z_seed = jax.random.normal(k_z, (B, p.latent_variable_size), jnp.float32)
    logits2, state2, kld2 = rvae_forward(fused, p, 0.0,
                                         decoder_word_input=dec_word,
                                         rng=k_rng2, z=z_seed,
                                         initial_state=(h_n, c_n))
    jax.block_until_ready((logits2, state2))
    assert kld2 is None
    assert logits2.shape == (B, T_dec, p.word_vocab_size)
    assert bool(jnp.all(jnp.isfinite(logits2)))

    print("KERNEL_OK")
</pallas_src>

<mosaic_0001>
module attributes {stable_mosaic.version = 11 : i64} {
  func.func @_rvae_fused_kernel(%arg0: memref<128x1xi32, #tpu.memory_space<vmem>>, %arg1: memref<128x10xi32, #tpu.memory_space<vmem>>, %arg2: memref<72x1xi32, #tpu.memory_space<vmem>>, %arg3: memref<72x16xf32, #tpu.memory_space<vmem>>, %arg4: memref<8x16xf32, #tpu.memory_space<vmem>>, %arg5: memref<8x32xf32, #tpu.memory_space<vmem>>, %arg6: memref<8x32xf32, #tpu.memory_space<vmem>>, %arg7: memref<64x256xf32, #tpu.memory_space<vmem>>, %arg8: memref<320x160xf32, #tpu.memory_space<vmem>>, %arg9: memref<16x256xf32, #tpu.memory_space<vmem>>, %arg10: memref<32x256xf32, #tpu.memory_space<vmem>>, %arg11: memref<1x256xf32, #tpu.memory_space<vmem>>, %arg12: memref<64x32xf32, #tpu.memory_space<vmem>>, %arg13: memref<1x32xf32, #tpu.memory_space<vmem>>, %arg14: memref<64x16xf32, #tpu.memory_space<vmem>>, %arg15: memref<16x128xf32, #tpu.memory_space<vmem>>, %arg16: memref<16x128xf32, #tpu.memory_space<vmem>>, %arg17: memref<32x128xf32, #tpu.memory_space<vmem>>, %arg18: memref<1x128xf32, #tpu.memory_space<vmem>>, %arg19: memref<32x128xf32, #tpu.memory_space<vmem>>, %arg20: memref<1x128xf32, #tpu.memory_space<vmem>>, %arg21: memref<8x9x128xf32, #tpu.memory_space<vmem>>, %arg22: memref<8x32xf32, #tpu.memory_space<vmem>>, %arg23: memref<8x32xf32, #tpu.memory_space<vmem>>, %arg24: memref<1x1xf32, #tpu.memory_space<vmem>>, %arg25: memref<8x16x128xf32, #tpu.memory_space<vmem>>, %arg26: memref<9x8x128xf32, #tpu.memory_space<vmem>>, %arg27: memref<9x8x32xf32, #tpu.memory_space<vmem>>) attributes {dimension_semantics = [], scalar_prefetch = 0 : i64, scratch_operands = 3 : i64, tpu.core_type = #tpu.core_type<tc>} {
    %c0 = arith.constant 0 : index
    %c0_0 = arith.constant 0 : index
    %0 = vector.load %arg0[%c0, %c0_0] : memref<128x1xi32, #tpu.memory_space<vmem>>, vector<128x1xi32>
    %c0_1 = arith.constant 0 : index
    %c0_2 = arith.constant 0 : index
    %1 = vector.load %arg1[%c0_1, %c0_2] : memref<128x10xi32, #tpu.memory_space<vmem>>, vector<128x10xi32>
    %c0_3 = arith.constant 0 : index
    %c0_4 = arith.constant 0 : index
    %2 = vector.load %arg4[%c0_3, %c0_4] : memref<8x16xf32, #tpu.memory_space<vmem>>, vector<8x16xf32>
    %3 = tpu.iota {dimensions = array<i32: 1>} : vector<128x64xi32>
    %4 = vector.broadcast %0 : vector<128x1xi32> to vector<128x64xi32>
    %5 = arith.cmpi eq, %3, %4 : vector<128x64xi32>
    %6 = arith.extui %5 : vector<128x64xi1> to vector<128x64xi32>
    %7 = arith.sitofp %6 : vector<128x64xi32> to vector<128x64xf32>
    %c0_5 = arith.constant 0 : index
    %c0_6 = arith.constant 0 : index
    %8 = vector.load %arg7[%c0_5, %c0_6] : memref<64x256xf32, #tpu.memory_space<vmem>>, vector<64x256xf32>
    %cst = arith.constant dense<0.000000e+00> : vector<128x256xf32>
    %9 = tpu.matmul %7, %8, %cst {dimension_numbers = #tpu.dot_dimension_numbers<[1], [0], [0], [1], [0, 0, 1, 1], [], []>} : vector<128x64xf32>, vector<64x256xf32>, vector<128x256xf32> -> vector<128x256xf32>
    %10 = tpu.iota {dimensions = array<i32: 1>} : vector<128x320xi32>
    %11 = vector.extract_strided_slice %1 {offsets = [0, 0], sizes = [128, 1], strides = [1, 1]} : vector<128x10xi32> to vector<128x1xi32>
    %12 = vector.broadcast %11 : vector<128x1xi32> to vector<128x320xi32>
    %13 = arith.cmpi eq, %10, %12 : vector<128x320xi32>
    %14 = arith.extui %13 : vector<128x320xi1> to vector<128x320xi32>
    %15 = arith.sitofp %14 : vector<128x320xi32> to vector<128x320xf32>
    %16 = vector.extract_strided_slice %1 {offsets = [0, 1], sizes = [128, 1], strides = [1, 1]} : vector<128x10xi32> to vector<128x1xi32>
    %c32_i32 = arith.constant 32 : i32
    %17 = vector.broadcast %c32_i32 : i32 to vector<128x1xi32>
    %18 = arith.addi %17, %16 : vector<128x1xi32>
    %19 = vector.broadcast %18 : vector<128x1xi32> to vector<128x320xi32>
    %20 = arith.cmpi eq, %10, %19 : vector<128x320xi32>
    %21 = arith.extui %20 : vector<128x320xi1> to vector<128x320xi32>
    %22 = arith.sitofp %21 : vector<128x320xi32> to vector<128x320xf32>
    %23 = arith.addf %15, %22 : vector<128x320xf32>
    %24 = vector.extract_strided_slice %1 {offsets = [0, 2], sizes = [128, 1], strides = [1, 1]} : vector<128x10xi32> to vector<128x1xi32>
    %c64_i32 = arith.constant 64 : i32
    %25 = vector.broadcast %c64_i32 : i32 to vector<128x1xi32>
    %26 = arith.addi %25, %24 : vector<128x1xi32>
    %27 = vector.broadcast %26 : vector<128x1xi32> to vector<128x320xi32>
    %28 = arith.cmpi eq, %10, %27 : vector<128x320xi32>
    %29 = arith.extui %28 : vector<128x320xi1> to vector<128x320xi32>
    %30 = arith.sitofp %29 : vector<128x320xi32> to vector<128x320xf32>
    %31 = arith.addf %23, %30 : vector<128x320xf32>
    %32 = vector.extract_strided_slice %1 {offsets = [0, 3], sizes = [128, 1], strides = [1, 1]} : vector<128x10xi32> to vector<128x1xi32>
    %c96_i32 = arith.constant 96 : i32
    %33 = vector.broadcast %c96_i32 : i32 to vector<128x1xi32>
    %34 = arith.addi %33, %32 : vector<128x1xi32>
    %35 = vector.broadcast %34 : vector<128x1xi32> to vector<128x320xi32>
    %36 = arith.cmpi eq, %10, %35 : vector<128x320xi32>
    %37 = arith.extui %36 : vector<128x320xi1> to vector<128x320xi32>
    %38 = arith.sitofp %37 : vector<128x320xi32> to vector<128x320xf32>
    %39 = arith.addf %31, %38 : vector<128x320xf32>
    %40 = vector.extract_strided_slice %1 {offsets = [0, 4], sizes = [128, 1], strides = [1, 1]} : vector<128x10xi32> to vector<128x1xi32>
    %c128_i32 = arith.constant 128 : i32
    %41 = vector.broadcast %c128_i32 : i32 to vector<128x1xi32>
    %42 = arith.addi %41, %40 : vector<128x1xi32>
    %43 = vector.broadcast %42 : vector<128x1xi32> to vector<128x320xi32>
    %44 = arith.cmpi eq, %10, %43 : vector<128x320xi32>
    %45 = arith.extui %44 : vector<128x320xi1> to vector<128x320xi32>
    %46 = arith.sitofp %45 : vector<128x320xi32> to vector<128x320xf32>
    %47 = arith.addf %39, %46 : vector<128x320xf32>
    %48 = vector.extract_strided_slice %1 {offsets = [0, 5], sizes = [128, 1], strides = [1, 1]} : vector<128x10xi32> to vector<128x1xi32>
    %c160_i32 = arith.constant 160 : i32
    %49 = vector.broadcast %c160_i32 : i32 to vector<128x1xi32>
    %50 = arith.addi %49, %48 : vector<128x1xi32>
    %51 = vector.broadcast %50 : vector<128x1xi32> to vector<128x320xi32>
    %52 = arith.cmpi eq, %10, %51 : vector<128x320xi32>
    %53 = arith.extui %52 : vector<128x320xi1> to vector<128x320xi32>
    %54 = arith.sitofp %53 : vector<128x320xi32> to vector<128x320xf32>
    %55 = arith.addf %47, %54 : vector<128x320xf32>
    %56 = vector.extract_strided_slice %1 {offsets = [0, 6], sizes = [128, 1], strides = [1, 1]} : vector<128x10xi32> to vector<128x1xi32>
    %c192_i32 = arith.constant 192 : i32
    %57 = vector.broadcast %c192_i32 : i32 to vector<128x1xi32>
    %58 = arith.addi %57, %56 : vector<128x1xi32>
    %59 = vector.broadcast %58 : vector<128x1xi32> to vector<128x320xi32>
    %60 = arith.cmpi eq, %10, %59 : vector<128x320xi32>
    %61 = arith.extui %60 : vector<128x320xi1> to vector<128x320xi32>
    %62 = arith.sitofp %61 : vector<128x320xi32> to vector<128x320xf32>
    %63 = arith.addf %55, %62 : vector<128x320xf32>
    %64 = vector.extract_strided_slice %1 {offsets = [0, 7], sizes = [128, 1], strides = [1, 1]} : vector<128x10xi32> to vector<128x1xi32>
    %c224_i32 = arith.constant 224 : i32
    %65 = vector.broadcast %c224_i32 : i32 to vector<128x1xi32>
    %66 = arith.addi %65, %64 : vector<128x1xi32>
    %67 = vector.broadcast %66 : vector<128x1xi32> to vector<128x320xi32>
    %68 = arith.cmpi eq, %10, %67 : vector<128x320xi32>
    %69 = arith.extui %68 : vector<128x320xi1> to vector<128x320xi32>
    %70 = arith.sitofp %69 : vector<128x320xi32> to vector<128x320xf32>
    %71 = arith.addf %63, %70 : vector<128x320xf32>
    %72 = vector.extract_strided_slice %1 {offsets = [0, 8], sizes = [128, 1], strides = [1, 1]} : vector<128x10xi32> to vector<128x1xi32>
    %c256_i32 = arith.constant 256 : i32
    %73 = vector.broadcast %c256_i32 : i32 to vector<128x1xi32>
    %74 = arith.addi %73, %72 : vector<128x1xi32>
    %75 = vector.broadcast %74 : vector<128x1xi32> to vector<128x320xi32>
    %76 = arith.cmpi eq, %10, %75 : vector<128x320xi32>
    %77 = arith.extui %76 : vector<128x320xi1> to vector<128x320xi32>
    %78 = arith.sitofp %77 : vector<128x320xi32> to vector<128x320xf32>
    %79 = arith.addf %71, %78 : vector<128x320xf32>
    %80 = vector.extract_strided_slice %1 {offsets = [0, 9], sizes = [128, 1], strides = [1, 1]} : vector<128x10xi32> to vector<128x1xi32>
    %c288_i32 = arith.constant 288 : i32
    %81 = vector.broadcast %c288_i32 : i32 to vector<128x1xi32>
    %82 = arith.addi %81, %80 : vector<128x1xi32>
    %83 = vector.broadcast %82 : vector<128x1xi32> to vector<128x320xi32>
    %84 = arith.cmpi eq, %10, %83 : vector<128x320xi32>
    %85 = arith.extui %84 : vector<128x320xi1> to vector<128x320xi32>
    %86 = arith.sitofp %85 : vector<128x320xi32> to vector<128x320xf32>
    %87 = arith.addf %79, %86 : vector<128x320xf32>
    %c0_7 = arith.constant 0 : index
    %c0_8 = arith.constant 0 : index
    %88 = vector.load %arg8[%c0_7, %c0_8] : memref<320x160xf32, #tpu.memory_space<vmem>>, vector<320x160xf32>
    %cst_9 = arith.constant dense<0.000000e+00> : vector<128x160xf32>
    %89 = tpu.matmul %87, %88, %cst_9 {dimension_numbers = #tpu.dot_dimension_numbers<[1], [0], [0], [1], [0, 0, 1, 1], [], []>} : vector<128x320xf32>, vector<320x160xf32>, vector<128x160xf32> -> vector<128x160xf32>
    %cst_10 = arith.constant 0.000000e+00 : f32
    %90 = vector.broadcast %cst_10 : f32 to vector<128x160xf32>
    %91 = arith.maximumf %89, %90 : vector<128x160xf32>
    %92 = vector.extract_strided_slice %91 {offsets = [0, 0], sizes = [128, 16], strides = [1, 1]} : vector<128x160xf32> to vector<128x16xf32>
    %93 = vector.extract_strided_slice %91 {offsets = [0, 16], sizes = [128, 16], strides = [1, 1]} : vector<128x160xf32> to vector<128x16xf32>
    %94 = arith.maximumf %92, %93 : vector<128x16xf32>
    %95 = vector.extract_strided_slice %91 {offsets = [0, 32], sizes = [128, 16], strides = [1, 1]} : vector<128x160xf32> to vector<128x16xf32>
    %96 = arith.maximumf %94, %95 : vector<128x16xf32>
    %97 = vector.extract_strided_slice %91 {offsets = [0, 48], sizes = [128, 16], strides = [1, 1]} : vector<128x160xf32> to vector<128x16xf32>
    %98 = arith.maximumf %96, %97 : vector<128x16xf32>
    %99 = vector.extract_strided_slice %91 {offsets = [0, 64], sizes = [128, 16], strides = [1, 1]} : vector<128x160xf32> to vector<128x16xf32>
    %100 = arith.maximumf %98, %99 : vector<128x16xf32>
    %101 = vector.extract_strided_slice %91 {offsets = [0, 80], sizes = [128, 16], strides = [1, 1]} : vector<128x160xf32> to vector<128x16xf32>
    %102 = arith.maximumf %100, %101 : vector<128x16xf32>
    %103 = vector.extract_strided_slice %91 {offsets = [0, 96], sizes = [128, 16], strides = [1, 1]} : vector<128x160xf32> to vector<128x16xf32>
    %104 = arith.maximumf %102, %103 : vector<128x16xf32>
    %105 = vector.extract_strided_slice %91 {offsets = [0, 112], sizes = [128, 16], strides = [1, 1]} : vector<128x160xf32> to vector<128x16xf32>
    %106 = arith.maximumf %104, %105 : vector<128x16xf32>
    %107 = vector.extract_strided_slice %91 {offsets = [0, 128], sizes = [128, 16], strides = [1, 1]} : vector<128x160xf32> to vector<128x16xf32>
    %108 = arith.maximumf %106, %107 : vector<128x16xf32>
    %109 = vector.extract_strided_slice %91 {offsets = [0, 144], sizes = [128, 16], strides = [1, 1]} : vector<128x160xf32> to vector<128x16xf32>
    %110 = arith.maximumf %108, %109 : vector<128x16xf32>
    %c0_11 = arith.constant 0 : index
    %c0_12 = arith.constant 0 : index
    %111 = vector.load %arg9[%c0_11, %c0_12] : memref<16x256xf32, #tpu.memory_space<vmem>>, vector<16x256xf32>
    %cst_13 = arith.constant dense<0.000000e+00> : vector<128x256xf32>
    %112 = tpu.matmul %110, %111, %cst_13 {dimension_numbers = #tpu.dot_dimension_numbers<[1], [0], [0], [1], [0, 0, 1, 1], [], []>} : vector<128x16xf32>, vector<16x256xf32>, vector<128x256xf32> -> vector<128x256xf32>
    %113 = arith.addf %9, %112 : vector<128x256xf32>
    %c0_14 = arith.constant 0 : index
    %c0_15 = arith.constant 0 : index
    %114 = vector.load %arg11[%c0_14, %c0_15] : memref<1x256xf32, #tpu.memory_space<vmem>>, vector<1x256xf32>
    %115 = vector.broadcast %114 : vector<1x256xf32> to vector<128x256xf32>
    %116 = arith.addf %113, %115 : vector<128x256xf32>
    %117 = tpu.iota {dimensions = array<i32: 0>} : vector<16x128xi32>
    %c8_i32 = arith.constant 8 : i32
    %118 = vector.broadcast %c8_i32 : i32 to vector<16x128xi32>
    %119 = arith.cmpi slt, %117, %118 : vector<16x128xi32>
    %120 = vector.shape_cast %116 : vector<128x256xf32> to vector<8x16x256xf32>
    %121 = vector.shape_cast %119 : vector<16x128xi1> to vector<1x16x128xi1>
    %122 = vector.extract_strided_slice %120 {offsets = [0, 0, 0], sizes = [8, 16, 128], strides = [1, 1, 1]} : vector<8x16x256xf32> to vector<8x16x128xf32>
    %123 = vector.extract_strided_slice %120 {offsets = [0, 0, 128], sizes = [8, 16, 128], strides = [1, 1, 1]} : vector<8x16x256xf32> to vector<8x16x128xf32>
    %124 = vector.shape_cast %121 : vector<1x16x128xi1> to vector<1x16x128xi1>
    %125 = vector.broadcast %124 : vector<1x16x128xi1> to vector<8x16x128xi1>
    %126 = arith.select %125, %122, %123 : vector<8x16x128xi1>, vector<8x16x128xf32>
    %c0_16 = arith.constant 0 : index
    %c0_17 = arith.constant 0 : index
    %c0_18 = arith.constant 0 : index
    %127 = vector.load %arg25[%c0_16, %c0_17, %c0_18] : memref<8x16x128xf32, #tpu.memory_space<vmem>>, vector<8x16x128xf32>
    tpu.vector_store %arg25[%c0_16, %c0_17, %c0_18], %126 {strides = array<i32>} : memref<8x16x128xf32, #tpu.memory_space<vmem>>, vector<8x16x128xf32>,
    %c0_19 = arith.constant 0 : index
    %c0_20 = arith.constant 0 : index
    %128 = vector.load %arg10[%c0_19, %c0_20] : memref<32x256xf32, #tpu.memory_space<vmem>>, vector<32x256xf32>
    %cst_21 = arith.constant 0.000000e+00 : f32
    %129 = vector.broadcast %cst_21 : f32 to vector<16x32xf32>
    %c0_i32 = arith.constant 0 : i32
    %c8_i32_22 = arith.constant 8 : i32
    %130 = arith.addi %c0_i32, %c8_i32_22 : i32
    %c1_i32 = arith.constant 1 : i32
    %131:2 = scf.for %arg28 = %c0_i32 to %130 step %c1_i32 iter_args(%arg29 = %129, %arg30 = %129) -> (vector<16x32xf32>, vector<16x32xf32>)  : i32 {
      %cst_96 = arith.constant dense<0.000000e+00> : vector<16x256xf32>
      %247 = tpu.matmul %arg29, %128, %cst_96 {dimension_numbers = #tpu.dot_dimension_numbers<[1], [0], [0], [1], [0, 0, 1, 1], [], []>} : vector<16x32xf32>, vector<32x256xf32>, vector<16x256xf32> -> vector<16x256xf32>
      %248 = arith.index_cast %arg28 : i32 to index
      %c0_97 = arith.constant 0 : index
      %c0_98 = arith.constant 0 : index
      %249 = vector.load %arg25[%248, %c0_97, %c0_98] : memref<8x16x128xf32, #tpu.memory_space<vmem>>, vector<1x16x128xf32>
      %250 = vector.shape_cast %249 : vector<1x16x128xf32> to vector<16x128xf32>
      %251 = vector.extract_strided_slice %247 {offsets = [0, 0], sizes = [16, 128], strides = [1, 1]} : vector<16x256xf32> to vector<16x128xf32>
      %252 = vector.extract_strided_slice %247 {offsets = [0, 128], sizes = [16, 128], strides = [1, 1]} : vector<16x256xf32> to vector<16x128xf32>
      %253 = arith.select %119, %251, %252 : vector<16x128xi1>, vector<16x128xf32>
      %254 = arith.addf %250, %253 : vector<16x128xf32>
      %255 = vector.extract_strided_slice %254 {offsets = [0, 0], sizes = [16, 96], strides = [1, 1]} : vector<16x128xf32> to vector<16x96xf32>
      %cst_99 = arith.constant 5.000000e-01 : f32
      %256 = vector.broadcast %cst_99 : f32 to vector<16x96xf32>
      %257 = arith.mulf %256, %255 : vector<16x96xf32>
      %258 = math.tanh %257 : vector<16x96xf32>
      %cst_100 = arith.constant 1.000000e+00 : f32
      %259 = vector.broadcast %cst_100 : f32 to vector<16x96xf32>
      %260 = arith.addf %258, %259 : vector<16x96xf32>
      %cst_101 = arith.constant 5.000000e-01 : f32
      %261 = vector.broadcast %cst_101 : f32 to vector<16x96xf32>
      %262 = arith.mulf %261, %260 : vector<16x96xf32>
      %263 = vector.extract_strided_slice %254 {offsets = [0, 96], sizes = [16, 32], strides = [1, 1]} : vector<16x128xf32> to vector<16x32xf32>
      %264 = math.tanh %263 : vector<16x32xf32>
      %265 = vector.extract_strided_slice %262 {offsets = [0, 32], sizes = [16, 32], strides = [1, 1]} : vector<16x96xf32> to vector<16x32xf32>
      %266 = arith.mulf %265, %arg30 : vector<16x32xf32>
      %267 = vector.extract_strided_slice %262 {offsets = [0, 0], sizes = [16, 32], strides = [1, 1]} : vector<16x96xf32> to vector<16x32xf32>
      %268 = arith.mulf %267, %264 : vector<16x32xf32>
      %269 = arith.addf %266, %268 : vector<16x32xf32>
      %270 = vector.extract_strided_slice %262 {offsets = [0, 64], sizes = [16, 32], strides = [1, 1]} : vector<16x96xf32> to vector<16x32xf32>
      %271 = math.tanh %269 : vector<16x32xf32>
      %272 = arith.mulf %270, %271 : vector<16x32xf32>
      scf.yield %272, %269 : vector<16x32xf32>, vector<16x32xf32>
    }
    %c8_i32_23 = arith.constant 8 : i32
    %c0_24 = arith.constant 0 : index
    %c0_25 = arith.constant 0 : index
    %132 = vector.load %arg12[%c0_24, %c0_25] : memref<64x32xf32, #tpu.memory_space<vmem>>, vector<64x32xf32>
    %133 = vector.extract_strided_slice %131#1 {offsets = [0, 0], sizes = [8, 32], strides = [1, 1]} : vector<16x32xf32> to vector<8x32xf32>
    %134 = vector.extract_strided_slice %132 {offsets = [0, 0], sizes = [32, 32], strides = [1, 1]} : vector<64x32xf32> to vector<32x32xf32>
    %cst_26 = arith.constant dense<0.000000e+00> : vector<8x32xf32>
    %135 = tpu.matmul %133, %134, %cst_26 {dimension_numbers = #tpu.dot_dimension_numbers<[1], [0], [0], [1], [0, 0, 1, 1], [], []>} : vector<8x32xf32>, vector<32x32xf32>, vector<8x32xf32> -> vector<8x32xf32>
    %136 = vector.extract_strided_slice %131#1 {offsets = [8, 0], sizes = [8, 32], strides = [1, 1]} : vector<16x32xf32> to vector<8x32xf32>
    %137 = vector.extract_strided_slice %132 {offsets = [32, 0], sizes = [32, 32], strides = [1, 1]} : vector<64x32xf32> to vector<32x32xf32>
    %cst_27 = arith.constant dense<0.000000e+00> : vector<8x32xf32>
    %138 = tpu.matmul %136, %137, %cst_27 {dimension_numbers = #tpu.dot_dimension_numbers<[1], [0], [0], [1], [0, 0, 1, 1], [], []>} : vector<8x32xf32>, vector<32x32xf32>, vector<8x32xf32> -> vector<8x32xf32>
    %139 = arith.addf %135, %138 : vector<8x32xf32>
    %c0_28 = arith.constant 0 : index
    %c0_29 = arith.constant 0 : index
    %140 = vector.load %arg13[%c0_28, %c0_29] : memref<1x32xf32, #tpu.memory_space<vmem>>, vector<1x32xf32>
    %141 = vector.broadcast %140 : vector<1x32xf32> to vector<8x32xf32>
    %142 = arith.addf %139, %141 : vector<8x32xf32>
    %143 = vector.extract_strided_slice %142 {offsets = [0, 0], sizes = [8, 16], strides = [1, 1]} : vector<8x32xf32> to vector<8x16xf32>
    %144 = vector.extract_strided_slice %142 {offsets = [0, 16], sizes = [8, 16], strides = [1, 1]} : vector<8x32xf32> to vector<8x16xf32>
    %cst_30 = arith.constant 5.000000e-01 : f32
    %145 = vector.broadcast %cst_30 : f32 to vector<8x16xf32>
    %146 = arith.mulf %145, %144 : vector<8x16xf32>
    %147 = math.exp %146 : vector<8x16xf32>
    %148 = arith.mulf %2, %147 : vector<8x16xf32>
    %149 = arith.addf %148, %143 : vector<8x16xf32>
    %150 = arith.mulf %143, %143 : vector<8x16xf32>
    %151 = arith.subf %144, %150 : vector<8x16xf32>
    %152 = math.exp %144 : vector<8x16xf32>
    %153 = arith.subf %151, %152 : vector<8x16xf32>
    %cst_31 = arith.constant 1.000000e+00 : f32
    %154 = vector.broadcast %cst_31 : f32 to vector<8x16xf32>
    %155 = arith.addf %153, %154 : vector<8x16xf32>
    %cst_32 = arith.constant dense<0.000000e+00> : vector<8xf32>
    %156 = vector.multi_reduction <add>, %155, %cst_32 [1] : vector<8x16xf32> to vector<8xf32>
    %157 = vector.shape_cast %156 : vector<8xf32> to vector<8x1xf32>
    %cst_33 = arith.constant -5.000000e-01 : f32
    %158 = vector.broadcast %cst_33 : f32 to vector<8x1xf32>
    %159 = arith.mulf %158, %157 : vector<8x1xf32>
    %cst_34 = arith.constant dense<0.000000e+00> : vector<1xf32>
    %160 = vector.multi_reduction <add>, %159, %cst_34 [0] : vector<8x1xf32> to vector<1xf32>
    %161 = vector.shape_cast %160 : vector<1xf32> to vector<1x1xf32>
    %cst_35 = arith.constant 8.000000e+00 : f32
    %162 = vector.broadcast %cst_35 : f32 to vector<1x1xf32>
    %163 = arith.divf %161, %162 : vector<1x1xf32>
    %c0_36 = arith.constant 0 : index
    %c0_37 = arith.constant 0 : index
    %164 = vector.load %arg24[%c0_36, %c0_37] : memref<1x1xf32, #tpu.memory_space<vmem>>, vector<1x1xf32>
    tpu.vector_store %arg24[%c0_36, %c0_37], %163 {strides = array<i32>} : memref<1x1xf32, #tpu.memory_space<vmem>>, vector<1x1xf32>,
    %c0_38 = arith.constant 0 : index
    %c0_39 = arith.constant 0 : index
    %165 = vector.load %arg2[%c0_38, %c0_39] : memref<72x1xi32, #tpu.memory_space<vmem>>, vector<72x1xi32>
    %c0_40 = arith.constant 0 : index
    %c0_41 = arith.constant 0 : index
    %166 = vector.load %arg3[%c0_40, %c0_41] : memref<72x16xf32, #tpu.memory_space<vmem>>, vector<72x16xf32>
    %c0_42 = arith.constant 0 : index
    %c0_43 = arith.constant 0 : index
    %167 = vector.load %arg5[%c0_42, %c0_43] : memref<8x32xf32, #tpu.memory_space<vmem>>, vector<8x32xf32>
    %c0_44 = arith.constant 0 : index
    %c0_45 = arith.constant 0 : index
    %168 = vector.load %arg6[%c0_44, %c0_45] : memref<8x32xf32, #tpu.memory_space<vmem>>, vector<8x32xf32>
    %169 = tpu.iota {dimensions = array<i32: 1>} : vector<72x64xi32>
    %170 = vector.broadcast %165 : vector<72x1xi32> to vector<72x64xi32>
    %171 = arith.cmpi eq, %169, %170 : vector<72x64xi32>
    %172 = arith.extui %171 : vector<72x64xi1> to vector<72x64xi32>
    %173 = arith.sitofp %172 : vector<72x64xi32> to vector<72x64xf32>
    %c0_46 = arith.constant 0 : index
    %c0_47 = arith.constant 0 : index
    %174 = vector.load %arg14[%c0_46, %c0_47] : memref<64x16xf32, #tpu.memory_space<vmem>>, vector<64x16xf32>
    %cst_48 = arith.constant dense<0.000000e+00> : vector<72x16xf32>
    %175 = tpu.matmul %173, %174, %cst_48 {dimension_numbers = #tpu.dot_dimension_numbers<[1], [0], [0], [1], [0, 0, 1, 1], [], []>} : vector<72x64xf32>, vector<64x16xf32>, vector<72x16xf32> -> vector<72x16xf32>
    %176 = arith.mulf %175, %166 : vector<72x16xf32>
    %c0_49 = arith.constant 0 : index
    %c0_50 = arith.constant 0 : index
    %177 = vector.load %arg16[%c0_49, %c0_50] : memref<16x128xf32, #tpu.memory_space<vmem>>, vector<16x128xf32>
    %cst_51 = arith.constant dense<0.000000e+00> : vector<8x128xf32>
    %178 = tpu.matmul %149, %177, %cst_51 {dimension_numbers = #tpu.dot_dimension_numbers<[1], [0], [0], [1], [0, 0, 1, 1], [], []>} : vector<8x16xf32>, vector<16x128xf32>, vector<8x128xf32> -> vector<8x128xf32>
    %c0_52 = arith.constant 0 : index
    %c0_53 = arith.constant 0 : index
    %179 = vector.load %arg15[%c0_52, %c0_53] : memref<16x128xf32, #tpu.memory_space<vmem>>, vector<16x128xf32>
    %cst_54 = arith.constant dense<0.000000e+00> : vector<72x128xf32>
    %180 = tpu.matmul %176, %179, %cst_54 {dimension_numbers = #tpu.dot_dimension_numbers<[1], [0], [0], [1], [0, 0, 1, 1], [], []>} : vector<72x16xf32>, vector<16x128xf32>, vector<72x128xf32> -> vector<72x128xf32>
    %c0_55 = arith.constant 0 : index
    %c0_56 = arith.constant 0 : index
    %181 = vector.load %arg18[%c0_55, %c0_56] : memref<1x128xf32, #tpu.memory_space<vmem>>, vector<1x128xf32>
    %182 = vector.broadcast %181 : vector<1x128xf32> to vector<72x128xf32>
    %183 = arith.addf %180, %182 : vector<72x128xf32>
    %184 = vector.shape_cast %183 : vector<72x128xf32> to vector<9x8x128xf32>
    %185 = vector.shape_cast %178 : vector<8x128xf32> to vector<1x8x128xf32>
    %186 = vector.broadcast %185 : vector<1x8x128xf32> to vector<9x8x128xf32>
    %187 = arith.addf %184, %186 : vector<9x8x128xf32>
    %c0_57 = arith.constant 0 : index
    %c0_58 = arith.constant 0 : index
    %c0_59 = arith.constant 0 : index
    %188 = vector.load %arg26[%c0_57, %c0_58, %c0_59] : memref<9x8x128xf32, #tpu.memory_space<vmem>>, vector<9x8x128xf32>
    tpu.vector_store %arg26[%c0_57, %c0_58, %c0_59], %187 {strides = array<i32>} : memref<9x8x128xf32, #tpu.memory_space<vmem>>, vector<9x8x128xf32>,
    %c0_60 = arith.constant 0 : index
    %c0_61 = arith.constant 0 : index
    %189 = vector.load %arg17[%c0_60, %c0_61] : memref<32x128xf32, #tpu.memory_space<vmem>>, vector<32x128xf32>
    %c0_i32_62 = arith.constant 0 : i32
    %c9_i32 = arith.constant 9 : i32
    %190 = arith.addi %c0_i32_62, %c9_i32 : i32
    %c1_i32_63 = arith.constant 1 : i32
    %191:2 = scf.for %arg28 = %c0_i32_62 to %190 step %c1_i32_63 iter_args(%arg29 = %167, %arg30 = %168) -> (vector<8x32xf32>, vector<8x32xf32>)  : i32 {
      %247 = arith.index_cast %arg28 : i32 to index
      %c0_96 = arith.constant 0 : index
      %c0_97 = arith.constant 0 : index
      %248 = vector.load %arg26[%247, %c0_96, %c0_97] : memref<9x8x128xf32, #tpu.memory_space<vmem>>, vector<1x8x128xf32>
      %249 = vector.shape_cast %248 : vector<1x8x128xf32> to vector<8x128xf32>
      %cst_98 = arith.constant dense<0.000000e+00> : vector<8x128xf32>
      %250 = tpu.matmul %arg29, %189, %cst_98 {dimension_numbers = #tpu.dot_dimension_numbers<[1], [0], [0], [1], [0, 0, 1, 1], [], []>} : vector<8x32xf32>, vector<32x128xf32>, vector<8x128xf32> -> vector<8x128xf32>
      %251 = arith.addf %249, %250 : vector<8x128xf32>
      %252 = vector.extract_strided_slice %251 {offsets = [0, 0], sizes = [8, 96], strides = [1, 1]} : vector<8x128xf32> to vector<8x96xf32>
      %cst_99 = arith.constant 5.000000e-01 : f32
      %253 = vector.broadcast %cst_99 : f32 to vector<8x96xf32>
      %254 = arith.mulf %253, %252 : vector<8x96xf32>
      %255 = math.tanh %254 : vector<8x96xf32>
      %cst_100 = arith.constant 1.000000e+00 : f32
      %256 = vector.broadcast %cst_100 : f32 to vector<8x96xf32>
      %257 = arith.addf %255, %256 : vector<8x96xf32>
      %cst_101 = arith.constant 5.000000e-01 : f32
      %258 = vector.broadcast %cst_101 : f32 to vector<8x96xf32>
      %259 = arith.mulf %258, %257 : vector<8x96xf32>
      %260 = vector.extract_strided_slice %251 {offsets = [0, 96], sizes = [8, 32], strides = [1, 1]} : vector<8x128xf32> to vector<8x32xf32>
      %261 = math.tanh %260 : vector<8x32xf32>
      %262 = vector.extract_strided_slice %259 {offsets = [0, 32], sizes = [8, 32], strides = [1, 1]} : vector<8x96xf32> to vector<8x32xf32>
      %263 = arith.mulf %262, %arg30 : vector<8x32xf32>
      %264 = vector.extract_strided_slice %259 {offsets = [0, 0], sizes = [8, 32], strides = [1, 1]} : vector<8x96xf32> to vector<8x32xf32>
      %265 = arith.mulf %264, %261 : vector<8x32xf32>
      %266 = arith.addf %263, %265 : vector<8x32xf32>
      %267 = vector.extract_strided_slice %259 {offsets = [0, 64], sizes = [8, 32], strides = [1, 1]} : vector<8x96xf32> to vector<8x32xf32>
      %268 = math.tanh %266 : vector<8x32xf32>
      %269 = arith.mulf %267, %268 : vector<8x32xf32>
      %270 = arith.index_cast %arg28 : i32 to index
      %c0_102 = arith.constant 0 : index
      %c0_103 = arith.constant 0 : index
      %271 = vector.load %arg27[%270, %c0_102, %c0_103] : memref<9x8x32xf32, #tpu.memory_space<vmem>>, vector<1x8x32xf32>
      %272 = vector.shape_cast %271 : vector<1x8x32xf32> to vector<8x32xf32>
      %273 = vector.shape_cast %269 : vector<8x32xf32> to vector<1x8x32xf32>
      tpu.vector_store %arg27[%270, %c0_102, %c0_103], %273 {strides = array<i32>} : memref<9x8x32xf32, #tpu.memory_space<vmem>>, vector<1x8x32xf32>,
      scf.yield %269, %266 : vector<8x32xf32>, vector<8x32xf32>
    }
    %c9_i32_64 = arith.constant 9 : i32
    %c0_65 = arith.constant 0 : index
    %c0_66 = arith.constant 0 : index
    %192 = vector.load %arg22[%c0_65, %c0_66] : memref<8x32xf32, #tpu.memory_space<vmem>>, vector<8x32xf32>
    tpu.vector_store %arg22[%c0_65, %c0_66], %191#0 {strides = array<i32>} : memref<8x32xf32, #tpu.memory_space<vmem>>, vector<8x32xf32>,
    %c0_67 = arith.constant 0 : index
    %c0_68 = arith.constant 0 : index
    %193 = vector.load %arg23[%c0_67, %c0_68] : memref<8x32xf32, #tpu.memory_space<vmem>>, vector<8x32xf32>
    tpu.vector_store %arg23[%c0_67, %c0_68], %191#1 {strides = array<i32>} : memref<8x32xf32, #tpu.memory_space<vmem>>, vector<8x32xf32>,
    %c0_69 = arith.constant 0 : index
    %c0_70 = arith.constant 0 : index
    %c0_71 = arith.constant 0 : index
    %194 = vector.load %arg27[%c0_69, %c0_70, %c0_71] : memref<9x8x32xf32, #tpu.memory_space<vmem>>, vector<9x8x32xf32>
    %195 = vector.shape_cast %194 : vector<9x8x32xf32> to vector<72x32xf32>
    %c0_72 = arith.constant 0 : index
    %c0_73 = arith.constant 0 : index
    %196 = vector.load %arg19[%c0_72, %c0_73] : memref<32x128xf32, #tpu.memory_space<vmem>>, vector<32x128xf32>
    %cst_74 = arith.constant dense<0.000000e+00> : vector<72x128xf32>
    %197 = tpu.matmul %195, %196, %cst_74 {dimension_numbers = #tpu.dot_dimension_numbers<[1], [0], [0], [1], [0, 0, 1, 1], [], []>} : vector<72x32xf32>, vector<32x128xf32>, vector<72x128xf32> -> vector<72x128xf32>
    %c0_75 = arith.constant 0 : index
    %c0_76 = arith.constant 0 : index
    %198 = vector.load %arg20[%c0_75, %c0_76] : memref<1x128xf32, #tpu.memory_space<vmem>>, vector<1x128xf32>
    %199 = vector.broadcast %198 : vector<1x128xf32> to vector<72x128xf32>
    %200 = arith.addf %197, %199 : vector<72x128xf32>
    %201 = vector.shape_cast %200 : vector<72x128xf32> to vector<9x8x128xf32>
    %202 = vector.extract_strided_slice %201 {offsets = [0, 0, 0], sizes = [1, 8, 128], strides = [1, 1, 1]} : vector<9x8x128xf32> to vector<1x8x128xf32>
    %203 = vector.shape_cast %202 : vector<1x8x128xf32> to vector<8x128xf32>
    %c0_77 = arith.constant 0 : index
    %c0_78 = arith.constant 0 : index
    %c0_79 = arith.constant 0 : index
    %204 = vector.load %arg21[%c0_77, %c0_78, %c0_79] : memref<8x9x128xf32, #tpu.memory_space<vmem>>, vector<8x1x128xf32>
    %205 = vector.shape_cast %204 : vector<8x1x128xf32> to vector<8x128xf32>
    %206 = vector.shape_cast %203 : vector<8x128xf32> to vector<8x1x128xf32>
    tpu.vector_store %arg21[%c0_77, %c0_78, %c0_79], %206 {strides = array<i32>} : memref<8x9x128xf32, #tpu.memory_space<vmem>>, vector<8x1x128xf32>,
    %207 = vector.extract_strided_slice %201 {offsets = [1, 0, 0], sizes = [1, 8, 128], strides = [1, 1, 1]} : vector<9x8x128xf32> to vector<1x8x128xf32>
    %208 = vector.shape_cast %207 : vector<1x8x128xf32> to vector<8x128xf32>
    %c0_80 = arith.constant 0 : index
    %c1 = arith.constant 1 : index
    %c0_81 = arith.constant 0 : index
    %209 = vector.load %arg21[%c0_80, %c1, %c0_81] : memref<8x9x128xf32, #tpu.memory_space<vmem>>, vector<8x1x128xf32>
    %210 = vector.shape_cast %209 : vector<8x1x128xf32> to vector<8x128xf32>
    %211 = vector.shape_cast %208 : vector<8x128xf32> to vector<8x1x128xf32>
    tpu.vector_store %arg21[%c0_80, %c1, %c0_81], %211 {strides = array<i32>} : memref<8x9x128xf32, #tpu.memory_space<vmem>>, vector<8x1x128xf32>,
    %212 = vector.extract_strided_slice %201 {offsets = [2, 0, 0], sizes = [1, 8, 128], strides = [1, 1, 1]} : vector<9x8x128xf32> to vector<1x8x128xf32>
    %213 = vector.shape_cast %212 : vector<1x8x128xf32> to vector<8x128xf32>
    %c0_82 = arith.constant 0 : index
    %c2 = arith.constant 2 : index
    %c0_83 = arith.constant 0 : index
    %214 = vector.load %arg21[%c0_82, %c2, %c0_83] : memref<8x9x128xf32, #tpu.memory_space<vmem>>, vector<8x1x128xf32>
    %215 = vector.shape_cast %214 : vector<8x1x128xf32> to vector<8x128xf32>
    %216 = vector.shape_cast %213 : vector<8x128xf32> to vector<8x1x128xf32>
    tpu.vector_store %arg21[%c0_82, %c2, %c0_83], %216 {strides = array<i32>} : memref<8x9x128xf32, #tpu.memory_space<vmem>>, vector<8x1x128xf32>,
    %217 = vector.extract_strided_slice %201 {offsets = [3, 0, 0], sizes = [1, 8, 128], strides = [1, 1, 1]} : vector<9x8x128xf32> to vector<1x8x128xf32>
    %218 = vector.shape_cast %217 : vector<1x8x128xf32> to vector<8x128xf32>
    %c0_84 = arith.constant 0 : index
    %c3 = arith.constant 3 : index
    %c0_85 = arith.constant 0 : index
    %219 = vector.load %arg21[%c0_84, %c3, %c0_85] : memref<8x9x128xf32, #tpu.memory_space<vmem>>, vector<8x1x128xf32>
    %220 = vector.shape_cast %219 : vector<8x1x128xf32> to vector<8x128xf32>
    %221 = vector.shape_cast %218 : vector<8x128xf32> to vector<8x1x128xf32>
    tpu.vector_store %arg21[%c0_84, %c3, %c0_85], %221 {strides = array<i32>} : memref<8x9x128xf32, #tpu.memory_space<vmem>>, vector<8x1x128xf32>,
    %222 = vector.extract_strided_slice %201 {offsets = [4, 0, 0], sizes = [1, 8, 128], strides = [1, 1, 1]} : vector<9x8x128xf32> to vector<1x8x128xf32>
    %223 = vector.shape_cast %222 : vector<1x8x128xf32> to vector<8x128xf32>
    %c0_86 = arith.constant 0 : index
    %c4 = arith.constant 4 : index
    %c0_87 = arith.constant 0 : index
    %224 = vector.load %arg21[%c0_86, %c4, %c0_87] : memref<8x9x128xf32, #tpu.memory_space<vmem>>, vector<8x1x128xf32>
    %225 = vector.shape_cast %224 : vector<8x1x128xf32> to vector<8x128xf32>
    %226 = vector.shape_cast %223 : vector<8x128xf32> to vector<8x1x128xf32>
    tpu.vector_store %arg21[%c0_86, %c4, %c0_87], %226 {strides = array<i32>} : memref<8x9x128xf32, #tpu.memory_space<vmem>>, vector<8x1x128xf32>,
    %227 = vector.extract_strided_slice %201 {offsets = [5, 0, 0], sizes = [1, 8, 128], strides = [1, 1, 1]} : vector<9x8x128xf32> to vector<1x8x128xf32>
    %228 = vector.shape_cast %227 : vector<1x8x128xf32> to vector<8x128xf32>
    %c0_88 = arith.constant 0 : index
    %c5 = arith.constant 5 : index
    %c0_89 = arith.constant 0 : index
    %229 = vector.load %arg21[%c0_88, %c5, %c0_89] : memref<8x9x128xf32, #tpu.memory_space<vmem>>, vector<8x1x128xf32>
    %230 = vector.shape_cast %229 : vector<8x1x128xf32> to vector<8x128xf32>
    %231 = vector.shape_cast %228 : vector<8x128xf32> to vector<8x1x128xf32>
    tpu.vector_store %arg21[%c0_88, %c5, %c0_89], %231 {strides = array<i32>} : memref<8x9x128xf32, #tpu.memory_space<vmem>>, vector<8x1x128xf32>,
    %232 = vector.extract_strided_slice %201 {offsets = [6, 0, 0], sizes = [1, 8, 128], strides = [1, 1, 1]} : vector<9x8x128xf32> to vector<1x8x128xf32>
    %233 = vector.shape_cast %232 : vector<1x8x128xf32> to vector<8x128xf32>
    %c0_90 = arith.constant 0 : index
    %c6 = arith.constant 6 : index
    %c0_91 = arith.constant 0 : index
    %234 = vector.load %arg21[%c0_90, %c6, %c0_91] : memref<8x9x128xf32, #tpu.memory_space<vmem>>, vector<8x1x128xf32>
    %235 = vector.shape_cast %234 : vector<8x1x128xf32> to vector<8x128xf32>
    %236 = vector.shape_cast %233 : vector<8x128xf32> to vector<8x1x128xf32>
    tpu.vector_store %arg21[%c0_90, %c6, %c0_91], %236 {strides = array<i32>} : memref<8x9x128xf32, #tpu.memory_space<vmem>>, vector<8x1x128xf32>,
    %237 = vector.extract_strided_slice %201 {offsets = [7, 0, 0], sizes = [1, 8, 128], strides = [1, 1, 1]} : vector<9x8x128xf32> to vector<1x8x128xf32>
    %238 = vector.shape_cast %237 : vector<1x8x128xf32> to vector<8x128xf32>
    %c0_92 = arith.constant 0 : index
    %c7 = arith.constant 7 : index
    %c0_93 = arith.constant 0 : index
    %239 = vector.load %arg21[%c0_92, %c7, %c0_93] : memref<8x9x128xf32, #tpu.memory_space<vmem>>, vector<8x1x128xf32>
    %240 = vector.shape_cast %239 : vector<8x1x128xf32> to vector<8x128xf32>
    %241 = vector.shape_cast %238 : vector<8x128xf32> to vector<8x1x128xf32>
    tpu.vector_store %arg21[%c0_92, %c7, %c0_93], %241 {strides = array<i32>} : memref<8x9x128xf32, #tpu.memory_space<vmem>>, vector<8x1x128xf32>,
    %242 = vector.extract_strided_slice %201 {offsets = [8, 0, 0], sizes = [1, 8, 128], strides = [1, 1, 1]} : vector<9x8x128xf32> to vector<1x8x128xf32>
    %243 = vector.shape_cast %242 : vector<1x8x128xf32> to vector<8x128xf32>
    %c0_94 = arith.constant 0 : index
    %c8 = arith.constant 8 : index
    %c0_95 = arith.constant 0 : index
    %244 = vector.load %arg21[%c0_94, %c8, %c0_95] : memref<8x9x128xf32, #tpu.memory_space<vmem>>, vector<8x1x128xf32>
    %245 = vector.shape_cast %244 : vector<8x1x128xf32> to vector<8x128xf32>
    %246 = vector.shape_cast %243 : vector<8x128xf32> to vector<8x1x128xf32>
    tpu.vector_store %arg21[%c0_94, %c8, %c0_95], %246 {strides = array<i32>} : memref<8x9x128xf32, #tpu.memory_space<vmem>>, vector<8x1x128xf32>,
    return
  }
}

</mosaic_0001>

<bundles_post_ra>
// kernel: _lambda_.1
= control target key start
LH: loop header
LB: loop body
LE: loop exit
PB: predicated region body
PF: predicated region fallthrough
CT: control target
= control target key end

     0   :  { %s12237_s0 = inlined_call_operand.vmem [shape: s32[128,1], index: 0, kind: input, shape index: {}]   ;;  %s12238_s1 = inlined_call_operand.vmem [shape: s32[128,10], index: 1, kind: input, shape index: {}]   ;;  %s12239_s2 = inlined_call_operand.vmem [shape: s32[72,1], index: 2, kind: input, shape index: {}]   ;;  %s12240_s3 = inlined_call_operand.vmem [shape: f32[72,16], index: 3, kind: input, shape index: {}]   ;;  %s12241_s4 = inlined_call_operand.vmem [shape: f32[8,16], index: 4, kind: input, shape index: {}]   ;;  %s12242_s5 = inlined_call_operand.vmem [shape: f32[8,32], index: 5, kind: input, shape index: {}, may-alias: {5,6}]   ;;  %s12243_s6 = inlined_call_operand.vmem [shape: f32[8,32], index: 6, kind: input, shape index: {}, may-alias: {5,6}]   ;;  %s12244_s7 = inlined_call_operand.vmem [shape: f32[64,256], index: 7, kind: input, shape index: {}]   ;;  %s12245_s8 = inlined_call_operand.vmem [shape: f32[320,160], index: 8, kind: input, shape index: {}]   ;;  %s12246_s9 = inlined_call_operand.vmem [shape: f32[16,256], index: 9, kind: input, shape index: {}]   ;;  %s12247_s10 = inlined_call_operand.vmem [shape: f32[32,256], index: 10, kind: input, shape index: {}]   ;;  %s12248_s11 = inlined_call_operand.vmem [shape: f32[1,256], index: 11, kind: input, shape index: {}]   ;;  %s12249_s12 = inlined_call_operand.vmem [shape: f32[64,32], index: 12, kind: input, shape index: {}]   ;;  %s12250_s13 = inlined_call_operand.vmem [shape: f32[1,32], index: 13, kind: input, shape index: {}]   ;;  %s12251_s14 = inlined_call_operand.vmem [shape: f32[64,16], index: 14, kind: input, shape index: {}]   ;;  %s12252_s15 = inlined_call_operand.vmem [shape: f32[16,128], index: 15, kind: input, shape index: {}]   ;;  %s12253_s16 = inlined_call_operand.vmem [shape: f32[16,128], index: 16, kind: input, shape index: {}]   ;;  %s12254_s17 = inlined_call_operand.vmem [shape: f32[32,128], index: 17, kind: input, shape index: {}]   ;;  %s12255_s18 = inlined_call_operand.vmem [shape: f32[1,128], index: 18, kind: input, shape index: {}]   ;;  %s12256_s19 = inlined_call_operand.vmem [shape: f32[32,128], index: 19, kind: input, shape index: {}]   ;;  %s12257_s20 = inlined_call_operand.vmem [shape: f32[1,128], index: 20, kind: input, shape index: {}]   ;;  %s12258_s21 = inlined_call_operand.vmem [shape: f32[8,9,128], index: 21, kind: output, shape index: {0}]   ;;  %s12259_s22 = inlined_call_operand.hbm [shape: f32[8,32], index: 22, kind: output, shape index: {1}]   ;;  %s12260_s23 = inlined_call_operand.hbm [shape: f32[8,32], index: 23, kind: output, shape index: {2}]   ;;  %s12261_s24 = inlined_call_operand.hbm [shape: f32[1,1], index: 24, kind: output, shape index: {3}]  }
   0x1   :  { %12425 = sst [smem:[#allocation124_spill]] %s12237_s0 }
   0x2   :  { %12426 = sst [smem:[#allocation125_spill]] %s12238_s1 }
   0x3   :  { %12427 = sst [smem:[#allocation126_spill]] %s12239_s2 }
   0x4   :  { %12428 = sst [smem:[#allocation127_spill]] %s12240_s3 }
   0x5   :  { %12429 = sst [smem:[#allocation128_spill]] %s12241_s4 }
   0x6   :  { %12430 = sst [smem:[#allocation129_spill]] %s12242_s5 }
   0x7   :  { %12431 = sst [smem:[#allocation130_spill]] %s12243_s6 }
   0x8   :  { %12432 = sst [smem:[#allocation131_spill]] %s12244_s7 }
   0x9   :  { %12433 = sst [smem:[#allocation132_spill]] %s12245_s8 }
   0xa   :  { %30 = vsyncpa [#allocation6], 0  ;;  %s12434_s27 = sld [smem:[#allocation124_spill]]  ;;  %v12268_v2 = vmov 0   ;;  %v12270_v5 = vmov 0.0  }
   0xb   :  { %7187 = vset.pattern.permute.xlu1 %v12268_v2  ;;  %7186 = vset.pattern.permute.xlu0 %v12268_v2 }
   0xc   :  { %3133 = vmatprep.mubr.f32.mxu1 %v12270_v5 }
  0x10   :  { %v76_v0 = vld [vmem:[%s12434_s27 + $0x10] sm:$0xff]  ;;  %v74_v1 = vld [vmem:[%s12434_s27] sm:$0xff]  ;;  %v77_v3 = vld [vmem:[%s12434_s27 + $0x18] sm:$0xff] }
  0x11   :  { %116 = vperm.xlu1 %7187, %v76_v0   ;;  %110 = vperm.xlu0 %7186, %v74_v1   ;;  %v75_v4 = vld [vmem:[%s12434_s27 + $0x8] sm:$0xff]  ;;  %v78_v7 = vld [vmem:[%s12434_s27 + $0x20] sm:$0xff]  ;;  %v81_v8 = vld [vmem:[%s12434_s27 + $0x38] sm:$0xff] }
  0x12   :  { %v79_v6 = vld [vmem:[%s12434_s27 + $0x28] sm:$0xff]  ;;  %v80_v9 = vld [vmem:[%s12434_s27 + $0x30] sm:$0xff] }
  0x15   :  { %119 = vperm.xlu1 %7187, %v77_v3   ;;  %113 = vperm.xlu0 %7186, %v75_v4  }
  0x19   :  { %125 = vperm.xlu1 %7187, %v79_v6   ;;  %122 = vperm.xlu0 %7186, %v78_v7  }
  0x1a   :  { %31 = vsyncpa [#allocation8], 0  ;;  %v83_v10 = vld [vmem:[%s12434_s27 + $0x48] sm:$0xff]  ;;  %v82_v11 = vld [vmem:[%s12434_s27 + $0x40] sm:$0xff]  ;;  %s12435_s0 = sld [smem:[#allocation125_spill]]  ;;  %v7459_v36 = vmov 1  }
  0x1b   :  { %v85_v12 = vld [vmem:[%s12434_s27 + $0x58] sm:$0xff]  ;;  %v84_v13 = vld [vmem:[%s12434_s27 + $0x50] sm:$0xff]  ;;  %v87_v14 = vld [vmem:[%s12434_s27 + $0x68] sm:$0xff]  ;;  %v12280_v37 = vmov 3   ;;  %v12274_v46 = vmov 8   ;;  %v12276_v53 = vmov 2  }
  0x1c   :  { %v86_v15 = vld [vmem:[%s12434_s27 + $0x60] sm:$0xff]  ;;  %v89_v16 = vld [vmem:[%s12434_s27 + $0x78] sm:$0xff]  ;;  %v88_v17 = vld [vmem:[%s12434_s27 + $0x70] sm:$0xff]  ;;  %v12286_v54 = vmov 9   ;;  %v12288_v59 = vmov 4   ;;  %v12278_v62 = vmov 5  }
  0x1d   :  { %131 = vperm.xlu1 %7187, %v81_v8   ;;  %128 = vperm.xlu0 %7186, %v80_v9   ;;  %v12282_v63 = vmov 6   ;;  %s12436_s27 = sld [smem:[#allocation132_spill]]  ;;  %s12437_s29 = sld [smem:[#allocation128_spill]] }
  0x1e   :  { %s7469_s8 = smov 96   ;;  %s7470_s4 = smov 80  }
  0x1f   :  { %s7471_s1 = smov 64   ;;  %s7472_s5 = smov 48  }
  0x20   :  { %v7669_v18 = vld [vmem:[%s12435_s0 + $0x8] sm:$0xff]  ;;  %v7674_v19 = vld [vmem:[%s12435_s0] sm:$0xff]  ;;  %v7681_v20 = vld [vmem:[%s12435_s0 + $0x18] sm:$0xff]  ;;  %s7473_s26 = smov 32   ;;  %s7474_s28 = smov 16  }
  0x21   :  { %137 = vperm.xlu1 %7187, %v83_v10   ;;  %134 = vperm.xlu0 %7186, %v82_v11   ;;  %v7686_v21 = vld [vmem:[%s12435_s0 + $0x10] sm:$0xff]  ;;  %v7693_v22 = vld [vmem:[%s12435_s0 + $0x28] sm:$0xff]  ;;  %v7698_v23 = vld [vmem:[%s12435_s0 + $0x20] sm:$0xff]  ;;  %v416_v34 = vadd.s32 32, %v7669_v18  ;;  %v927_v35 = vadd.s32 96, %v7674_v19  ;;  %v928_v39 = vadd.s32 96, %v7669_v18 }
  0x22   :  { %v7705_v24 = vld [vmem:[%s12435_s0 + $0x38] sm:$0xff]  ;;  %v7710_v25 = vld [vmem:[%s12435_s0 + $0x30] sm:$0xff]  ;;  %v7717_v26 = vld [vmem:[%s12435_s0 + $0x48] sm:$0xff]  ;;  %v417_v38 = vadd.s32 32, %v7686_v21  ;;  %v419_v40 = vadd.s32 32, %v7698_v23  ;;  %v929_v41 = vadd.s32 96, %v7686_v21 }
  0x23   :  { %v7722_v27 = vld [vmem:[%s12435_s0 + $0x40] sm:$0xff]  ;;  %v7729_v28 = vld [vmem:[%s12435_s0 + $0x58] sm:$0xff]  ;;  %v7734_v29 = vld [vmem:[%s12435_s0 + $0x50] sm:$0xff]  ;;  %v421_v42 = vadd.s32 32, %v7710_v25  ;;  %v931_v43 = vadd.s32 96, %v7698_v23  ;;  %v2207_v45 = vadd.s32 256, %v7674_v19 }
  0x24   :  { %v7741_v30 = vld [vmem:[%s12435_s0 + $0x68] sm:$0xff]  ;;  %v7746_v31 = vld [vmem:[%s12435_s0 + $0x60] sm:$0xff]  ;;  %v7753_v32 = vld [vmem:[%s12435_s0 + $0x78] sm:$0xff]  ;;  %v423_v44 = vadd.s32 32, %v7722_v27  ;;  %v425_v47 = vadd.s32 32, %v7734_v29  ;;  %v2210_v48 = vadd.s32 256, %v7681_v20 }
  0x25   :  { %143 = vperm.xlu1 %7187, %v85_v12   ;;  %140 = vperm.xlu0 %7186, %v84_v13   ;;  %v7758_v33 = vld [vmem:[%s12435_s0 + $0x70] sm:$0xff]  ;;  %v427_v49 = vadd.s32 32, %v7746_v31  ;;  %v2213_v50 = vadd.s32 256, %v7710_v25  ;;  %v671_v51 = vadd.s32 64, %v7674_v19  ;;  %v2464_v52 = vadd.s32 288, %v7669_v18  ;;  %v2720_v3 = vld [vmem:[%s12436_s27 + $0x8] sm:$0xff] }
  0x26   :  { %v672_v55 = vadd.s32 64, %v7669_v18  ;;  %v2467_v56 = vadd.s32 288, %v7698_v23  ;;  %v1183_v57 = vadd.s32 128, %v7674_v19  ;;  %v2470_v58 = vadd.s32 288, %v7705_v24  ;;  %v2722_v4 = vld [vmem:[%s12436_s27 + $0x18] sm:$0xff]  ;;  %v2719_v7 = vld [vmem:[%s12436_s27] sm:$0xff] }
  0x27   :  { %v1439_v60 = vadd.s32 160, %v7674_v19  ;;  %v1698_v61 = vadd.s32 192, %v7681_v20  ;;  %v1701_v0 = vadd.s32 192, %v7710_v25  ;;  %v1184_v1 = vadd.s32 128, %v7669_v18  ;;  %v2721_v8 = vld [vmem:[%s12436_s27 + $0x10] sm:$0xff]  ;;  %v7809_v9 = vld [vmem:[%s12437_s29] sm:$0xff] }
  0x28   :  { %v6891_v6 = vpack.c.bf16 %v2722_v4, %v2720_v3  ;;  %12438 = vst [vmem:[#allocation12_spill] sm:$0xff] %v7809_v9  ;;  %v6893_v10 = vpack.c.bf16 %v2721_v8, %v2719_v7  ;;  %v1704_v11 = vadd.s32 192, %v7717_v26  ;;  %v2724_v12 = vld [vmem:[%s12436_s27 + $0x28] sm:$0xff]  ;;  %v2726_v13 = vld [vmem:[%s12436_s27 + $0x38] sm:$0xff]  ;;  %v1185_v7 = vadd.s32 128, %v7686_v21  ;;  %s12719_s2 = sld [smem:[#allocation131_spill]] }
  0x29   :  { %149 = vperm.xlu1 %7187, %v87_v14   ;;  %146 = vperm.xlu0 %7186, %v86_v15   ;;  %v1695_v14 = vadd.s32 192, %v7674_v19  ;;  %v6895_v15 = vpack.c.bf16 %v2726_v13, %v2724_v12  ;;  %v2740_v8 = vld [vmem:[%s12436_s27 + $0xa8] sm:$0xff]  ;;  %v2739_v13 = vld [vmem:[%s12436_s27 + $0xa0] sm:$0xff]  ;;  %v1189_v9 = vadd.s32 128, %v7710_v25 }
  0x2a   :  { %6892 = vmatprep.subr.bf16.mxu0 %v6891_v6 }
  0x2b   :  { %6894 = vmatpush1.bf16.msra.mxu0 %v6893_v10  ;;  %v2742_v10 = vld [vmem:[%s12436_s27 + $0xb8] sm:$0xff] }
  0x2c   :  { %6896 = vmatprep.subr.bf16.mxu0 %v6895_v15  ;;  %v6911_v12 = vpack.c.bf16 %v2742_v10, %v2740_v8  ;;  %v1441_v8 = vadd.s32 160, %v7686_v21 }
  0x2d   :  { %155 = vperm.xlu1 %7187, %v89_v16   ;;  %152 = vperm.xlu0 %7186, %v88_v17   ;;  %v2723_v16 = vld [vmem:[%s12436_s27 + $0x20] sm:$0xff]  ;;  %v2725_v17 = vld [vmem:[%s12436_s27 + $0x30] sm:$0xff] }
  0x31   :  { %227 = vperm.xlu1 %7187, %v7669_v18   ;;  %224 = vperm.xlu0 %7186, %v7674_v19  }
  0x35   :  { %233 = vperm.xlu1 %7187, %v7681_v20   ;;  %230 = vperm.xlu0 %7186, %v7686_v21  }
  0x39   :  { %239 = vperm.xlu1 %7187, %v7693_v22   ;;  %236 = vperm.xlu0 %7186, %v7698_v23  }
  0x3d   :  { %245 = vperm.xlu1 %7187, %v7705_v24   ;;  %242 = vperm.xlu0 %7186, %v7710_v25  }
  0x41   :  { %251 = vperm.xlu1 %7187, %v7717_v26   ;;  %248 = vperm.xlu0 %7186, %v7722_v27  }
  0x45   :  { %257 = vperm.xlu1 %7187, %v7729_v28   ;;  %254 = vperm.xlu0 %7186, %v7734_v29  }
  0x49   :  { %263 = vperm.xlu1 %7187, %v7741_v30   ;;  %260 = vperm.xlu0 %7186, %v7746_v31  }
  0x4d   :  { %269 = vperm.xlu1 %7187, %v7753_v32   ;;  %266 = vperm.xlu0 %7186, %v7758_v33  }
  0x51   :  { %7188 = vset.pattern.permute.xlu1 %v7459_v36  ;;  %7190 = vset.pattern.permute.xlu0 %v12280_v37 }
  0x52   :  { %435 = vperm.xlu1 %7188, %v416_v34   ;;  %944 = vperm.xlu0 %7190, %v927_v35   ;;  %v6897_v34 = vpack.c.bf16 %v2725_v17, %v2723_v16  ;;  %v1443_v35 = vadd.s32 160, %v7698_v23 }
  0x54   :  { %6898 = vmatpush1.bf16.msra.mxu0 %v6897_v34  ;;  %v1696_v34 = vadd.s32 192, %v7669_v18 }
  0x56   :  { %438 = vperm.xlu1 %7188, %v417_v38   ;;  %947 = vperm.xlu0 %7190, %v928_v39   ;;  %v2728_v38 = vld [vmem:[%s12436_s27 + $0x48] sm:$0xff]  ;;  %v2730_v39 = vld [vmem:[%s12436_s27 + $0x58] sm:$0xff] }
  0x5a   :  { %444 = vperm.xlu1 %7188, %v419_v40   ;;  %950 = vperm.xlu0 %7190, %v929_v41   ;;  %v6899_v40 = vpack.c.bf16 %v2730_v39, %v2728_v38  ;;  %v2727_v41 = vld [vmem:[%s12436_s27 + $0x40] sm:$0xff]  ;;  %v2744_v38 = vld [vmem:[%s12436_s27 + $0xc8] sm:$0xff]  ;;  %v2746_v39 = vld [vmem:[%s12436_s27 + $0xd8] sm:$0xff] }
  0x5c   :  { %6900 = vmatprep.subr.bf16.mxu0 %v6899_v40 }
  0x5e   :  { %450 = vperm.xlu1 %7188, %v421_v42   ;;  %956 = vperm.xlu0 %7190, %v931_v43   ;;  %v2729_v42 = vld [vmem:[%s12436_s27 + $0x50] sm:$0xff]  ;;  %v1440_v43 = vadd.s32 160, %v7669_v18 }
  0x62   :  { %456 = vperm.xlu1 %7188, %v423_v44   ;;  %7205 = vset.pattern.permute.xlu0 %v12274_v46  ;;  %v6901_v44 = vpack.c.bf16 %v2729_v42, %v2727_v41  ;;  %v6915_v42 = vpack.c.bf16 %v2746_v39, %v2744_v38  ;;  %v415_v39 = vadd.s32 32, %v7674_v19 }
  0x63   :  { %2224 = vperm.xlu0 %7205, %v2207_v45   ;;  %v1446_v45 = vadd.s32 160, %v7705_v24 }
  0x64   :  { %6902 = vmatpush1.bf16.msra.mxu0 %v6901_v44  ;;  %v2745_v44 = vld [vmem:[%s12436_s27 + $0xd0] sm:$0xff] }
  0x66   :  { %462 = vperm.xlu1 %7188, %v425_v47   ;;  %v2732_v47 = vld [vmem:[%s12436_s27 + $0x68] sm:$0xff] }
  0x67   :  { %2233 = vperm.xlu0 %7205, %v2210_v48   ;;  %v2734_v48 = vld [vmem:[%s12436_s27 + $0x78] sm:$0xff] }
  0x6a   :  { %468 = vperm.xlu1 %7188, %v427_v49   ;;  %v6903_v49 = vpack.c.bf16 %v2734_v48, %v2732_v47  ;;  %v677_v47 = vadd.s32 64, %v7710_v25  ;;  %v2748_v48 = vld [vmem:[%s12436_s27 + $0xe8] sm:$0xff] }
  0x6b   :  { %2242 = vperm.xlu0 %7205, %v2213_v50   ;;  %v2731_v50 = vld [vmem:[%s12436_s27 + $0x60] sm:$0xff] }
  0x6c   :  { %6904 = vmatprep.subr.bf16.mxu0 %v6903_v49  ;;  %v2750_v49 = vld [vmem:[%s12436_s27 + $0xf8] sm:$0xff] }
  0x6e   :  { %7189 = vset.pattern.permute.xlu1 %v12276_v53 }
  0x6f   :  { %688 = vperm.xlu1 %7189, %v671_v51   ;;  %7232 = vset.pattern.permute.xlu0 %v12286_v54  ;;  %v2733_v51 = vld [vmem:[%s12436_s27 + $0x70] sm:$0xff] }
  0x70   :  { %2483 = vperm.xlu0 %7232, %v2464_v52   ;;  %v6905_v52 = vpack.c.bf16 %v2733_v51, %v2731_v50  ;;  %v930_v51 = vadd.s32 96, %v7681_v20 }
  0x72   :  { %6906 = vmatpush1.bf16.msra.mxu0 %v6905_v52 }
  0x73   :  { %691 = vperm.xlu1 %7189, %v672_v55   ;;  %v1951_v55 = vadd.s32 224, %v7674_v19 }
  0x74   :  { %2492 = vperm.xlu0 %7232, %v2467_v56   ;;  %v1449_v56 = vadd.s32 160, %v7734_v29 }
  0x77   :  { %7191 = vset.pattern.permute.xlu1 %v12288_v59 }
  0x78   :  { %1200 = vperm.xlu1 %7191, %v1183_v57   ;;  %2501 = vperm.xlu0 %7232, %v2470_v58   ;;  %v2736_v57 = vld [vmem:[%s12436_s27 + $0x88] sm:$0xff]  ;;  %v2738_v58 = vld [vmem:[%s12436_s27 + $0x98] sm:$0xff] }
  0x7c   :  { %7192 = vset.pattern.permute.xlu1 %v12278_v62  ;;  %7241 = vset.pattern.permute.xlu0 %v12282_v63 }
  0x7d   :  { %1456 = vperm.xlu1 %7192, %v1439_v60   ;;  %1721 = vperm.xlu0 %7241, %v1698_v61   ;;  %v6907_v60 = vpack.c.bf16 %v2738_v58, %v2736_v57  ;;  %v2735_v61 = vld [vmem:[%s12436_s27 + $0x80] sm:$0xff]  ;;  %v2749_v57 = vld [vmem:[%s12436_s27 + $0xf0] sm:$0xff] }
  0x7f   :  { %6908 = vmatprep.subr.bf16.mxu0 %v6907_v60  ;;  %v680_v60 = vadd.s32 64, %v7717_v26 }
  0x81   :  { %7193 = vset.pattern.permute.xlu1 %v12288_v59  ;;  %1730 = vperm.xlu0 %7241, %v1701_v0   ;;  %v2737_v0 = vld [vmem:[%s12436_s27 + $0x90] sm:$0xff] }
  0x82   :  { %1203 = vperm.xlu1 %7193, %v1184_v1   ;;  %v12284_v1 = vmov 7   ;;  %v6909_v6 = vpack.c.bf16 %v2737_v0, %v2735_v61 }
  0x84   :  { %6910 = vmatpush1.bf16.msra.mxu0 %v6909_v6  ;;  %v2752_v6 = vld [vmem:[%s12436_s27 + $0x108] sm:$0xff] }
  0x85   :  { %1739 = vperm.xlu0 %7241, %v1704_v11   ;;  %v673_v11 = vadd.s32 64, %v7686_v21  ;;  %6912 = vmatprep.subr.bf16.mxu0 %v6911_v12  ;;  %v2753_v12 = vld [vmem:[%s12436_s27 + $0x110] sm:$0xff] }
  0x86   :  { %7194 = vset.pattern.permute.xlu1 %v12282_v63 }
  0x87   :  { %1712 = vperm.xlu1 %7194, %v1695_v14   ;;  %v2741_v14 = vld [vmem:[%s12436_s27 + $0xb0] sm:$0xff] }
  0x88   :  { %v6913_v17 = vpack.c.bf16 %v2741_v14, %v2739_v13  ;;  %v683_v14 = vadd.s32 64, %v7746_v31 }
  0x89   :  { %7244 = vset.pattern.permute.xlu0 %v12278_v62 }
  0x8a   :  { %1468 = vperm.xlu0 %7244, %v1443_v35   ;;  %v674_v35 = vadd.s32 64, %v7681_v20  ;;  %6914 = vmatpush1.bf16.msra.mxu0 %v6913_v17 }
  0x8b   :  { %7195 = vset.pattern.permute.xlu1 %v12278_v62  ;;  %6916 = vmatprep.subr.bf16.mxu0 %v6915_v42 }
  0x8c   :  { %1459 = vperm.xlu1 %7195, %v1440_v43   ;;  %v2743_v43 = vld [vmem:[%s12436_s27 + $0xc0] sm:$0xff] }
  0x8e   :  { %1477 = vperm.xlu0 %7244, %v1446_v45   ;;  %v6917_v45 = vpack.c.bf16 %v2745_v44, %v2743_v43  ;;  %v2756_v43 = vld [vmem:[%s12436_s27 + $0x128] sm:$0xff]  ;;  %v2758_v44 = vld [vmem:[%s12436_s27 + $0x138] sm:$0xff] }
  0x90   :  { %7196 = vset.pattern.permute.xlu1 %v12284_v1  ;;  %v7871_v3 = vpop.permute.xlu1 %116  ;;  %v7873_v4 = vpop.permute.xlu0 %110  ;;  %6918 = vmatpush1.bf16.msra.mxu0 %v6917_v45  ;;  %v2755_v45 = vld [vmem:[%s12436_s27 + $0x120] sm:$0xff] }
  0x91   :  { %12439 = vst [vmem:[#allocation13_spill] sm:$0xff] %v7871_v3  ;;  %12440 = vst [vmem:[#allocation14_spill] sm:$0xff] %v7873_v4  ;;  %1968 = vperm.xlu1 %7196, %v1951_v55   ;;  %v6919_v55 = vpack.c.bf16 %v2750_v49, %v2748_v48  ;;  %v2760_v49 = vld [vmem:[%s12436_s27 + $0x148] sm:$0xff] }
  0x92   :  { %1486 = vperm.xlu0 %7244, %v1449_v56   ;;  %v2747_v56 = vld [vmem:[%s12436_s27 + $0xe0] sm:$0xff] }
  0x93   :  { %v6921_v58 = vpack.c.bf16 %v2749_v57, %v2747_v56  ;;  %6920 = vmatprep.subr.bf16.mxu0 %v6919_v55  ;;  %v675_v55 = vadd.s32 64, %v7698_v23  ;;  %v2759_v57 = vld [vmem:[%s12436_s27 + $0x140] sm:$0xff] }
  0x94   :  { %v7889_v15 = vpop.permute.xlu1 %119  ;;  %v7891_v16 = vpop.permute.xlu0 %113 }
  0x95   :  { %12441 = vst [vmem:[#allocation15_spill] sm:$0xff] %v7889_v15  ;;  %12442 = vst [vmem:[#allocation16_spill] sm:$0xff] %v7891_v16  ;;  %7197 = vset.pattern.permute.xlu1 %v12288_v59  ;;  %6922 = vmatpush1.bf16.msra.mxu0 %v6921_v58  ;;  %v2761_v58 = vld [vmem:[%s12436_s27 + $0x150] sm:$0xff]  ;;  %v12487_v15 = vmov 8   ;;  %v1445_v16 = vadd.s32 160, %v7710_v25 }
  0x96   :  { %1206 = vperm.xlu1 %7197, %v1185_v7   ;;  %7247 = vset.pattern.permute.xlu0 %v12276_v53  ;;  %v2754_v7 = vld [vmem:[%s12436_s27 + $0x118] sm:$0xff] }
  0x97   :  { %694 = vperm.xlu0 %7247, %v673_v11   ;;  %v6923_v10 = vpack.c.bf16 %v2754_v7, %v2752_v6  ;;  %v2751_v11 = vld [vmem:[%s12436_s27 + $0x100] sm:$0xff]  ;;  %v418_v6 = vadd.s32 32, %v7681_v20 }
  0x98   :  { %v7903_v40 = vpop.permute.xlu1 %125  ;;  %v7905_v41 = vpop.permute.xlu0 %122  ;;  %v6925_v13 = vpack.c.bf16 %v2753_v12, %v2751_v11  ;;  %v420_v11 = vadd.s32 32, %v7693_v22 }
  0x99   :  { %12443 = vst [vmem:[#allocation17_spill] sm:$0xff] %v7903_v40  ;;  %12444 = vst [vmem:[#allocation18_spill] sm:$0xff] %v7905_v41  ;;  %6924 = vmatprep.subr.bf16.mxu0 %v6923_v10  ;;  %v1697_v10 = vadd.s32 192, %v7686_v21  ;;  %v1700_v40 = vadd.s32 192, %v7693_v22  ;;  %v942_v41 = vadd.s32 96, %v7753_v32 }
  0x9a   :  { %7198 = vset.pattern.permute.xlu1 %v12282_v63  ;;  %6926 = vmatpush1.bf16.msra.mxu0 %v6925_v13  ;;  %v2764_v13 = vld [vmem:[%s12436_s27 + $0x168] sm:$0xff] }
  0x9b   :  { %1715 = vperm.xlu1 %7198, %v1696_v34   ;;  %697 = vperm.xlu0 %7247, %v674_v35   ;;  %v2463_v35 = vadd.s32 288, %v7674_v19  ;;  %v2757_v19 = vld [vmem:[%s12436_s27 + $0x130] sm:$0xff] }
  0x9c   :  { %v7921_v50 = vpop.permute.xlu1 %131  ;;  %v7924_v52 = vpop.permute.xlu0 %128  ;;  %v6929_v48 = vpack.c.bf16 %v2757_v19, %v2755_v45 }
  0x9d   :  { %12445 = vst [vmem:[#allocation19_spill] sm:$0xff] %v7921_v50  ;;  %12446 = vst [vmem:[#allocation20_spill] sm:$0xff] %v7924_v52  ;;  %v12479_v50 = vmov 9  }
  0x9f   :  { %7199 = vset.pattern.permute.xlu1 %v12280_v37  ;;  %706 = vperm.xlu0 %7247, %v677_v47   ;;  %v6927_v47 = vpack.c.bf16 %v2758_v44, %v2756_v43  ;;  %v422_v44 = vadd.s32 32, %v7705_v24 }
  0xa0   :  { %953 = vperm.xlu1 %7199, %v930_v51   ;;  %v7934_v61 = vpop.permute.xlu1 %137  ;;  %v7936_v0 = vpop.permute.xlu0 %134  ;;  %v2762_v51 = vld [vmem:[%s12436_s27 + $0x158] sm:$0xff] }
  0xa1   :  { %12447 = vst [vmem:[#allocation21_spill] sm:$0xff] %v7934_v61  ;;  %12448 = vst [vmem:[#allocation22_spill] sm:$0xff] %v7936_v0  ;;  %6928 = vmatprep.subr.bf16.mxu0 %v6927_v47  ;;  %v6931_v56 = vpack.c.bf16 %v2762_v51, %v2760_v49  ;;  %v2768_v49 = vld [vmem:[%s12436_s27 + $0x188] sm:$0xff]  ;;  %v2770_v51 = vld [vmem:[%s12436_s27 + $0x198] sm:$0xff]  ;;  %v1196_v61 = vadd.s32 128, %v7741_v30 }
  0xa2   :  { %6930 = vmatpush1.bf16.msra.mxu0 %v6929_v48  ;;  %v2208_v48 = vadd.s32 256, %v7669_v18 }
  0xa3   :  { %715 = vperm.xlu0 %7247, %v680_v60   ;;  %6932 = vmatprep.subr.bf16.mxu0 %v6931_v56  ;;  %v2767_v56 = vld [vmem:[%s12436_s27 + $0x180] sm:$0xff] }
  0xa4   :  { %7200 = vset.pattern.permute.xlu1 %v12278_v62  ;;  %v7953_v17 = vpop.permute.xlu1 %143  ;;  %v7955_v34 = vpop.permute.xlu0 %140 }
  0xa5   :  { %12449 = vst [vmem:[#allocation23_spill] sm:$0xff] %v7953_v17  ;;  %12450 = vst [vmem:[#allocation24_spill] sm:$0xff] %v7955_v34  ;;  %1462 = vperm.xlu1 %7200, %v1441_v8   ;;  %v1195_v17 = vadd.s32 128, %v7746_v31  ;;  %v12476_v34 = vmov 5  }
  0xa7   :  { %724 = vperm.xlu0 %7247, %v683_v14   ;;  %v2766_v14 = vld [vmem:[%s12436_s27 + $0x178] sm:$0xff] }
  0xa8   :  { %v7958_v38 = vpop.permute.xlu1 %149  ;;  %v7961_v42 = vpop.permute.xlu0 %146  ;;  %v6935_v47 = vpack.c.bf16 %v2766_v14, %v2764_v13  ;;  %v2772_v13 = vld [vmem:[%s12436_s27 + $0x1a8] sm:$0xff]  ;;  %v2774_v14 = vld [vmem:[%s12436_s27 + $0x1b8] sm:$0xff] }
  0xa9   :  { %12451 = vst [vmem:[#allocation25_spill] sm:$0xff] %v7958_v38  ;;  %12452 = vst [vmem:[#allocation26_spill] sm:$0xff] %v7961_v42  ;;  %7201 = vset.pattern.permute.xlu1 %v12286_v54  ;;  %v12475_v38 = vmov 3  }
  0xaa   :  { %2480 = vperm.xlu1 %7201, %v2463_v35   ;;  %v2763_v35 = vld [vmem:[%s12436_s27 + $0x160] sm:$0xff] }
  0xab   :  { %7250 = vset.pattern.permute.xlu0 %v7459_v36  ;;  %v6933_v36 = vpack.c.bf16 %v2761_v58, %v2759_v57  ;;  %v2769_v57 = vld [vmem:[%s12436_s27 + $0x190] sm:$0xff] }
  0xac   :  { %v7990_v60 = vpop.permute.xlu1 %155  ;;  %432 = vperm.xlu0 %7250, %v415_v39   ;;  %v7993_v7 = vpop.permute.xlu0 %152  ;;  %v2765_v39 = vld [vmem:[%s12436_s27 + $0x170] sm:$0xff] }
  0xad   :  { %12453 = vst [vmem:[#allocation27_spill] sm:$0xff] %v7990_v60  ;;  %12454 = vst [vmem:[#allocation28_spill] sm:$0xff] %v7993_v7  ;;  %6934 = vmatpush1.bf16.msra.mxu0 %v6933_v36  ;;  %v6937_v19 = vpack.c.bf16 %v2765_v39, %v2763_v35  ;;  %v6943_v35 = vpack.c.bf16 %v2774_v14, %v2772_v13  ;;  %v2771_v39 = vld [vmem:[%s12436_s27 + $0x1a0] sm:$0xff]  ;;  %v428_v13 = vadd.s32 32, %v7741_v30  ;;  %v1192_v7 = vadd.s32 128, %v7717_v26 }
  0xae   :  { %7202 = vset.pattern.permute.xlu1 %v12276_v53  ;;  %6936 = vmatprep.subr.bf16.mxu0 %v6935_v47 }
  0xaf   :  { %700 = vperm.xlu1 %7202, %v675_v55   ;;  %v6939_v55 = vpack.c.bf16 %v2770_v51, %v2768_v49  ;;  %v2776_v51 = vld [vmem:[%s12436_s27 + $0x1c8] sm:$0xff] }
  0xb0   :  { %v7996_v8 = vpop.permute.xlu1 %227  ;;  %441 = vperm.xlu0 %7250, %v418_v6   ;;  %v8000_v12 = vpop.permute.xlu0 %224  ;;  %v424_v6 = vadd.s32 32, %v7717_v26 }
  0xb1   :  { %12455 = vst [vmem:[#allocation29_spill] sm:$0xff] %v7996_v8  ;;  %12456 = vst [vmem:[#allocation30_spill] sm:$0xff] %v8000_v12  ;;  %6938 = vmatpush1.bf16.msra.mxu0 %v6937_v19  ;;  %v426_v19 = vadd.s32 32, %v7729_v28 }
  0xb2   :  { %6940 = vmatprep.subr.bf16.mxu0 %v6939_v55  ;;  %v2778_v55 = vld [vmem:[%s12436_s27 + $0x1d8] sm:$0xff] }
  0xb3   :  { %7203 = vset.pattern.permute.xlu1 %v12282_v63  ;;  %v1963_v63 = vadd.s32 224, %v7746_v31  ;;  %v1197_v31 = vadd.s32 128, %v7758_v33 }
  0xb4   :  { %1718 = vperm.xlu1 %7203, %v1697_v10   ;;  %v8015_v43 = vpop.permute.xlu1 %233  ;;  %447 = vperm.xlu0 %7250, %v420_v11   ;;  %v8018_v45 = vpop.permute.xlu0 %230  ;;  %v6941_v10 = vpack.c.bf16 %v2769_v57, %v2767_v56  ;;  %v1442_v11 = vadd.s32 160, %v7681_v20  ;;  %v1953_v56 = vadd.s32 224, %v7686_v21  ;;  %v6947_v57 = vpack.c.bf16 %v2778_v55, %v2776_v51  ;;  %v2781_v51 = vld [vmem:[%s12436_s27 + $0x1f0] sm:$0xff] }
  0xb5   :  { %12457 = vst [vmem:[#allocation31_spill] sm:$0xff] %v8018_v45 }
  0xb6   :  { %6942 = vmatpush1.bf16.msra.mxu0 %v6941_v10  ;;  %v2777_v10 = vld [vmem:[%s12436_s27 + $0x1d0] sm:$0xff] }
  0xb7   :  { %6944 = vmatprep.subr.bf16.mxu0 %v6943_v35 }
  0xb8   :  { %7204 = vset.pattern.permute.xlu1 %v12274_v46  ;;  %v8034_v58 = vpop.permute.xlu1 %239  ;;  %453 = vperm.xlu0 %7250, %v422_v44   ;;  %v8037_v36 = vpop.permute.xlu0 %236  ;;  %v2773_v44 = vld [vmem:[%s12436_s27 + $0x1b0] sm:$0xff] }
  0xb9   :  { %2227 = vperm.xlu1 %7204, %v2208_v48   ;;  %v6945_v49 = vpack.c.bf16 %v2773_v44, %v2771_v39  ;;  %v2780_v39 = vld [vmem:[%s12436_s27 + $0x1e8] sm:$0xff]  ;;  %v2782_v44 = vld [vmem:[%s12436_s27 + $0x1f8] sm:$0xff] }
  0xbb   :  { %6946 = vmatpush1.bf16.msra.mxu0 %v6945_v49  ;;  %v6951_v49 = vpack.c.bf16 %v2782_v44, %v2780_v39  ;;  %v430_v39 = vadd.s32 32, %v7753_v32 }
  0xbc   :  { %v8052_v47 = vpop.permute.xlu1 %245  ;;  %459 = vperm.xlu0 %7250, %v424_v6   ;;  %v8055_v48 = vpop.permute.xlu0 %242  ;;  %v2775_v6 = vld [vmem:[%s12436_s27 + $0x1c0] sm:$0xff]  ;;  %6948 = vmatprep.subr.bf16.mxu0 %v6947_v57  ;;  %v676_v57 = vadd.s32 64, %v7693_v22 }
  0xbd   :  { %12458 = vst [vmem:[#allocation32_spill] sm:$0xff] %v8052_v47  ;;  %7206 = vset.pattern.permute.xlu1 %v12278_v62  ;;  %v6949_v35 = vpack.c.bf16 %v2777_v10, %v2775_v6  ;;  %v429_v6 = vadd.s32 32, %v7758_v33  ;;  %v2465_v62 = vadd.s32 288, %v7686_v21  ;;  %v937_v33 = vadd.s32 96, %v7734_v29 }
  0xbe   :  { %1465 = vperm.xlu1 %7206, %v1442_v11  }
  0xbf   :  { %6950 = vmatpush1.bf16.msra.mxu0 %v6949_v35 }
  0xc0   :  { %v8071_v11 = vpop.permute.xlu1 %251  ;;  %465 = vperm.xlu0 %7250, %v426_v19   ;;  %v8074_v14 = vpop.permute.xlu0 %248  ;;  %v2779_v19 = vld [vmem:[%s12436_s27 + $0x1e0] sm:$0xff]  ;;  %6952 = vmatprep.subr.bf16.mxu0 %v6951_v49  ;;  %v1952_v49 = vadd.s32 224, %v7669_v18  ;;  %v1958_v18 = vadd.s32 224, %v7705_v24 }
  0xc1   :  { %12459 = vst [vmem:[#allocation33_spill] sm:$0xff] %v8071_v11  ;;  %12460 = vst [vmem:[#allocation34_spill] sm:$0xff] %v8074_v14 }
  0xc2   :  { %7207 = vset.pattern.permute.xlu1 %v12284_v1 }
  0xc3   :  { %1974 = vperm.xlu1 %7207, %v1953_v56   ;;  %v6953_v56 = vpack.c.bf16 %v2781_v51, %v2779_v19  ;;  %v2209_v51 = vadd.s32 256, %v7686_v21  ;;  %v1186_v21 = vadd.s32 128, %v7681_v20 }
  0xc4   :  { %v8089_v55 = vpop.permute.xlu1 %257  ;;  %471 = vperm.xlu0 %7250, %v428_v13   ;;  %v8093_v10 = vpop.permute.xlu0 %254  ;;  %v1187_v13 = vadd.s32 128, %v7698_v23 }
  0xc5   :  { %12461 = vst [vmem:[#allocation35_spill] sm:$0xff] %v8089_v55  ;;  %12462 = vst [vmem:[#allocation36_spill] sm:$0xff] %v8093_v10  ;;  %6954 = vmatpush1.bf16.msra.mxu0 %v6953_v56 }
  0xc7   :  { %7208 = vset.pattern.permute.xlu1 %v12276_v53  ;;  %v1961_v53 = vadd.s32 224, %v7734_v29  ;;  %v2216_v29 = vadd.s32 256, %v7717_v26 }
  0xc8   :  { %703 = vperm.xlu1 %7208, %v676_v57   ;;  %v8096_v35 = vpop.permute.xlu1 %263  ;;  %474 = vperm.xlu0 %7250, %v429_v6   ;;  %v8099_v44 = vpop.permute.xlu0 %260  ;;  %v1955_v6 = vadd.s32 224, %v7698_v23 }
  0xc9   :  { %12463 = vst [vmem:[#allocation37_spill] sm:$0xff] %v8096_v35  ;;  %12464 = vst [vmem:[#allocation38_spill] sm:$0xff] %v8099_v44  ;;  %v12304_v35 = vlaneseq }
  0xcc   :  { %7209 = vset.pattern.permute.xlu1 %v12288_v59  ;;  %v8103_v2 = vpop.permute.xlu1 %269  ;;  %477 = vperm.xlu0 %7250, %v430_v39   ;;  %v8105_v19 = vpop.permute.xlu0 %266  ;;  %v932_v39 = vadd.s32 96, %v7693_v22 }
  0xcd   :  { %12465 = vst [vmem:[#allocation39_spill] sm:$0xff] %v8103_v2  ;;  %12466 = vst [vmem:[#allocation40_spill] sm:$0xff] %v8105_v19  ;;  %1212 = vperm.xlu1 %7209, %v1187_v13  }
  0xd0   :  { %7265 = vset.pattern.permute.xlu0 %v12284_v1 }
  0xd1   :  { %7210 = vset.pattern.permute.xlu1 %v12274_v46  ;;  %v8111_v57 = vpop.permute.xlu1 %435  ;;  %1971 = vperm.xlu0 %7265, %v1952_v49   ;;  %v8114_v56 = vpop.permute.xlu0 %944  ;;  %v1954_v46 = vadd.s32 224, %v7681_v20 }
  0xd2   :  { %12467 = vst [vmem:[#allocation41_spill] sm:$0xff] %v8111_v57  ;;  %12468 = vst [vmem:[#allocation42_spill] sm:$0xff] %v8114_v56  ;;  %2230 = vperm.xlu1 %7210, %v2209_v51  }
  0xd5   :  { %v8117_v5 = vpop.permute.xlu1 %438  ;;  %1980 = vperm.xlu0 %7265, %v1955_v6   ;;  %v8120_v13 = vpop.permute.xlu0 %947 }
  0xd6   :  { %7211 = vset.pattern.permute.xlu1 %v12280_v37  ;;  %v1962_v37 = vadd.s32 224, %v7729_v28 }
  0xd7   :  { %959 = vperm.xlu1 %7211, %v932_v39  }
  0xd9   :  { %v8124_v49 = vpop.permute.xlu1 %444  ;;  %1989 = vperm.xlu0 %7265, %v1958_v18   ;;  %v8127_v51 = vpop.permute.xlu0 %950 }
  0xdb   :  { %7212 = vset.pattern.permute.xlu1 %v12284_v1  ;;  %v1188_v1 = vadd.s32 128, %v7693_v22 }
  0xdc   :  { %1977 = vperm.xlu1 %7212, %v1954_v46  }
  0xdd   :  { %v8130_v6 = vpop.permute.xlu1 %450  ;;  %1998 = vperm.xlu0 %7265, %v1961_v53   ;;  %v8134_v39 = vpop.permute.xlu0 %956 }
  0xe0   :  { %7213 = vset.pattern.permute.xlu1 %v12286_v54 }
  0xe1   :  { %2486 = vperm.xlu1 %7213, %v2465_v62   ;;  %v8137_v18 = vpop.permute.xlu1 %456  ;;  %2001 = vperm.xlu0 %7265, %v1962_v37   ;;  %v1699_v62 = vadd.s32 192, %v7698_v23  ;;  %v12472_v37 = vmov 6  }
  0xe2   :  { %12469 = vst [vmem:[#allocation43_spill] sm:$0xff] %v8137_v18  ;;  %v8141_v46 = vpop.permute.xlu0 %2224 }
  0xe5   :  { %7214 = vset.pattern.permute.xlu1 %v12288_v59  ;;  %v8144_v53 = vpop.permute.xlu1 %462  ;;  %2004 = vperm.xlu0 %7265, %v1963_v63   ;;  %v933_v63 = vadd.s32 96, %v7710_v25 }
  0xe6   :  { %12470 = vst [vmem:[#allocation44_spill] sm:$0xff] %v8144_v53  ;;  %1215 = vperm.xlu1 %7214, %v1188_v1   ;;  %v8147_v28 = vpop.permute.xlu0 %2233 }
  0xe9   :  { %v8150_v54 = vpop.permute.xlu1 %468  ;;  %7268 = vset.pattern.permute.xlu0 %v12288_v59  ;;  %v1444_v59 = vadd.s32 160, %v7693_v22 }
  0xea   :  { %12471 = vst [vmem:[#allocation45_spill] sm:$0xff] %v8150_v54  ;;  %7215 = vset.pattern.permute.xlu1 %v12472_v37  ;;  %1209 = vperm.xlu0 %7268, %v1186_v21   ;;  %v8155_v60 = vpop.permute.xlu0 %2242 }
  0xeb   :  { %12473 = vst [vmem:[#allocation46_spill] sm:$0xff] %v8155_v60  ;;  %1724 = vperm.xlu1 %7215, %v1699_v62  }
  0xee   :  { %v8158_v1 = vpop.permute.xlu1 %688  ;;  %1218 = vperm.xlu0 %7268, %v1189_v9   ;;  %v2466_v9 = vadd.s32 288, %v7681_v20  ;;  %v934_v20 = vadd.s32 96, %v7705_v24 }
  0xef   :  { %12474 = vst [vmem:[#allocation47_spill] sm:$0xff] %v8158_v1  ;;  %7216 = vset.pattern.permute.xlu1 %v12475_v38  ;;  %v8162_v42 = vpop.permute.xlu0 %2483 }
  0xf0   :  { %962 = vperm.xlu1 %7216, %v933_v63  }
  0xf2   :  { %v8165_v21 = vpop.permute.xlu1 %691  ;;  %1227 = vperm.xlu0 %7268, %v1192_v7   ;;  %v678_v7 = vadd.s32 64, %v7705_v24 }
  0xf3   :  { %v8168_v62 = vpop.permute.xlu0 %2492 }
  0xf4   :  { %7217 = vset.pattern.permute.xlu1 %v12476_v34 }
  0xf5   :  { %1471 = vperm.xlu1 %7217, %v1444_v59  }
  0xf6   :  { %1236 = vperm.xlu0 %7268, %v1195_v17   ;;  %v12482_v17 = vmov 2  }
  0xf7   :  { %v8173_v0 = vpop.permute.xlu1 %1200  ;;  %v8175_v63 = vpop.permute.xlu0 %2501 }
  0xf8   :  { %12477 = vst [vmem:[#allocation48_spill] sm:$0xff] %v8173_v0  ;;  %12478 = vst [vmem:[#allocation49_spill] sm:$0xff] %v8175_v63 }
  0xf9   :  { %7218 = vset.pattern.permute.xlu1 %v12479_v50 }
  0xfa   :  { %2489 = vperm.xlu1 %7218, %v2466_v9   ;;  %1239 = vperm.xlu0 %7268, %v1196_v61  }
  0xfc   :  { %v8180_v52 = vpop.permute.xlu1 %1456  ;;  %v8182_v59 = vpop.permute.xlu0 %1721 }
  0xfd   :  { %12480 = vst [vmem:[#allocation50_spill] sm:$0xff] %v8180_v52  ;;  %12481 = vst [vmem:[#allocation51_spill] sm:$0xff] %v8182_v59 }
  0xfe   :  { %7219 = vset.pattern.permute.xlu1 %v12482_v17  ;;  %1242 = vperm.xlu0 %7268, %v1197_v31   ;;  %v2211_v31 = vadd.s32 256, %v7698_v23 }
  0xff   :  { %709 = vperm.xlu1 %7219, %v678_v7  }
 0x100   :  { %v8186_v30 = vpop.permute.xlu0 %1730 }
 0x101   :  { %12483 = vst [vmem:[#allocation52_spill] sm:$0xff] %v8186_v30  ;;  %v8189_v9 = vpop.permute.xlu1 %1203 }
 0x102   :  { %12484 = vst [vmem:[#allocation53_spill] sm:$0xff] %v8189_v9  ;;  %7271 = vset.pattern.permute.xlu0 %v12475_v38 }
 0x103   :  { %7220 = vset.pattern.permute.xlu1 %v12472_v37  ;;  %965 = vperm.xlu0 %7271, %v934_v20  }
 0x104   :  { %1727 = vperm.xlu1 %7220, %v1700_v40   ;;  %v8194_v61 = vpop.permute.xlu0 %1739  ;;  %v1956_v40 = vadd.s32 224, %v7693_v22 }
 0x105   :  { %12485 = vst [vmem:[#allocation54_spill] sm:$0xff] %v8194_v61 }
 0x106   :  { %v8197_v7 = vpop.permute.xlu1 %1712 }
 0x107   :  { %12486 = vst [vmem:[#allocation55_spill] sm:$0xff] %v8197_v7  ;;  %974 = vperm.xlu0 %7271, %v937_v33  }
 0x108   :  { %7221 = vset.pattern.permute.xlu1 %v12487_v15 }
 0x109   :  { %2236 = vperm.xlu1 %7221, %v2211_v31   ;;  %v8201_v3 = vpop.permute.xlu0 %1468  ;;  %v12493_v31 = vmov 7  }
 0x10a   :  { %12488 = vst [vmem:[#allocation56_spill] sm:$0xff] %v8201_v3 }
 0x10b   :  { %v8204_v20 = vpop.permute.xlu1 %1459  ;;  %989 = vperm.xlu0 %7271, %v942_v41   ;;  %v679_v41 = vadd.s32 64, %v7722_v27 }
 0x10c   :  { %12489 = vst [vmem:[#allocation57_spill] sm:$0xff] %v8204_v20 }
 0x10d   :  { %7222 = vset.pattern.permute.xlu1 %v12476_v34  ;;  %v8208_v23 = vpop.permute.xlu0 %1477 }
 0x10e   :  { %12490 = vst [vmem:[#allocation58_spill] sm:$0xff] %v8208_v23  ;;  %1474 = vperm.xlu1 %7222, %v1445_v16   ;;  %v1190_v16 = vadd.s32 128, %v7705_v24 }
 0x10f   :  { %7274 = vset.pattern.permute.xlu0 %v12487_v15 }
 0x110   :  { %v8212_v32 = vpop.permute.xlu1 %1968  ;;  %2251 = vperm.xlu0 %7274, %v2216_v29   ;;  %v12498_v29 = vmov 4  }
 0x111   :  { %12491 = vst [vmem:[#allocation59_spill] sm:$0xff] %v8212_v32  ;;  %v8214_v33 = vpop.permute.xlu0 %1486 }
 0x112   :  { %12492 = vst [vmem:[#allocation60_spill] sm:$0xff] %v8214_v33  ;;  %7223 = vset.pattern.permute.xlu1 %v12493_v31 }
 0x113   :  { %1983 = vperm.xlu1 %7223, %v1956_v40   ;;  %v2212_v40 = vadd.s32 256, %v7693_v22 }
 0x115   :  { %v8218_v4 = vpop.permute.xlu1 %1206 }
 0x116   :  { %12494 = vst [vmem:[#allocation61_spill] sm:$0xff] %v8218_v4  ;;  %v8220_v61 = vpop.permute.xlu0 %694 }
 0x117   :  { %12495 = vst [vmem:[#allocation62_spill] sm:$0xff] %v8220_v61  ;;  %7224 = vset.pattern.permute.xlu1 %v12482_v17 }
 0x118   :  { %712 = vperm.xlu1 %7224, %v679_v41   ;;  %v935_v41 = vadd.s32 96, %v7722_v27 }
 0x11a   :  { %v8224_v54 = vpop.permute.xlu1 %1715  ;;  %v8226_v53 = vpop.permute.xlu0 %697 }
 0x11b   :  { %12496 = vst [vmem:[#allocation63_spill] sm:$0xff] %v8224_v54  ;;  %12497 = vst [vmem:[#allocation64_spill] sm:$0xff] %v8226_v53 }
 0x11c   :  { %7225 = vset.pattern.permute.xlu1 %v12498_v29 }
 0x11d   :  { %1221 = vperm.xlu1 %7225, %v1190_v16   ;;  %v1957_v16 = vadd.s32 224, %v7710_v25 }
 0x11e   :  { %v8229_v33 = vpop.permute.xlu0 %706 }
 0x11f   :  { %12499 = vst [vmem:[#allocation65_spill] sm:$0xff] %v8229_v33  ;;  %v8232_v18 = vpop.permute.xlu1 %953 }
 0x120   :  { %12500 = vst [vmem:[#allocation66_spill] sm:$0xff] %v8232_v18 }
 0x121   :  { %7226 = vset.pattern.permute.xlu1 %v12487_v15 }
 0x122   :  { %2239 = vperm.xlu1 %7226, %v2212_v40   ;;  %v8235_v19 = vpop.permute.xlu0 %715  ;;  %v8250_v40 = vand.u32 127, %v12304_v35  ;;  %v1191_v35 = vadd.s32 128, %v7722_v27  ;;  %v1702_v27 = vadd.s32 192, %v7705_v24 }
 0x123   :  { %12501 = vst [vmem:[#allocation67_spill] sm:$0xff] %v8235_v19  ;;  %v2468_v19 = vadd.s32 288, %v7693_v22  ;;  %v12508_v22 = vmov 0.0  }
 0x124   :  { %v8238_v2 = vpop.permute.xlu1 %1462  ;;  %vm271_vm0 = vcmp.eq.s32.totalorder %v8250_v40, %v8000_v12  ;;  %vm735_vm4 = vcmp.eq.s32.totalorder %v8250_v40, %v8158_v1  ;;  %vm991_vm5 = vcmp.eq.s32.totalorder %v8250_v40, %v8114_v56  ;;  %vm274_vm8 = vcmp.eq.s32.totalorder %v8250_v40, %v7996_v8 }
 0x125   :  { %12502 = vst [vmem:[#allocation68_spill] sm:$0xff] %v8238_v2  ;;  %v6168_v60 = vsel %vm735_vm4, 1.0, %v12508_v22  ;;  %vm1247_vm10 = vcmp.eq.s32.totalorder %v8250_v40, %v8173_v0  ;;  %vm277_vm12 = vcmp.eq.s32.totalorder %v8250_v40, %v8018_v45  ;;  %vm482_vm14 = vcmp.eq.s32.totalorder %v8250_v40, %v8111_v57 }
 0x126   :  { %7227 = vset.pattern.permute.xlu1 %v12475_v38  ;;  %v8241_v44 = vpop.permute.xlu0 %724 }
 0x127   :  { %12503 = vst [vmem:[#allocation69_spill] sm:$0xff] %v8241_v44  ;;  %968 = vperm.xlu1 %7227, %v935_v41   ;;  %v8256_v44 = vadd.s32 128, %v8250_v40  ;;  %v6072_v41 = vsel %vm271_vm0, 1.0, %v12508_v22  ;;  %vm1503_vm0 = vcmp.eq.s32.totalorder %v8250_v40, %v8180_v52 }
 0x129   :  { %v8244_v10 = vpop.permute.xlu1 %2480  ;;  %vm272_vm2 = vcmp.eq.s32.totalorder %v8256_v44, %v8000_v12  ;;  %vm736_vm6 = vcmp.eq.s32.totalorder %v8256_v44, %v8158_v1  ;;  %vm992_vm7 = vcmp.eq.s32.totalorder %v8256_v44, %v8114_v56  ;;  %vm483_vm9 = vcmp.eq.s32.totalorder %v8256_v44, %v8111_v57 }
 0x12a   :  { %12504 = vst [vmem:[#allocation70_spill] sm:$0xff] %v8244_v10  ;;  %v6073_v23 = vsel %vm272_vm2, 1.0, %v12508_v22  ;;  %vm275_vm11 = vcmp.eq.s32.totalorder %v8256_v44, %v7996_v8  ;;  %vm278_vm13 = vcmp.eq.s32.totalorder %v8256_v44, %v8018_v45  ;;  %vm1248_vm15 = vcmp.eq.s32.totalorder %v8256_v44, %v8173_v0 }
 0x12b   :  { %7228 = vset.pattern.permute.xlu1 %v12493_v31  ;;  %v8247_v55 = vpop.permute.xlu0 %432  ;;  %v8336_v56 = vsel %vm277_vm12, 1.0, %v12508_v22  ;;  %v8339_v45 = vsel %vm278_vm13, 1.0, %v12508_v22  ;;  %v6265_v8 = vsel %vm1248_vm15, 1.0, %v12508_v22  ;;  %vm1759_vm2 = vcmp.eq.s32.totalorder %v8250_v40, %v8197_v7 }
 0x12c   :  { %12505 = vst [vmem:[#allocation71_spill] sm:$0xff] %v8247_v55  ;;  %1986 = vperm.xlu1 %7228, %v1957_v16   ;;  %vm479_vm1 = vcmp.eq.s32.totalorder %v8250_v40, %v8247_v55  ;;  %vm480_vm3 = vcmp.eq.s32.totalorder %v8256_v44, %v8247_v55  ;;  %vm1760_vm4 = vcmp.eq.s32.totalorder %v8256_v44, %v8197_v7 }
 0x12d   :  { %v6120_v16 = vsel %vm479_vm1, 1.0, %v12508_v22  ;;  %vm1504_vm1 = vcmp.eq.s32.totalorder %v8256_v44, %v8180_v52  ;;  %v6360_v52 = vsel %vm1759_vm2, 1.0, %v12508_v22  ;;  %v6361_v7 = vsel %vm1760_vm4, 1.0, %v12508_v22 }
 0x12e   :  { %v8253_v14 = vpop.permute.xlu1 %700  ;;  %v623_v12 = vadd.f32 %v6120_v16, %v6072_v41  ;;  %v6169_v41 = vsel %vm736_vm6, 1.0, %v12508_v22  ;;  %vm2272_vm6 = vcmp.eq.s32.totalorder %v8256_v44, %v8141_v46  ;;  %vm486_vm12 = vcmp.eq.s32.totalorder %v8256_v44, %v8117_v5 }
 0x12f   :  { %12506 = vst [vmem:[#allocation72_spill] sm:$0xff] %v8253_v14  ;;  %v8262_v25 = vpop.permute.xlu0 %441  ;;  %vm995_vm13 = vcmp.eq.s32.totalorder %v8256_v44, %v8120_v13  ;;  %vm994_vm15 = vcmp.eq.s32.totalorder %v8250_v40, %v8120_v13  ;;  %vm1250_vm2 = vcmp.eq.s32.totalorder %v8250_v40, %v8189_v9  ;;  %vm1763_vm4 = vcmp.eq.s32.totalorder %v8256_v44, %v8224_v54 }
 0x130   :  { %12507 = vst [vmem:[#allocation73_spill] sm:$0xff] %v8262_v25  ;;  %7229 = vset.pattern.permute.xlu1 %v12479_v50  ;;  %v879_v33 = vadd.f32 %v6168_v60, %v623_v12  ;;  %v6217_v60 = vsel %vm992_vm7, 1.0, %v12508_v22  ;;  %vm739_vm7 = vcmp.eq.s32.totalorder %v8256_v44, %v8165_v21 }
 0x131   :  { %2495 = vperm.xlu1 %7229, %v2468_v19   ;;  %v6121_v19 = vsel %vm480_vm3, 1.0, %v12508_v22  ;;  %vm2271_vm3 = vcmp.eq.s32.totalorder %v8250_v40, %v8141_v46 }
 0x132   :  { %v624_v47 = vadd.f32 %v6121_v19, %v6073_v23  ;;  %v936_v23 = vadd.s32 96, %v7717_v26 }
 0x133   :  { %v8272_v63 = vpop.permute.xlu1 %1718  ;;  %v8274_v11 = vpop.permute.xlu0 %447 }
 0x134   :  { %12509 = vst [vmem:[#allocation74_spill] sm:$0xff] %v8272_v63  ;;  %12510 = vst [vmem:[#allocation75_spill] sm:$0xff] %v8274_v11  ;;  %v880_v16 = vadd.f32 %v6169_v41, %v624_v47  ;;  %v6124_v47 = vsel %vm483_vm9, 1.0, %v12508_v22  ;;  %v6076_v41 = vsel %vm275_vm11, 1.0, %v12508_v22  ;;  %vm485_vm9 = vcmp.eq.s32.totalorder %v8250_v40, %v8117_v5 }
 0x135   :  { %7230 = vset.pattern.permute.xlu1 %v12498_v29  ;;  %vm2527_vm11 = vcmp.eq.s32.totalorder %v8250_v40, %v8244_v10 }
 0x136   :  { %1224 = vperm.xlu1 %7230, %v1191_v35   ;;  %v6216_v35 = vsel %vm991_vm5, 1.0, %v12508_v22  ;;  %vm2015_vm5 = vcmp.eq.s32.totalorder %v8250_v40, %v8212_v32 }
 0x137   :  { %v8283_v55 = vpop.permute.xlu0 %453  ;;  %v1135_v12 = vadd.f32 %v6216_v35, %v879_v33  ;;  %v6264_v33 = vsel %vm1247_vm10, 1.0, %v12508_v22  ;;  %v1136_v35 = vadd.f32 %v6217_v60, %v880_v16  ;;  %vm738_vm10 = vcmp.eq.s32.totalorder %v8250_v40, %v8165_v21 }
 0x138   :  { %12511 = vst [vmem:[#allocation76_spill] sm:$0xff] %v8283_v55  ;;  %v8289_v30 = vpop.permute.xlu1 %2227 }
 0x139   :  { %12512 = vst [vmem:[#allocation77_spill] sm:$0xff] %v8289_v30  ;;  %v1391_v1 = vadd.f32 %v6264_v33, %v1135_v12  ;;  %v6123_v12 = vsel %vm482_vm14, 1.0, %v12508_v22  ;;  %v627_v33 = vadd.f32 %v6124_v47, %v6076_v41  ;;  %v1392_v47 = vadd.f32 %v6265_v8, %v1136_v35 }
 0x13a   :  { %7231 = vset.pattern.permute.xlu1 %v12472_v37  ;;  %v6313_v41 = vsel %vm1504_vm1, 1.0, %v12508_v22  ;;  %v6456_v35 = vsel %vm2271_vm3, 1.0, %v12508_v22  ;;  %vm2528_vm14 = vcmp.eq.s32.totalorder %v8256_v44, %v8244_v10  ;;  %vm1507_vm1 = vcmp.eq.s32.totalorder %v8256_v44, %v8204_v20 }
 0x13b   :  { %1733 = vperm.xlu1 %7231, %v1702_v27   ;;  %v8296_v24 = vpop.permute.xlu0 %459  ;;  %v8311_v27 = vsel %vm274_vm8, 1.0, %v12508_v22  ;;  %vm2016_vm8 = vcmp.eq.s32.totalorder %v8256_v44, %v8212_v32  ;;  %v1648_v8 = vadd.f32 %v6313_v41, %v1392_v47  ;;  %v6457_v47 = vsel %vm2272_vm6, 1.0, %v12508_v22 }
 0x13c   :  { %12513 = vst [vmem:[#allocation78_spill] sm:$0xff] %v8296_v24  ;;  %v8332_v24 = vld [vmem:[%s12435_s0 + $0x40] sm:$0xff]  ;;  %v6172_v41 = vsel %vm739_vm7, 1.0, %v12508_v22  ;;  %vm742_vm3 = vcmp.eq.s32.totalorder %v8256_v44, %v8220_v61  ;;  %vm741_vm6 = vcmp.eq.s32.totalorder %v8250_v40, %v8220_v61  ;;  %vm1762_vm7 = vcmp.eq.s32.totalorder %v8250_v40, %v8224_v54 }
 0x13d   :  { %v8306_v19 = vpop.permute.xlu1 %1465 }
 0x13e   :  { %12514 = vst [vmem:[#allocation79_spill] sm:$0xff] %v8306_v19 }
 0x13f   :  { %7233 = vset.pattern.permute.xlu1 %v12475_v38  ;;  %v8320_v26 = vpop.permute.xlu0 %465 }
 0x140   :  { %12515 = vst [vmem:[#allocation80_spill] sm:$0xff] %v8320_v26  ;;  %971 = vperm.xlu1 %7233, %v936_v23   ;;  %v1447_v26 = vadd.s32 160, %v8332_v24  ;;  %v7289_v23 = vld [vmem:[%s12435_s0 + $0x30] sm:$0xff] }
 0x141   :  { %v2469_v60 = vadd.s32 288, %v7289_v23  ;;  %v6312_v23 = vsel %vm1503_vm0, 1.0, %v12508_v22  ;;  %vm1251_vm0 = vcmp.eq.s32.totalorder %v8256_v44, %v8189_v9 }
 0x142   :  { %v8343_v16 = vpop.permute.xlu1 %1974 }
 0x143   :  { %12516 = vst [vmem:[#allocation81_spill] sm:$0xff] %v8343_v16  ;;  %v8358_v55 = vpop.permute.xlu0 %471 }
 0x144   :  { %12517 = vst [vmem:[#allocation82_spill] sm:$0xff] %v8358_v55  ;;  %7234 = vset.pattern.permute.xlu1 %v12476_v34  ;;  %v1647_v55 = vadd.f32 %v6312_v23, %v1391_v1  ;;  %v1904_v23 = vadd.f32 %v6361_v7, %v1648_v8  ;;  %v6171_v8 = vsel %vm738_vm10, 1.0, %v12508_v22 }
 0x145   :  { %1480 = vperm.xlu1 %7234, %v1447_v26   ;;  %v6408_v26 = vsel %vm2015_vm5, 1.0, %v12508_v22  ;;  %vm1506_vm5 = vcmp.eq.s32.totalorder %v8250_v40, %v8204_v20  ;;  %v6363_v20 = vsel %vm1762_vm7, 1.0, %v12508_v22 }
 0x146   :  { %v1903_v0 = vadd.f32 %v6360_v52, %v1647_v55  ;;  %v6409_v52 = vsel %vm2016_vm8, 1.0, %v12508_v22  ;;  %vm997_vm8 = vcmp.eq.s32.totalorder %v8250_v40, %v8127_v51 }
 0x147   :  { %v8383_v57 = vpop.permute.xlu1 %703  ;;  %v8385_v1 = vpop.permute.xlu0 %474  ;;  %v2160_v7 = vadd.f32 %v6409_v52, %v1904_v23  ;;  %v883_v23 = vadd.f32 %v6172_v41, %v627_v33  ;;  %v6504_v52 = vsel %vm2527_vm11, 1.0, %v12508_v22  ;;  %v6505_v33 = vsel %vm2528_vm14, 1.0, %v12508_v22 }
 0x148   :  { %12518 = vst [vmem:[#allocation83_spill] sm:$0xff] %v8383_v57  ;;  %12519 = vst [vmem:[#allocation84_spill] sm:$0xff] %v8385_v1  ;;  %v2159_v55 = vadd.f32 %v6408_v26, %v1903_v0  ;;  %v8413_v26 = vld [vmem:[%s12435_s0 + $0x50] sm:$0xff]  ;;  %vm2530_vm14 = vcmp.eq.s32.totalorder %v8250_v40, %v8162_v42 }
 0x149   :  { %7235 = vset.pattern.permute.xlu1 %v12479_v50  ;;  %v681_v32 = vadd.s32 64, %v8413_v26 }
 0x14a   :  { %2498 = vperm.xlu1 %7235, %v2469_v60   ;;  %v2415_v1 = vadd.f32 %v6456_v35, %v2159_v55  ;;  %v2416_v60 = vadd.f32 %v6457_v47, %v2160_v7  ;;  %v626_v55 = vadd.f32 %v6123_v12, %v8311_v27  ;;  %v6126_v47 = vsel %vm485_vm9, 1.0, %v12508_v22 }
 0x14b   :  { %v8408_v0 = vpop.permute.xlu0 %477  ;;  %v6127_v7 = vsel %vm486_vm12, 1.0, %v12508_v22  ;;  %v6219_v12 = vsel %vm994_vm15, 1.0, %v12508_v22  ;;  %vm998_vm9 = vcmp.eq.s32.totalorder %v8256_v44, %v8127_v51  ;;  %vm2531_vm12 = vcmp.eq.s32.totalorder %v8256_v44, %v8162_v42 }
 0x14c   :  { %12520 = vst [vmem:[#allocation85_spill] sm:$0xff] %v8408_v0  ;;  %v8422_v35 = vpop.permute.xlu1 %1212  ;;  %v6220_v0 = vsel %vm995_vm13, 1.0, %v12508_v22  ;;  %v2671_v41 = vadd.f32 %v6504_v52, %v2415_v1  ;;  %v2672_v27 = vadd.f32 %v6505_v33, %v2416_v60  ;;  %v882_v1 = vadd.f32 %v6171_v8, %v626_v55 }
 0x14d   :  { %12521 = vst [vmem:[#allocation86_spill] sm:$0xff] %v8422_v35  ;;  %v6268_v52 = vsel %vm1251_vm0, 1.0, %v12508_v22  ;;  %v1139_v10 = vadd.f32 %v6220_v0, %v883_v23  ;;  %v1703_v8 = vadd.s32 192, %v8332_v24  ;;  %v629_v55 = vadd.f32 %v6126_v47, %v8336_v56 }
 0x14e   :  { %7236 = vset.pattern.permute.xlu1 %v12482_v17  ;;  %2912 = vmatprep.mubr.f32.mxu0 %v2672_v27  ;;  %v630_v23 = vadd.f32 %v6127_v7, %v8339_v45  ;;  %v6267_v33 = vsel %vm1250_vm2, 1.0, %v12508_v22  ;;  %v1138_v56 = vadd.f32 %v6219_v12, %v882_v1  ;;  %v6175_v47 = vsel %vm742_vm3, 1.0, %v12508_v22 }
 0x14f   :  { %718 = vperm.xlu1 %7236, %v681_v32   ;;  %v6316_v32 = vsel %vm1507_vm1, 1.0, %v12508_v22  ;;  %2913 = vmatmul.mubr.f32.vlgmr.msra.gmra.mrb[0].mxu0 %v2671_v41  ;;  %v1395_v27 = vadd.f32 %v6268_v52, %v1139_v10  ;;  %v6364_v41 = vsel %vm1763_vm4, 1.0, %v12508_v22  ;;  %v6315_v45 = vsel %vm1506_vm5, 1.0, %v12508_v22  ;;  %v7291_v52 = vld [vmem:[%s12435_s0 + $0x38] sm:$0xff] }
 0x150   :  { %v8455_v60 = vpop.permute.xlu0 %1971  ;;  %v1394_v12 = vadd.f32 %v6267_v33, %v1138_v56  ;;  %v6174_v1 = vsel %vm741_vm6, 1.0, %v12508_v22  ;;  %v2214_v54 = vadd.s32 256, %v7291_v52  ;;  %v886_v61 = vadd.f32 %v6175_v47, %v630_v23  ;;  %v8519_v52 = vld [vmem:[%s12435_s0 + $0x48] sm:$0xff] }
 0x151   :  { %12522 = vst [vmem:[#allocation87_spill] sm:$0xff] %v8455_v60  ;;  %v8465_v0 = vpop.permute.xlu1 %2230  ;;  %v1651_v10 = vadd.f32 %v6316_v32, %v1395_v27  ;;  %vm2018_vm10 = vcmp.eq.s32.totalorder %v8250_v40, %v8455_v60  ;;  %vm2019_vm11 = vcmp.eq.s32.totalorder %v8256_v44, %v8455_v60  ;;  %v6223_v32 = vsel %vm998_vm9, 1.0, %v12508_v22 }
 0x152   :  { %12523 = vst [vmem:[#allocation88_spill] sm:$0xff] %v8465_v0  ;;  %v1650_v33 = vadd.f32 %v6315_v45, %v1394_v12  ;;  %v6412_v27 = vsel %vm2019_vm11, 1.0, %v12508_v22  ;;  %vm2275_vm13 = vcmp.eq.s32.totalorder %v8256_v44, %v8289_v30  ;;  %v6411_v23 = vsel %vm2018_vm10, 1.0, %v12508_v22 }
 0x153   :  { %7237 = vset.pattern.permute.xlu1 %v12472_v37  ;;  %v1907_v9 = vadd.f32 %v6364_v41, %v1651_v10  ;;  %v6222_v41 = vsel %vm997_vm8, 1.0, %v12508_v22  ;;  %v885_v45 = vadd.f32 %v6174_v1, %v629_v55  ;;  %vm1254_vm15 = vcmp.eq.s32.totalorder %v8256_v44, %v8218_v4 }
 0x154   :  { %1736 = vperm.xlu1 %7237, %v1703_v8   ;;  %v8484_v7 = vpop.permute.xlu0 %1980  ;;  %v1906_v10 = vadd.f32 %v6363_v20, %v1650_v33  ;;  %v1142_v12 = vadd.f32 %v6223_v32, %v886_v61  ;;  %vm1510_vm0 = vcmp.eq.s32.totalorder %v8256_v44, %v8238_v2  ;;  %vm2274_vm1 = vcmp.eq.s32.totalorder %v8250_v40, %v8289_v30 }
 0x155   :  { %12524 = vst [vmem:[#allocation89_spill] sm:$0xff] %v8484_v7  ;;  %v2163_v56 = vadd.f32 %v6412_v27, %v1907_v9  ;;  %v6508_v9 = vsel %vm2531_vm12, 1.0, %v12508_v22  ;;  %v1448_v27 = vadd.s32 160, %v8519_v52  ;;  %v6507_v1 = vsel %vm2530_vm14, 1.0, %v12508_v22 }
 0x156   :  { %v8495_v8 = vpop.permute.xlu1 %959  ;;  %v2162_v61 = vadd.f32 %v6411_v23, %v1906_v10  ;;  %vm1253_vm2 = vcmp.eq.s32.totalorder %v8250_v40, %v8218_v4  ;;  %v6271_v33 = vsel %vm1254_vm15, 1.0, %v12508_v22  ;;  %v1141_v60 = vadd.f32 %v6222_v41, %v885_v45 }
 0x157   :  { %12525 = vst [vmem:[#allocation90_spill] sm:$0xff] %v8495_v8  ;;  %vm1766_vm3 = vcmp.eq.s32.totalorder %v8256_v44, %v8272_v63  ;;  %vm1509_vm4 = vcmp.eq.s32.totalorder %v8250_v40, %v8238_v2  ;;  %v6319_v23 = vsel %vm1510_vm0, 1.0, %v12508_v22  ;;  %vm2022_vm5 = vcmp.eq.s32.totalorder %v8256_v44, %v8343_v16 }
 0x158   :  { %7238 = vset.pattern.permute.xlu1 %v12487_v15  ;;  %v8505_v47 = vpop.permute.xlu0 %1989  ;;  %v1959_v41 = vadd.s32 224, %v8332_v24  ;;  %v6270_v45 = vsel %vm1253_vm2, 1.0, %v12508_v22  ;;  %vm1765_vm6 = vcmp.eq.s32.totalorder %v8250_v40, %v8272_v63  ;;  %vm2278_vm7 = vcmp.eq.s32.totalorder %v8256_v44, %v8465_v0 }
 0x159   :  { %12526 = vst [vmem:[#allocation91_spill] sm:$0xff] %v8505_v47  ;;  %2245 = vperm.xlu1 %7238, %v2214_v54   ;;  %v6460_v54 = vsel %vm2275_vm13, 1.0, %v12508_v22  ;;  %vm2021_vm8 = vcmp.eq.s32.totalorder %v8250_v40, %v8343_v16  ;;  %vm2277_vm9 = vcmp.eq.s32.totalorder %v8250_v40, %v8465_v0  ;;  %vm489_vm11 = vcmp.eq.s32.totalorder %v8256_v44, %v8262_v25 }
 0x15a   :  { %v2419_v55 = vadd.f32 %v6460_v54, %v2163_v56  ;;  %v6459_v56 = vsel %vm2274_vm1, 1.0, %v12508_v22  ;;  %v1398_v54 = vadd.f32 %v6271_v33, %v1142_v12  ;;  %v6415_v33 = vsel %vm2022_vm5, 1.0, %v12508_v22 }
 0x15b   :  { %v8530_v20 = vpop.permute.xlu1 %1977  ;;  %v2418_v30 = vadd.f32 %v6459_v56, %v2162_v61  ;;  %v6366_v56 = vsel %vm1765_vm6, 1.0, %v12508_v22  ;;  %vm281_vm12 = vcmp.eq.s32.totalorder %v8256_v44, %v8015_v43  ;;  %vm745_vm14 = vcmp.eq.s32.totalorder %v8256_v44, %v8226_v53 }
 0x15c   :  { %12527 = vst [vmem:[#allocation92_spill] sm:$0xff] %v8530_v20  ;;  %v8533_v32 = vpop.permute.xlu0 %1998  ;;  %v2675_v10 = vadd.f32 %v6508_v9, %v2419_v55  ;;  %v6318_v9 = vsel %vm1509_vm4, 1.0, %v12508_v22  ;;  %v1397_v55 = vadd.f32 %v6270_v45, %v1141_v60  ;;  %v8570_v60 = vld [vmem:[%s12435_s0 + $0x58] sm:$0xff]  ;;  %vm488_vm15 = vcmp.eq.s32.totalorder %v8250_v40, %v8262_v25 }
 0x15d   :  { %12528 = vst [vmem:[#allocation93_spill] sm:$0xff] %v8533_v32  ;;  %7239 = vset.pattern.permute.xlu1 %v12476_v34  ;;  %v6367_v32 = vsel %vm1766_vm3, 1.0, %v12508_v22  ;;  %v2674_v12 = vadd.f32 %v6507_v1, %v2418_v30  ;;  %v6463_v30 = vsel %vm2278_vm7, 1.0, %v12508_v22  ;;  %v682_v1 = vadd.s32 64, %v8570_v60 }
 0x15e   :  { %1483 = vperm.xlu1 %7239, %v1448_v27   ;;  %2918 = vmatprep.mubr.f32.mxu0 %v2675_v10  ;;  %v1654_v27 = vadd.f32 %v6319_v23, %v1398_v54  ;;  %v1653_v23 = vadd.f32 %v6318_v9, %v1397_v55  ;;  %v6414_v54 = vsel %vm2021_vm8, 1.0, %v12508_v22  ;;  %v6462_v9 = vsel %vm2277_vm9, 1.0, %v12508_v22 }
 0x15f   :  { %2919 = vmatmul.mubr.f32.gmra.mrb[2].mxu0 %v2674_v12  ;;  %vm280_vm0 = vcmp.eq.s32.totalorder %v8250_v40, %v8015_v43  ;;  %vm283_vm1 = vcmp.eq.s32.totalorder %v8250_v40, %v8037_v36  ;;  %vm744_vm2 = vcmp.eq.s32.totalorder %v8250_v40, %v8226_v53  ;;  %vm284_vm3 = vcmp.eq.s32.totalorder %v8256_v44, %v8037_v36 }
 0x160   :  { %v8552_v2 = vpop.permute.xlu1 %2486  ;;  %v8557_v61 = vpop.permute.xlu0 %2001  ;;  %v1910_v10 = vadd.f32 %v6367_v32, %v1654_v27  ;;  %vm491_vm4 = vcmp.eq.s32.totalorder %v8250_v40, %v8124_v49  ;;  %vm492_vm5 = vcmp.eq.s32.totalorder %v8256_v44, %v8124_v49  ;;  %vm1001_vm6 = vcmp.eq.s32.totalorder %v8256_v44, %v8232_v18 }
 0x161   :  { %12529 = vst [vmem:[#allocation94_spill] sm:$0xff] %v8552_v2  ;;  %12530 = vst [vmem:[#allocation95_spill] sm:$0xff] %v8557_v61  ;;  %vm2534_vm10 = vcmp.eq.s32.totalorder %v8256_v44, %v8552_v2  ;;  %vm2533_vm13 = vcmp.eq.s32.totalorder %v8250_v40, %v8552_v2  ;;  %v6129_v2 = vsel %vm488_vm15, 1.0, %v12508_v22  ;;  %vm1003_vm8 = vcmp.eq.s32.totalorder %v8250_v40, %v8134_v39 }
 0x162   :  { %7240 = vset.pattern.permute.xlu1 %v12493_v31  ;;  %v2166_v45 = vadd.f32 %v6415_v33, %v1910_v10  ;;  %v6511_v33 = vsel %vm2534_vm10, 1.0, %v12508_v22  ;;  %v6130_v10 = vsel %vm489_vm11, 1.0, %v12508_v22  ;;  %vm747_vm9 = vcmp.eq.s32.totalorder %v8250_v40, %v8253_v14 }
 0x163   :  { %1992 = vperm.xlu1 %7240, %v1959_v41   ;;  %v1909_v41 = vadd.f32 %v6366_v56, %v1653_v23  ;;  %v1193_v23 = vadd.s32 128, %v8413_v26  ;;  %vm1000_vm10 = vcmp.eq.s32.totalorder %v8250_v40, %v8232_v18  ;;  %v6180_v63 = vsel %vm747_vm9, 1.0, %v12508_v22 }
 0x164   :  { %v2422_v27 = vadd.f32 %v6463_v30, %v2166_v45  ;;  %v8581_v12 = vpop.permute.xlu0 %2004  ;;  %vm1769_vm15 = vcmp.eq.s32.totalorder %v8256_v44, %v8182_v59  ;;  %vm1516_vm9 = vcmp.eq.s32.totalorder %v8256_v44, %v8201_v3 }
 0x165   :  { %v8576_v32 = vpop.permute.xlu1 %1215  ;;  %12532 = vst [vmem:[#allocation97_spill] sm:$0xff] %v8581_v12  ;;  %v2165_v55 = vadd.f32 %v6414_v54, %v1909_v41  ;;  %v6082_v54 = vsel %vm281_vm12, 1.0, %v12508_v22  ;;  %v6510_v41 = vsel %vm2533_vm13, 1.0, %v12508_v22  ;;  %v6133_v12 = vsel %vm492_vm5, 1.0, %v12508_v22 }
 0x166   :  { %12531 = vst [vmem:[#allocation96_spill] sm:$0xff] %v8576_v32  ;;  %v2678_v56 = vadd.f32 %v6511_v33, %v2422_v27  ;;  %v6178_v33 = vsel %vm745_vm14, 1.0, %v12508_v22  ;;  %vm748_vm12 = vcmp.eq.s32.totalorder %v8256_v44, %v8253_v14  ;;  %vm1004_vm13 = vcmp.eq.s32.totalorder %v8256_v44, %v8134_v39 }
 0x167   :  { %7242 = vset.pattern.permute.xlu1 %v12482_v17  ;;  %v2421_v30 = vadd.f32 %v6462_v9, %v2165_v55  ;;  %v2215_v9 = vadd.s32 256, %v8332_v24  ;;  %v6081_v55 = vsel %vm280_vm0, 1.0, %v12508_v22  ;;  %vm1513_vm14 = vcmp.eq.s32.totalorder %v8256_v44, %v8306_v19 }
 0x168   :  { %721 = vperm.xlu1 %7242, %v682_v1   ;;  %2924 = vmatprep.mubr.f32.mxu0 %v2678_v56  ;;  %v633_v1 = vadd.f32 %v6130_v10, %v6082_v54  ;;  %v632_v56 = vadd.f32 %v6129_v2, %v6081_v55  ;;  %v6177_v54 = vsel %vm744_vm2, 1.0, %v12508_v22  ;;  %v6226_v2 = vsel %vm1001_vm6, 1.0, %v12508_v22 }
 0x169   :  { %v2677_v27 = vadd.f32 %v6510_v41, %v2421_v30  ;;  %v8604_v0 = vpop.permute.xlu0 %1209  ;;  %v6084_v30 = vsel %vm283_vm1, 1.0, %v12508_v22  ;;  %v6085_v41 = vsel %vm284_vm3, 1.0, %v12508_v22  ;;  %vm2281_vm0 = vcmp.eq.s32.totalorder %v8256_v44, %v8147_v28 }
 0x16a   :  { %v8595_v45 = vpop.permute.xlu1 %1724  ;;  %12534 = vst [vmem:[#allocation99_spill] sm:$0xff] %v8604_v0  ;;  %vm1257_vm7 = vcmp.eq.s32.totalorder %v8256_v44, %v8604_v0  ;;  %v888_v55 = vadd.f32 %v6177_v54, %v632_v56  ;;  %vm1256_vm11 = vcmp.eq.s32.totalorder %v8250_v40, %v8604_v0  ;;  %v636_v56 = vadd.f32 %v6133_v12, %v6085_v41 }
 0x16b   :  { %12533 = vst [vmem:[#allocation98_spill] sm:$0xff] %v8595_v45  ;;  %2925 = vmatmul.mubr.f32.gmra.mrb[4].mxu0 %v2677_v27  ;;  %v6132_v27 = vsel %vm491_vm4, 1.0, %v12508_v22  ;;  %v6273_v54 = vsel %vm1256_vm11, 1.0, %v12508_v22  ;;  %v6229_v12 = vsel %vm1004_vm13, 1.0, %v12508_v22  ;;  %vm1512_vm1 = vcmp.eq.s32.totalorder %v8250_v40, %v8306_v19 }
 0x16c   :  { %7243 = vset.pattern.permute.xlu1 %v12498_v29  ;;  %vm1259_vm2 = vcmp.eq.s32.totalorder %v8250_v40, %v8422_v35  ;;  %vm2280_vm3 = vcmp.eq.s32.totalorder %v8250_v40, %v8147_v28  ;;  %vm1260_vm4 = vcmp.eq.s32.totalorder %v8256_v44, %v8422_v35  ;;  %vm1768_vm5 = vcmp.eq.s32.totalorder %v8250_v40, %v8182_v59 }
 0x16d   :  { %1230 = vperm.xlu1 %7243, %v1193_v23   ;;  %v889_v23 = vadd.f32 %v6178_v33, %v633_v1  ;;  %v6274_v1 = vsel %vm1257_vm7, 1.0, %v12508_v22  ;;  %v938_v33 = vadd.s32 96, %v8570_v60  ;;  %vm1515_vm6 = vcmp.eq.s32.totalorder %v8250_v40, %v8201_v3 }
 0x16e   :  { %vm2025_vm7 = vcmp.eq.s32.totalorder %v8256_v44, %v8530_v20  ;;  %v6369_v35 = vsel %vm1768_vm5, 1.0, %v12508_v22  ;;  %vm1771_vm11 = vcmp.eq.s32.totalorder %v8250_v40, %v8595_v45  ;;  %vm495_vm5 = vcmp.eq.s32.totalorder %v8256_v44, %v8274_v11 }
 0x16f   :  { %v8618_v10 = vpop.permute.xlu1 %962  ;;  %v1145_v61 = vadd.f32 %v6226_v2, %v889_v23  ;;  %v6228_v23 = vsel %vm1003_vm8, 1.0, %v12508_v22 }
 0x170   :  { %12535 = vst [vmem:[#allocation100_spill] sm:$0xff] %v8618_v10 }
 0x171   :  { %7245 = vset.pattern.permute.xlu1 %v12487_v15  ;;  %v1401_v25 = vadd.f32 %v6274_v1, %v1145_v61  ;;  %v1960_v61 = vadd.s32 224, %v8519_v52  ;;  %v6322_v1 = vsel %vm1513_vm14, 1.0, %v12508_v22  ;;  %vm2027_vm14 = vcmp.eq.s32.totalorder %v8250_v40, %v8484_v7 }
 0x172   :  { %2248 = vperm.xlu1 %7245, %v2215_v9   ;;  %v635_v9 = vadd.f32 %v6132_v27, %v6084_v30  ;;  %v6225_v30 = vsel %vm1000_vm10, 1.0, %v12508_v22  ;;  %v6181_v27 = vsel %vm748_vm12, 1.0, %v12508_v22  ;;  %vm2024_vm10 = vcmp.eq.s32.totalorder %v8250_v40, %v8530_v20 }
 0x173   :  { %v1144_v2 = vadd.f32 %v6225_v30, %v888_v55  ;;  %v1657_v55 = vadd.f32 %v6322_v1, %v1401_v25  ;;  %v6370_v30 = vsel %vm1769_vm15, 1.0, %v12508_v22  ;;  %v892_v14 = vadd.f32 %v6181_v27, %v636_v56 }
 0x174   :  { %v8641_v16 = vpop.permute.xlu1 %1471  ;;  %v891_v41 = vadd.f32 %v6180_v63, %v635_v9  ;;  %v6466_v63 = vsel %vm2281_vm0, 1.0, %v12508_v22  ;;  %v6321_v25 = vsel %vm1512_vm1, 1.0, %v12508_v22  ;;  %v6276_v56 = vsel %vm1259_vm2, 1.0, %v12508_v22 }
 0x175   :  { %12536 = vst [vmem:[#allocation101_spill] sm:$0xff] %v8641_v16  ;;  %v6277_v27 = vsel %vm1260_vm4, 1.0, %v12508_v22  ;;  %v1913_v19 = vadd.f32 %v6370_v30, %v1657_v55  ;;  %vm1772_vm12 = vcmp.eq.s32.totalorder %v8256_v44, %v8595_v45  ;;  %vm2028_vm15 = vcmp.eq.s32.totalorder %v8256_v44, %v8484_v7 }
 0x176   :  { %7246 = vset.pattern.permute.xlu1 %v12475_v38  ;;  %v1147_v9 = vadd.f32 %v6228_v23, %v891_v41  ;;  %v6418_v23 = vsel %vm2025_vm7, 1.0, %v12508_v22  ;;  %vm2540_vm0 = vcmp.eq.s32.totalorder %v8256_v44, %v8168_v62  ;;  %vm494_vm4 = vcmp.eq.s32.totalorder %v8250_v40, %v8274_v11 }
 0x177   :  { %977 = vperm.xlu1 %7246, %v938_v33   ;;  %v1400_v33 = vadd.f32 %v6273_v54, %v1144_v2  ;;  %v2471_v54 = vadd.s32 288, %v8332_v24  ;;  %v6324_v24 = vsel %vm1515_vm6, 1.0, %v12508_v22  ;;  %vm286_vm6 = vcmp.eq.s32.totalorder %v8250_v40, %v8034_v58 }
 0x178   :  { %v1403_v41 = vadd.f32 %v6276_v56, %v1147_v9  ;;  %v6417_v9 = vsel %vm2024_vm10, 1.0, %v12508_v22  ;;  %vm287_vm7 = vcmp.eq.s32.totalorder %v8256_v44, %v8034_v58  ;;  %vm1006_vm10 = vcmp.eq.s32.totalorder %v8250_v40, %v8495_v8 }
 0x179   :  { %v8665_v0 = vpop.permute.xlu1 %2489  ;;  %v1656_v2 = vadd.f32 %v6321_v25, %v1400_v33  ;;  %v2169_v33 = vadd.f32 %v6418_v23, %v1913_v19  ;;  %v6465_v19 = vsel %vm2280_vm3, 1.0, %v12508_v22  ;;  %vm2539_vm3 = vcmp.eq.s32.totalorder %v8250_v40, %v8168_v62 }
 0x17a   :  { %12537 = vst [vmem:[#allocation102_spill] sm:$0xff] %v8665_v0  ;;  %vm2537_vm8 = vcmp.eq.s32.totalorder %v8256_v44, %v8665_v0  ;;  %vm2536_vm13 = vcmp.eq.s32.totalorder %v8250_v40, %v8665_v0 }
 0x17b   :  { %7248 = vset.pattern.permute.xlu1 %v12493_v31  ;;  %v2425_v30 = vadd.f32 %v6466_v63, %v2169_v33  ;;  %v1912_v25 = vadd.f32 %v6369_v35, %v1656_v2  ;;  %v1659_v2 = vadd.f32 %v6324_v24, %v1403_v41  ;;  %v6513_v33 = vsel %vm2536_vm13, 1.0, %v12508_v22 }
 0x17c   :  { %1995 = vperm.xlu1 %7248, %v1960_v61   ;;  %v1148_v61 = vadd.f32 %v6229_v12, %v892_v14  ;;  %v6514_v14 = vsel %vm2537_vm8, 1.0, %v12508_v22  ;;  %v6325_v12 = vsel %vm1516_vm9, 1.0, %v12508_v22  ;;  %v1705_v24 = vadd.s32 192, %v8413_v26 }
 0x17d   :  { %v2681_v63 = vadd.f32 %v6514_v14, %v2425_v30  ;;  %v2168_v35 = vadd.f32 %v6417_v9, %v1912_v25  ;;  %v6420_v14 = vsel %vm2027_vm14, 1.0, %v12508_v22  ;;  %v6421_v30 = vsel %vm2028_vm15, 1.0, %v12508_v22 }
 0x17e   :  { %v8690_v1 = vpop.permute.xlu1 %709  ;;  %v1404_v55 = vadd.f32 %v6277_v27, %v1148_v61  ;;  %v6372_v27 = vsel %vm1771_vm11, 1.0, %v12508_v22  ;;  %v6373_v61 = vsel %vm1772_vm12, 1.0, %v12508_v22  ;;  %vm750_vm8 = vcmp.eq.s32.totalorder %v8250_v40, %v8383_v57 }
 0x17f   :  { %12538 = vst [vmem:[#allocation103_spill] sm:$0xff] %v8690_v1  ;;  %2930 = vmatprep.mubr.f32.mxu0 %v2681_v63  ;;  %v2424_v0 = vadd.f32 %v6465_v19, %v2168_v35  ;;  %v1915_v45 = vadd.f32 %v6372_v27, %v1659_v2  ;;  %v6517_v19 = vsel %vm2540_vm0, 1.0, %v12508_v22  ;;  %v6516_v2 = vsel %vm2539_vm3, 1.0, %v12508_v22 }
 0x180   :  { %7249 = vset.pattern.permute.xlu1 %v12479_v50  ;;  %v1660_v23 = vadd.f32 %v6325_v12, %v1404_v55  ;;  %vm751_vm9 = vcmp.eq.s32.totalorder %v8256_v44, %v8383_v57  ;;  %vm1007_vm11 = vcmp.eq.s32.totalorder %v8256_v44, %v8495_v8  ;;  %vm1262_vm12 = vcmp.eq.s32.totalorder %v8250_v40, %v8576_v32 }
 0x181   :  { %2504 = vperm.xlu1 %7249, %v2471_v54   ;;  %v1194_v54 = vadd.s32 128, %v8570_v60  ;;  %v2680_v25 = vadd.f32 %v6513_v33, %v2424_v0  ;;  %v2171_v12 = vadd.f32 %v6420_v14, %v1915_v45  ;;  %v1450_v33 = vadd.s32 160, %v8570_v60 }
 0x182   :  { %v1916_v20 = vadd.f32 %v6373_v61, %v1660_v23  ;;  %v8752_v61 = vld [vmem:[%s12435_s0 + $0x60] sm:$0xff]  ;;  %vm1263_vm13 = vcmp.eq.s32.totalorder %v8256_v44, %v8576_v32  ;;  %vm1518_vm14 = vcmp.eq.s32.totalorder %v8250_v40, %v8641_v16  ;;  %vm1519_vm15 = vcmp.eq.s32.totalorder %v8256_v44, %v8641_v16 }
 0x183   :  { %v8718_v56 = vpop.permute.xlu1 %1727  ;;  %2931 = vmatmul.mubr.f32.gmra.mrb[6].mxu0 %v2680_v25  ;;  %v939_v63 = vadd.s32 96, %v8752_v61  ;;  %v8767_v25 = vld [vmem:[%s12435_s0 + $0x68] sm:$0xff]  ;;  %v2217_v32 = vadd.s32 256, %v8413_v26 }
 0x184   :  { %12539 = vst [vmem:[#allocation104_spill] sm:$0xff] %v8718_v56  ;;  %v2172_v55 = vadd.f32 %v6421_v30, %v1916_v20  ;;  %v2472_v30 = vadd.s32 288, %v8519_v52  ;;  %v2476_v52 = vadd.s32 288, %v8767_v25  ;;  %vm1774_vm0 = vcmp.eq.s32.totalorder %v8250_v40, %v8718_v56 }
 0x185   :  { %7251 = vset.pattern.permute.xlu1 %v12498_v29 }
 0x186   :  { %1233 = vperm.xlu1 %7251, %v1194_v54  }
 0x188   :  { %v8732_v9 = vpop.permute.xlu1 %2236 }
 0x189   :  { %12540 = vst [vmem:[#allocation105_spill] sm:$0xff] %v8732_v9  ;;  %vm2283_vm1 = vcmp.eq.s32.totalorder %v8250_v40, %v8732_v9  ;;  %vm2284_vm2 = vcmp.eq.s32.totalorder %v8256_v44, %v8732_v9  ;;  %v6280_v9 = vsel %vm1263_vm13, 1.0, %v12508_v22 }
 0x18a   :  { %v6468_v41 = vsel %vm2283_vm1, 1.0, %v12508_v22  ;;  %v6469_v0 = vsel %vm2284_vm2, 1.0, %v12508_v22  ;;  %7252 = vset.pattern.permute.xlu1 %v12472_v37  ;;  %vm1775_vm1 = vcmp.eq.s32.totalorder %v8256_v44, %v8718_v56 }
 0x18b   :  { %1742 = vperm.xlu1 %7252, %v1705_v24   ;;  %v2428_v27 = vadd.f32 %v6469_v0, %v2172_v55  ;;  %v2427_v35 = vadd.f32 %v6468_v41, %v2171_v12  ;;  %v2220_v24 = vadd.s32 256, %v8767_v25  ;;  %v2475_v41 = vadd.s32 288, %v8752_v61 }
 0x18c   :  { %v684_v55 = vadd.s32 64, %v8767_v25  ;;  %v6135_v12 = vsel %vm494_vm4, 1.0, %v12508_v22  ;;  %vm289_vm4 = vcmp.eq.s32.totalorder %v8250_v40, %v8055_v48 }
 0x18d   :  { %v8747_v54 = vpop.permute.xlu1 %1474  ;;  %v2684_v23 = vadd.f32 %v6517_v19, %v2428_v27  ;;  %v2683_v20 = vadd.f32 %v6516_v2, %v2427_v35  ;;  %2263 = vperm.xlu0 %7274, %v2220_v24   ;;  %v6136_v19 = vsel %vm495_vm5, 1.0, %v12508_v22  ;;  %v6087_v35 = vsel %vm286_vm6, 1.0, %v12508_v22 }
 0x18e   :  { %12541 = vst [vmem:[#allocation106_spill] sm:$0xff] %v8747_v54  ;;  %v6088_v2 = vsel %vm287_vm7, 1.0, %v12508_v22  ;;  %v6231_v24 = vsel %vm1006_vm10, 1.0, %v12508_v22  ;;  %vm290_vm7 = vcmp.eq.s32.totalorder %v8256_v44, %v8055_v48 }
 0x18f   :  { %7253 = vset.pattern.permute.xlu1 %v12475_v38  ;;  %2936 = vmatprep.mubr.f32.mxu0 %v2684_v23  ;;  %v6183_v23 = vsel %vm750_vm8, 1.0, %v12508_v22  ;;  %vm497_vm8 = vcmp.eq.s32.totalorder %v8250_v40, %v8130_v6 }
 0x190   :  { %980 = vperm.xlu1 %7253, %v939_v63   ;;  %2937 = vmatmul.mubr.f32.gmra.mrb[8].mxu0 %v2683_v20  ;;  %v1706_v63 = vadd.s32 192, %v8570_v60  ;;  %v6184_v20 = vsel %vm751_vm9, 1.0, %v12508_v22  ;;  %vm498_vm9 = vcmp.eq.s32.totalorder %v8256_v44, %v8130_v6 }
 0x191   :  { %7279 = vset.pattern.permute.xlu0 %v12479_v50 }
 0x192   :  { %v8757_v45 = vpop.permute.xlu1 %1983  ;;  %2516 = vperm.xlu0 %7279, %v2475_v41   ;;  %v6232_v41 = vsel %vm1007_vm11, 1.0, %v12508_v22 }
 0x193   :  { %12542 = vst [vmem:[#allocation107_spill] sm:$0xff] %v8757_v45  ;;  %vm2030_vm2 = vcmp.eq.s32.totalorder %v8250_v40, %v8757_v45  ;;  %vm2031_vm3 = vcmp.eq.s32.totalorder %v8256_v44, %v8757_v45 }
 0x194   :  { %7254 = vset.pattern.permute.xlu1 %v12476_v34 }
 0x195   :  { %1489 = vperm.xlu1 %7254, %v1450_v33   ;;  %v638_v33 = vadd.f32 %v6135_v12, %v6087_v35 }
 0x196   :  { %2519 = vperm.xlu0 %7279, %v2476_v52   ;;  %v8815_v52 = vld [vmem:[%s12435_s0 + $0x78] sm:$0xff] }
 0x197   :  { %v8761_v14 = vpop.permute.xlu1 %712  ;;  %v1966_v12 = vadd.s32 224, %v8815_v52 }
 0x198   :  { %12543 = vst [vmem:[#allocation108_spill] sm:$0xff] %v8761_v14 }
 0x199   :  { %7255 = vset.pattern.permute.xlu1 %v12479_v50 }
 0x19a   :  { %2507 = vperm.xlu1 %7255, %v2472_v30   ;;  %v639_v30 = vadd.f32 %v6136_v19, %v6088_v2  ;;  %v894_v19 = vadd.f32 %v6183_v23, %v638_v33  ;;  %v6279_v2 = vsel %vm1262_vm12, 1.0, %v12508_v22  ;;  %7284 = vset.pattern.permute.xlu0 %v12493_v31  ;;  %v2478_v33 = vadd.s32 288, %v8815_v52 }
 0x19b   :  { %2013 = vperm.xlu0 %7284, %v1966_v12   ;;  %v6376_v12 = vsel %vm1775_vm1, 1.0, %v12508_v22 }
 0x19c   :  { %v8772_v0 = vpop.permute.xlu1 %1221  ;;  %v895_v35 = vadd.f32 %v6184_v20, %v639_v30  ;;  %v1150_v8 = vadd.f32 %v6231_v24, %v894_v19  ;;  %v6328_v20 = vsel %vm1519_vm15, 1.0, %v12508_v22  ;;  %vm1010_vm15 = vcmp.eq.s32.totalorder %v8256_v44, %v8618_v10 }
 0x19d   :  { %12544 = vst [vmem:[#allocation109_spill] sm:$0xff] %v8772_v0 }
 0x19e   :  { %7256 = vset.pattern.permute.xlu1 %v12482_v17  ;;  %v1151_v23 = vadd.f32 %v6232_v41, %v895_v35  ;;  %v1406_v30 = vadd.f32 %v6279_v2, %v1150_v8  ;;  %v6375_v41 = vsel %vm1774_vm0, 1.0, %v12508_v22  ;;  %v940_v8 = vadd.s32 96, %v8767_v25  ;;  %v2784_v2 = vld [vmem:[%s12436_s27 + $0x208] sm:$0xff] }
 0x19f   :  { %727 = vperm.xlu1 %7256, %v684_v55   ;;  %v8809_v55 = vpop.permute.xlu0 %1218  ;;  %7287 = vset.pattern.permute.xlu0 %v12479_v50 }
 0x1a0   :  { %12546 = vst [vmem:[#allocation111_spill] sm:$0xff] %v8809_v55  ;;  %v1407_v16 = vadd.f32 %v6280_v9, %v1151_v23  ;;  %2525 = vperm.xlu0 %7287, %v2478_v33   ;;  %v2786_v23 = vld [vmem:[%s12436_s27 + $0x218] sm:$0xff]  ;;  %v2785_v33 = vld [vmem:[%s12436_s27 + $0x210] sm:$0xff]  ;;  %vm1265_vm0 = vcmp.eq.s32.totalorder %v8250_v40, %v8809_v55  ;;  %vm1266_vm1 = vcmp.eq.s32.totalorder %v8256_v44, %v8809_v55 }
 0x1a1   :  { %v8796_v27 = vpop.permute.xlu1 %2239  ;;  %v6955_v45 = vpack.c.bf16 %v2786_v23, %v2784_v2  ;;  %v6138_v2 = vsel %vm497_vm8, 1.0, %v12508_v22  ;;  %v6139_v23 = vsel %vm498_vm9, 1.0, %v12508_v22 }
 0x1a2   :  { %12545 = vst [vmem:[#allocation110_spill] sm:$0xff] %v8796_v27  ;;  %v1663_v19 = vadd.f32 %v6328_v20, %v1407_v16  ;;  %vm2286_vm5 = vcmp.eq.s32.totalorder %v8250_v40, %v8796_v27  ;;  %vm2287_vm6 = vcmp.eq.s32.totalorder %v8256_v44, %v8796_v27  ;;  %v6423_v16 = vsel %vm2030_vm2, 1.0, %v12508_v22 }
 0x1a3   :  { %7257 = vset.pattern.permute.xlu1 %v12472_v37  ;;  %v8842_v24 = vpop.permute.xlu0 %1227  ;;  %v6471_v56 = vsel %vm2286_vm5, 1.0, %v12508_v22  ;;  %v6472_v57 = vsel %vm2287_vm6, 1.0, %v12508_v22  ;;  %7041 = vmatprep.subr.bf16.mxu1 %v6955_v45  ;;  %vm1521_vm2 = vcmp.eq.s32.totalorder %v8250_v40, %v8747_v54 }
 0x1a4   :  { %1745 = vperm.xlu1 %7257, %v1706_v63   ;;  %v6327_v63 = vsel %vm1518_vm14, 1.0, %v12508_v22  ;;  %12548 = vst [vmem:[#allocation113_spill] sm:$0xff] %v8842_v24  ;;  %6956 = vmatprep.subr.bf16.mxu0 %v6955_v45  ;;  %v2787_v45 = vld [vmem:[%s12436_s27 + $0x220] sm:$0xff]  ;;  %vm1009_vm14 = vcmp.eq.s32.totalorder %v8250_v40, %v8618_v10  ;;  %v2218_v10 = vadd.s32 256, %v8570_v60 }
 0x1a5   :  { %v1662_v9 = vadd.f32 %v6327_v63, %v1406_v30  ;;  %v2783_v63 = vld [vmem:[%s12436_s27 + $0x200] sm:$0xff]  ;;  %v1919_v30 = vadd.f32 %v6376_v12, %v1663_v19  ;;  %v6091_v12 = vsel %vm290_vm7, 1.0, %v12508_v22 }
 0x1a6   :  { %v8824_v7 = vpop.permute.xlu1 %968  ;;  %v6957_v11 = vpack.c.bf16 %v2785_v33, %v2783_v63  ;;  %v12550_v63 = vld [vmem:[#allocation65_spill] sm:$0xff] }
 0x1a7   :  { %12547 = vst [vmem:[#allocation112_spill] sm:$0xff] %v8824_v7  ;;  %v1918_v20 = vadd.f32 %v6375_v41, %v1662_v9  ;;  %v6090_v41 = vsel %vm289_vm4, 1.0, %v12508_v22  ;;  %vm753_vm10 = vcmp.eq.s32.totalorder %v8250_v40, %v12550_v63  ;;  %v8907_v33 = vpop.permute.xlu0 %1236  ;;  %vm754_vm13 = vcmp.eq.s32.totalorder %v8256_v44, %v12550_v63 }
 0x1a8   :  { %7258 = vset.pattern.permute.xlu1 %v12487_v15  ;;  %12551 = vst [vmem:[#allocation115_spill] sm:$0xff] %v8907_v33  ;;  %7045 = vmatpush1.bf16.msra.mxu1 %v6957_v11  ;;  %v6186_v18 = vsel %vm753_vm10, 1.0, %v12508_v22 }
 0x1a9   :  { %2254 = vperm.xlu1 %7258, %v2217_v32   ;;  %v6424_v32 = vsel %vm2031_vm3, 1.0, %v12508_v22  ;;  %v2174_v9 = vadd.f32 %v6423_v16, %v1918_v20  ;;  %v2788_v20 = vld [vmem:[%s12436_s27 + $0x228] sm:$0xff]  ;;  %6958 = vmatpush1.bf16.msra.mxu0 %v6957_v11  ;;  %vm1522_vm3 = vcmp.eq.s32.totalorder %v8256_v44, %v8747_v54  ;;  %v9027_v54 = vadd.s32 256, %v8250_v40 }
 0x1aa   :  { %v2175_v19 = vadd.f32 %v6424_v32, %v1919_v30  ;;  %v2790_v30 = vld [vmem:[%s12436_s27 + $0x238] sm:$0xff] }
 0x1ab   :  { %v8851_v35 = vpop.permute.xlu1 %1986  ;;  %v2430_v32 = vadd.f32 %v6471_v56, %v2174_v9  ;;  %v6959_v56 = vpack.c.bf16 %v2790_v30, %v2788_v20  ;;  %v2789_v9 = vld [vmem:[%s12436_s27 + $0x230] sm:$0xff]  ;;  %v641_v20 = vadd.f32 %v6138_v2, %v6090_v41  ;;  %v6187_v30 = vsel %vm754_vm13, 1.0, %v12508_v22  ;;  %v2792_v41 = vld [vmem:[%s12436_s27 + $0x248] sm:$0xff]  ;;  %v2794_v2 = vld [vmem:[%s12436_s27 + $0x258] sm:$0xff] }
 0x1ac   :  { %12549 = vst [vmem:[#allocation114_spill] sm:$0xff] %v8851_v35  ;;  %v2431_v16 = vadd.f32 %v6472_v57, %v2175_v19  ;;  %v6961_v11 = vpack.c.bf16 %v2789_v9, %v2787_v45  ;;  %v8949_v45 = vpop.permute.xlu0 %1239  ;;  %vm2033_vm6 = vcmp.eq.s32.totalorder %v8250_v40, %v8851_v35  ;;  %vm2034_vm7 = vcmp.eq.s32.totalorder %v8256_v44, %v8851_v35 }
 0x1ad   :  { %7259 = vset.pattern.permute.xlu1 %v12475_v38  ;;  %7042 = vmatprep.subr.bf16.mxu1 %v6959_v56  ;;  %12554 = vst [vmem:[#allocation118_spill] sm:$0xff] %v8949_v45 }
 0x1ae   :  { %983 = vperm.xlu1 %7259, %v940_v8   ;;  %v1451_v8 = vadd.s32 160, %v8752_v61  ;;  %7046 = vmatpush1.bf16.msra.mxu1 %v6961_v11 }
 0x1af   :  { %6960 = vmatprep.subr.bf16.mxu0 %v6959_v56 }
 0x1b0   :  { %v8909_v27 = vpop.permute.xlu1 %2495  ;;  %6962 = vmatpush1.bf16.msra.mxu0 %v6961_v11  ;;  %v8981_v11 = vld [vmem:[%s12435_s0 + $0x70] sm:$0xff] }
 0x1b1   :  { %12552 = vst [vmem:[#allocation116_spill] sm:$0xff] %v8909_v27  ;;  %vm2542_vm11 = vcmp.eq.s32.totalorder %v8250_v40, %v8909_v27  ;;  %vm2543_vm12 = vcmp.eq.s32.totalorder %v8256_v44, %v8909_v27 }
 0x1b2   :  { %v6520_v27 = vsel %vm2543_vm12, 1.0, %v12508_v22  ;;  %v6519_v57 = vsel %vm2542_vm11, 1.0, %v12508_v22  ;;  %7260 = vset.pattern.permute.xlu1 %v12476_v34 }
 0x1b3   :  { %v2687_v19 = vadd.f32 %v6520_v27, %v2431_v16  ;;  %v2686_v33 = vadd.f32 %v6519_v57, %v2430_v32  ;;  %1492 = vperm.xlu1 %7260, %v1451_v8   ;;  %v2473_v27 = vadd.s32 288, %v8413_v26  ;;  %v642_v16 = vadd.f32 %v6139_v23, %v6091_v12  ;;  %v2791_v26 = vld [vmem:[%s12436_s27 + $0x240] sm:$0xff]  ;;  %v2793_v8 = vld [vmem:[%s12436_s27 + $0x250] sm:$0xff] }
 0x1b4   :  { %v6234_v32 = vsel %vm1009_vm14, 1.0, %v12508_v22  ;;  %v897_v12 = vadd.f32 %v6186_v18, %v641_v20  ;;  %v6235_v23 = vsel %vm1010_vm15, 1.0, %v12508_v22  ;;  %v6965_v18 = vpack.c.bf16 %v2793_v8, %v2791_v26  ;;  %v2797_v26 = vld [vmem:[%s12436_s27 + $0x270] sm:$0xff] }
 0x1b5   :  { %v8942_v53 = vpop.permute.xlu1 %1224  ;;  %2942 = vmatprep.mubr.f32.mxu0 %v2687_v19  ;;  %v898_v57 = vadd.f32 %v6187_v30, %v642_v16  ;;  %v685_v20 = vadd.s32 64, %v8981_v11  ;;  %v2796_v30 = vld [vmem:[%s12436_s27 + $0x268] sm:$0xff]  ;;  %v2795_v16 = vld [vmem:[%s12436_s27 + $0x260] sm:$0xff]  ;;  %v6330_v8 = vsel %vm1521_vm2, 1.0, %v12508_v22  ;;  %vm756_vm15 = vcmp.eq.s32.totalorder %v8250_v40, %v8690_v1 }
 0x1b6   :  { %12553 = vst [vmem:[#allocation117_spill] sm:$0xff] %v8942_v53  ;;  %2943 = vmatmul.mubr.f32.gmra.mrb[10].mxu0 %v2686_v33  ;;  %v6963_v33 = vpack.c.bf16 %v2794_v2, %v2792_v41  ;;  %v1153_v56 = vadd.f32 %v6234_v32, %v897_v12  ;;  %v6282_v32 = vsel %vm1265_vm0, 1.0, %v12508_v22  ;;  %v6283_v41 = vsel %vm1266_vm1, 1.0, %v12508_v22  ;;  %v9004_v12 = vpop.permute.xlu0 %1242 }
 0x1b7   :  { %7261 = vset.pattern.permute.xlu1 %v12479_v50  ;;  %v1154_v9 = vadd.f32 %v6235_v23, %v898_v57  ;;  %12556 = vst [vmem:[#allocation120_spill] sm:$0xff] %v9004_v12  ;;  %v6969_v23 = vpack.c.bf16 %v2797_v26, %v2795_v16  ;;  %v6331_v57 = vsel %vm1522_vm3, 1.0, %v12508_v22  ;;  %v1707_v16 = vadd.s32 192, %v8752_v61  ;;  %v12564_v12 = vld [vmem:[#allocation29_spill] sm:$0xff] }
 0x1b8   :  { %2510 = vperm.xlu1 %7261, %v2473_v27   ;;  %7043 = vmatprep.subr.bf16.mxu1 %v6963_v33  ;;  %v2798_v27 = vld [vmem:[%s12436_s27 + $0x278] sm:$0xff]  ;;  %vm276_vm14 = vcmp.eq.s32.totalorder %v9027_v54, %v12564_v12  ;;  %vm757_vm0 = vcmp.eq.s32.totalorder %v8256_v44, %v8690_v1  ;;  %vm1268_vm3 = vcmp.eq.s32.totalorder %v8250_v40, %v8772_v0 }
 0x1b9   :  { %7047 = vmatpush1.bf16.msra.mxu1 %v6965_v18  ;;  %6964 = vmatprep.subr.bf16.mxu0 %v6963_v33  ;;  %v6967_v2 = vpack.c.bf16 %v2798_v27, %v2796_v30  ;;  %v12557_v33 = vld [vmem:[#allocation52_spill] sm:$0xff]  ;;  %v1410_v30 = vadd.f32 %v6283_v41, %v1154_v9 }
 0x1ba   :  { %v8976_v19 = vpop.permute.xlu1 %1733  ;;  %6966 = vmatpush1.bf16.msra.mxu0 %v6965_v18  ;;  %vm1777_vm4 = vcmp.eq.s32.totalorder %v8250_v40, %v12557_v33  ;;  %vm1778_vm5 = vcmp.eq.s32.totalorder %v8256_v44, %v12557_v33  ;;  %v1409_v18 = vadd.f32 %v6282_v32, %v1153_v56  ;;  %v12560_v32 = vld [vmem:[#allocation32_spill] sm:$0xff]  ;;  %v9042_v41 = vpop.permute.xlu0 %965 }
 0x1bb   :  { %12555 = vst [vmem:[#allocation119_spill] sm:$0xff] %v8976_v19  ;;  %7044 = vmatprep.subr.bf16.mxu1 %v6967_v2  ;;  %6968 = vmatprep.subr.bf16.mxu0 %v6967_v2  ;;  %v1666_v55 = vadd.f32 %v6331_v57, %v1410_v30  ;;  %v6378_v56 = vsel %vm1777_vm4, 1.0, %v12508_v22  ;;  %v6379_v9 = vsel %vm1778_vm5, 1.0, %v12508_v22  ;;  %vm292_vm9 = vcmp.eq.s32.totalorder %v8250_v40, %v12560_v32  ;;  %v12562_v2 = vld [vmem:[#allocation46_spill] sm:$0xff] }
 0x1bc   :  { %7262 = vset.pattern.permute.xlu1 %v12482_v17  ;;  %v1665_v26 = vadd.f32 %v6330_v8, %v1409_v18  ;;  %vm293_vm10 = vcmp.eq.s32.totalorder %v8256_v44, %v12560_v32  ;;  %12561 = vst [vmem:[#allocation32_spill] sm:$0xff] %v9042_v41  ;;  %vm2289_vm12 = vcmp.eq.s32.totalorder %v8250_v40, %v12562_v2  ;;  %v6427_v8 = vsel %vm2034_vm7, 1.0, %v12508_v22 }
 0x1bd   :  { %730 = vperm.xlu1 %7262, %v685_v20   ;;  %7048 = vmatpush1.bf16.msra.mxu1 %v6969_v23  ;;  %v12559_v20 = vld [vmem:[#allocation76_spill] sm:$0xff]  ;;  %vm2290_vm13 = vcmp.eq.s32.totalorder %v8256_v44, %v12562_v2  ;;  %v1922_v30 = vadd.f32 %v6379_v9, %v1666_v55  ;;  %vm1012_vm1 = vcmp.eq.s32.totalorder %v8250_v40, %v9042_v41  ;;  %v6093_v55 = vsel %vm292_vm9, 1.0, %v12508_v22 }
 0x1be   :  { %6970 = vmatpush1.bf16.msra.mxu0 %v6969_v23  ;;  %vm500_vm8 = vcmp.eq.s32.totalorder %v8250_v40, %v12559_v20  ;;  %vm501_vm11 = vcmp.eq.s32.totalorder %v8256_v44, %v12559_v20  ;;  %v6426_v23 = vsel %vm2033_vm6, 1.0, %v12508_v22  ;;  %v1921_v18 = vadd.f32 %v6378_v56, %v1665_v26 }
 0x1bf   :  { %v9019_v27 = vpop.permute.xlu1 %971  ;;  %v6141_v57 = vsel %vm500_vm8, 1.0, %v12508_v22  ;;  %v6142_v45 = vsel %vm501_vm11, 1.0, %v12508_v22  ;;  %vm1013_vm2 = vcmp.eq.s32.totalorder %v8256_v44, %v9042_v41  ;;  %v2178_v26 = vadd.f32 %v6427_v8, %v1922_v30 }
 0x1c0   :  { %12558 = vst [vmem:[#allocation121_spill] sm:$0xff] %v9019_v27  ;;  %v6094_v56 = vsel %vm293_vm10, 1.0, %v12508_v22  ;;  %v6474_v9 = vsel %vm2289_vm12, 1.0, %v12508_v22  ;;  %v6475_v1 = vsel %vm2290_vm13, 1.0, %v12508_v22  ;;  %v644_v20 = vadd.f32 %v6141_v57, %v6093_v55  ;;  %v12566_v27 = vld [vmem:[#allocation58_spill] sm:$0xff] }
 0x1c1   :  { %7263 = vset.pattern.permute.xlu1 %v12472_v37  ;;  %v6189_v8 = vsel %vm756_vm15, 1.0, %v12508_v22  ;;  %v6237_v30 = vsel %vm1012_vm1, 1.0, %v12508_v22  ;;  %v6238_v41 = vsel %vm1013_vm2, 1.0, %v12508_v22  ;;  %vm1269_vm4 = vcmp.eq.s32.totalorder %v8256_v44, %v8772_v0 }
 0x1c2   :  { %1748 = vperm.xlu1 %7263, %v1707_v16   ;;  %v2177_v16 = vadd.f32 %v6426_v23, %v1921_v18  ;;  %v645_v23 = vadd.f32 %v6142_v45, %v6094_v56  ;;  %v6190_v18 = vsel %vm757_vm0, 1.0, %v12508_v22  ;;  %v941_v57 = vadd.s32 96, %v8981_v11 }
 0x1c3   :  { %v2434_v45 = vadd.f32 %v6475_v1, %v2178_v26  ;;  %v900_v55 = vadd.f32 %v6189_v8, %v644_v20  ;;  %v6285_v0 = vsel %vm1268_vm3, 1.0, %v12508_v22  ;;  %v6286_v33 = vsel %vm1269_vm4, 1.0, %v12508_v22 }
 0x1c4   :  { %v9052_v35 = vpop.permute.xlu1 %1480  ;;  %v901_v56 = vadd.f32 %v6190_v18, %v645_v23  ;;  %vm1524_vm7 = vcmp.eq.s32.totalorder %v8250_v40, %v12566_v27  ;;  %vm1525_vm8 = vcmp.eq.s32.totalorder %v8256_v44, %v12566_v27  ;;  %v1452_v26 = vadd.s32 160, %v8767_v25 }
 0x1c5   :  { %12563 = vst [vmem:[#allocation46_spill] sm:$0xff] %v9052_v35  ;;  %v1156_v1 = vadd.f32 %v6237_v30, %v900_v55  ;;  %vm1780_vm9 = vcmp.eq.s32.totalorder %v8250_v40, %v8976_v19  ;;  %vm1781_vm10 = vcmp.eq.s32.totalorder %v8256_v44, %v8976_v19  ;;  %vm282_vm12 = vcmp.eq.s32.totalorder %v9027_v54, %v8015_v43 }
 0x1c6   :  { %7264 = vset.pattern.permute.xlu1 %v12487_v15  ;;  %v1157_v20 = vadd.f32 %v6238_v41, %v901_v56  ;;  %vm288_vm13 = vcmp.eq.s32.totalorder %v9027_v54, %v8034_v58  ;;  %vm294_vm0 = vcmp.eq.s32.totalorder %v9027_v54, %v12560_v32  ;;  %vm2036_vm1 = vcmp.eq.s32.totalorder %v8250_v40, %v8505_v47 }
 0x1c7   :  { %2257 = vperm.xlu1 %7264, %v2218_v10   ;;  %v2433_v10 = vadd.f32 %v6474_v9, %v2177_v16  ;;  %v1412_v9 = vadd.f32 %v6285_v0, %v1156_v1  ;;  %v6334_v0 = vsel %vm1525_vm8, 1.0, %v12508_v22  ;;  %v6382_v43 = vsel %vm1781_vm10, 1.0, %v12508_v22 }
 0x1c8   :  { %v1413_v23 = vadd.f32 %v6286_v33, %v1157_v20  ;;  %vm2037_vm2 = vcmp.eq.s32.totalorder %v8256_v44, %v8505_v47  ;;  %v2474_v8 = vadd.s32 288, %v8570_v60  ;;  %v9145_v18 = vsel %vm282_vm12, 1.0, %v12508_v22  ;;  %v12586_v47 = vld [vmem:[#allocation40_spill] sm:$0xff] }
 0x1c9   :  { %v9091_v63 = vpop.permute.xlu1 %2498  ;;  %vm291_vm3 = vcmp.eq.s32.totalorder %v9027_v54, %v8055_v48  ;;  %v9162_v60 = vsel %vm288_vm13, 1.0, %v12508_v22  ;;  %v9170_v56 = vsel %vm294_vm0, 1.0, %v12508_v22  ;;  %v6429_v58 = vsel %vm2036_vm1, 1.0, %v12508_v22 }
 0x1ca   :  { %12565 = vst [vmem:[#allocation29_spill] sm:$0xff] %v9091_v63  ;;  %vm2545_vm5 = vcmp.eq.s32.totalorder %v8250_v40, %v9091_v63  ;;  %vm2546_vm6 = vcmp.eq.s32.totalorder %v8256_v44, %v9091_v63  ;;  %v1669_v33 = vadd.f32 %v6334_v0, %v1413_v23  ;;  %v6430_v1 = vsel %vm2037_vm2, 1.0, %v12508_v22  ;;  %v12585_v63 = vld [vmem:[#allocation41_spill] sm:$0xff] }
 0x1cb   :  { %v6523_v4 = vsel %vm2546_vm6, 1.0, %v12508_v22  ;;  %v6522_v3 = vsel %vm2545_vm5, 1.0, %v12508_v22  ;;  %7266 = vset.pattern.permute.xlu1 %v12475_v38  ;;  %v6333_v38 = vsel %vm1524_vm7, 1.0, %v12508_v22  ;;  %v9190_v32 = vsel %vm291_vm3, 1.0, %v12508_v22 }
 0x1cc   :  { %v2690_v24 = vadd.f32 %v6523_v4, %v2434_v45  ;;  %v2689_v59 = vadd.f32 %v6522_v3, %v2433_v10  ;;  %986 = vperm.xlu1 %7266, %v941_v57   ;;  %v9118_v3 = vsel %vm276_vm14, 1.0, %v12508_v22  ;;  %v12567_v4 = vld [vmem:[#allocation30_spill] sm:$0xff]  ;;  %vm285_vm14 = vcmp.eq.s32.totalorder %v9027_v54, %v8037_v36  ;;  %v12570_v45 = vld [vmem:[#allocation33_spill] sm:$0xff] }
 0x1cd   :  { %vm273_vm11 = vcmp.eq.s32.totalorder %v9027_v54, %v12567_v4  ;;  %v1668_v12 = vadd.f32 %v6333_v38, %v1412_v9  ;;  %vm298_vm4 = vcmp.eq.s32.totalorder %v8250_v40, %v12570_v45  ;;  %v1925_v55 = vadd.f32 %v6382_v43, %v1669_v33  ;;  %v12571_v36 = vld [vmem:[#allocation49_spill] sm:$0xff] }
 0x1ce   :  { %v9107_v16 = vpop.permute.xlu1 %718  ;;  %2948 = vmatprep.mubr.f32.mxu0 %v2690_v24  ;;  %v6381_v24 = vsel %vm1780_vm9, 1.0, %v12508_v22  ;;  %v9151_v30 = vsel %vm273_vm11, 1.0, %v12508_v22  ;;  %v9176_v48 = vsel %vm285_vm14, 1.0, %v12508_v22  ;;  %vm299_vm5 = vcmp.eq.s32.totalorder %v8256_v44, %v12570_v45 }
 0x1cf   :  { %2949 = vmatmul.mubr.f32.gmra.mrb[12].mxu0 %v2689_v59  ;;  %v12568_v59 = vld [vmem:[#allocation31_spill] sm:$0xff]  ;;  %v1924_v10 = vadd.f32 %v6381_v24, %v1668_v12  ;;  %vm2548_vm6 = vcmp.eq.s32.totalorder %v8250_v40, %v12571_v36  ;;  %vm2549_vm7 = vcmp.eq.s32.totalorder %v8256_v44, %v12571_v36  ;;  %vm300_vm8 = vcmp.eq.s32.totalorder %v9027_v54, %v12570_v45 }
 0x1d0   :  { %vm279_vm15 = vcmp.eq.s32.totalorder %v9027_v54, %v12568_v59  ;;  %7267 = vset.pattern.permute.xlu1 %v12476_v34  ;;  %v9199_v20 = vsel %vm298_vm4, 1.0, %v12508_v22  ;;  %v686_v23 = vadd.s32 64, %v8815_v52  ;;  %v2181_v4 = vadd.f32 %v6430_v1, %v1925_v55  ;;  %v12574_v55 = vld [vmem:[#allocation35_spill] sm:$0xff] }
 0x1d1   :  { %1495 = vperm.xlu1 %7267, %v1452_v26   ;;  %v9154_v57 = vsel %vm279_vm15, 1.0, %v12508_v22  ;;  %v12572_v26 = vld [vmem:[#allocation34_spill] sm:$0xff]  ;;  %v2180_v38 = vadd.f32 %v6429_v58, %v1924_v10  ;;  %v6526_v24 = vsel %vm2549_vm7, 1.0, %v12508_v22  ;;  %v6525_v43 = vsel %vm2548_vm6, 1.0, %v12508_v22 }
 0x1d2   :  { %vm295_vm9 = vcmp.eq.s32.totalorder %v8250_v40, %v12572_v26  ;;  %v9218_v12 = vsel %vm299_vm5, 1.0, %v12508_v22  ;;  %vm296_vm12 = vcmp.eq.s32.totalorder %v8256_v44, %v12572_v26  ;;  %v9227_v10 = vsel %vm300_vm8, 1.0, %v12508_v22 }
 0x1d3   :  { %v9141_v41 = vpop.permute.xlu1 %1736  ;;  %vm304_vm13 = vcmp.eq.s32.totalorder %v8250_v40, %v12574_v55  ;;  %vm305_vm15 = vcmp.eq.s32.totalorder %v8256_v44, %v12574_v55  ;;  %vm297_vm14 = vcmp.eq.s32.totalorder %v9027_v54, %v12572_v26  ;;  %vm306_vm0 = vcmp.eq.s32.totalorder %v9027_v54, %v12574_v55  ;;  %v12579_v55 = vld [vmem:[#allocation38_spill] sm:$0xff] }
 0x1d4   :  { %12569 = vst [vmem:[#allocation58_spill] sm:$0xff] %v9141_v41  ;;  %v1708_v45 = vadd.s32 192, %v8767_v25  ;;  %v9267_v26 = vsel %vm305_vm15, 1.0, %v12508_v22  ;;  %vm307_vm7 = vcmp.eq.s32.totalorder %v8250_v40, %v12579_v55  ;;  %vm308_vm8 = vcmp.eq.s32.totalorder %v8256_v44, %v12579_v55 }
 0x1d5   :  { %7269 = vset.pattern.permute.xlu1 %v12479_v50  ;;  %vm313_vm15 = vcmp.eq.s32.totalorder %v8250_v40, %v12586_v47 }
 0x1d6   :  { %2513 = vperm.xlu1 %7269, %v2474_v8  }
 0x1d8   :  { %v9203_v9 = vpop.permute.xlu1 %2245 }
 0x1d9   :  { %12573 = vst [vmem:[#allocation30_spill] sm:$0xff] %v9203_v9  ;;  %vm2292_vm10 = vcmp.eq.s32.totalorder %v8250_v40, %v9203_v9  ;;  %vm2293_vm11 = vcmp.eq.s32.totalorder %v8256_v44, %v9203_v9 }
 0x1da   :  { %v6477_v0 = vsel %vm2292_vm10, 1.0, %v12508_v22  ;;  %v6478_v59 = vsel %vm2293_vm11, 1.0, %v12508_v22  ;;  %7270 = vset.pattern.permute.xlu1 %v12482_v17  ;;  %vm484_vm11 = vcmp.eq.s32.totalorder %v9027_v54, %v12585_v63 }
 0x1db   :  { %v2437_v33 = vadd.f32 %v6478_v59, %v2181_v4  ;;  %v2436_v8 = vadd.f32 %v6477_v0, %v2180_v38  ;;  %733 = vperm.xlu1 %7270, %v686_v23   ;;  %v9244_v4 = vsel %vm295_vm9, 1.0, %v12508_v22  ;;  %v9247_v38 = vsel %vm296_vm12, 1.0, %v12508_v22  ;;  %v12576_v0 = vld [vmem:[#allocation36_spill] sm:$0xff] }
 0x1dc   :  { %vm301_vm1 = vcmp.eq.s32.totalorder %v8250_v40, %v12576_v0  ;;  %vm302_vm2 = vcmp.eq.s32.totalorder %v8256_v44, %v12576_v0  ;;  %v9254_v23 = vsel %vm304_vm13, 1.0, %v12508_v22  ;;  %v9257_v59 = vsel %vm297_vm14, 1.0, %v12508_v22 }
 0x1dd   :  { %v9237_v17 = vpop.permute.xlu1 %1483  ;;  %v2693_v58 = vadd.f32 %v6526_v24, %v2437_v33  ;;  %v2692_v1 = vadd.f32 %v6525_v43, %v2436_v8  ;;  %v12577_v24 = vld [vmem:[#allocation37_spill] sm:$0xff]  ;;  %vm303_vm4 = vcmp.eq.s32.totalorder %v9027_v54, %v12576_v0  ;;  %v9270_v43 = vsel %vm306_vm0, 1.0, %v12508_v22 }
 0x1de   :  { %12575 = vst [vmem:[#allocation31_spill] sm:$0xff] %v9237_v17  ;;  %vm310_vm3 = vcmp.eq.s32.totalorder %v8250_v40, %v12577_v24  ;;  %12578 = vst [vmem:[#allocation33_spill] sm:$0xff] %v9270_v43  ;;  %vm311_vm5 = vcmp.eq.s32.totalorder %v8256_v44, %v12577_v24  ;;  %vm312_vm6 = vcmp.eq.s32.totalorder %v9027_v54, %v12577_v24  ;;  %v9278_v33 = vsel %vm301_vm1, 1.0, %v12508_v22 }
 0x1df   :  { %2954 = vmatprep.mubr.f32.mxu0 %v2693_v58  ;;  %7272 = vset.pattern.permute.xlu1 %v12472_v37  ;;  %v9281_v8 = vsel %vm302_vm2, 1.0, %v12508_v22  ;;  %v9288_v58 = vsel %vm310_vm3, 1.0, %v12508_v22  ;;  %v9291_v0 = vsel %vm303_vm4, 1.0, %v12508_v22  ;;  %vm309_vm9 = vcmp.eq.s32.totalorder %v9027_v54, %v12579_v55 }
 0x1e0   :  { %2955 = vmatmul.mubr.f32.gmra.mrb[14].mxu0 %v2692_v1  ;;  %1751 = vperm.xlu1 %7272, %v1708_v45   ;;  %12580 = vst [vmem:[#allocation34_spill] sm:$0xff] %v9288_v58  ;;  %v2219_v24 = vadd.s32 256, %v8752_v61  ;;  %v9299_v36 = vsel %vm311_vm5, 1.0, %v12508_v22  ;;  %v9302_v9 = vsel %vm312_vm6, 1.0, %v12508_v22  ;;  %v12584_v45 = vld [vmem:[#allocation39_spill] sm:$0xff]  ;;  %v9313_v61 = vsel %vm307_vm7, 1.0, %v12508_v22 }
 0x1e1   :  { %12582 = vst [vmem:[#allocation36_spill] sm:$0xff] %v9299_v36  ;;  %12583 = vst [vmem:[#allocation37_spill] sm:$0xff] %v9302_v9  ;;  %vm316_vm10 = vcmp.eq.s32.totalorder %v8250_v40, %v12584_v45  ;;  %vm317_vm12 = vcmp.eq.s32.totalorder %v8256_v44, %v12584_v45  ;;  %vm318_vm13 = vcmp.eq.s32.totalorder %v9027_v54, %v12584_v45  ;;  %v9316_v55 = vsel %vm308_vm8, 1.0, %v12508_v22 }
 0x1e2   :  { %v9295_v1 = vpop.permute.xlu1 %1992  ;;  %v9319_v19 = vsel %vm309_vm9, 1.0, %v12508_v22  ;;  %vm314_vm14 = vcmp.eq.s32.totalorder %v8256_v44, %v12586_v47  ;;  %vm487_vm0 = vcmp.eq.s32.totalorder %v9027_v54, %v8117_v5  ;;  %v9329_v63 = vsel %vm316_vm10, 1.0, %v12508_v22  ;;  %v12590_v5 = vld [vmem:[#allocation42_spill] sm:$0xff] }
 0x1e3   :  { %12581 = vst [vmem:[#allocation35_spill] sm:$0xff] %v9295_v1  ;;  %12587 = vst [vmem:[#allocation38_spill] sm:$0xff] %v9329_v63  ;;  %v6125_v45 = vsel %vm484_vm11, 1.0, %v12508_v22  ;;  %vm315_vm1 = vcmp.eq.s32.totalorder %v9027_v54, %v12586_v47  ;;  %vm493_vm2 = vcmp.eq.s32.totalorder %v9027_v54, %v8124_v49  ;;  %v9337_v9 = vsel %vm317_vm12, 1.0, %v12508_v22 }
 0x1e4   :  { %7273 = vset.pattern.permute.xlu1 %v12487_v15  ;;  %12588 = vst [vmem:[#allocation39_spill] sm:$0xff] %v9337_v9  ;;  %v9340_v36 = vsel %vm318_vm13, 1.0, %v12508_v22  ;;  %vm993_vm3 = vcmp.eq.s32.totalorder %v9027_v54, %v12590_v5  ;;  %v1453_v63 = vadd.s32 160, %v8981_v11  ;;  %v9348_v43 = vsel %vm313_vm15, 1.0, %v12508_v22 }
 0x1e5   :  { %2260 = vperm.xlu1 %7273, %v2219_v24   ;;  %12589 = vst [vmem:[#allocation41_spill] sm:$0xff] %v9340_v36  ;;  %v9351_v47 = vsel %vm314_vm14, 1.0, %v12508_v22  ;;  %v6128_v49 = vsel %vm487_vm0, 1.0, %v12508_v22  ;;  %vm499_vm4 = vcmp.eq.s32.totalorder %v9027_v54, %v8130_v6  ;;  %v9357_v24 = vadd.f32 %v6125_v45, %v9118_v3 }
 0x1e6   :  { %12591 = vst [vmem:[#allocation40_spill] sm:$0xff] %v9351_v47  ;;  %v9360_v5 = vsel %vm315_vm1, 1.0, %v12508_v22  ;;  %v6134_v36 = vsel %vm493_vm2, 1.0, %v12508_v22  ;;  %vm996_vm5 = vcmp.eq.s32.totalorder %v9027_v54, %v8120_v13  ;;  %v9366_v9 = vsel %vm993_vm3, 1.0, %v12508_v22  ;;  %v12593_v47 = vld [vmem:[#allocation43_spill] sm:$0xff] }
 0x1e7   :  { %v9344_v58 = vpop.permute.xlu1 %721  ;;  %12592 = vst [vmem:[#allocation42_spill] sm:$0xff] %v9360_v5  ;;  %vm503_vm6 = vcmp.eq.s32.totalorder %v8250_v40, %v12593_v47  ;;  %vm504_vm7 = vcmp.eq.s32.totalorder %v8256_v44, %v12593_v47  ;;  %vm505_vm8 = vcmp.eq.s32.totalorder %v9027_v54, %v12593_v47  ;;  %v9376_v6 = vadd.f32 %v6128_v49, %v9154_v57  ;;  %v12594_v47 = vld [vmem:[#allocation44_spill] sm:$0xff] }
 0x1e8   :  { %v6140_v3 = vsel %vm499_vm4, 1.0, %v12508_v22  ;;  %vm999_vm9 = vcmp.eq.s32.totalorder %v9027_v54, %v8127_v51  ;;  %vm1005_vm10 = vcmp.eq.s32.totalorder %v9027_v54, %v8134_v39  ;;  %v9384_v13 = vadd.f32 %v6134_v36, %v9176_v48 }
 0x1e9   :  { %7275 = vset.pattern.permute.xlu1 %v12476_v34  ;;  %v9387_v45 = vsel %vm996_vm5, 1.0, %v12508_v22  ;;  %vm509_vm11 = vcmp.eq.s32.totalorder %v8250_v40, %v12594_v47  ;;  %v1964_v49 = vadd.s32 224, %v8767_v25  ;;  %v6144_v5 = vsel %vm503_vm6, 1.0, %v12508_v22 }
 0x1ea   :  { %1498 = vperm.xlu1 %7275, %v1453_v63   ;;  %v6145_v51 = vsel %vm504_vm7, 1.0, %v12508_v22  ;;  %v6146_v39 = vsel %vm505_vm8, 1.0, %v12508_v22  ;;  %vm510_vm12 = vcmp.eq.s32.totalorder %v8256_v44, %v12594_v47  ;;  %v9400_v48 = vadd.f32 %v6140_v3, %v9190_v32 }
 0x1eb   :  { %v9403_v36 = vsel %vm999_vm9, 1.0, %v12508_v22  ;;  %v9406_v63 = vsel %vm1005_vm10, 1.0, %v12508_v22  ;;  %vm2273_vm13 = vcmp.eq.s32.totalorder %v9027_v54, %v8141_v46  ;;  %vm511_vm15 = vcmp.eq.s32.totalorder %v9027_v54, %v12594_v47 }
 0x1ec   :  { %v9391_v57 = vpop.permute.xlu1 %1230  ;;  %12595 = vst [vmem:[#allocation43_spill] sm:$0xff] %v9406_v63  ;;  %v6150_v25 = vsel %vm509_vm11, 1.0, %v12508_v22  ;;  %vm759_vm14 = vcmp.eq.s32.totalorder %v8250_v40, %v8761_v14  ;;  %vm760_vm0 = vcmp.eq.s32.totalorder %v8256_v44, %v8761_v14  ;;  %v647_v32 = vadd.f32 %v6144_v5, %v9244_v4 }
 0x1ed   :  { %v648_v3 = vadd.f32 %v6145_v51, %v9247_v38  ;;  %v9421_v63 = vadd.f32 %v6146_v39, %v9257_v59  ;;  %v6151_v46 = vsel %vm510_vm12, 1.0, %v12508_v22  ;;  %v9425_v47 = vsel %vm2273_vm13, 1.0, %v12508_v22  ;;  %v12598_v39 = vld [vmem:[#allocation45_spill] sm:$0xff] }
 0x1ee   :  { %7276 = vset.pattern.permute.xlu1 %v12493_v31  ;;  %vm1015_vm1 = vcmp.eq.s32.totalorder %v8250_v40, %v8824_v7  ;;  %vm1016_vm2 = vcmp.eq.s32.totalorder %v8256_v44, %v8824_v7  ;;  %v1198_v4 = vadd.s32 128, %v8815_v52  ;;  %v6152_v38 = vsel %vm511_vm15, 1.0, %v12508_v22 }
 0x1ef   :  { %12596 = vst [vmem:[#allocation44_spill] sm:$0xff] %v9421_v63  ;;  %2007 = vperm.xlu1 %7276, %v1964_v49   ;;  %v9436_v59 = vadd.f32 %v6150_v25, %v9278_v33  ;;  %v6192_v5 = vsel %vm759_vm14, 1.0, %v12508_v22  ;;  %v6193_v49 = vsel %vm760_vm0, 1.0, %v12508_v22  ;;  %v9441_v51 = vadd.f32 %v6151_v46, %v9281_v8 }
 0x1f0   :  { %vm2282_vm3 = vcmp.eq.s32.totalorder %v9027_v54, %v8147_v28  ;;  %vm1271_vm4 = vcmp.eq.s32.totalorder %v8250_v40, %v8942_v53  ;;  %vm1272_vm5 = vcmp.eq.s32.totalorder %v8256_v44, %v8942_v53  ;;  %vm515_vm6 = vcmp.eq.s32.totalorder %v8250_v40, %v12598_v39 }
 0x1f1   :  { %v9431_v14 = vpop.permute.xlu1 %2248  ;;  %vm516_vm7 = vcmp.eq.s32.totalorder %v8256_v44, %v12598_v39  ;;  %v6240_v33 = vsel %vm1015_vm1, 1.0, %v12508_v22  ;;  %v6241_v8 = vsel %vm1016_vm2, 1.0, %v12508_v22  ;;  %v903_v25 = vadd.f32 %v6192_v5, %v647_v32 }
 0x1f2   :  { %12597 = vst [vmem:[#allocation122_spill] sm:$0xff] %v9431_v14  ;;  %v904_v46 = vadd.f32 %v6193_v49, %v648_v3  ;;  %vm1527_vm8 = vcmp.eq.s32.totalorder %v8250_v40, %v9052_v35  ;;  %vm1528_vm9 = vcmp.eq.s32.totalorder %v8256_v44, %v9052_v35  ;;  %vm517_vm10 = vcmp.eq.s32.totalorder %v9027_v54, %v12598_v39 }
 0x1f3   :  { %7277 = vset.pattern.permute.xlu1 %v12498_v29  ;;  %v6288_v63 = vsel %vm1271_vm4, 1.0, %v12508_v22  ;;  %v6289_v53 = vsel %vm1272_vm5, 1.0, %v12508_v22  ;;  %v1709_v29 = vadd.s32 192, %v8981_v11  ;;  %v1159_v32 = vadd.f32 %v6240_v33, %v903_v25 }
 0x1f4   :  { %1245 = vperm.xlu1 %7277, %v1198_v4   ;;  %v1160_v3 = vadd.f32 %v6241_v8, %v904_v46  ;;  %vm1783_vm11 = vcmp.eq.s32.totalorder %v8250_v40, %v9141_v41  ;;  %vm1784_vm12 = vcmp.eq.s32.totalorder %v8256_v44, %v9141_v41  ;;  %v6156_v4 = vsel %vm515_vm6, 1.0, %v12508_v22 }
 0x1f5   :  { %v6157_v5 = vsel %vm516_vm7, 1.0, %v12508_v22  ;;  %v6336_v49 = vsel %vm1527_vm8, 1.0, %v12508_v22  ;;  %v6337_v33 = vsel %vm1528_vm9, 1.0, %v12508_v22  ;;  %v1415_v8 = vadd.f32 %v6288_v63, %v1159_v32 }
 0x1f6   :  { %v9464_v7 = vpop.permute.xlu1 %977  ;;  %v1416_v25 = vadd.f32 %v6289_v53, %v1160_v3  ;;  %vm2039_vm13 = vcmp.eq.s32.totalorder %v8250_v40, %v9295_v1  ;;  %vm2040_vm15 = vcmp.eq.s32.totalorder %v8256_v44, %v9295_v1  ;;  %v6158_v46 = vsel %vm517_vm10, 1.0, %v12508_v22 }
 0x1f7   :  { %v6384_v41 = vsel %vm1783_vm11, 1.0, %v12508_v22  ;;  %v6385_v35 = vsel %vm1784_vm12, 1.0, %v12508_v22  ;;  %v1454_v53 = vadd.s32 160, %v8815_v52  ;;  %v1671_v63 = vadd.f32 %v6336_v49, %v1415_v8 }
 0x1f8   :  { %7278 = vset.pattern.permute.xlu1 %v12472_v37  ;;  %v1672_v32 = vadd.f32 %v6337_v33, %v1416_v25  ;;  %vm2295_vm14 = vcmp.eq.s32.totalorder %v8250_v40, %v9431_v14  ;;  %vm2296_vm0 = vcmp.eq.s32.totalorder %v8256_v44, %v9431_v14  ;;  %v9500_v39 = vadd.f32 %v6152_v38, %v9291_v0  ;;  %v12601_v25 = vld [vmem:[#allocation78_spill] sm:$0xff] }
 0x1f9   :  { %1754 = vperm.xlu1 %7278, %v1709_v29   ;;  %v9506_v29 = vsel %vm2282_vm3, 1.0, %v12508_v22  ;;  %v6432_v49 = vsel %vm2039_vm13, 1.0, %v12508_v22  ;;  %v6433_v33 = vsel %vm2040_vm15, 1.0, %v12508_v22  ;;  %v9511_v8 = vadd.f32 %v6156_v4, %v9313_v61  ;;  %v12602_v61 = vld [vmem:[#allocation47_spill] sm:$0xff] }
 0x1fa   :  { %12600 = vst [vmem:[#allocation123_spill] sm:$0xff] %v9506_v29  ;;  %vm506_vm1 = vcmp.eq.s32.totalorder %v8250_v40, %v12601_v25  ;;  %v1927_v14 = vadd.f32 %v6384_v41, %v1671_v63  ;;  %v1928_v1 = vadd.f32 %v6385_v35, %v1672_v32  ;;  %v9516_v0 = vadd.f32 %v6157_v5, %v9316_v55 }
 0x1fb   :  { %v9497_v3 = vpop.permute.xlu1 %1995  ;;  %v9519_v38 = vadd.f32 %v6158_v46, %v9319_v19  ;;  %v6480_v28 = vsel %vm2295_vm14, 1.0, %v12508_v22  ;;  %v6481_v29 = vsel %vm2296_vm0, 1.0, %v12508_v22  ;;  %vm740_vm2 = vcmp.eq.s32.totalorder %v9027_v54, %v8165_v21 }
 0x1fc   :  { %12599 = vst [vmem:[#allocation45_spill] sm:$0xff] %v9497_v3  ;;  %vm507_vm3 = vcmp.eq.s32.totalorder %v8256_v44, %v12601_v25  ;;  %v2183_v41 = vadd.f32 %v6432_v49, %v1927_v14  ;;  %v2184_v35 = vadd.f32 %v6433_v33, %v1928_v1  ;;  %vm737_vm4 = vcmp.eq.s32.totalorder %v9027_v54, %v12602_v61  ;;  %v12610_v61 = vld [vmem:[#allocation50_spill] sm:$0xff] }
 0x1fd   :  { %7280 = vset.pattern.permute.xlu1 %v12476_v34  ;;  %vm2291_vm5 = vcmp.eq.s32.totalorder %v9027_v54, %v12562_v2  ;;  %v6147_v19 = vsel %vm506_vm1, 1.0, %v12508_v22  ;;  %v1965_v34 = vadd.s32 224, %v8981_v11  ;;  %v6173_v1 = vsel %vm740_vm2, 1.0, %v12508_v22 }
 0x1fe   :  { %1501 = vperm.xlu1 %7280, %v1454_v53   ;;  %v2440_v21 = vadd.f32 %v6481_v29, %v2184_v35  ;;  %v2439_v14 = vadd.f32 %v6480_v28, %v2183_v41  ;;  %v6148_v4 = vsel %vm507_vm3, 1.0, %v12508_v22  ;;  %v12604_v53 = vld [vmem:[#allocation67_spill] sm:$0xff]  ;;  %v9553_v29 = vsel %vm2291_vm5, 1.0, %v12508_v22  ;;  %v12609_v35 = vld [vmem:[#allocation53_spill] sm:$0xff] }
 0x1ff   :  { %vm762_vm8 = vcmp.eq.s32.totalorder %v8250_v40, %v12604_v53  ;;  %vm763_vm9 = vcmp.eq.s32.totalorder %v8256_v44, %v12604_v53  ;;  %12605 = vst [vmem:[#allocation47_spill] sm:$0xff] %v9553_v29  ;;  %vm2532_vm10 = vcmp.eq.s32.totalorder %v9027_v54, %v8162_v42  ;;  %vm2541_vm11 = vcmp.eq.s32.totalorder %v9027_v54, %v8168_v62  ;;  %v12619_v29 = vld [vmem:[#allocation57_spill] sm:$0xff] }
 0x200   :  { %v9533_v55 = vpop.permute.xlu1 %2504  ;;  %v650_v49 = vadd.f32 %v6147_v19, %v9199_v20  ;;  %v651_v33 = vadd.f32 %v6148_v4, %v9218_v12  ;;  %v1710_v2 = vadd.s32 192, %v8815_v52  ;;  %v9570_v42 = vsel %vm737_vm4, 1.0, %v12508_v22  ;;  %v12611_v19 = vld [vmem:[#allocation51_spill] sm:$0xff] }
 0x201   :  { %12603 = vst [vmem:[#allocation78_spill] sm:$0xff] %v9533_v55  ;;  %vm2551_vm6 = vcmp.eq.s32.totalorder %v8250_v40, %v9533_v55  ;;  %vm2552_vm7 = vcmp.eq.s32.totalorder %v8256_v44, %v9533_v55  ;;  %v884_v62 = vadd.f32 %v6173_v1, %v9357_v24  ;;  %v6195_v20 = vsel %vm762_vm8, 1.0, %v12508_v22  ;;  %v12608_v24 = vld [vmem:[#allocation48_spill] sm:$0xff]  ;;  %v12612_v1 = vld [vmem:[#allocation113_spill] sm:$0xff] }
 0x202   :  { %v6529_v5 = vsel %vm2552_vm7, 1.0, %v12508_v22  ;;  %v6528_v46 = vsel %vm2551_vm6, 1.0, %v12508_v22  ;;  %7281 = vset.pattern.permute.xlu1 %v12493_v31  ;;  %v12606_v31 = vld [vmem:[#allocation121_spill] sm:$0xff]  ;;  %v6196_v12 = vsel %vm763_vm9, 1.0, %v12508_v22  ;;  %v9584_v52 = vsel %vm2532_vm10, 1.0, %v12508_v22 }
 0x203   :  { %v2696_v63 = vadd.f32 %v6529_v5, %v2440_v21  ;;  %v2695_v32 = vadd.f32 %v6528_v46, %v2439_v14  ;;  %2010 = vperm.xlu1 %7281, %v1965_v34   ;;  %vm1018_vm12 = vcmp.eq.s32.totalorder %v8250_v40, %v12606_v31  ;;  %vm1019_vm13 = vcmp.eq.s32.totalorder %v8256_v44, %v12606_v31  ;;  %v9605_v14 = vpop.permute.xlu0 %974 }
 0x204   :  { %v9587_v41 = vsel %vm2541_vm11, 1.0, %v12508_v22  ;;  %vm1249_vm15 = vcmp.eq.s32.totalorder %v9027_v54, %v12608_v24  ;;  %vm1252_vm14 = vcmp.eq.s32.totalorder %v9027_v54, %v12609_v35  ;;  %vm1505_vm0 = vcmp.eq.s32.totalorder %v9027_v54, %v12610_v61  ;;  %v12613_v61 = vld [vmem:[#allocation52_spill] sm:$0xff] }
 0x205   :  { %2960 = vmatprep.mubr.f32.mxu0 %v2696_v63  ;;  %v9581_v28 = vpop.permute.xlu1 %1233  ;;  %12607 = vst [vmem:[#allocation67_spill] sm:$0xff] %v9587_v41  ;;  %vm1770_vm1 = vcmp.eq.s32.totalorder %v9027_v54, %v12611_v19  ;;  %v6243_v34 = vsel %vm1018_vm12, 1.0, %v12508_v22  ;;  %v6244_v21 = vsel %vm1019_vm13, 1.0, %v12508_v22  ;;  %vm1274_vm2 = vcmp.eq.s32.totalorder %v8250_v40, %v12612_v1  ;;  %v12615_v19 = vld [vmem:[#allocation71_spill] sm:$0xff] }
 0x206   :  { %2961 = vmatmul.mubr.f32.gmra.mrb[16].mxu0 %v2695_v32  ;;  %vm1275_vm3 = vcmp.eq.s32.totalorder %v8256_v44, %v12612_v1  ;;  %v906_v4 = vadd.f32 %v6195_v20, %v650_v49  ;;  %v907_v5 = vadd.f32 %v6196_v12, %v651_v33  ;;  %v9613_v46 = vsel %vm1249_vm15, 1.0, %v12508_v22 }
 0x207   :  { %7282 = vset.pattern.permute.xlu1 %v12472_v37  ;;  %v1140_v63 = vadd.f32 %v9387_v45, %v884_v62  ;;  %v6269_v32 = vsel %vm1252_vm14, 1.0, %v12508_v22  ;;  %v2221_v24 = vadd.s32 256, %v8981_v11  ;;  %vm1530_vm4 = vcmp.eq.s32.totalorder %v8250_v40, %v9237_v17  ;;  %v9644_v20 = vpop.permute.xlu0 %989 }
 0x208   :  { %1757 = vperm.xlu1 %7282, %v1710_v2   ;;  %v1162_v35 = vadd.f32 %v6243_v34, %v906_v4  ;;  %v1163_v37 = vadd.f32 %v6244_v21, %v907_v5  ;;  %vm1531_vm5 = vcmp.eq.s32.totalorder %v8256_v44, %v9237_v17  ;;  %v9628_v33 = vsel %vm1505_vm0, 1.0, %v12508_v22  ;;  %v12614_v34 = vld [vmem:[#allocation54_spill] sm:$0xff]  ;;  %v12616_v21 = vld [vmem:[#allocation55_spill] sm:$0xff] }
 0x209   :  { %v9634_v45 = vsel %vm1770_vm1, 1.0, %v12508_v22  ;;  %v6291_v2 = vsel %vm1274_vm2, 1.0, %v12508_v22  ;;  %v6292_v62 = vsel %vm1275_vm3, 1.0, %v12508_v22  ;;  %v1396_v12 = vadd.f32 %v6269_v32, %v1140_v63  ;;  %v12617_v63 = vld [vmem:[#allocation56_spill] sm:$0xff]  ;;  %v12620_v17 = vld [vmem:[#allocation62_spill] sm:$0xff] }
 0x20a   :  { %v9622_v49 = vpop.permute.xlu1 %1742  ;;  %vm1779_vm6 = vcmp.eq.s32.totalorder %v9027_v54, %v12613_v61  ;;  %vm1786_vm7 = vcmp.eq.s32.totalorder %v8250_v40, %v12614_v34  ;;  %vm481_vm8 = vcmp.eq.s32.totalorder %v9027_v54, %v12615_v19  ;;  %vm1761_vm9 = vcmp.eq.s32.totalorder %v9027_v54, %v12616_v21  ;;  %v12622_v21 = vld [vmem:[#allocation59_spill] sm:$0xff] }
 0x20b   :  { %vm1787_vm10 = vcmp.eq.s32.totalorder %v8256_v44, %v12614_v34  ;;  %v6339_v4 = vsel %vm1530_vm4, 1.0, %v12508_v22  ;;  %v6340_v5 = vsel %vm1531_vm5, 1.0, %v12508_v22  ;;  %vm1517_vm11 = vcmp.eq.s32.totalorder %v9027_v54, %v12617_v63 }
 0x20c   :  { %7283 = vset.pattern.permute.xlu1 %v12487_v15  ;;  %v1418_v32 = vadd.f32 %v6291_v2, %v1162_v35  ;;  %v1419_v61 = vadd.f32 %v6292_v62, %v1163_v37  ;;  %v2477_v19 = vadd.s32 288, %v8981_v11  ;;  %v9663_v55 = vsel %vm1779_vm6, 1.0, %v12508_v22  ;;  %v9696_v2 = vpop.permute.xlu0 %2251 }
 0x20d   :  { %2266 = vperm.xlu1 %7283, %v2221_v24   ;;  %12618 = vst [vmem:[#allocation48_spill] sm:$0xff] %v9663_v55  ;;  %vm1508_vm12 = vcmp.eq.s32.totalorder %v9027_v54, %v12619_v29  ;;  %vm743_vm13 = vcmp.eq.s32.totalorder %v9027_v54, %v12620_v17  ;;  %v6122_v41 = vsel %vm481_vm8, 1.0, %v12508_v22  ;;  %vm2042_vm15 = vcmp.eq.s32.totalorder %v8250_v40, %v9497_v3 }
 0x20e   :  { %v1674_v24 = vadd.f32 %v6339_v4, %v1418_v32  ;;  %v1675_v1 = vadd.f32 %v6340_v5, %v1419_v61  ;;  %vm2043_vm14 = vcmp.eq.s32.totalorder %v8256_v44, %v9497_v3  ;;  %v9680_v11 = vsel %vm1761_vm9, 1.0, %v12508_v22  ;;  %12621 = vst [vmem:[#allocation53_spill] sm:$0xff] %v9696_v2  ;;  %v7298_v32 = vld [vmem:[%s12435_s0 + $0x78] sm:$0xff]  ;;  %s7468_s0 = smov 112  }
 0x20f   :  { %v9670_v31 = vpop.permute.xlu1 %980  ;;  %v6387_v29 = vsel %vm1786_vm7, 1.0, %v12508_v22  ;;  %v6388_v35 = vsel %vm1787_vm10, 1.0, %v12508_v22  ;;  %v9694_v37 = vsel %vm1517_vm11, 1.0, %v12508_v22  ;;  %v6317_v62 = vsel %vm1508_vm12, 1.0, %v12508_v22 }
 0x210   :  { %vm1526_vm0 = vcmp.eq.s32.totalorder %v9027_v54, %v12566_v27  ;;  %vm2017_vm1 = vcmp.eq.s32.totalorder %v9027_v54, %v12622_v21  ;;  %v6176_v4 = vsel %vm743_vm13, 1.0, %v12508_v22  ;;  %v625_v5 = vadd.f32 %v6122_v41, %v9151_v30  ;;  %v12623_v41 = vld [vmem:[#allocation60_spill] sm:$0xff] }
 0x211   :  { %7285 = vset.pattern.permute.xlu1 %v12479_v50  ;;  %v6435_v63 = vsel %vm2042_vm15, 1.0, %v12508_v22  ;;  %v6436_v50 = vsel %vm2043_vm14, 1.0, %v12508_v22  ;;  %v2222_v61 = vadd.s32 256, %v7298_v32  ;;  %v1930_v3 = vadd.f32 %v6387_v29, %v1674_v24  ;;  %v12625_v24 = vld [vmem:[#allocation63_spill] sm:$0xff] }
 0x212   :  { %2522 = vperm.xlu1 %7285, %v2477_v19   ;;  %v1931_v34 = vadd.f32 %v6388_v35, %v1675_v1  ;;  %vm2298_vm2 = vcmp.eq.s32.totalorder %v8250_v40, %v9696_v2  ;;  %vm2299_vm3 = vcmp.eq.s32.totalorder %v8256_v44, %v9696_v2  ;;  %v1652_v30 = vadd.f32 %v6317_v62, %v1396_v12 }
 0x213   :  { %vm1533_vm4 = vcmp.eq.s32.totalorder %v8250_v40, %v12623_v41  ;;  %vm1534_vm5 = vcmp.eq.s32.totalorder %v8256_v44, %v12623_v41  ;;  %v887_v19 = vadd.f32 %v6176_v4, %v9376_v6  ;;  %v9729_v1 = vsel %vm1526_vm0, 1.0, %v12508_v22 }
 0x214   :  { %v9718_v17 = vpop.permute.xlu1 %1489  ;;  %12624 = vst [vmem:[#allocation50_spill] sm:$0xff] %v9729_v1  ;;  %vm1764_vm6 = vcmp.eq.s32.totalorder %v9027_v54, %v12625_v24  ;;  %v2186_v29 = vadd.f32 %v6435_v63, %v1930_v3  ;;  %v2187_v35 = vadd.f32 %v6436_v50, %v1931_v34  ;;  %v9738_v12 = vsel %vm2017_vm1, 1.0, %v12508_v22  ;;  %v12627_v63 = vld [vmem:[#allocation64_spill] sm:$0xff]  ;;  %v12628_v50 = vld [vmem:[#allocation65_spill] sm:$0xff] }
 0x215   :  { %vm1535_vm7 = vcmp.eq.s32.totalorder %v9027_v54, %v12623_v41  ;;  %v6483_v27 = vsel %vm2298_vm2, 1.0, %v12508_v22  ;;  %v6484_v6 = vsel %vm2299_vm3, 1.0, %v12508_v22  ;;  %v9745_v62 = vsel %vm1533_vm4, 1.0, %v12508_v22 }
 0x216   :  { %7286 = vset.pattern.permute.xlu1 %v12487_v15  ;;  %v9748_v3 = vsel %vm1534_vm5, 1.0, %v12508_v22  ;;  %v12626_v15 = vld [vmem:[#allocation61_spill] sm:$0xff]  ;;  %v881_v34 = vadd.f32 %v9570_v42, %v625_v5  ;;  %v1143_v21 = vadd.f32 %v9403_v36, %v887_v19  ;;  %v6365_v4 = vsel %vm1764_vm6, 1.0, %v12508_v22  ;;  %v12630_v5 = vld [vmem:[#allocation68_spill] sm:$0xff] }
 0x217   :  { %2269 = vperm.xlu1 %7286, %v2222_v61   ;;  %vm1255_vm8 = vcmp.eq.s32.totalorder %v9027_v54, %v12626_v15  ;;  %vm746_vm9 = vcmp.eq.s32.totalorder %v9027_v54, %v12627_v63  ;;  %vm755_vm10 = vcmp.eq.s32.totalorder %v9027_v54, %v12628_v50  ;;  %v2443_v61 = vadd.f32 %v6484_v6, %v2187_v35  ;;  %v12631_v6 = vld [vmem:[#allocation69_spill] sm:$0xff] }
 0x218   :  { %v2442_v42 = vadd.f32 %v6483_v27, %v2186_v29  ;;  %v9769_v36 = vsel %vm1535_vm7, 1.0, %v12508_v22  ;;  %vm1511_vm13 = vcmp.eq.s32.totalorder %v9027_v54, %v12630_v5  ;;  %v6272_v15 = vsel %vm1255_vm8, 1.0, %v12508_v22  ;;  %v12632_v5 = vld [vmem:[#allocation66_spill] sm:$0xff] }
 0x219   :  { %v9759_v32 = vpop.permute.xlu1 %2507  ;;  %v1137_v2 = vadd.f32 %v9366_v9, %v881_v34  ;;  %v9777_v29 = vadd.f32 %v6365_v4, %v1652_v30  ;;  %v9783_v41 = vsel %vm746_vm9, 1.0, %v12508_v22  ;;  %v6188_v27 = vsel %vm755_vm10, 1.0, %v12508_v22 }
 0x21a   :  { %12629 = vst [vmem:[#allocation51_spill] sm:$0xff] %v9759_v32  ;;  %vm2554_vm11 = vcmp.eq.s32.totalorder %v8250_v40, %v9759_v32  ;;  %vm2555_vm12 = vcmp.eq.s32.totalorder %v8256_v44, %v9759_v32  ;;  %vm771_vm15 = vcmp.eq.s32.totalorder %v8250_v40, %v12631_v6  ;;  %vm1002_vm14 = vcmp.eq.s32.totalorder %v9027_v54, %v12632_v5 }
 0x21b   :  { %v6532_v19 = vsel %vm2555_vm12, 1.0, %v12508_v22  ;;  %v6531_v24 = vsel %vm2554_vm11, 1.0, %v12508_v22  ;;  %vm764_vm0 = vcmp.eq.s32.totalorder %v9027_v54, %v12604_v53  ;;  %v1399_v9 = vadd.f32 %v6272_v15, %v1143_v21 }
 0x21c   :  { %v2699_v32 = vadd.f32 %v6532_v19, %v2443_v61  ;;  %v2698_v35 = vadd.f32 %v6531_v24, %v2442_v42  ;;  %v6320_v30 = vsel %vm1511_vm13, 1.0, %v12508_v22  ;;  %vm772_vm1 = vcmp.eq.s32.totalorder %v8256_v44, %v12631_v6  ;;  %v12634_v61 = vld [vmem:[#allocation73_spill] sm:$0xff] }
 0x21d   :  { %vm773_vm2 = vcmp.eq.s32.totalorder %v9027_v54, %v12631_v6  ;;  %vm766_vm3 = vcmp.eq.s32.totalorder %v8256_v44, %v9107_v16  ;;  %vm767_vm4 = vcmp.eq.s32.totalorder %v9027_v54, %v9107_v16  ;;  %v9807_v53 = vadd.f32 %v6188_v27, %v9400_v48 }
 0x21e   :  { %v9796_v34 = vpop.permute.xlu1 %727  ;;  %2966 = vmatprep.mubr.f32.mxu0 %v2699_v32  ;;  %v6204_v21 = vsel %vm771_vm15, 1.0, %v12508_v22  ;;  %v1393_v4 = vadd.f32 %v9613_v46, %v1137_v2  ;;  %vm765_vm5 = vcmp.eq.s32.totalorder %v8250_v40, %v9107_v16  ;;  %v9814_v63 = vsel %vm1002_vm14, 1.0, %v12508_v22 }
 0x21f   :  { %2967 = vmatmul.mubr.f32.gmra.mrb[18].mxu0 %v2698_v35  ;;  %v9817_v50 = vsel %vm764_vm0, 1.0, %v12508_v22  ;;  %v1655_v32 = vadd.f32 %v6320_v30, %v1399_v9  ;;  %vm490_vm6 = vcmp.eq.s32.totalorder %v9027_v54, %v12634_v61  ;;  %v6205_v48 = vsel %vm772_vm1, 1.0, %v12508_v22  ;;  %v12635_v35 = vld [vmem:[#allocation72_spill] sm:$0xff] }
 0x220   :  { %12633 = vst [vmem:[#allocation52_spill] sm:$0xff] %v9817_v50  ;;  %v6206_v42 = vsel %vm773_vm2, 1.0, %v12508_v22  ;;  %v6199_v19 = vsel %vm766_vm3, 1.0, %v12508_v22  ;;  %v6200_v46 = vsel %vm767_vm4, 1.0, %v12508_v22  ;;  %v9826_v16 = vadd.f32 %v6204_v21, %v9511_v8 }
 0x221   :  { %v6198_v2 = vsel %vm765_vm5, 1.0, %v12508_v22  ;;  %vm1022_vm7 = vcmp.eq.s32.totalorder %v8256_v44, %v9605_v14  ;;  %vm1023_vm8 = vcmp.eq.s32.totalorder %v9027_v54, %v9605_v14  ;;  %v1649_v15 = vadd.f32 %v9628_v33, %v1393_v4 }
 0x222   :  { %vm749_vm9 = vcmp.eq.s32.totalorder %v9027_v54, %v12635_v35  ;;  %v6131_v27 = vsel %vm490_vm6, 1.0, %v12508_v22  ;;  %vm1021_vm10 = vcmp.eq.s32.totalorder %v8250_v40, %v9605_v14  ;;  %v910_v8 = vadd.f32 %v6199_v19, %v9441_v51  ;;  %v12636_v51 = vld [vmem:[#allocation70_spill] sm:$0xff] }
 0x223   :  { %v9833_v24 = vpop.permute.xlu1 %1745  ;;  %v911_v6 = vadd.f32 %v6200_v46, %v9500_v39  ;;  %vm1278_vm11 = vcmp.eq.s32.totalorder %v8256_v44, %v9391_v57  ;;  %vm1279_vm12 = vcmp.eq.s32.totalorder %v9027_v54, %v9391_v57  ;;  %v909_v33 = vadd.f32 %v6198_v2, %v9436_v59  ;;  %v12637_v39 = vld [vmem:[#allocation74_spill] sm:$0xff] }
 0x224   :  { %v6247_v5 = vsel %vm1022_vm7, 1.0, %v12508_v22  ;;  %v6248_v9 = vsel %vm1023_vm8, 1.0, %v12508_v22  ;;  %vm1277_vm13 = vcmp.eq.s32.totalorder %v8250_v40, %v9391_v57  ;;  %v9853_v14 = vadd.f32 %v6205_v48, %v9516_v0 }
 0x225   :  { %vm2529_vm15 = vcmp.eq.s32.totalorder %v9027_v54, %v12636_v51  ;;  %vm1767_vm14 = vcmp.eq.s32.totalorder %v9027_v54, %v12637_v39  ;;  %v6246_v30 = vsel %vm1021_vm10, 1.0, %v12508_v22  ;;  %v6182_v59 = vsel %vm749_vm9, 1.0, %v12508_v22  ;;  %v12638_v39 = vld [vmem:[#allocation75_spill] sm:$0xff] }
 0x226   :  { %v634_v21 = vadd.f32 %v6131_v27, %v9145_v18  ;;  %v6295_v4 = vsel %vm1278_vm11, 1.0, %v12508_v22  ;;  %v6296_v61 = vsel %vm1279_vm12, 1.0, %v12508_v22  ;;  %v1905_v0 = vadd.f32 %v9680_v11, %v1649_v15 }
 0x227   :  { %v1166_v48 = vadd.f32 %v6247_v5, %v910_v8  ;;  %v1167_v19 = vadd.f32 %v6248_v9, %v911_v6  ;;  %v6294_v46 = vsel %vm1277_vm13, 1.0, %v12508_v22  ;;  %v9867_v2 = vadd.f32 %v6206_v42, %v9519_v38  ;;  %v12640_v9 = vld [vmem:[#allocation93_spill] sm:$0xff] }
 0x228   :  { %v2255_v57 = vpop.permute.xlu1 %2254  ;;  %v6368_v35 = vsel %vm1767_vm14, 1.0, %v12508_v22  ;;  %vm496_vm0 = vcmp.eq.s32.totalorder %v9027_v54, %v12638_v39  ;;  %v1165_v18 = vadd.f32 %v6246_v30, %v909_v33  ;;  %vm1790_vm1 = vcmp.eq.s32.totalorder %v8256_v44, %v9622_v49  ;;  %v12639_v33 = vld [vmem:[#allocation76_spill] sm:$0xff] }
 0x229   :  { %v1422_v27 = vadd.f32 %v6295_v4, %v1166_v48  ;;  %v1423_v1 = vadd.f32 %v6296_v61, %v1167_v19  ;;  %vm1791_vm2 = vcmp.eq.s32.totalorder %v9027_v54, %v9622_v49  ;;  %v9880_v38 = vsel %vm2529_vm15, 1.0, %v12508_v22  ;;  %v12642_v48 = vld [vmem:[#allocation80_spill] sm:$0xff] }
 0x22a   :  { %v9883_v11 = vadd.f32 %v6182_v59, %v9384_v13  ;;  %v1421_v42 = vadd.f32 %v6294_v46, %v1165_v18  ;;  %vm1789_vm3 = vcmp.eq.s32.totalorder %v8250_v40, %v9622_v49  ;;  %v9888_v15 = vadd.f32 %v9738_v12, %v1905_v0  ;;  %v12643_v46 = vld [vmem:[#allocation77_spill] sm:$0xff] }
 0x22b   :  { %v9891_v8 = vadd.f32 %v9783_v41, %v634_v21  ;;  %v9893_v6 = vadd.f32 %v6368_v35, %v1655_v32  ;;  %vm502_vm4 = vcmp.eq.s32.totalorder %v9027_v54, %v12639_v33  ;;  %v6137_v13 = vsel %vm496_vm0, 1.0, %v12508_v22 }
 0x22c   :  { %vm2046_vm5 = vcmp.eq.s32.totalorder %v8256_v44, %v12640_v9  ;;  %v6391_v49 = vsel %vm1790_vm1, 1.0, %v12508_v22  ;;  %v6392_v12 = vsel %vm1791_vm2, 1.0, %v12508_v22  ;;  %vm2047_vm6 = vcmp.eq.s32.totalorder %v9027_v54, %v12640_v9 }
 0x22d   :  { %v9897_v5 = vpop.permute.xlu1 %983  ;;  %v1678_v41 = vadd.f32 %v9748_v3, %v1422_v27  ;;  %v1679_v32 = vadd.f32 %v9769_v36, %v1423_v1  ;;  %v6390_v51 = vsel %vm1789_vm3, 1.0, %v12508_v22  ;;  %v6143_v30 = vsel %vm502_vm4, 1.0, %v12508_v22 }
 0x22e   :  { %vm508_vm7 = vcmp.eq.s32.totalorder %v9027_v54, %v12601_v25  ;;  %vm2045_vm8 = vcmp.eq.s32.totalorder %v8250_v40, %v12640_v9  ;;  %v1677_v59 = vadd.f32 %v9745_v62, %v1421_v42  ;;  %vm2302_vm9 = vcmp.eq.s32.totalorder %v8256_v44, %v2255_v57  ;;  %v12644_v42 = vld [vmem:[#allocation82_spill] sm:$0xff] }
 0x22f   :  { %v1934_v21 = vadd.f32 %v6391_v49, %v1678_v41  ;;  %v1935_v4 = vadd.f32 %v6392_v12, %v1679_v32  ;;  %vm2303_vm10 = vcmp.eq.s32.totalorder %v9027_v54, %v2255_v57  ;;  %v6439_v1 = vsel %vm2046_vm5, 1.0, %v12508_v22 }
 0x230   :  { %v6440_v3 = vsel %vm2047_vm6, 1.0, %v12508_v22  ;;  %v1933_v36 = vadd.f32 %v6390_v51, %v1677_v59  ;;  %vm2301_vm11 = vcmp.eq.s32.totalorder %v8250_v40, %v2255_v57  ;;  %v9923_v0 = vadd.f32 %v6137_v13, %v9162_v60 }
 0x231   :  { %v9926_v62 = vadd.f32 %v6143_v30, %v9170_v56  ;;  %vm512_vm12 = vcmp.eq.s32.totalorder %v8250_v40, %v12642_v48  ;;  %v6438_v19 = vsel %vm2045_vm8, 1.0, %v12508_v22  ;;  %vm2276_vm13 = vcmp.eq.s32.totalorder %v9027_v54, %v12643_v46  ;;  %v12650_v46 = vld [vmem:[#allocation34_spill] sm:$0xff] }
 0x232   :  { %v9920_v61 = vpop.permute.xlu1 %1492  ;;  %v6149_v57 = vsel %vm508_vm7, 1.0, %v12508_v22  ;;  %v6487_v35 = vsel %vm2302_vm9, 1.0, %v12508_v22  ;;  %v6488_v60 = vsel %vm2303_vm10, 1.0, %v12508_v22  ;;  %vm513_vm15 = vcmp.eq.s32.totalorder %v8256_v44, %v12642_v48 }
 0x233   :  { %12641 = vst [vmem:[#allocation71_spill] sm:$0xff] %v9926_v62  ;;  %v2191_v56 = vadd.f32 %v6440_v3, %v1935_v4  ;;  %v6486_v39 = vsel %vm2301_vm11, 1.0, %v12508_v22  ;;  %v2190_v18 = vadd.f32 %v6439_v1, %v1934_v21  ;;  %vm514_vm14 = vcmp.eq.s32.totalorder %v9027_v54, %v12642_v48  ;;  %v12646_v3 = vld [vmem:[#allocation81_spill] sm:$0xff]  ;;  %v12647_v48 = vld [vmem:[#allocation84_spill] sm:$0xff] }
 0x234   :  { %v6153_v27 = vsel %vm512_vm12, 1.0, %v12508_v22  ;;  %vm518_vm0 = vcmp.eq.s32.totalorder %v8250_v40, %v12644_v42  ;;  %v2189_v25 = vadd.f32 %v6438_v19, %v1933_v36  ;;  %vm519_vm1 = vcmp.eq.s32.totalorder %v8256_v44, %v12644_v42 }
 0x235   :  { %vm520_vm2 = vcmp.eq.s32.totalorder %v9027_v54, %v12644_v42  ;;  %v2447_v33 = vadd.f32 %v6488_v60, %v2191_v56  ;;  %v2446_v9 = vadd.f32 %v6487_v35, %v2190_v18  ;;  %vm2799_vm6 = vcmask 523264   ;;  %v12649_v18 = vld [vmem:[#allocation33_spill] sm:$0xff] }
 0x236   :  { %v2445_v49 = vadd.f32 %v6486_v39, %v2189_v25  ;;  %v6154_v51 = vsel %vm513_vm15, 1.0, %v12508_v22  ;;  %v9962_v4 = vadd.f32 %v6149_v57, %v9227_v10  ;;  %v6155_v1 = vsel %vm514_vm14, 1.0, %v12508_v22  ;;  %v12648_v39 = vld [vmem:[#allocation83_spill] sm:$0xff] }
 0x237   :  { %v2511_v13 = vpop.permute.xlu1 %2510  ;;  %vm2023_vm7 = vcmp.eq.s32.totalorder %v9027_v54, %v12646_v3  ;;  %v6159_v36 = vsel %vm518_vm0, 1.0, %v12508_v22  ;;  %v6160_v19 = vsel %vm519_vm1, 1.0, %v12508_v22  ;;  %v6161_v10 = vsel %vm520_vm2, 1.0, %v12508_v22 }
 0x238   :  { %vm2557_vm3 = vcmp.eq.s32.totalorder %v8250_v40, %v2511_v13  ;;  %vm2558_vm4 = vcmp.eq.s32.totalorder %v8256_v44, %v2511_v13  ;;  %vm2559_vm5 = vcmp.eq.s32.totalorder %v9027_v54, %v2511_v13  ;;  %12645 = vst [vmem:[#allocation55_spill] sm:$0xff] %v9962_v4  ;;  %vm521_vm8 = vcmp.eq.s32.totalorder %v8250_v40, %v12647_v48 }
 0x239   :  { %v6536_v12 = vsel %vm2559_vm5, 1.0, %v12508_v22  ;;  %v6535_v41 = vsel %vm2558_vm4, 1.0, %v12508_v22  ;;  %v6534_v32 = vsel %vm2557_vm3, 1.0, %v12508_v22  ;;  %vm522_vm9 = vcmp.eq.s32.totalorder %v8256_v44, %v12647_v48 }
 0x23a   :  { %v2702_v30 = vadd.f32 %v6535_v41, %v2446_v9  ;;  %v2703_v59 = vadd.f32 %v6536_v12, %v2447_v33  ;;  %v2701_v21 = vadd.f32 %v6534_v32, %v2445_v49  ;;  %v9993_v35 = vsel %vm2276_vm13, 1.0, %v12508_v22  ;;  %v12653_v41 = vld [vmem:[#allocation95_spill] sm:$0xff] }
 0x23b   :  { %v656_v60 = vadd.f32 %v6153_v27, %v9254_v23  ;;  %v657_v56 = vadd.f32 %v6154_v51, %v9267_v26  ;;  %vm752_vm10 = vcmp.eq.s32.totalorder %v9027_v54, %v12648_v39  ;;  %v658_v42 = vadd.f32 %v6155_v1, %v12649_v18  ;;  %v12651_v23 = vld [vmem:[#allocation36_spill] sm:$0xff]  ;;  %v12652_v27 = vld [vmem:[#allocation37_spill] sm:$0xff] }
 0x23c   :  { %v9986_v57 = vpop.permute.xlu1 %730  ;;  %2972 = vmatprep.mubr.f32.mxu0 %v2702_v30  ;;  %6562 = vmatmul.mubr.msk.f32.vlgmr.msra.gmra.mrb[0].mxu1 %vm2799_vm6, %v2703_v59  ;;  %v10005_v25 = vsel %vm2023_vm7, 1.0, %v12508_v22  ;;  %v10008_v33 = vadd.f32 %v6159_v36, %v12650_v46  ;;  %vm523_vm11 = vcmp.eq.s32.totalorder %v9027_v54, %v12647_v48  ;;  %v10013_v26 = vadd.f32 %v6160_v19, %v12651_v23  ;;  %v12654_v59 = vld [vmem:[#allocation40_spill] sm:$0xff]  ;;  %v12655_v1 = vld [vmem:[#allocation97_spill] sm:$0xff] }
 0x23d   :  { %2973 = vmatmul.mubr.f32.gmra.mrb[20].mxu0 %v2701_v21  ;;  %3139 = vmatprep.mubr.f32.mxu1 %v12508_v22  ;;  %v10016_v13 = vadd.f32 %v6161_v10, %v12652_v27  ;;  %v6162_v9 = vsel %vm521_vm8, 1.0, %v12508_v22  ;;  %v6163_v49 = vsel %vm522_vm9, 1.0, %v12508_v22  ;;  %v10027_v12 = vsel %vm752_vm10, 1.0, %v12508_v22 }
 0x23e   :  { %vm2048_vm12 = vcmp.eq.s32.totalorder %v8250_v40, %v12653_v41  ;;  %vm768_vm13 = vcmp.eq.s32.totalorder %v8250_v40, %v9344_v58  ;;  %vm769_vm15 = vcmp.eq.s32.totalorder %v8256_v44, %v9344_v58  ;;  %v10036_v32 = vsel %vm523_vm11, 1.0, %v12508_v22 }
 0x23f   :  { %vm2049_vm14 = vcmp.eq.s32.totalorder %v8256_v44, %v12653_v41  ;;  %vm2050_vm0 = vcmp.eq.s32.totalorder %v9027_v54, %v12653_v41  ;;  %vm770_vm1 = vcmp.eq.s32.totalorder %v9027_v54, %v9344_v58  ;;  %v10047_v30 = vadd.f32 %v6162_v9, %v9348_v43 }
 0x240   :  { %v10050_v21 = vadd.f32 %v6163_v49, %v12654_v59  ;;  %vm2051_vm2 = vcmp.eq.s32.totalorder %v8250_v40, %v12655_v1  ;;  %vm1025_vm3 = vcmp.eq.s32.totalorder %v8256_v44, %v9464_v7  ;;  %v10057_v3 = vsel %vm2048_vm12, 1.0, %v12508_v22 }
 0x241   :  { %v10044_v51 = vpop.permute.xlu1 %1748  ;;  %v6201_v36 = vsel %vm768_vm13, 1.0, %v12508_v22  ;;  %v6202_v58 = vsel %vm769_vm15, 1.0, %v12508_v22  ;;  %vm1026_vm4 = vcmp.eq.s32.totalorder %v9027_v54, %v9464_v7  ;;  %v10064_v43 = vsel %vm2049_vm14, 1.0, %v12508_v22 }
 0x242   :  { %v10067_v19 = vsel %vm2050_vm0, 1.0, %v12508_v22  ;;  %v6203_v10 = vsel %vm770_vm1, 1.0, %v12508_v22  ;;  %vm1024_vm5 = vcmp.eq.s32.totalorder %v8250_v40, %v9464_v7  ;;  %vm2052_vm7 = vcmp.eq.s32.totalorder %v8256_v44, %v12655_v1 }
 0x243   :  { %v10075_v48 = vsel %vm2051_vm2, 1.0, %v12508_v22  ;;  %v6250_v39 = vsel %vm1025_vm3, 1.0, %v12508_v22  ;;  %vm1281_vm8 = vcmp.eq.s32.totalorder %v8256_v44, %v9581_v28  ;;  %vm1282_vm9 = vcmp.eq.s32.totalorder %v9027_v54, %v9581_v28 }
 0x244   :  { %vm2053_vm10 = vcmp.eq.s32.totalorder %v9027_v54, %v12655_v1  ;;  %v912_v18 = vadd.f32 %v6201_v36, %v656_v60  ;;  %v913_v46 = vadd.f32 %v6202_v58, %v657_v56  ;;  %v6251_v7 = vsel %vm1026_vm4, 1.0, %v12508_v22 }
 0x245   :  { %vm1280_vm11 = vcmp.eq.s32.totalorder %v8250_v40, %v9581_v28  ;;  %v914_v27 = vadd.f32 %v6203_v10, %v658_v42  ;;  %v6249_v9 = vsel %vm1024_vm5, 1.0, %v12508_v22  ;;  %vm1537_vm12 = vcmp.eq.s32.totalorder %v8256_v44, %v9718_v17 }
 0x246   :  { %v2258_v23 = vpop.permute.xlu1 %2257  ;;  %vm1538_vm13 = vcmp.eq.s32.totalorder %v9027_v54, %v9718_v17  ;;  %v1169_v49 = vadd.f32 %v6250_v39, %v913_v46  ;;  %v6298_v41 = vsel %vm1281_vm8, 1.0, %v12508_v22  ;;  %v6299_v60 = vsel %vm1282_vm9, 1.0, %v12508_v22  ;;  %v12656_v46 = vld [vmem:[#allocation115_spill] sm:$0xff] }
 0x247   :  { %vm1536_vm15 = vcmp.eq.s32.totalorder %v8250_v40, %v9718_v17  ;;  %v1170_v56 = vadd.f32 %v6251_v7, %v914_v27  ;;  %v6297_v28 = vsel %vm1280_vm11, 1.0, %v12508_v22  ;;  %vm1793_vm14 = vcmp.eq.s32.totalorder %v8256_v44, %v9833_v24 }
 0x248   :  { %vm1794_vm0 = vcmp.eq.s32.totalorder %v9027_v54, %v9833_v24  ;;  %v1168_v42 = vadd.f32 %v6249_v9, %v912_v18  ;;  %v6346_v59 = vsel %vm1537_vm12, 1.0, %v12508_v22  ;;  %v6347_v36 = vsel %vm1538_vm13, 1.0, %v12508_v22 }
 0x249   :  { %vm1792_vm1 = vcmp.eq.s32.totalorder %v8250_v40, %v9833_v24  ;;  %v1425_v58 = vadd.f32 %v6298_v41, %v1169_v49  ;;  %v1426_v10 = vadd.f32 %v6299_v60, %v1170_v56  ;;  %vm1027_vm2 = vcmp.eq.s32.totalorder %v8250_v40, %v9670_v31 }
 0x24a   :  { %v6345_v17 = vsel %vm1536_vm15, 1.0, %v12508_v22  ;;  %vm1283_vm3 = vcmp.eq.s32.totalorder %v8250_v40, %v12656_v46  ;;  %v1424_v18 = vadd.f32 %v6297_v28, %v1168_v42  ;;  %v6394_v7 = vsel %vm1793_vm14, 1.0, %v12508_v22 }
 0x24b   :  { %v10108_v39 = vpop.permute.xlu1 %986  ;;  %v6395_v27 = vsel %vm1794_vm0, 1.0, %v12508_v22  ;;  %vm1284_vm4 = vcmp.eq.s32.totalorder %v8256_v44, %v12656_v46  ;;  %v1681_v24 = vadd.f32 %v6346_v59, %v1425_v58  ;;  %v1682_v9 = vadd.f32 %v6347_v36, %v1426_v10  ;;  %v10135_v36 = vpop.permute.xlu0 %2263 }
 0x24c   :  { %v6393_v49 = vsel %vm1792_vm1, 1.0, %v12508_v22  ;;  %vm1028_vm5 = vcmp.eq.s32.totalorder %v8256_v44, %v9670_v31  ;;  %vm1029_vm8 = vcmp.eq.s32.totalorder %v9027_v54, %v9670_v31  ;;  %v6252_v41 = vsel %vm1027_vm2, 1.0, %v12508_v22 }
 0x24d   :  { %v1680_v60 = vadd.f32 %v6345_v17, %v1424_v18  ;;  %v1937_v56 = vadd.f32 %v6394_v7, %v1681_v24  ;;  %v1938_v28 = vadd.f32 %v6395_v27, %v1682_v9  ;;  %vm2305_vm9 = vcmp.eq.s32.totalorder %v8256_v44, %v2258_v23 }
 0x24e   :  { %vm2306_vm11 = vcmp.eq.s32.totalorder %v9027_v54, %v2258_v23  ;;  %v10128_v42 = vsel %vm2052_vm7, 1.0, %v12508_v22  ;;  %vm1285_vm12 = vcmp.eq.s32.totalorder %v9027_v54, %v12656_v46  ;;  %vm2304_vm13 = vcmp.eq.s32.totalorder %v8250_v40, %v2258_v23 }
 0x24f   :  { %v1936_v59 = vadd.f32 %v6393_v49, %v1680_v60  ;;  %v10141_v58 = vsel %vm2053_vm10, 1.0, %v12508_v22  ;;  %v6253_v10 = vsel %vm1028_vm5, 1.0, %v12508_v22  ;;  %v6254_v17 = vsel %vm1029_vm8, 1.0, %v12508_v22 }
 0x250   :  { %v10133_v31 = vpop.permute.xlu1 %1495  ;;  %v1171_v18 = vadd.f32 %v6252_v41, %v9826_v16  ;;  %v6300_v23 = vsel %vm1283_vm3, 1.0, %v12508_v22  ;;  %v6301_v7 = vsel %vm1284_vm4, 1.0, %v12508_v22  ;;  %v6490_v1 = vsel %vm2305_vm9, 1.0, %v12508_v22  ;;  %v12657_v41 = vld [vmem:[#allocation118_spill] sm:$0xff] }
 0x251   :  { %v6491_v27 = vsel %vm2306_vm11, 1.0, %v12508_v22  ;;  %v6302_v24 = vsel %vm1285_vm12, 1.0, %v12508_v22  ;;  %v2194_v9 = vadd.f32 %v10067_v19, %v1938_v28  ;;  %v6489_v16 = vsel %vm2304_vm13, 1.0, %v12508_v22 }
 0x252   :  { %v2193_v49 = vadd.f32 %v10064_v43, %v1937_v56  ;;  %vm1286_vm7 = vcmp.eq.s32.totalorder %v8250_v40, %v12657_v41  ;;  %v1172_v60 = vadd.f32 %v6253_v10, %v9853_v14  ;;  %v1173_v46 = vadd.f32 %v6254_v17, %v9867_v2  ;;  %v2517_v2 = vpop.permute.xlu0 %2516 }
 0x253   :  { %v2192_v55 = vadd.f32 %v10057_v3, %v1936_v59  ;;  %v1427_v50 = vadd.f32 %v6300_v23, %v1171_v18  ;;  %vm1539_vm10 = vcmp.eq.s32.totalorder %v8250_v40, %v9920_v61  ;;  %v2450_v4 = vadd.f32 %v6491_v27, %v2194_v9 }
 0x254   :  { %v2449_v19 = vadd.f32 %v6490_v1, %v2193_v49  ;;  %vm1287_vm15 = vcmp.eq.s32.totalorder %v8256_v44, %v12657_v41  ;;  %vm1288_vm14 = vcmp.eq.s32.totalorder %v9027_v54, %v12657_v41  ;;  %vm1540_vm3 = vcmp.eq.s32.totalorder %v8256_v44, %v9920_v61 }
 0x255   :  { %v2514_v62 = vpop.permute.xlu1 %2513  ;;  %v2448_v14 = vadd.f32 %v6489_v16, %v2192_v55  ;;  %vm1541_vm4 = vcmp.eq.s32.totalorder %v9027_v54, %v9920_v61  ;;  %vm774_vm5 = vcmp.eq.s32.totalorder %v8250_v40, %v9796_v34  ;;  %v1428_v55 = vadd.f32 %v6301_v7, %v1172_v60 }
 0x256   :  { %vm2560_vm0 = vcmp.eq.s32.totalorder %v8250_v40, %v2514_v62  ;;  %vm2561_vm1 = vcmp.eq.s32.totalorder %v8256_v44, %v2514_v62  ;;  %vm2562_vm2 = vcmp.eq.s32.totalorder %v9027_v54, %v2514_v62  ;;  %v1429_v62 = vadd.f32 %v6302_v24, %v1173_v46 }
 0x257   :  { %v6539_v3 = vsel %vm2562_vm2, 1.0, %v12508_v22  ;;  %v6538_v43 = vsel %vm2561_vm1, 1.0, %v12508_v22  ;;  %v6537_v56 = vsel %vm2560_vm0, 1.0, %v12508_v22  ;;  %vm2563_vm8 = vcmp.eq.s32.totalorder %v8250_v40, %v2517_v2 }
 0x258   :  { %v2705_v28 = vadd.f32 %v6538_v43, %v2449_v19  ;;  %v2706_v59 = vadd.f32 %v6539_v3, %v2450_v4  ;;  %v2704_v10 = vadd.f32 %v6537_v56, %v2448_v14  ;;  %v10188_v17 = vsel %vm1286_vm7, 1.0, %v12508_v22 }
 0x259   :  { %vm1795_vm9 = vcmp.eq.s32.totalorder %v8250_v40, %v10044_v51  ;;  %vm1796_vm11 = vcmp.eq.s32.totalorder %v8256_v44, %v10044_v51  ;;  %vm1797_vm12 = vcmp.eq.s32.totalorder %v9027_v54, %v10044_v51  ;;  %vm775_vm13 = vcmp.eq.s32.totalorder %v8256_v44, %v9796_v34 }
 0x25a   :  { %v10196_v4 = vpop.permute.xlu1 %733  ;;  %2978 = vmatprep.mubr.f32.mxu0 %v2705_v28  ;;  %6563 = vmatmul.mubr.msk.f32.gmra.mrb[2].mxu1 %vm2799_vm6, %v2706_v59  ;;  %v6348_v18 = vsel %vm1539_vm10, 1.0, %v12508_v22  ;;  %v6349_v23 = vsel %vm1540_vm3, 1.0, %v12508_v22  ;;  %v6350_v7 = vsel %vm1541_vm4, 1.0, %v12508_v22  ;;  %vm776_vm7 = vcmp.eq.s32.totalorder %v9027_v54, %v9796_v34 }
 0x25b   :  { %2979 = vmatmul.mubr.f32.gmra.mrb[22].mxu0 %v2704_v10  ;;  %3145 = vmatprep.mubr.f32.mxu1 %v12508_v22  ;;  %v6207_v1 = vsel %vm774_vm5, 1.0, %v12508_v22  ;;  %vm1030_vm10 = vcmp.eq.s32.totalorder %v8250_v40, %v9897_v5  ;;  %vm2564_vm0 = vcmp.eq.s32.totalorder %v8256_v44, %v2517_v2  ;;  %vm1031_vm1 = vcmp.eq.s32.totalorder %v8256_v44, %v9897_v5  ;;  %v12658_v10 = vld [vmem:[#allocation85_spill] sm:$0xff] }
 0x25c   :  { %v6396_v61 = vsel %vm1795_vm9, 1.0, %v12508_v22  ;;  %v6397_v27 = vsel %vm1796_vm11, 1.0, %v12508_v22  ;;  %v6398_v34 = vsel %vm1797_vm12, 1.0, %v12508_v22  ;;  %v6208_v24 = vsel %vm775_vm13, 1.0, %v12508_v22 }
 0x25d   :  { %v1683_v9 = vadd.f32 %v6348_v18, %v1427_v50  ;;  %v1684_v16 = vadd.f32 %v6349_v23, %v1428_v55  ;;  %v1685_v49 = vadd.f32 %v6350_v7, %v1429_v62  ;;  %v6209_v60 = vsel %vm776_vm7, 1.0, %v12508_v22 }
 0x25e   :  { %vm1032_vm2 = vcmp.eq.s32.totalorder %v9027_v54, %v9897_v5  ;;  %v6255_v46 = vsel %vm1030_vm10, 1.0, %v12508_v22  ;;  %vm2565_vm3 = vcmp.eq.s32.totalorder %v9027_v54, %v2517_v2  ;;  %v6256_v14 = vsel %vm1031_vm1, 1.0, %v12508_v22 }
 0x25f   :  { %v1752_v19 = vpop.permute.xlu1 %1751  ;;  %v1939_v3 = vadd.f32 %v6396_v61, %v1683_v9  ;;  %v1940_v51 = vadd.f32 %v6397_v27, %v1684_v16  ;;  %v1941_v43 = vadd.f32 %v6398_v34, %v1685_v49  ;;  %v6304_v50 = vsel %vm1287_vm15, 1.0, %v12508_v22 }
 0x260   :  { %v6305_v56 = vsel %vm1288_vm14, 1.0, %v12508_v22  ;;  %v918_v28 = vadd.f32 %v6207_v1, %v10008_v33  ;;  %v919_v59 = vadd.f32 %v6208_v24, %v10013_v26  ;;  %vm524_vm4 = vcmp.eq.s32.totalorder %v8250_v40, %v12658_v10 }
 0x261   :  { %vm2310_vm5 = vcmp.eq.s32.totalorder %v8250_v40, %v10135_v36  ;;  %v6542_v55 = vsel %vm2565_vm3, 1.0, %v12508_v22  ;;  %v6541_v62 = vsel %vm2564_vm0, 1.0, %v12508_v22  ;;  %v6540_v41 = vsel %vm2563_vm8, 1.0, %v12508_v22 }
 0x262   :  { %v920_v33 = vadd.f32 %v6209_v60, %v10016_v13  ;;  %v6257_v26 = vsel %vm1032_vm2, 1.0, %v12508_v22  ;;  %v1174_v18 = vadd.f32 %v6255_v46, %v918_v28  ;;  %v1175_v23 = vadd.f32 %v6256_v14, %v919_v59  ;;  %v2520_v59 = vpop.permute.xlu0 %2519 }
 0x263   :  { %vm1542_vm15 = vcmp.eq.s32.totalorder %v8250_v40, %v10133_v31  ;;  %v2197_v1 = vadd.f32 %v10141_v58, %v1941_v43  ;;  %v2196_v61 = vadd.f32 %v10128_v42, %v1940_v51  ;;  %v2195_v2 = vadd.f32 %v10075_v48, %v1939_v3 }
 0x264   :  { %v2261_v7 = vpop.permute.xlu1 %2260  ;;  %vm1543_vm14 = vcmp.eq.s32.totalorder %v8256_v44, %v10133_v31  ;;  %v1176_v5 = vadd.f32 %v6257_v26, %v920_v33  ;;  %vm525_vm12 = vcmp.eq.s32.totalorder %v8256_v44, %v12658_v10  ;;  %vm1544_vm13 = vcmp.eq.s32.totalorder %v9027_v54, %v10133_v31 }
 0x265   :  { %vm2307_vm8 = vcmp.eq.s32.totalorder %v8250_v40, %v2261_v7  ;;  %vm2308_vm9 = vcmp.eq.s32.totalorder %v8256_v44, %v2261_v7  ;;  %vm2309_vm11 = vcmp.eq.s32.totalorder %v9027_v54, %v2261_v7  ;;  %v6351_v24 = vsel %vm1542_vm15, 1.0, %v12508_v22 }
 0x266   :  { %v6492_v13 = vsel %vm2307_vm8, 1.0, %v12508_v22  ;;  %v6493_v27 = vsel %vm2308_vm9, 1.0, %v12508_v22  ;;  %v6494_v58 = vsel %vm2309_vm11, 1.0, %v12508_v22  ;;  %v6352_v9 = vsel %vm1543_vm14, 1.0, %v12508_v22 }
 0x267   :  { %v2453_v48 = vadd.f32 %v6494_v58, %v2197_v1  ;;  %v2452_v42 = vadd.f32 %v6493_v27, %v2196_v61  ;;  %v2451_v34 = vadd.f32 %v6492_v13, %v2195_v2  ;;  %vm1798_vm7 = vcmp.eq.s32.totalorder %v8250_v40, %v1752_v19 }
 0x268   :  { %vm1799_vm10 = vcmp.eq.s32.totalorder %v8256_v44, %v1752_v19  ;;  %vm1800_vm0 = vcmp.eq.s32.totalorder %v9027_v54, %v1752_v19  ;;  %v1430_v14 = vadd.f32 %v10188_v17, %v1174_v18  ;;  %v1431_v3 = vadd.f32 %v6304_v50, %v1175_v23 }
 0x269   :  { %v10295_v16 = vpop.permute.xlu1 %1498  ;;  %v2708_v49 = vadd.f32 %v6541_v62, %v2452_v42  ;;  %v2709_v60 = vadd.f32 %v6542_v55, %v2453_v48  ;;  %v2707_v46 = vadd.f32 %v6540_v41, %v2451_v34  ;;  %v6353_v51 = vsel %vm1544_vm13, 1.0, %v12508_v22  ;;  %v12659_v48 = vld [vmem:[#allocation87_spill] sm:$0xff] }
 0x26a   :  { %vm2311_vm1 = vcmp.eq.s32.totalorder %v8256_v44, %v10135_v36  ;;  %v1432_v31 = vadd.f32 %v6305_v56, %v1176_v5  ;;  %v6399_v43 = vsel %vm1798_vm7, 1.0, %v12508_v22  ;;  %v6400_v28 = vsel %vm1799_vm10, 1.0, %v12508_v22 }
 0x26b   :  { %vm2312_vm2 = vcmp.eq.s32.totalorder %v9027_v54, %v10135_v36  ;;  %2984 = vmatprep.mubr.f32.mxu0 %v2708_v49  ;;  %6564 = vmatmul.mubr.msk.f32.gmra.mrb[4].mxu1 %vm2799_vm6, %v2709_v60  ;;  %vm526_vm3 = vcmp.eq.s32.totalorder %v9027_v54, %v12658_v10  ;;  %v1686_v17 = vadd.f32 %v6351_v24, %v1430_v14  ;;  %v6401_v56 = vsel %vm1800_vm0, 1.0, %v12508_v22 }
 0x26c   :  { %v1687_v50 = vadd.f32 %v6352_v9, %v1431_v3  ;;  %2985 = vmatmul.mubr.f32.gmra.mrb[24].mxu0 %v2707_v46  ;;  %3151 = vmatprep.mubr.f32.mxu1 %v12508_v22  ;;  %v6165_v55 = vsel %vm524_vm4, 1.0, %v12508_v22  ;;  %v1688_v62 = vadd.f32 %v6353_v51, %v1432_v31  ;;  %v6495_v41 = vsel %vm2310_vm5, 1.0, %v12508_v22  ;;  %v12660_v46 = vld [vmem:[#allocation42_spill] sm:$0xff]  ;;  %v12662_v31 = vld [vmem:[#allocation39_spill] sm:$0xff] }
 0x26d   :  { %v6496_v19 = vsel %vm2311_vm1, 1.0, %v12508_v22  ;;  %v1942_v33 = vadd.f32 %v6399_v43, %v1686_v17  ;;  %v6497_v18 = vsel %vm2312_vm2, 1.0, %v12508_v22  ;;  %vm2567_vm4 = vcmp.eq.s32.totalorder %v8256_v44, %v2520_v59  ;;  %v12661_v3 = vld [vmem:[#allocation38_spill] sm:$0xff] }
 0x26e   :  { %v1943_v26 = vadd.f32 %v6400_v28, %v1687_v50  ;;  %v2008_v23 = vpop.permute.xlu1 %2007  ;;  %v1944_v7 = vadd.f32 %v6401_v56, %v1688_v62  ;;  %vm2568_vm8 = vcmp.eq.s32.totalorder %v9027_v54, %v2520_v59  ;;  %vm2566_vm9 = vcmp.eq.s32.totalorder %v8250_v40, %v2520_v59  ;;  %v12663_v28 = vld [vmem:[#allocation41_spill] sm:$0xff]  ;;  %v12664_v56 = vld [vmem:[#allocation120_spill] sm:$0xff] }
 0x26f   :  { %vm2054_vm15 = vcmp.eq.s32.totalorder %v8250_v40, %v2008_v23  ;;  %vm2055_vm5 = vcmp.eq.s32.totalorder %v8256_v44, %v2008_v23  ;;  %vm2056_vm14 = vcmp.eq.s32.totalorder %v9027_v54, %v2008_v23  ;;  %v6166_v27 = vsel %vm525_vm12, 1.0, %v12508_v22 }
 0x270   :  { %v6447_v1 = vsel %vm2054_vm15, 1.0, %v12508_v22  ;;  %v6448_v61 = vsel %vm2055_vm5, 1.0, %v12508_v22  ;;  %v6449_v2 = vsel %vm2056_vm14, 1.0, %v12508_v22  ;;  %v6167_v58 = vsel %vm526_vm3, 1.0, %v12508_v22 }
 0x271   :  { %v2198_v36 = vadd.f32 %v6447_v1, %v1942_v33  ;;  %v2199_v5 = vadd.f32 %v6448_v61, %v1943_v26  ;;  %v2200_v13 = vadd.f32 %v6449_v2, %v1944_v7  ;;  %vm2020_vm11 = vcmp.eq.s32.totalorder %v9027_v54, %v12659_v48  ;;  %v10403_v7 = vpop.permute.xlu0 %2013 }
 0x272   :  { %v6544_v42 = vsel %vm2567_vm4, 1.0, %v12508_v22  ;;  %v6545_v34 = vsel %vm2568_vm8, 1.0, %v12508_v22  ;;  %v667_v14 = vadd.f32 %v10036_v32, %v12660_v46  ;;  %v668_v10 = vadd.f32 %v6165_v55, %v12661_v3 }
 0x273   :  { %v10351_v24 = vpop.permute.xlu1 %1245  ;;  %v2455_v9 = vadd.f32 %v6496_v19, %v2199_v5  ;;  %v2456_v49 = vadd.f32 %v6497_v18, %v2200_v13  ;;  %v2454_v60 = vadd.f32 %v6495_v41, %v2198_v36  ;;  %vm777_vm12 = vcmp.eq.s32.totalorder %v8250_v40, %v9986_v57 }
 0x274   :  { %v6543_v51 = vsel %vm2566_vm9, 1.0, %v12508_v22  ;;  %v669_v43 = vadd.f32 %v6166_v27, %v12662_v31  ;;  %v670_v59 = vadd.f32 %v6167_v58, %v12663_v28  ;;  %vm778_vm13 = vcmp.eq.s32.totalorder %v8256_v44, %v9986_v57 }
 0x275   :  { %v2711_v17 = vadd.f32 %v6544_v42, %v2455_v9  ;;  %v10364_v50 = vsel %vm2020_vm11, 1.0, %v12508_v22  ;;  %vm1289_vm7 = vcmp.eq.s32.totalorder %v8250_v40, %v12664_v56  ;;  %vm779_vm10 = vcmp.eq.s32.totalorder %v9027_v54, %v9986_v57 }
 0x276   :  { %v2712_v32 = vadd.f32 %v6545_v34, %v2456_v49  ;;  %v6210_v55 = vsel %vm777_vm12, 1.0, %v12508_v22  ;;  %vm1033_vm0 = vcmp.eq.s32.totalorder %v8250_v40, %v10108_v39  ;;  %vm1034_vm1 = vcmp.eq.s32.totalorder %v8256_v44, %v10108_v39 }
 0x277   :  { %2990 = vmatprep.mubr.f32.mxu0 %v2711_v17  ;;  %v2710_v62 = vadd.f32 %v6543_v51, %v2454_v60  ;;  %vm1290_vm2 = vcmp.eq.s32.totalorder %v8256_v44, %v12664_v56  ;;  %v6211_v41 = vsel %vm778_vm13, 1.0, %v12508_v22  ;;  %vm1035_vm3 = vcmp.eq.s32.totalorder %v9027_v54, %v10108_v39 }
 0x278   :  { %vm780_vm4 = vcmp.eq.s32.totalorder %v8250_v40, %v10196_v4  ;;  %6565 = vmatmul.mubr.msk.f32.gmra.mrb[6].mxu1 %vm2799_vm6, %v2712_v32  ;;  %v10383_v57 = vpop.permute.xlu1 %1754  ;;  %vm1291_vm15 = vcmp.eq.s32.totalorder %v9027_v54, %v12664_v56  ;;  %v6306_v19 = vsel %vm1289_vm7, 1.0, %v12508_v22  ;;  %v6212_v33 = vsel %vm779_vm10, 1.0, %v12508_v22 }
 0x279   :  { %vm781_vm5 = vcmp.eq.s32.totalorder %v8256_v44, %v10196_v4  ;;  %2991 = vmatmul.mubr.f32.gmra.mrb[26].mxu0 %v2710_v62  ;;  %3157 = vmatprep.mubr.f32.mxu1 %v12508_v22  ;;  %vm1036_vm14 = vcmp.eq.s32.totalorder %v8250_v40, %v9644_v20  ;;  %v921_v26 = vadd.f32 %v6210_v55, %v10047_v30  ;;  %v6258_v18 = vsel %vm1033_vm0, 1.0, %v12508_v22 }
 0x27a   :  { %v6259_v23 = vsel %vm1034_vm1, 1.0, %v12508_v22  ;;  %v922_v1 = vadd.f32 %v6211_v41, %v10050_v21  ;;  %v6260_v61 = vsel %vm1035_vm3, 1.0, %v12508_v22  ;;  %vm782_vm8 = vcmp.eq.s32.totalorder %v9027_v54, %v10196_v4 }
 0x27b   :  { %v6213_v30 = vsel %vm780_vm4, 1.0, %v12508_v22  ;;  %vm1037_vm9 = vcmp.eq.s32.totalorder %v8256_v44, %v9644_v20  ;;  %vm1038_vm11 = vcmp.eq.s32.totalorder %v9027_v54, %v9644_v20  ;;  %v923_v21 = vadd.f32 %v6212_v33, %v667_v14 }
 0x27c   :  { %v6214_v2 = vsel %vm781_vm5, 1.0, %v12508_v22  ;;  %v6307_v39 = vsel %vm1290_vm2, 1.0, %v12508_v22  ;;  %v1177_v36 = vadd.f32 %v6258_v18, %v921_v26  ;;  %v1178_v5 = vadd.f32 %v6259_v23, %v922_v1 }
 0x27d   :  { %v1502_v13 = vpop.permute.xlu1 %1501  ;;  %vm2060_vm12 = vcmp.eq.s32.totalorder %v8250_v40, %v10403_v7  ;;  %v6308_v4 = vsel %vm1291_vm15, 1.0, %v12508_v22  ;;  %v1179_v27 = vadd.f32 %v6260_v61, %v923_v21  ;;  %v6215_v58 = vsel %vm782_vm8, 1.0, %v12508_v22 }
 0x27e   :  { %v924_v48 = vadd.f32 %v6213_v30, %v668_v10  ;;  %v6261_v42 = vsel %vm1036_vm14, 1.0, %v12508_v22  ;;  %v6262_v34 = vsel %vm1037_vm9, 1.0, %v12508_v22  ;;  %v6263_v9 = vsel %vm1038_vm11, 1.0, %v12508_v22  ;;  %v12665_v30 = vld [vmem:[#allocation99_spill] sm:$0xff] }
 0x27f   :  { %v925_v49 = vadd.f32 %v6214_v2, %v669_v43  ;;  %vm1545_vm13 = vcmp.eq.s32.totalorder %v8250_v40, %v10295_v16  ;;  %vm1546_vm7 = vcmp.eq.s32.totalorder %v8256_v44, %v10295_v16  ;;  %vm1547_vm10 = vcmp.eq.s32.totalorder %v9027_v54, %v10295_v16 }
 0x280   :  { %v10445_v60 = vsel %vm2060_vm12, 1.0, %v12508_v22  ;;  %v926_v46 = vadd.f32 %v6215_v58, %v670_v59  ;;  %v1433_v20 = vadd.f32 %v6306_v19, %v1177_v36  ;;  %v1434_v14 = vadd.f32 %v6307_v39, %v1178_v5 }
 0x281   :  { %vm1292_vm0 = vcmp.eq.s32.totalorder %v8250_v40, %v10351_v24  ;;  %v1435_v3 = vadd.f32 %v6308_v4, %v1179_v27  ;;  %v1180_v10 = vadd.f32 %v6261_v42, %v924_v48  ;;  %vm1293_vm1 = vcmp.eq.s32.totalorder %v8256_v44, %v10351_v24 }
 0x282   :  { %vm1294_vm2 = vcmp.eq.s32.totalorder %v9027_v54, %v10351_v24  ;;  %v2011_v51 = vpop.permute.xlu1 %2010  ;;  %v6354_v16 = vsel %vm1545_vm13, 1.0, %v12508_v22  ;;  %v6355_v31 = vsel %vm1546_vm7, 1.0, %v12508_v22  ;;  %v6356_v43 = vsel %vm1547_vm10, 1.0, %v12508_v22 }
 0x283   :  { %v1181_v28 = vadd.f32 %v6262_v34, %v925_v49  ;;  %v6309_v59 = vsel %vm1292_vm0, 1.0, %v12508_v22  ;;  %vm1801_vm3 = vcmp.eq.s32.totalorder %v8250_v40, %v10383_v57  ;;  %vm1802_vm4 = vcmp.eq.s32.totalorder %v8256_v44, %v10383_v57 }
 0x284   :  { %vm1803_vm15 = vcmp.eq.s32.totalorder %v9027_v54, %v10383_v57  ;;  %v1182_v24 = vadd.f32 %v6263_v9, %v926_v46  ;;  %v6310_v17 = vsel %vm1293_vm1, 1.0, %v12508_v22  ;;  %v6311_v56 = vsel %vm1294_vm2, 1.0, %v12508_v22 }
 0x285   :  { %vm1548_vm5 = vcmp.eq.s32.totalorder %v8250_v40, %v1502_v13  ;;  %vm2061_vm14 = vcmp.eq.s32.totalorder %v8256_v44, %v10403_v7  ;;  %vm2062_vm8 = vcmp.eq.s32.totalorder %v9027_v54, %v10403_v7  ;;  %v1689_v32 = vadd.f32 %v6354_v16, %v1433_v20  ;;  %v12666_v20 = vld [vmem:[#allocation86_spill] sm:$0xff] }
 0x286   :  { %v1690_v55 = vadd.f32 %v6355_v31, %v1434_v14  ;;  %v1691_v62 = vadd.f32 %v6356_v43, %v1435_v3  ;;  %vm1549_vm9 = vcmp.eq.s32.totalorder %v8256_v44, %v1502_v13  ;;  %v1436_v41 = vadd.f32 %v6309_v59, %v1180_v10  ;;  %v2526_v59 = vpop.permute.xlu0 %2525 }
 0x287   :  { %v6402_v57 = vsel %vm1801_vm3, 1.0, %v12508_v22  ;;  %v6403_v19 = vsel %vm1802_vm4, 1.0, %v12508_v22  ;;  %v6404_v33 = vsel %vm1803_vm15, 1.0, %v12508_v22  ;;  %v1758_v26 = vpop.permute.xlu1 %1757  ;;  %v1437_v18 = vadd.f32 %v6310_v17, %v1181_v28 }
 0x288   :  { %v1438_v23 = vadd.f32 %v6311_v56, %v1182_v24  ;;  %vm1550_vm11 = vcmp.eq.s32.totalorder %v9027_v54, %v1502_v13  ;;  %v6357_v1 = vsel %vm1548_vm5, 1.0, %v12508_v22  ;;  %v6358_v61 = vsel %vm1549_vm9, 1.0, %v12508_v22 }
 0x289   :  { %vm2057_vm12 = vcmp.eq.s32.totalorder %v8250_v40, %v2011_v51  ;;  %vm2058_vm13 = vcmp.eq.s32.totalorder %v8256_v44, %v2011_v51  ;;  %vm2059_vm7 = vcmp.eq.s32.totalorder %v9027_v54, %v2011_v51  ;;  %vm1258_vm10 = vcmp.eq.s32.totalorder %v9027_v54, %v12665_v30 }
 0x28a   :  { %v1945_v21 = vadd.f32 %v6402_v57, %v1689_v32  ;;  %v1946_v2 = vadd.f32 %v6403_v19, %v1690_v55  ;;  %v1947_v39 = vadd.f32 %v6404_v33, %v1691_v62  ;;  %vm1804_vm0 = vcmp.eq.s32.totalorder %v8250_v40, %v1758_v26  ;;  %v12667_v62 = vld [vmem:[#allocation79_spill] sm:$0xff] }
 0x28b   :  { %v6359_v36 = vsel %vm1550_vm11, 1.0, %v12508_v22  ;;  %v1692_v5 = vadd.f32 %v6357_v1, %v1436_v41  ;;  %vm1805_vm1 = vcmp.eq.s32.totalorder %v8256_v44, %v1758_v26  ;;  %vm1806_vm2 = vcmp.eq.s32.totalorder %v9027_v54, %v1758_v26 }
 0x28c   :  { %v1693_v13 = vadd.f32 %v6358_v61, %v1437_v18  ;;  %v6450_v4 = vsel %vm2057_vm12, 1.0, %v12508_v22  ;;  %v6451_v27 = vsel %vm2058_vm13, 1.0, %v12508_v22  ;;  %v6452_v58 = vsel %vm2059_vm7, 1.0, %v12508_v22  ;;  %v2267_v48 = vpop.permute.xlu1 %2266 }
 0x28d   :  { %v6405_v42 = vsel %vm1804_vm0, 1.0, %v12508_v22  ;;  %vm2313_vm3 = vcmp.eq.s32.totalorder %v8250_v40, %v2267_v48  ;;  %vm2314_vm4 = vcmp.eq.s32.totalorder %v8256_v44, %v2267_v48  ;;  %vm2315_vm15 = vcmp.eq.s32.totalorder %v9027_v54, %v2267_v48 }
 0x28e   :  { %v6406_v34 = vsel %vm1805_vm1, 1.0, %v12508_v22  ;;  %v6407_v9 = vsel %vm1806_vm2, 1.0, %v12508_v22  ;;  %v6499_v49 = vsel %vm2314_vm4, 1.0, %v12508_v22  ;;  %v6500_v46 = vsel %vm2315_vm15, 1.0, %v12508_v22 }
 0x28f   :  { %vm1261_vm5 = vcmp.eq.s32.totalorder %v9027_v54, %v12666_v20  ;;  %v1694_v14 = vadd.f32 %v6359_v36, %v1438_v23  ;;  %v2202_v3 = vadd.f32 %v6451_v27, %v1946_v2  ;;  %v2203_v10 = vadd.f32 %v6452_v58, %v1947_v39  ;;  %v12668_v23 = vld [vmem:[#allocation88_spill] sm:$0xff] }
 0x290   :  { %v6498_v51 = vsel %vm2313_vm3, 1.0, %v12508_v22  ;;  %v2201_v16 = vadd.f32 %v6450_v4, %v1945_v21  ;;  %v1948_v31 = vadd.f32 %v6405_v42, %v1692_v5  ;;  %v6454_v43 = vsel %vm2061_vm14, 1.0, %v12508_v22  ;;  %v12669_v4 = vld [vmem:[#allocation90_spill] sm:$0xff]  ;;  %v12670_v42 = vld [vmem:[#allocation43_spill] sm:$0xff] }
 0x291   :  { %v6455_v28 = vsel %vm2062_vm8, 1.0, %v12508_v22  ;;  %v1949_v24 = vadd.f32 %v6406_v34, %v1693_v13  ;;  %v1950_v17 = vadd.f32 %v6407_v9, %v1694_v14  ;;  %v2459_v56 = vadd.f32 %v6500_v46, %v2203_v10  ;;  %v2523_v32 = vpop.permute.xlu1 %2522 }
 0x292   :  { %v2458_v55 = vadd.f32 %v6499_v49, %v2202_v3  ;;  %vm1514_vm9 = vcmp.eq.s32.totalorder %v9027_v54, %v12667_v62  ;;  %vm2569_vm11 = vcmp.eq.s32.totalorder %v8250_v40, %v2523_v32  ;;  %vm2570_vm12 = vcmp.eq.s32.totalorder %v8256_v44, %v2523_v32 }
 0x293   :  { %vm2571_vm14 = vcmp.eq.s32.totalorder %v9027_v54, %v2523_v32  ;;  %v2457_v41 = vadd.f32 %v6498_v51, %v2201_v16  ;;  %v6547_v7 = vsel %vm2570_vm12, 1.0, %v12508_v22  ;;  %v6546_v19 = vsel %vm2569_vm11, 1.0, %v12508_v22  ;;  %v12672_v16 = vld [vmem:[#allocation100_spill] sm:$0xff] }
 0x294   :  { %v6548_v57 = vsel %vm2571_vm14, 1.0, %v12508_v22  ;;  %vm2572_vm8 = vcmp.eq.s32.totalorder %v8250_v40, %v2526_v59  ;;  %v2714_v33 = vadd.f32 %v6547_v7, %v2458_v55  ;;  %vm2574_vm13 = vcmp.eq.s32.totalorder %v9027_v54, %v2526_v59 }
 0x295   :  { %v2715_v26 = vadd.f32 %v6548_v57, %v2459_v56  ;;  %v2713_v18 = vadd.f32 %v6546_v19, %v2457_v41  ;;  %vm2279_vm7 = vcmp.eq.s32.totalorder %v9027_v54, %v12668_v23  ;;  %v1146_v1 = vadd.f32 %v9814_v63, %v9891_v8  ;;  %v12678_v41 = vld [vmem:[#allocation94_spill] sm:$0xff]  ;;  %v12680_v23 = vld [vmem:[#allocation32_spill] sm:$0xff] }
 0x296   :  { %v6275_v61 = vsel %vm1258_vm10, 1.0, %v12508_v22  ;;  %vm2573_vm0 = vcmp.eq.s32.totalorder %v8256_v44, %v2526_v59  ;;  %v2204_v21 = vadd.f32 %v10445_v60, %v1948_v31  ;;  %v2205_v2 = vadd.f32 %v6454_v43, %v1949_v24  ;;  %v2270_v36 = vpop.permute.xlu1 %2269  ;;  %2996 = vmatprep.mubr.f32.mxu0 %v2714_v33  ;;  %v12674_v59 = vld [vmem:[#allocation92_spill] sm:$0xff]  ;;  %v12676_v24 = vld [vmem:[#allocation101_spill] sm:$0xff] }
 0x297   :  { %v2206_v39 = vadd.f32 %v6455_v28, %v1950_v17  ;;  %6566 = vmatmul.mubr.msk.f32.gmra.mrb[8].mxu1 %vm2799_vm6, %v2715_v26  ;;  %v6549_v5 = vsel %vm2572_vm8, 1.0, %v12508_v22  ;;  %vm2316_vm1 = vcmp.eq.s32.totalorder %v8250_v40, %v2270_v36  ;;  %vm2317_vm2 = vcmp.eq.s32.totalorder %v8256_v44, %v2270_v36  ;;  %2997 = vmatmul.mubr.f32.gmra.mrb[28].mxu0 %v2713_v18  ;;  %v12671_v44 = vld [vmem:[#allocation96_spill] sm:$0xff]  ;;  %v12673_v28 = vld [vmem:[#allocation89_spill] sm:$0xff]  ;;  %v12677_v17 = vld [vmem:[#allocation103_spill] sm:$0xff] }
 0x298   :  { %vm2318_vm3 = vcmp.eq.s32.totalorder %v9027_v54, %v2270_v36  ;;  %v6551_v63 = vsel %vm2574_vm13, 1.0, %v12508_v22  ;;  %3163 = vmatprep.mubr.f32.mxu1 %v12508_v22  ;;  %v6501_v8 = vsel %vm2316_vm1, 1.0, %v12508_v22  ;;  %v6502_v60 = vsel %vm2317_vm2, 1.0, %v12508_v22  ;;  %v12679_v26 = vld [vmem:[#allocation111_spill] sm:$0xff] }
 0x299   :  { %v6503_v30 = vsel %vm2318_vm3, 1.0, %v12508_v22  ;;  %v6550_v13 = vsel %vm2573_vm0, 1.0, %v12508_v22  ;;  %vm1008_vm10 = vcmp.eq.s32.totalorder %v9027_v54, %v12669_v4  ;;  %v2461_v58 = vadd.f32 %v6502_v60, %v2205_v2 }
 0x29a   :  { %v2462_v27 = vadd.f32 %v6503_v30, %v2206_v39  ;;  %v2460_v48 = vadd.f32 %v6501_v8, %v2204_v21  ;;  %v1149_v34 = vadd.f32 %v12670_v42, %v9883_v11  ;;  %v6278_v9 = vsel %vm1261_vm5, 1.0, %v12508_v22  ;;  %v12684_v39 = vld [vmem:[#allocation109_spill] sm:$0xff]  ;;  %v12686_v8 = vld [vmem:[#allocation71_spill] sm:$0xff] }
 0x29b   :  { %v2164_v49 = vadd.f32 %v10364_v50, %v9777_v29  ;;  %v1402_v46 = vadd.f32 %v6275_v61, %v1146_v1  ;;  %vm1264_vm4 = vcmp.eq.s32.totalorder %v9027_v54, %v12671_v44  ;;  %v2717_v14 = vadd.f32 %v6550_v13, %v2461_v58  ;;  %v12683_v1 = vld [vmem:[#allocation106_spill] sm:$0xff]  ;;  %v12688_v58 = vld [vmem:[#allocation113_spill] sm:$0xff]  ;;  %v12689_v42 = vld [vmem:[#allocation107_spill] sm:$0xff] }
 0x29c   :  { %v2718_v3 = vadd.f32 %v6551_v63, %v2462_v27  ;;  %v2716_v10 = vadd.f32 %v6549_v5, %v2460_v48  ;;  %v6464_v11 = vsel %vm2279_vm7, 1.0, %v12508_v22  ;;  %v6233_v51 = vsel %vm1008_vm10, 1.0, %v12508_v22  ;;  %v12685_v5 = vld [vmem:[#allocation102_spill] sm:$0xff]  ;;  %v12687_v27 = vld [vmem:[#allocation91_spill] sm:$0xff] }
 0x29d   :  { %vm1011_vm15 = vcmp.eq.s32.totalorder %v9027_v54, %v12672_v16  ;;  %v2417_v29 = vadd.f32 %v9425_v47, %v9888_v15  ;;  %v6323_v50 = vsel %vm1514_vm9, 1.0, %v12508_v22  ;;  %v2167_v20 = vadd.f32 %v10005_v25, %v9893_v6  ;;  %3002 = vmatprep.mubr.f32.mxu0 %v2717_v14  ;;  %v12675_v25 = vld [vmem:[#allocation98_spill] sm:$0xff]  ;;  %v12690_v14 = vld [vmem:[#allocation108_spill] sm:$0xff] }
 0x29e   :  { %v896_v31 = vadd.f32 %v10027_v12, %v9923_v0  ;;  %v1405_v43 = vadd.f32 %v6278_v9, %v1149_v34  ;;  %6567 = vmatmul.mubr.msk.f32.gmra.mrb[10].mxu1 %vm2799_vm6, %v2718_v3  ;;  %vm2029_vm5 = vcmp.eq.s32.totalorder %v9027_v54, %v12673_v28  ;;  %vm2026_vm11 = vcmp.eq.s32.totalorder %v9027_v54, %v12674_v59  ;;  %v12694_v28 = vld [vmem:[#allocation119_spill] sm:$0xff]  ;;  %v12695_v59 = vld [vmem:[#allocation121_spill] sm:$0xff] }
 0x29f   :  { %v6281_v47 = vsel %vm1264_vm4, 1.0, %v12508_v22  ;;  %v1658_v15 = vadd.f32 %v6323_v50, %v1402_v46  ;;  %3003 = vmatmul.mubr.f32.gmra.mrb[30].mxu0 %v2716_v10  ;;  %3879 = vmatprep.mubr.f32.mxu1 %v12508_v22  ;;  %v2423_v6 = vadd.f32 %v6464_v11, %v2167_v20  ;;  %vm1773_vm9 = vcmp.eq.s32.totalorder %v9027_v54, %v12675_v25  ;;  %v12691_v10 = vld [vmem:[#allocation110_spill] sm:$0xff]  ;;  %v12697_v25 = vld [vmem:[#allocation55_spill] sm:$0xff] }
 0x2a0   :  { %v1152_v0 = vadd.f32 %v6233_v51, %v896_v31  ;;  %v6236_v12 = vsel %vm1011_vm15, 1.0, %v12508_v22  ;;  %3073 = vmatprep.mubr.f32.mxu0 %v12508_v22  ;;  %vm1520_vm12 = vcmp.eq.s32.totalorder %v9027_v54, %v12676_v24  ;;  %vm758_vm14 = vcmp.eq.s32.totalorder %v9027_v54, %v12677_v17  ;;  %v12692_v11 = vld [vmem:[#allocation114_spill] sm:$0xff]  ;;  %v12693_v51 = vld [vmem:[#allocation123_spill] sm:$0xff] }
 0x2a1   :  { %v2673_v56 = vadd.f32 %v9880_v38, %v2417_v29  ;;  %v2420_v32 = vadd.f32 %v9993_v35, %v2164_v49  ;;  %v6422_v55 = vsel %vm2029_vm5, 1.0, %v12508_v22  ;;  %v6419_v62 = vsel %vm2026_vm11, 1.0, %v12508_v22 }
 0x2a2   :  { %vm2535_vm8 = vcmp.eq.s32.totalorder %v9027_v54, %v12678_v41  ;;  %v1408_v57 = vadd.f32 %v6281_v47, %v1152_v0  ;;  %v1914_v7 = vadd.f32 %v9634_v45, %v1658_v15  ;;  %v1661_v19 = vadd.f32 %v9694_v37, %v1405_v43  ;;  %v12681_v45 = vld [vmem:[#allocation104_spill] sm:$0xff]  ;;  %v12682_v37 = vld [vmem:[#allocation105_spill] sm:$0xff] }
 0x2a3   :  { %v6374_v33 = vsel %vm1773_vm9, 1.0, %v12508_v22  ;;  %vm1267_vm13 = vcmp.eq.s32.totalorder %v9027_v54, %v12679_v26  ;;  %6552 = vmatmul.mubr.msk.f32.vlgmr.msra.gmra.mrb[0].mxu0 %vm2799_vm6, %v2673_v56  ;;  %v1155_v38 = vadd.f32 %v6236_v12, %v9807_v53  ;;  %v6329_v35 = vsel %vm1520_vm12, 1.0, %v12508_v22  ;;  %v12698_v12 = vld [vmem:[#allocation52_spill] sm:$0xff] }
 0x2a4   :  { %v6191_v18 = vsel %vm758_vm14, 1.0, %v12508_v22  ;;  %vm1014_vm7 = vcmp.eq.s32.totalorder %v9027_v54, %v12680_v23  ;;  %3079 = vmatprep.mubr.f32.mxu0 %v12508_v22  ;;  %vm1776_vm0 = vcmp.eq.s32.totalorder %v9027_v54, %v12681_v45  ;;  %vm2285_vm1 = vcmp.eq.s32.totalorder %v9027_v54, %v12682_v37  ;;  %v12699_v56 = vld [vmem:[#allocation48_spill] sm:$0xff]  ;;  %v12704_v23 = vld [vmem:[#allocation67_spill] sm:$0xff] }
 0x2a5   :  { %vm1523_vm2 = vcmp.eq.s32.totalorder %v9027_v54, %v12683_v1  ;;  %v2676_v53 = vadd.f32 %v9584_v52, %v2420_v32  ;;  %v6512_v61 = vsel %vm2535_vm8, 1.0, %v12508_v22  ;;  %v1917_v21 = vadd.f32 %v6374_v33, %v1661_v19  ;;  %v12702_v41 = vld [vmem:[#allocation44_spill] sm:$0xff] }
 0x2a6   :  { %v6284_v2 = vsel %vm1267_vm13, 1.0, %v12508_v22  ;;  %vm1270_vm3 = vcmp.eq.s32.totalorder %v9027_v54, %v12684_v39  ;;  %v1664_v36 = vadd.f32 %v6329_v35, %v1408_v57  ;;  %vm2538_vm10 = vcmp.eq.s32.totalorder %v9027_v54, %v12685_v5  ;;  %v12707_v39 = vld [vmem:[#allocation30_spill] sm:$0xff]  ;;  %v12709_v5 = vld [vmem:[#allocation49_spill] sm:$0xff] }
 0x2a7   :  { %v6239_v63 = vsel %vm1014_vm7, 1.0, %v12508_v22  ;;  %6553 = vmatmul.mubr.msk.f32.gmra.mrb[2].mxu0 %vm2799_vm6, %v2676_v53  ;;  %v2170_v52 = vadd.f32 %v6419_v62, %v1914_v7  ;;  %v902_v60 = vadd.f32 %v6191_v18, %v12686_v8  ;;  %v6377_v30 = vsel %vm1776_vm0, 1.0, %v12508_v22  ;;  %v12701_v62 = vld [vmem:[#allocation117_spill] sm:$0xff]  ;;  %v12703_v7 = vld [vmem:[#allocation50_spill] sm:$0xff] }
 0x2a8   :  { %v6470_v13 = vsel %vm2285_vm1, 1.0, %v12508_v22  ;;  %v6332_v4 = vsel %vm1523_vm2, 1.0, %v12508_v22  ;;  %3085 = vmatprep.mubr.f32.mxu0 %v12508_v22  ;;  %vm2038_vm4 = vcmp.eq.s32.totalorder %v9027_v54, %v12687_v27  ;;  %vm1276_vm15 = vcmp.eq.s32.totalorder %v9027_v54, %v12688_v58  ;;  %v12705_v53 = vld [vmem:[#allocation46_spill] sm:$0xff] }
 0x2a9   :  { %v1411_v48 = vadd.f32 %v6284_v2, %v1155_v38  ;;  %vm2032_vm5 = vcmp.eq.s32.totalorder %v9027_v54, %v12689_v42  ;;  %v6287_v34 = vsel %vm1270_vm3, 1.0, %v12508_v22  ;;  %v2679_v9 = vadd.f32 %v6512_v61, %v2423_v6  ;;  %v12696_v6 = vld [vmem:[#allocation112_spill] sm:$0xff]  ;;  %v12706_v61 = vld [vmem:[#allocation29_spill] sm:$0xff]  ;;  %v12712_v58 = vld [vmem:[#allocation54_spill] sm:$0xff] }
 0x2aa   :  { %v6515_v49 = vsel %vm2538_vm10, 1.0, %v12508_v22  ;;  %v1158_v46 = vadd.f32 %v6239_v63, %v902_v60  ;;  %v2173_v44 = vadd.f32 %v6422_v55, %v1917_v21  ;;  %vm761_vm11 = vcmp.eq.s32.totalorder %v9027_v54, %v12690_v14  ;;  %v12700_v55 = vld [vmem:[#allocation116_spill] sm:$0xff] }
 0x2ab   :  { %v1667_v3 = vadd.f32 %v6332_v4, %v1411_v48  ;;  %vm2288_vm9 = vcmp.eq.s32.totalorder %v9027_v54, %v12691_v10  ;;  %vm2035_vm12 = vcmp.eq.s32.totalorder %v9027_v54, %v12692_v11  ;;  %6554 = vmatmul.mubr.msk.f32.gmra.mrb[4].mxu0 %vm2799_vm6, %v2679_v9  ;;  %v2426_v16 = vadd.f32 %v12693_v51, %v2170_v52 }
 0x2ac   :  { %v1920_v29 = vadd.f32 %v6377_v30, %v1664_v36  ;;  %v2429_v50 = vadd.f32 %v6470_v13, %v2173_v44  ;;  %v6425_v20 = vsel %vm2032_vm5, 1.0, %v12508_v22  ;;  %v1414_v31 = vadd.f32 %v6287_v34, %v1158_v46  ;;  %3091 = vmatprep.mubr.f32.mxu0 %v12508_v22  ;;  %v12708_v36 = vld [vmem:[#allocation31_spill] sm:$0xff]  ;;  %v12710_v13 = vld [vmem:[#allocation58_spill] sm:$0xff] }
 0x2ad   :  { %v6194_v43 = vsel %vm761_vm11, 1.0, %v12508_v22  ;;  %vm1782_vm14 = vcmp.eq.s32.totalorder %v9027_v54, %v12694_v28  ;;  %vm1020_vm8 = vcmp.eq.s32.totalorder %v9027_v54, %v12695_v59  ;;  %v2682_v47 = vadd.f32 %v6515_v49, %v2426_v16  ;;  %v12711_v34 = vld [vmem:[#allocation47_spill] sm:$0xff]  ;;  %v12714_v16 = vld [vmem:[#allocation122_spill] sm:$0xff] }
 0x2ae   :  { %v6473_v15 = vsel %vm2288_vm9, 1.0, %v12508_v22  ;;  %vm1017_vm13 = vcmp.eq.s32.totalorder %v9027_v54, %v12696_v6  ;;  %v6428_v0 = vsel %vm2035_vm12, 1.0, %v12508_v22  ;;  %v908_v24 = vadd.f32 %v12698_v12, %v12697_v25  ;;  %v12713_v44 = vld [vmem:[#allocation35_spill] sm:$0xff]  ;;  %v12716_v28 = vld [vmem:[#allocation78_spill] sm:$0xff] }
 0x2af   :  { %v2176_v17 = vadd.f32 %v6425_v20, %v1920_v29  ;;  %v1923_v32 = vadd.f32 %v12699_v56, %v1667_v3  ;;  %vm2544_vm7 = vcmp.eq.s32.totalorder %v9027_v54, %v12700_v55  ;;  %vm1273_vm0 = vcmp.eq.s32.totalorder %v9027_v54, %v12701_v62  ;;  %6555 = vmatmul.mubr.msk.f32.gmra.mrb[6].mxu0 %vm2799_vm6, %v2682_v47  ;;  %v12715_v29 = vld [vmem:[#allocation45_spill] sm:$0xff]  ;;  %v12718_v56 = vld [vmem:[#allocation51_spill] sm:$0xff] }
 0x2b0   :  { %v905_v57 = vadd.f32 %v6194_v43, %v12702_v41  ;;  %v1670_v19 = vadd.f32 %v12703_v7, %v1414_v31  ;;  %v6383_v33 = vsel %vm1782_vm14, 1.0, %v12508_v22  ;;  %v6245_v26 = vsel %vm1020_vm8, 1.0, %v12508_v22  ;;  %3097 = vmatprep.mubr.f32.mxu0 %v12508_v22 }
 0x2b1   :  { %v2432_v38 = vadd.f32 %v6473_v15, %v2176_v17  ;;  %v6242_v35 = vsel %vm1017_vm13, 1.0, %v12508_v22  ;;  %v2179_v18 = vadd.f32 %v6428_v0, %v1923_v32  ;;  %v2685_v45 = vadd.f32 %v12704_v23, %v2429_v50  ;;  %v12717_v0 = vld [vmem:[#allocation53_spill] sm:$0xff] }
 0x2b2   :  { %v6521_v37 = vsel %vm2544_vm7, 1.0, %v12508_v22  ;;  %v6290_v1 = vsel %vm1273_vm0, 1.0, %v12508_v22  ;;  %vm1529_vm1 = vcmp.eq.s32.totalorder %v9027_v54, %v12705_v53  ;;  %vm2547_vm2 = vcmp.eq.s32.totalorder %v9027_v54, %v12706_v61 }
 0x2b3   :  { %v1926_v21 = vadd.f32 %v6383_v33, %v1670_v19  ;;  %v1164_v2 = vadd.f32 %v6245_v26, %v908_v24  ;;  %vm2294_vm3 = vcmp.eq.s32.totalorder %v9027_v54, %v12707_v39  ;;  %vm1532_vm10 = vcmp.eq.s32.totalorder %v9027_v54, %v12708_v36  ;;  %6556 = vmatmul.mubr.msk.f32.gmra.mrb[8].mxu0 %vm2799_vm6, %v2685_v45 }
 0x2b4   :  { %vm2550_vm5 = vcmp.eq.s32.totalorder %v9027_v54, %v12709_v5  ;;  %v6431_v63 = vsel %vm2038_vm4, 1.0, %v12508_v22  ;;  %v6293_v52 = vsel %vm1276_vm15, 1.0, %v12508_v22  ;;  %v1161_v8 = vadd.f32 %v6242_v35, %v905_v57  ;;  %3103 = vmatprep.mubr.f32.mxu0 %v12508_v22 }
 0x2b5   :  { %v6338_v60 = vsel %vm1529_vm1, 1.0, %v12508_v22  ;;  %v6524_v30 = vsel %vm2547_vm2, 1.0, %v12508_v22  ;;  %vm1785_vm11 = vcmp.eq.s32.totalorder %v9027_v54, %v12710_v13  ;;  %v2688_v4 = vadd.f32 %v6521_v37, %v2432_v38 }
 0x2b6   :  { %v1417_v48 = vadd.f32 %v6290_v1, %v1161_v8  ;;  %v6479_v27 = vsel %vm2294_vm3, 1.0, %v12508_v22  ;;  %v6341_v42 = vsel %vm1532_vm10, 1.0, %v12508_v22  ;;  %v2435_v9 = vadd.f32 %v12711_v34, %v2179_v18 }
 0x2b7   :  { %vm1788_vm4 = vcmp.eq.s32.totalorder %v9027_v54, %v12712_v58  ;;  %v2182_v49 = vadd.f32 %v6431_v63, %v1926_v21  ;;  %v1420_v46 = vadd.f32 %v6293_v52, %v1164_v2  ;;  %vm2041_vm15 = vcmp.eq.s32.totalorder %v9027_v54, %v12713_v44  ;;  %6557 = vmatmul.mubr.msk.f32.gmra.mrb[10].mxu0 %vm2799_vm6, %v2688_v4 }
 0x2b8   :  { %v1673_v14 = vadd.f32 %v6338_v60, %v1417_v48  ;;  %v6386_v3 = vsel %vm1785_vm11, 1.0, %v12508_v22  ;;  %3109 = vmatprep.mubr.f32.mxu0 %v12508_v22  ;;  %v2691_v10 = vadd.f32 %v6524_v30, %v2435_v9  ;;  %vm2297_vm9 = vcmp.eq.s32.totalorder %v9027_v54, %v12714_v16 }
 0x2b9   :  { %v2438_v11 = vadd.f32 %v6479_v27, %v2182_v49  ;;  %v1676_v51 = vadd.f32 %v6341_v42, %v1420_v46  ;;  %vm2044_vm12 = vcmp.eq.s32.totalorder %v9027_v54, %v12715_v29  ;;  %v6527_v50 = vsel %vm2550_vm5, 1.0, %v12508_v22 }
 0x2ba   :  { %v6389_v20 = vsel %vm1788_vm4, 1.0, %v12508_v22  ;;  %v6434_v31 = vsel %vm2041_vm15, 1.0, %v12508_v22  ;;  %v1929_v43 = vadd.f32 %v6386_v3, %v1673_v14  ;;  %vm2553_vm14 = vcmp.eq.s32.totalorder %v9027_v54, %v12716_v28 }
 0x2bb   :  { %6558 = vmatmul.mubr.msk.f32.gmra.mrb[12].mxu0 %vm2799_vm6, %v2691_v10  ;;  %v6482_v59 = vsel %vm2297_vm9, 1.0, %v12508_v22  ;;  %v6437_v47 = vsel %vm2044_vm12, 1.0, %v12508_v22  ;;  %v1932_v6 = vadd.f32 %v6389_v20, %v1676_v51  ;;  %vm2300_vm8 = vcmp.eq.s32.totalorder %v9027_v54, %v12717_v0 }
 0x2bc   :  { %3115 = vmatprep.mubr.f32.mxu0 %v12508_v22  ;;  %v2185_v15 = vadd.f32 %v6434_v31, %v1929_v43  ;;  %v2694_v25 = vadd.f32 %v6527_v50, %v2438_v11  ;;  %v6530_v12 = vsel %vm2553_vm14, 1.0, %v12508_v22  ;;  %vm2556_vm13 = vcmp.eq.s32.totalorder %v9027_v54, %v12718_v56 }
 0x2bd   :  { %v2188_v17 = vadd.f32 %v6437_v47, %v1932_v6  ;;  %v6485_v32 = vsel %vm2300_vm8, 1.0, %v12508_v22  ;;  %v6533_v62 = vsel %vm2556_vm13, 1.0, %v12508_v22  ;;  %vm3766_vm7 = vcmask 130048  }
 0x2be   :  { %v2441_v24 = vadd.f32 %v6482_v59, %v2185_v15 }
 0x2bf   :  { %6559 = vmatmul.mubr.msk.f32.gmra.mrb[14].mxu0 %vm2799_vm6, %v2694_v25  ;;  %v2444_v41 = vadd.f32 %v6485_v32, %v2188_v17 }
 0x2c0   :  { %3121 = vmatprep.mubr.f32.mxu0 %v12508_v22  ;;  %v2697_v55 = vadd.f32 %v6530_v12, %v2441_v24 }
 0x2c1   :  { %v2700_v57 = vadd.f32 %v6533_v62, %v2444_v41  ;;  %v3765_v62 = vld [vmem:[%s12246_s9 + $0x18] sm:$0xff] }
 0x2c3   :  { %6560 = vmatmul.mubr.msk.f32.gmra.mrb[16].mxu0 %vm2799_vm6, %v2697_v55  ;;  %v3763_v55 = vld [vmem:[%s12246_s9 + $0x8] sm:$0xff] }
 0x2c4   :  { %3127 = vmatprep.mubr.f32.mxu0 %v12508_v22 }
 0x2c7   :  { %6561 = vmatmul.mubr.msk.f32.gmra.mrb[18].mxu0 %vm2799_vm6, %v2700_v57  ;;  %v6971_v57 = vpack.c.bf16 %v3765_v62, %v3763_v55 }
 0x2c9   :  { %6972 = vmatprep.subr.bf16.mxu1 %v6971_v57 }
 0x30f   :  { %v3135_v7 = vpop.f32.mrb[0].mxu1 }
 0x310   :  { %v2974_v19 = vpop.f32.mrb[20].mxu0  ;;  %v3137_v54 = vpop.f32.mrb[1].mxu1 }
 0x311   :  { %v10740_v33 = vadd.f32 %v3135_v7, %v2974_v19  ;;  %v2976_v26 = vpop.f32.mrb[21].mxu0  ;;  %v3762_v7 = vld [vmem:[%s12246_s9] sm:$0xff]  ;;  %v3764_v19 = vld [vmem:[%s12246_s9 + $0x10] sm:$0xff] }
 0x312   :  { %v10742_v38 = vadd.f32 %v3137_v54, %v2976_v26  ;;  %v6973_v26 = vpack.c.bf16 %v3764_v19, %v3762_v7 }
 0x314   :  { %6974 = vmatpush1.bf16.msra.mxu1 %v6973_v26 }
 0x32d   :  { %v3141_v35 = vpop.f32.mrb[2].mxu1 }
 0x32e   :  { %v2980_v18 = vpop.f32.mrb[22].mxu0  ;;  %v3143_v23 = vpop.f32.mrb[3].mxu1 }
 0x32f   :  { %v10744_v45 = vadd.f32 %v3141_v35, %v2980_v18  ;;  %v2982_v37 = vpop.f32.mrb[23].mxu0 }
 0x330   :  { %v10746_v1 = vadd.f32 %v3143_v23, %v2982_v37 }
 0x331   :  { %v10995_v7 = vmax.f32 %v10744_v45, 0.0 }
 0x33e   :  { %v3147_v53 = vpop.f32.mrb[4].mxu1 }
 0x33f   :  { %v2986_v61 = vpop.f32.mrb[24].mxu0  ;;  %v3149_v21 = vpop.f32.mrb[5].mxu1 }
 0x340   :  { %v10748_v2 = vadd.f32 %v3147_v53, %v2986_v61  ;;  %v2988_v39 = vpop.f32.mrb[25].mxu0 }
 0x341   :  { %v10750_v36 = vadd.f32 %v3149_v21, %v2988_v39 }
 0x34b   :  { %v3153_v5 = vpop.f32.mrb[6].mxu1 }
 0x34c   :  { %v2992_v63 = vpop.f32.mrb[26].mxu0  ;;  %v3155_v52 = vpop.f32.mrb[7].mxu1 }
 0x34d   :  { %v10752_v8 = vadd.f32 %v3153_v5, %v2992_v63  ;;  %v2994_v60 = vpop.f32.mrb[27].mxu0 }
 0x34e   :  { %v10754_v30 = vadd.f32 %v3155_v52, %v2994_v60 }
 0x36a   :  { %v3159_v13 = vpop.f32.mrb[8].mxu1  ;;  %v2998_v4 = vpop.f32.mrb[28].mxu0 }
 0x36b   :  { %v3161_v48 = vpop.f32.mrb[9].mxu1  ;;  %v10756_v27 = vadd.f32 %v3159_v13, %v2998_v4  ;;  %v3000_v42 = vpop.f32.mrb[29].mxu0 }
 0x36c   :  { %v10758_v34 = vadd.f32 %v3161_v48, %v3000_v42 }
 0x371   :  { %v3165_v9 = vpop.f32.mrb[10].mxu1 }
 0x372   :  { %v3004_v58 = vpop.f32.mrb[30].mxu0  ;;  %v3167_v49 = vpop.f32.mrb[11].mxu1 }
 0x373   :  { %v10760_v46 = vadd.f32 %v3165_v9, %v3004_v58  ;;  %v3006_v44 = vpop.f32.mrb[31].mxu0 }
 0x374   :  { %v10762_v14 = vadd.f32 %v3167_v49, %v3006_v44 }
 0x376   :  { %v3075_v3 = vpop.f32.mrb[0].mxu0 }
 0x377   :  { %v10764_v10 = vmax.f32 %v3075_v3, 0.0  ;;  %v10766_v11 = vpop.f32.mrb[1].mxu0 }
 0x378   :  { %v3171_v18 = vmax.f32 %v10766_v11, 0.0 }
 0x379   :  { %3218 = vrot.lane.b32.xlu1 %v10764_v10, %s7468_s0 }
 0x37a   :  { %v3081_v51 = vpop.f32.mrb[2].mxu0 }
 0x37b   :  { %v10770_v16 = vmax.f32 %v3081_v51, 0.0  ;;  %v10772_v29 = vpop.f32.mrb[3].mxu0  ;;  %v10965_v51 = vmax.f32 %v10740_v33, 0.0 }
 0x37c   :  { %v3173_v37 = vmax.f32 %v10772_v29, 0.0 }
 0x37d   :  { %3282 = vrot.lane.b32.xlu1 %v10764_v10, %s7469_s8  ;;  %3220 = vrot.lane.b32.xlu0 %v10770_v16, %s7468_s0 }
 0x37e   :  { %v3087_v50 = vpop.f32.mrb[4].mxu0 }
 0x37f   :  { %v10778_v20 = vpop.f32.mrb[5].mxu0  ;;  %v10784_v43 = vmax.f32 %v3087_v50, 0.0 }
 0x380   :  { %v3175_v61 = vmax.f32 %v10778_v20, 0.0 }
 0x381   :  { %3346 = vrot.lane.b32.xlu1 %v10764_v10, %s7470_s4  ;;  %3284 = vrot.lane.b32.xlu0 %v10770_v16, %s7469_s8 }
 0x382   :  { %v3093_v31 = vpop.f32.mrb[6].mxu0 }
 0x383   :  { %v10786_v28 = vpop.f32.mrb[7].mxu0  ;;  %v10804_v25 = vmax.f32 %v3093_v31, 0.0 }
 0x384   :  { %v3177_v39 = vmax.f32 %v10786_v28, 0.0 }
 0x385   :  { %3410 = vrot.lane.b32.xlu1 %v10764_v10, %s7471_s1  ;;  %3222 = vrot.lane.b32.xlu0 %v10784_v43, %s7468_s0 }
 0x386   :  { %v3099_v59 = vpop.f32.mrb[8].mxu0 }
 0x387   :  { %v10792_v47 = vpop.f32.mrb[9].mxu0  ;;  %v10842_v35 = vmax.f32 %v3099_v59, 0.0 }
 0x388   :  { %v3179_v63 = vmax.f32 %v10792_v47, 0.0 }
 0x389   :  { %3348 = vrot.lane.b32.xlu1 %v10770_v16, %s7470_s4  ;;  %3474 = vrot.lane.b32.xlu0 %v10764_v10, %s7472_s5 }
 0x38a   :  { %v3105_v15 = vpop.f32.mrb[10].mxu0 }
 0x38b   :  { %v10798_v6 = vpop.f32.mrb[11].mxu0  ;;  %v10862_v23 = vmax.f32 %v3105_v15, 0.0 }
 0x38c   :  { %v12424_v9 = vmax.f32 %v10798_v6, 0.0 }
 0x38d   :  { %3286 = vrot.lane.b32.xlu1 %v10784_v43, %s7469_s8  ;;  %3412 = vrot.lane.b32.xlu0 %v10770_v16, %s7471_s1 }
 0x38e   :  { %v3111_v0 = vpop.f32.mrb[12].mxu0 }
 0x38f   :  { %v10806_v12 = vpop.f32.mrb[13].mxu0  ;;  %v10882_v53 = vmax.f32 %v3111_v0, 0.0 }
 0x390   :  { %v3183_v33 = vmax.f32 %v10806_v12, 0.0 }
 0x391   :  { %3538 = vrot.lane.b32.xlu1 %v10764_v10, %s7473_s26  ;;  %3224 = vrot.lane.b32.xlu0 %v10804_v25, %s7468_s0 }
 0x392   :  { %v3117_v24 = vpop.f32.mrb[14].mxu0 }
 0x393   :  { %v10812_v17 = vpop.f32.mrb[15].mxu0  ;;  %v10902_v21 = vmax.f32 %v3117_v24, 0.0 }
 0x395   :  { %3350 = vrot.lane.b32.xlu1 %v10784_v43, %s7470_s4  ;;  %3476 = vrot.lane.b32.xlu0 %v10770_v16, %s7472_s5 }
 0x396   :  { %v3123_v56 = vpop.f32.mrb[16].mxu0 }
 0x397   :  { %v10818_v32 = vpop.f32.mrb[17].mxu0  ;;  %v10922_v5 = vmax.f32 %v3123_v56, 0.0 }
 0x399   :  { %3602 = vrot.lane.b32.xlu1 %v10764_v10, %s7474_s28  ;;  %3288 = vrot.lane.b32.xlu0 %v10804_v25, %s7469_s8 }
 0x39a   :  { %v3129_v41 = vpop.f32.mrb[18].mxu0 }
 0x39b   :  { %v10836_v54 = vpop.f32.mrb[19].mxu0  ;;  %v10942_v60 = vmax.f32 %v3129_v41, 0.0 }
 0x39d   :  { %3414 = vrot.lane.b32.xlu1 %v10784_v43, %s7471_s1  ;;  %3540 = vrot.lane.b32.xlu0 %v10770_v16, %s7473_s26 }
 0x3a1   :  { %3352 = vrot.lane.b32.xlu0 %v10804_v25, %s7470_s4  ;;  %3226 = vrot.lane.b32.xlu1 %v10842_v35, %s7468_s0 }
 0x3a5   :  { %3604 = vrot.lane.b32.xlu0 %v10770_v16, %s7474_s28  ;;  %3478 = vrot.lane.b32.xlu1 %v10784_v43, %s7472_s5 }
 0x3a9   :  { %3290 = vrot.lane.b32.xlu0 %v10842_v35, %s7469_s8  ;;  %3698 = vrot.lane.b32.xlu1 %v3171_v18, %s7468_s0 }
 0x3ad   :  { %3542 = vrot.lane.b32.xlu0 %v10784_v43, %s7473_s26  ;;  %3416 = vrot.lane.b32.xlu1 %v10804_v25, %s7471_s1 }
 0x3b1   :  { %3354 = vrot.lane.b32.xlu0 %v10842_v35, %s7470_s4  ;;  %3228 = vrot.lane.b32.xlu1 %v10862_v23, %s7468_s0 }
 0x3b5   :  { %3606 = vrot.lane.b32.xlu0 %v10784_v43, %s7474_s28  ;;  %3480 = vrot.lane.b32.xlu1 %v10804_v25, %s7472_s5 }
 0x3b9   :  { %3292 = vrot.lane.b32.xlu0 %v10862_v23, %s7469_s8  ;;  %3700 = vrot.lane.b32.xlu1 %v3173_v37, %s7468_s0 }
 0x3bd   :  { %3544 = vrot.lane.b32.xlu0 %v10804_v25, %s7473_s26  ;;  %3418 = vrot.lane.b32.xlu1 %v10842_v35, %s7471_s1 }
 0x3c1   :  { %3356 = vrot.lane.b32.xlu0 %v10862_v23, %s7470_s4  ;;  %3230 = vrot.lane.b32.xlu1 %v10882_v53, %s7468_s0 }
 0x3c5   :  { %3608 = vrot.lane.b32.xlu0 %v10804_v25, %s7474_s28  ;;  %3482 = vrot.lane.b32.xlu1 %v10842_v35, %s7472_s5 }
 0x3c9   :  { %3294 = vrot.lane.b32.xlu0 %v10882_v53, %s7469_s8  ;;  %3702 = vrot.lane.b32.xlu1 %v3175_v61, %s7468_s0 }
 0x3cd   :  { %3546 = vrot.lane.b32.xlu0 %v10842_v35, %s7473_s26  ;;  %3420 = vrot.lane.b32.xlu1 %v10862_v23, %s7471_s1 }
 0x3d1   :  { %3358 = vrot.lane.b32.xlu0 %v10882_v53, %s7470_s4  ;;  %3232 = vrot.lane.b32.xlu1 %v10902_v21, %s7468_s0 }
 0x3d5   :  { %3610 = vrot.lane.b32.xlu0 %v10842_v35, %s7474_s28  ;;  %3484 = vrot.lane.b32.xlu1 %v10862_v23, %s7472_s5 }
 0x3d9   :  { %3296 = vrot.lane.b32.xlu0 %v10902_v21, %s7469_s8  ;;  %3704 = vrot.lane.b32.xlu1 %v3177_v39, %s7468_s0 }
 0x3dd   :  { %3548 = vrot.lane.b32.xlu0 %v10862_v23, %s7473_s26  ;;  %3422 = vrot.lane.b32.xlu1 %v10882_v53, %s7471_s1 }
 0x3e1   :  { %3360 = vrot.lane.b32.xlu0 %v10902_v21, %s7470_s4  ;;  %3234 = vrot.lane.b32.xlu1 %v10922_v5, %s7468_s0 }
 0x3e5   :  { %3612 = vrot.lane.b32.xlu0 %v10862_v23, %s7474_s28  ;;  %3486 = vrot.lane.b32.xlu1 %v10882_v53, %s7472_s5 }
 0x3e9   :  { %3298 = vrot.lane.b32.xlu0 %v10922_v5, %s7469_s8  ;;  %3706 = vrot.lane.b32.xlu1 %v3179_v63, %s7468_s0 }
 0x3eb   :  { %v3219_v52 = vpop.permute.xlu1 %3218 }
 0x3ec   :  { %v3266_v56 = vmax.f32 %v10764_v10, %v3219_v52 }
 0x3ed   :  { %3550 = vrot.lane.b32.xlu0 %v10882_v53, %s7473_s26  ;;  %3424 = vrot.lane.b32.xlu1 %v10902_v21, %s7471_s1 }
 0x3ef   :  { %v3283_v13 = vpop.permute.xlu1 %3282  ;;  %v3221_v4 = vpop.permute.xlu0 %3220 }
 0x3f0   :  { %v3330_v41 = vmax.f32 %v3266_v56, %v3283_v13 }
 0x3f1   :  { %3362 = vrot.lane.b32.xlu0 %v10922_v5, %s7470_s4  ;;  %3236 = vrot.lane.b32.xlu1 %v10942_v60, %s7468_s0 }
 0x3f3   :  { %v3347_v48 = vpop.permute.xlu1 %3346  ;;  %v3285_v42 = vpop.permute.xlu0 %3284 }
 0x3f4   :  { %v3394_v57 = vmax.f32 %v3330_v41, %v3347_v48  ;;  %v3185_v48 = vmax.f32 %v10812_v17, 0.0 }
 0x3f5   :  { %3614 = vrot.lane.b32.xlu0 %v10882_v53, %s7474_s28  ;;  %3488 = vrot.lane.b32.xlu1 %v10902_v21, %s7472_s5 }
 0x3f7   :  { %v3411_v58 = vpop.permute.xlu1 %3410  ;;  %v10953_v49 = vpop.permute.xlu0 %3222 }
 0x3f9   :  { %3300 = vrot.lane.b32.xlu0 %v10942_v60, %s7469_s8  ;;  %3708 = vrot.lane.b32.xlu1 %v12424_v9, %s7468_s0  ;;  %v3458_v9 = vmax.f32 %v3394_v57, %v3411_v58 }
 0x3fb   :  { %v3349_v44 = vpop.permute.xlu1 %3348  ;;  %v3475_v3 = vpop.permute.xlu0 %3474 }
 0x3fc   :  { %v3522_v10 = vmax.f32 %v3458_v9, %v3475_v3  ;;  %v3267_v9 = vmax.f32 %v10770_v16, %v3221_v4  ;;  %v11026_v16 = vmax.f32 %v10748_v2, 0.0 }
 0x3fd   :  { %3552 = vrot.lane.b32.xlu0 %v10902_v21, %s7473_s26  ;;  %3426 = vrot.lane.b32.xlu1 %v10922_v5, %s7471_s1 }
 0x3ff   :  { %v10967_v50 = vpop.permute.xlu1 %3286  ;;  %v3413_v31 = vpop.permute.xlu0 %3412 }
 0x401   :  { %3364 = vrot.lane.b32.xlu0 %v10942_v60, %s7470_s4  ;;  %3238 = vrot.lane.b32.xlu1 %v10965_v51, %s7468_s0 }
 0x403   :  { %v3539_v59 = vpop.permute.xlu1 %3538  ;;  %v10973_v15 = vpop.permute.xlu0 %3224 }
 0x404   :  { %v3586_v56 = vmax.f32 %v3522_v10, %v3539_v59 }
 0x405   :  { %3616 = vrot.lane.b32.xlu0 %v10902_v21, %s7474_s28  ;;  %3490 = vrot.lane.b32.xlu1 %v10922_v5, %s7472_s5 }
 0x407   :  { %v10980_v0 = vpop.permute.xlu1 %3350  ;;  %v3477_v24 = vpop.permute.xlu0 %3476 }
 0x409   :  { %3302 = vrot.lane.b32.xlu0 %v10965_v51, %s7469_s8  ;;  %3710 = vrot.lane.b32.xlu1 %v3183_v33, %s7468_s0 }
 0x40b   :  { %v3603_v55 = vpop.permute.xlu1 %3602  ;;  %v10988_v62 = vpop.permute.xlu0 %3288 }
 0x40c   :  { %v3650_v45 = vmax.f32 %v3586_v56, %v3603_v55  ;;  %v3331_v55 = vmax.f32 %v3267_v9, %v3285_v42 }
 0x40d   :  { %3554 = vrot.lane.b32.xlu0 %v10922_v5, %s7473_s26  ;;  %3428 = vrot.lane.b32.xlu1 %v10942_v60, %s7471_s1 }
 0x40e   :  { %v3666_v3 = vmax.f32 %v3650_v45, %v3171_v18  ;;  %v3395_v56 = vmax.f32 %v3331_v55, %v3349_v44 }
 0x40f   :  { %v3415_v19 = vpop.permute.xlu1 %3414  ;;  %v3541_v26 = vpop.permute.xlu0 %3540 }
 0x410   :  { %v3459_v4 = vmax.f32 %v3395_v56, %v3413_v31  ;;  %v3187_v31 = vmax.f32 %v10818_v32, 0.0 }
 0x411   :  { %3366 = vrot.lane.b32.xlu0 %v10965_v51, %s7470_s4  ;;  %3240 = vrot.lane.b32.xlu1 %v10995_v7, %s7468_s0 }
 0x412   :  { %v3523_v42 = vmax.f32 %v3459_v4, %v3477_v24  ;;  %v3268_v24 = vmax.f32 %v10784_v43, %v10953_v49  ;;  %v11065_v43 = vmax.f32 %v10752_v8, 0.0 }
 0x413   :  { %v11001_v52 = vpop.permute.xlu0 %3352  ;;  %v11003_v13 = vpop.permute.xlu1 %3226 }
 0x414   :  { %v3587_v9 = vmax.f32 %v3523_v42, %v3541_v26  ;;  %v208_v42 = vld [vmem:[%s12719_s2 + $0x18] sm:$0xff] }
 0x415   :  { %3618 = vrot.lane.b32.xlu0 %v10922_v5, %s7474_s28  ;;  %3492 = vrot.lane.b32.xlu1 %v10942_v60, %s7472_s5 }
 0x417   :  { %v3605_v58 = vpop.permute.xlu0 %3604  ;;  %v3479_v41 = vpop.permute.xlu1 %3478 }
 0x418   :  { %v3651_v2 = vmax.f32 %v3587_v9, %v3605_v58 }
 0x419   :  { %3304 = vrot.lane.b32.xlu0 %v10995_v7, %s7469_s8  ;;  %3712 = vrot.lane.b32.xlu1 %v3185_v48, %s7468_s0 }
 0x41a   :  { %v3667_v26 = vmax.f32 %v3651_v2, %v3173_v37 }
 0x41b   :  { %v11018_v59 = vpop.permute.xlu0 %3290  ;;  %v3699_v57 = vpop.permute.xlu1 %3698 }
 0x41c   :  { %v3746_v10 = vmax.f32 %v3666_v3, %v3699_v57 }
 0x41d   :  { %3556 = vrot.lane.b32.xlu0 %v10942_v60, %s7473_s26  ;;  %3430 = vrot.lane.b32.xlu1 %v10965_v51, %s7471_s1 }
 0x41e   :  { %6568 = vmatmul.mubr.msk.f32.vlgmr.msra.gmra.mrb[12].mxu1 %vm3766_vm7, %v3746_v10  ;;  %v3332_v10 = vmax.f32 %v3268_v24, %v10967_v50  ;;  %v206_v50 = vld [vmem:[%s12719_s2 + $0x8] sm:$0xff] }
 0x41f   :  { %v3543_v11 = vpop.permute.xlu0 %3542  ;;  %v11028_v18 = vpop.permute.xlu1 %3416  ;;  %3885 = vmatprep.mubr.f32.mxu1 %v12508_v22  ;;  %v6975_v8 = vpack.c.bf16 %v208_v42, %v206_v50 }
 0x420   :  { %v3396_v4 = vmax.f32 %v3332_v10, %v10980_v0  ;;  %v205_v0 = vld [vmem:[%s12719_s2] sm:$0xff] }
 0x421   :  { %3368 = vrot.lane.b32.xlu0 %v10995_v7, %s7470_s4  ;;  %3242 = vrot.lane.b32.xlu1 %v11026_v16, %s7468_s0 }
 0x422   :  { %v3460_v49 = vmax.f32 %v3396_v4, %v3415_v19  ;;  %v207_v19 = vld [vmem:[%s12719_s2 + $0x10] sm:$0xff]  ;;  %6976 = vmatprep.subr.bf16.mxu1 %v6975_v8 }
 0x423   :  { %v11035_v45 = vpop.permute.xlu0 %3354  ;;  %v11037_v44 = vpop.permute.xlu1 %3228  ;;  %v6977_v2 = vpack.c.bf16 %v207_v19, %v205_v0 }
 0x424   :  { %v3524_v9 = vmax.f32 %v3460_v49, %v3479_v41  ;;  %v3269_v41 = vmax.f32 %v10804_v25, %v10973_v15  ;;  %v11116_v25 = vmax.f32 %v10756_v27, 0.0  ;;  %v209_v27 = vld [vmem:[%s12719_s2 + $0x20] sm:$0xff] }
 0x425   :  { %3620 = vrot.lane.b32.xlu0 %v10942_v60, %s7474_s28  ;;  %3494 = vrot.lane.b32.xlu1 %v10965_v51, %s7472_s5 }
 0x426   :  { %6978 = vmatpush1.bf16.msra.mxu1 %v6977_v2  ;;  %v3333_v42 = vmax.f32 %v3269_v41, %v10988_v62  ;;  %v210_v62 = vld [vmem:[%s12719_s2 + $0x28] sm:$0xff] }
 0x427   :  { %v3607_v3 = vpop.permute.xlu0 %3606  ;;  %v11044_v57 = vpop.permute.xlu1 %3480 }
 0x428   :  { %v3397_v8 = vmax.f32 %v3333_v42, %v11001_v52  ;;  %v212_v52 = vld [vmem:[%s12719_s2 + $0x38] sm:$0xff] }
 0x429   :  { %3306 = vrot.lane.b32.xlu0 %v11026_v16, %s7469_s8  ;;  %3714 = vrot.lane.b32.xlu1 %v3187_v31, %s7468_s0  ;;  %v6979_v19 = vpack.c.bf16 %v212_v52, %v210_v62 }
 0x42a   :  { %v3461_v15 = vmax.f32 %v3397_v8, %v11028_v18  ;;  %v211_v18 = vld [vmem:[%s12719_s2 + $0x30] sm:$0xff] }
 0x42b   :  { %v11055_v55 = vpop.permute.xlu0 %3292  ;;  %v3701_v58 = vpop.permute.xlu1 %3700  ;;  %v6981_v2 = vpack.c.bf16 %v211_v18, %v209_v27  ;;  %6980 = vmatprep.subr.bf16.mxu1 %v6979_v19 }
 0x42c   :  { %v3747_v56 = vmax.f32 %v3667_v26, %v3701_v58  ;;  %v3588_v58 = vmax.f32 %v3524_v9, %v3543_v11  ;;  %v3525_v9 = vmax.f32 %v3461_v15, %v11044_v57  ;;  %v3270_v57 = vmax.f32 %v10842_v35, %v11003_v13 }
 0x42d   :  { %3558 = vrot.lane.b32.xlu0 %v10965_v51, %s7473_s26  ;;  %3432 = vrot.lane.b32.xlu1 %v10995_v7, %s7471_s1  ;;  %v11169_v35 = vmax.f32 %v10760_v46, 0.0  ;;  %v213_v46 = vld [vmem:[%s12719_s2 + $0x40] sm:$0xff] }
 0x42e   :  { %6569 = vmatmul.mubr.msk.f32.gmra.mrb[14].mxu1 %vm3766_vm7, %v3747_v56  ;;  %v3652_v10 = vmax.f32 %v3588_v58, %v3607_v3  ;;  %v3189_v56 = vmax.f32 %v10836_v54, 0.0  ;;  %v3334_v15 = vmax.f32 %v3270_v57, %v11018_v59  ;;  %v214_v59 = vld [vmem:[%s12719_s2 + $0x48] sm:$0xff]  ;;  %v3193_v57 = vmax.f32 %v10746_v1, 0.0 }
 0x42f   :  { %v3545_v29 = vpop.permute.xlu0 %3544  ;;  %v11067_v37 = vpop.permute.xlu1 %3418  ;;  %3891 = vmatprep.mubr.f32.mxu1 %v12508_v22  ;;  %6982 = vmatpush1.bf16.msra.mxu1 %v6981_v2 }
 0x430   :  { %v3668_v11 = vmax.f32 %v3652_v10, %v3175_v61  ;;  %v3589_v41 = vmax.f32 %v3525_v9, %v3545_v29  ;;  %v3398_v52 = vmax.f32 %v3334_v15, %v11035_v45  ;;  %v216_v45 = vld [vmem:[%s12719_s2 + $0x58] sm:$0xff] }
 0x431   :  { %3370 = vrot.lane.b32.xlu0 %v11026_v16, %s7470_s4  ;;  %3244 = vrot.lane.b32.xlu1 %v11065_v43, %s7468_s0  ;;  %v6983_v27 = vpack.c.bf16 %v216_v45, %v214_v59 }
 0x432   :  { %v3462_v13 = vmax.f32 %v3398_v52, %v11067_v37  ;;  %v215_v37 = vld [vmem:[%s12719_s2 + $0x50] sm:$0xff] }
 0x433   :  { %v11086_v24 = vpop.permute.xlu0 %3356  ;;  %v11088_v26 = vpop.permute.xlu1 %3230  ;;  %v6985_v18 = vpack.c.bf16 %v215_v37, %v213_v46  ;;  %6984 = vmatprep.subr.bf16.mxu1 %v6983_v27  ;;  %v3195_v27 = vmax.f32 %v10750_v36, 0.0 }
 0x435   :  { %3622 = vrot.lane.b32.xlu0 %v10965_v51, %s7474_s28  ;;  %3496 = vrot.lane.b32.xlu1 %v10995_v7, %s7472_s5 }
 0x436   :  { %6986 = vmatpush1.bf16.msra.mxu1 %v6985_v18 }
 0x437   :  { %v3609_v4 = vpop.permute.xlu0 %3608  ;;  %v11095_v50 = vpop.permute.xlu1 %3482 }
 0x438   :  { %v3526_v19 = vmax.f32 %v3462_v13, %v11095_v50  ;;  %v3271_v50 = vmax.f32 %v10862_v23, %v11037_v44 }
 0x439   :  { %3308 = vrot.lane.b32.xlu0 %v11065_v43, %s7469_s8  ;;  %3716 = vrot.lane.b32.xlu1 %v3189_v56, %s7468_s0 }
 0x43b   :  { %v11106_v49 = vpop.permute.xlu0 %3294  ;;  %v3703_v3 = vpop.permute.xlu1 %3702 }
 0x43c   :  { %v3748_v0 = vmax.f32 %v3668_v11, %v3703_v3  ;;  %v3653_v11 = vmax.f32 %v3589_v41, %v3609_v4  ;;  %v3191_v3 = vmax.f32 %v10742_v38, 0.0 }
 0x43d   :  { %3560 = vrot.lane.b32.xlu0 %v10995_v7, %s7473_s26  ;;  %3434 = vrot.lane.b32.xlu1 %v11026_v16, %s7471_s1 }
 0x43e   :  { %6570 = vmatmul.mubr.msk.f32.gmra.mrb[16].mxu1 %vm3766_vm7, %v3748_v0  ;;  %v3669_v29 = vmax.f32 %v3653_v11, %v3177_v39 }
 0x43f   :  { %v3547_v20 = vpop.permute.xlu0 %3546  ;;  %v11118_v61 = vpop.permute.xlu1 %3420  ;;  %3897 = vmatprep.mubr.f32.mxu1 %v12508_v22 }
 0x440   :  { %v3590_v41 = vmax.f32 %v3526_v19, %v3547_v20 }
 0x441   :  { %3372 = vrot.lane.b32.xlu0 %v11065_v43, %s7470_s4  ;;  %3246 = vrot.lane.b32.xlu1 %v11116_v25, %s7468_s0 }
 0x443   :  { %v11139_v58 = vpop.permute.xlu0 %3358  ;;  %v11141_v10 = vpop.permute.xlu1 %3232 }
 0x445   :  { %3624 = vrot.lane.b32.xlu0 %v10995_v7, %s7474_s28  ;;  %3498 = vrot.lane.b32.xlu1 %v11026_v16, %s7472_s5 }
 0x447   :  { %v3611_v42 = vpop.permute.xlu0 %3610  ;;  %v11148_v0 = vpop.permute.xlu1 %3484 }
 0x448   :  { %v3654_v11 = vmax.f32 %v3590_v41, %v3611_v42 }
 0x449   :  { %3310 = vrot.lane.b32.xlu0 %v11116_v25, %s7469_s8  ;;  %3718 = vrot.lane.b32.xlu1 %v3191_v3, %s7468_s0 }
 0x44a   :  { %v3670_v20 = vmax.f32 %v3654_v11, %v3179_v63  ;;  %v218_v63 = vld [vmem:[%s12719_s2 + $0x68] sm:$0xff] }
 0x44b   :  { %v11159_v8 = vpop.permute.xlu0 %3296  ;;  %v3705_v4 = vpop.permute.xlu1 %3704 }
 0x44c   :  { %v3749_v62 = vmax.f32 %v3669_v29, %v3705_v4 }
 0x44d   :  { %3562 = vrot.lane.b32.xlu0 %v11026_v16, %s7473_s26  ;;  %3436 = vrot.lane.b32.xlu1 %v11065_v43, %s7471_s1 }
 0x44e   :  { %6571 = vmatmul.mubr.msk.f32.gmra.mrb[18].mxu1 %vm3766_vm7, %v3749_v62  ;;  %v3335_v62 = vmax.f32 %v3271_v50, %v11055_v55  ;;  %v220_v55 = vld [vmem:[%s12719_s2 + $0x78] sm:$0xff]  ;;  %v12720_v50 = vmax.f32 %v10798_v6, 0.0 }
 0x44f   :  { %v3549_v28 = vpop.permute.xlu0 %3548  ;;  %v11171_v39 = vpop.permute.xlu1 %3422  ;;  %3903 = vmatprep.mubr.f32.mxu1 %v12508_v22  ;;  %v6987_v59 = vpack.c.bf16 %v220_v55, %v218_v63 }
 0x450   :  { %v3399_v13 = vmax.f32 %v3335_v62, %v11086_v24  ;;  %v217_v24 = vld [vmem:[%s12719_s2 + $0x60] sm:$0xff] }
 0x451   :  { %3374 = vrot.lane.b32.xlu0 %v11116_v25, %s7470_s4  ;;  %3248 = vrot.lane.b32.xlu1 %v11169_v35, %s7468_s0 }
 0x452   :  { %v3463_v47 = vmax.f32 %v3399_v13, %v11118_v61  ;;  %v219_v61 = vld [vmem:[%s12719_s2 + $0x70] sm:$0xff]  ;;  %6988 = vmatprep.subr.bf16.mxu1 %v6987_v59  ;;  %v3201_v59 = vmax.f32 %v10762_v14, 0.0 }
 0x453   :  { %v11192_v9 = vpop.permute.xlu0 %3360  ;;  %v11194_v2 = vpop.permute.xlu1 %3234  ;;  %v6989_v46 = vpack.c.bf16 %v219_v61, %v217_v24 }
 0x454   :  { %v3527_v45 = vmax.f32 %v3463_v47, %v11148_v0 }
 0x455   :  { %3626 = vrot.lane.b32.xlu0 %v11026_v16, %s7474_s28  ;;  %3500 = vrot.lane.b32.xlu1 %v11065_v43, %s7472_s5 }
 0x456   :  { %v3591_v18 = vmax.f32 %v3527_v45, %v3549_v28  ;;  %6990 = vmatpush1.bf16.msra.mxu1 %v6989_v46  ;;  %v3272_v28 = vmax.f32 %v10882_v53, %v11088_v26  ;;  %v3197_v53 = vmax.f32 %v10754_v30, 0.0 }
 0x457   :  { %v3613_v29 = vpop.permute.xlu0 %3612  ;;  %v3487_v4 = vpop.permute.xlu1 %3486 }
 0x458   :  { %v3655_v41 = vmax.f32 %v3591_v18, %v3613_v29 }
 0x459   :  { %3312 = vrot.lane.b32.xlu0 %v11169_v35, %s7469_s8  ;;  %3720 = vrot.lane.b32.xlu1 %v3193_v57, %s7468_s0 }
 0x45b   :  { %v11210_v15 = vpop.permute.xlu0 %3298  ;;  %v3707_v42 = vpop.permute.xlu1 %3706 }
 0x45c   :  { %v3750_v52 = vmax.f32 %v3670_v20, %v3707_v42  ;;  %v3671_v20 = vmax.f32 %v3655_v41, %v12720_v50 }
 0x45d   :  { %3564 = vrot.lane.b32.xlu0 %v11065_v43, %s7473_s26  ;;  %3438 = vrot.lane.b32.xlu1 %v11116_v25, %s7471_s1 }
 0x45e   :  { %6572 = vmatmul.mubr.msk.f32.gmra.mrb[20].mxu1 %vm3766_vm7, %v3750_v52  ;;  %v3336_v52 = vmax.f32 %v3272_v28, %v11106_v49 }
 0x45f   :  { %v3551_v23 = vpop.permute.xlu0 %3550  ;;  %v11219_v44 = vpop.permute.xlu1 %3424  ;;  %3909 = vmatprep.mubr.f32.mxu1 %v12508_v22 }
 0x460   :  { %v3400_v13 = vmax.f32 %v3336_v52, %v11139_v58  ;;  %v3199_v58 = vmax.f32 %v10758_v34, 0.0 }
 0x461   :  { %3502 = vrot.lane.b32.xlu0 %v11116_v25, %s7472_s5  ;;  %3376 = vrot.lane.b32.xlu1 %v11169_v35, %s7470_s4 }
 0x462   :  { %v3464_v47 = vmax.f32 %v3400_v13, %v11171_v39 }
 0x463   :  { %v11241_v37 = vpop.permute.xlu0 %3362  ;;  %v11243_v19 = vpop.permute.xlu1 %3236 }
 0x464   :  { %v3528_v49 = vmax.f32 %v3464_v47, %v3487_v4  ;;  %v3273_v4 = vmax.f32 %v10902_v21, %v11141_v10 }
 0x465   :  { %3722 = vrot.lane.b32.xlu0 %v3195_v27, %s7468_s0  ;;  %3628 = vrot.lane.b32.xlu1 %v11065_v43, %s7474_s28 }
 0x466   :  { %v3592_v24 = vmax.f32 %v3528_v49, %v3551_v23  ;;  %v3337_v41 = vmax.f32 %v3273_v4, %v11159_v8  ;;  %v3274_v8 = vmax.f32 %v10922_v5, %v11194_v2 }
 0x467   :  { %v3615_v11 = vpop.permute.xlu0 %3614  ;;  %v3489_v0 = vpop.permute.xlu1 %3488 }
 0x468   :  { %v3656_v39 = vmax.f32 %v3592_v24, %v3615_v11  ;;  %v3401_v11 = vmax.f32 %v3337_v41, %v11192_v9  ;;  %v3338_v24 = vmax.f32 %v3274_v8, %v11210_v15  ;;  %v3275_v15 = vmax.f32 %v10942_v60, %v11243_v19 }
 0x469   :  { %3566 = vrot.lane.b32.xlu0 %v11116_v25, %s7473_s26  ;;  %3440 = vrot.lane.b32.xlu1 %v11169_v35, %s7471_s1 }
 0x46a   :  { %v3672_v23 = vmax.f32 %v3656_v39, %v3183_v33 }
 0x46b   :  { %v11258_v42 = vpop.permute.xlu0 %3300  ;;  %v3709_v62 = vpop.permute.xlu1 %3708 }
 0x46c   :  { %v3751_v29 = vmax.f32 %v3671_v20, %v3709_v62  ;;  %v3465_v62 = vmax.f32 %v3401_v11, %v11219_v44  ;;  %v3402_v44 = vmax.f32 %v3338_v24, %v11241_v37  ;;  %v3339_v11 = vmax.f32 %v3275_v15, %v11258_v42 }
 0x46d   :  { %3630 = vrot.lane.b32.xlu0 %v11116_v25, %s7474_s28  ;;  %3504 = vrot.lane.b32.xlu1 %v11169_v35, %s7472_s5 }
 0x46e   :  { %6573 = vmatmul.mubr.msk.f32.gmra.mrb[22].mxu1 %vm3766_vm7, %v3751_v29  ;;  %v3529_v52 = vmax.f32 %v3465_v62, %v3489_v0 }
 0x46f   :  { %v3553_v6 = vpop.permute.xlu0 %3552  ;;  %v3427_v26 = vpop.permute.xlu1 %3426  ;;  %3915 = vmatprep.mubr.f32.mxu1 %v12508_v22 }
 0x470   :  { %v3593_v12 = vmax.f32 %v3529_v52, %v3553_v6 }
 0x471   :  { %3568 = vrot.lane.b32.xlu0 %v11169_v35, %s7473_s26  ;;  %3724 = vrot.lane.b32.xlu1 %v3197_v53, %s7468_s0 }
 0x473   :  { %v3365_v63 = vpop.permute.xlu0 %3364  ;;  %v11276_v55 = vpop.permute.xlu1 %3238 }
 0x474   :  { %v3276_v8 = vmax.f32 %v10965_v51, %v11276_v55 }
 0x475   :  { %3726 = vrot.lane.b32.xlu0 %v3199_v58, %s7468_s0  ;;  %3632 = vrot.lane.b32.xlu1 %v11169_v35, %s7474_s28 }
 0x477   :  { %v3617_v61 = vpop.permute.xlu0 %3616  ;;  %v3491_v45 = vpop.permute.xlu1 %3490 }
 0x478   :  { %v3657_v33 = vmax.f32 %v3593_v12, %v3617_v61  ;;  %v3466_v61 = vmax.f32 %v3402_v44, %v3427_v26  ;;  %v3403_v26 = vmax.f32 %v3339_v11, %v3365_v63 }
 0x479   :  { %3728 = vrot.lane.b32.xlu1 %v3201_v59, %s7468_s0 }
 0x47a   :  { %v3673_v9 = vmax.f32 %v3657_v33, %v3185_v48  ;;  %v3530_v4 = vmax.f32 %v3466_v61, %v3491_v45 }
 0x47b   :  { %v3303_v46 = vpop.permute.xlu0 %3302  ;;  %v3711_v18 = vpop.permute.xlu1 %3710 }
 0x47c   :  { %v3752_v28 = vmax.f32 %v3672_v23, %v3711_v18 }
 0x47e   :  { %6574 = vmatmul.mubr.msk.f32.gmra.mrb[24].mxu1 %vm3766_vm7, %v3752_v28 }
 0x47f   :  { %v3555_v50 = vpop.permute.xlu0 %3554  ;;  %v3429_v20 = vpop.permute.xlu1 %3428  ;;  %3921 = vmatprep.mubr.f32.mxu1 %v12508_v22 }
 0x480   :  { %v3594_v17 = vmax.f32 %v3530_v4, %v3555_v50  ;;  %v3467_v50 = vmax.f32 %v3403_v26, %v3429_v20 }
 0x483   :  { %v3367_v21 = vpop.permute.xlu0 %3366  ;;  %v11296_v10 = vpop.permute.xlu1 %3240 }
 0x487   :  { %v3619_v29 = vpop.permute.xlu0 %3618  ;;  %v3493_v13 = vpop.permute.xlu1 %3492 }
 0x488   :  { %v3658_v48 = vmax.f32 %v3594_v17, %v3619_v29  ;;  %v3531_v12 = vmax.f32 %v3467_v50, %v3493_v13 }
 0x48a   :  { %v3674_v37 = vmax.f32 %v3658_v48, %v3187_v31 }
 0x48b   :  { %v3305_v47 = vpop.permute.xlu0 %3304  ;;  %v3713_v49 = vpop.permute.xlu1 %3712 }
 0x48c   :  { %v3753_v39 = vmax.f32 %v3673_v9, %v3713_v49  ;;  %v3340_v49 = vmax.f32 %v3276_v8, %v3303_v46 }
 0x48e   :  { %6575 = vmatmul.mubr.msk.f32.gmra.mrb[26].mxu1 %vm3766_vm7, %v3753_v39  ;;  %v3404_v39 = vmax.f32 %v3340_v49, %v3367_v21 }
 0x48f   :  { %v3557_v0 = vpop.permute.xlu0 %3556  ;;  %v3431_v6 = vpop.permute.xlu1 %3430  ;;  %3927 = vmatprep.mubr.f32.mxu1 %v12508_v22 }
 0x490   :  { %v3595_v60 = vmax.f32 %v3531_v12, %v3557_v0  ;;  %v3468_v44 = vmax.f32 %v3404_v39, %v3431_v6 }
 0x493   :  { %v3369_v23 = vpop.permute.xlu0 %3368  ;;  %v11306_v5 = vpop.permute.xlu1 %3242 }
 0x494   :  { %v3278_v38 = vmax.f32 %v11026_v16, %v11306_v5 }
 0x497   :  { %v3621_v2 = vpop.permute.xlu0 %3620  ;;  %v3495_v18 = vpop.permute.xlu1 %3494 }
 0x498   :  { %v3659_v19 = vmax.f32 %v3595_v60, %v3621_v2  ;;  %v3532_v0 = vmax.f32 %v3468_v44, %v3495_v18 }
 0x49a   :  { %v3675_v42 = vmax.f32 %v3659_v19, %v3189_v56  ;;  %v3277_v56 = vmax.f32 %v10995_v7, %v11296_v10 }
 0x49b   :  { %v3307_v41 = vpop.permute.xlu0 %3306  ;;  %v3715_v28 = vpop.permute.xlu1 %3714 }
 0x49c   :  { %v3754_v62 = vmax.f32 %v3674_v37, %v3715_v28  ;;  %v3341_v2 = vmax.f32 %v3277_v56, %v3305_v47  ;;  %v3342_v47 = vmax.f32 %v3278_v38, %v3307_v41  ;;  %v12721_v38 = vld [vmem:[#allocation14_spill] sm:$0xff] }
 0x49d   :  { %vm157_vm0 = vcmp.eq.s32.totalorder %v8250_v40, %v12721_v38 }
 0x49e   :  { %6576 = vmatmul.mubr.msk.f32.gmra.mrb[28].mxu1 %vm3766_vm7, %v3754_v62  ;;  %v3405_v37 = vmax.f32 %v3341_v2, %v3369_v23  ;;  %v6056_v34 = vsel %vm157_vm0, 1.0, %v12508_v22 }
 0x49f   :  { %v3559_v45 = vpop.permute.xlu0 %3558  ;;  %v3433_v52 = vpop.permute.xlu1 %3432  ;;  %3933 = vmatprep.mubr.f32.mxu1 %v12508_v22 }
 0x4a0   :  { %v3596_v17 = vmax.f32 %v3532_v0, %v3559_v45  ;;  %v3469_v28 = vmax.f32 %v3405_v37, %v3433_v52 }
 0x4a3   :  { %v3371_v33 = vpop.permute.xlu0 %3370  ;;  %v3245_v29 = vpop.permute.xlu1 %3244 }
 0x4a4   :  { %v3406_v50 = vmax.f32 %v3342_v47, %v3371_v33  ;;  %v3279_v5 = vmax.f32 %v11065_v43, %v3245_v29  ;;  %v12724_v47 = vld [vmem:[#allocation15_spill] sm:$0xff] }
 0x4a5   :  { %vm160_vm3 = vcmp.eq.s32.totalorder %v8250_v40, %v12724_v47 }
 0x4a7   :  { %v3623_v32 = vpop.permute.xlu0 %3622  ;;  %v3497_v31 = vpop.permute.xlu1 %3496 }
 0x4a8   :  { %v3660_v51 = vmax.f32 %v3596_v17, %v3623_v32  ;;  %v3533_v11 = vmax.f32 %v3469_v28, %v3497_v31 }
 0x4aa   :  { %v3676_v46 = vmax.f32 %v3660_v51, %v3191_v3 }
 0x4ab   :  { %v3309_v63 = vpop.permute.xlu0 %3308  ;;  %v3717_v9 = vpop.permute.xlu1 %3716 }
 0x4ac   :  { %v3755_v24 = vmax.f32 %v3675_v42, %v3717_v9  ;;  %v3343_v9 = vmax.f32 %v3279_v5, %v3309_v63 }
 0x4ae   :  { %6577 = vmatmul.mubr.msk.f32.gmra.mrb[30].mxu1 %vm3766_vm7, %v3755_v24 }
 0x4af   :  { %v3561_v20 = vpop.permute.xlu0 %3560  ;;  %v3435_v13 = vpop.permute.xlu1 %3434  ;;  %3939 = vmatprep.mubr.f32.mxu1 %v12508_v22 }
 0x4b0   :  { %v3597_v45 = vmax.f32 %v3533_v11, %v3561_v20  ;;  %v3470_v19 = vmax.f32 %v3406_v50, %v3435_v13  ;;  %v6059_v50 = vsel %vm160_vm3, 1.0, %v12508_v22 }
 0x4b3   :  { %v3373_v61 = vpop.permute.xlu0 %3372  ;;  %v3247_v4 = vpop.permute.xlu1 %3246 }
 0x4b4   :  { %v3407_v1 = vmax.f32 %v3343_v9, %v3373_v61  ;;  %v12730_v9 = vld [vmem:[#allocation21_spill] sm:$0xff] }
 0x4b5   :  { %vm166_vm9 = vcmp.eq.s32.totalorder %v8250_v40, %v12730_v9 }
 0x4b7   :  { %v3625_v55 = vpop.permute.xlu0 %3624  ;;  %v3499_v54 = vpop.permute.xlu1 %3498 }
 0x4b8   :  { %v3661_v7 = vmax.f32 %v3597_v45, %v3625_v55  ;;  %v3534_v52 = vmax.f32 %v3470_v19, %v3499_v54  ;;  %v12726_v19 = vld [vmem:[#allocation17_spill] sm:$0xff] }
 0x4b9   :  { %vm162_vm5 = vcmp.eq.s32.totalorder %v8250_v40, %v12726_v19 }
 0x4ba   :  { %v3677_v23 = vmax.f32 %v3661_v7, %v3193_v57  ;;  %v3280_v57 = vmax.f32 %v11116_v25, %v3247_v4  ;;  %v12722_v7 = vld [vmem:[#allocation16_spill] sm:$0xff] }
 0x4bb   :  { %v3311_v21 = vpop.permute.xlu0 %3310  ;;  %v3719_v48 = vpop.permute.xlu1 %3718  ;;  %vm158_vm1 = vcmp.eq.s32.totalorder %v8250_v40, %v12722_v7 }
 0x4bc   :  { %v3756_v15 = vmax.f32 %v3676_v46, %v3719_v48  ;;  %v3344_v20 = vmax.f32 %v3280_v57, %v3311_v21  ;;  %v6065_v57 = vsel %vm166_vm9, 1.0, %v12508_v22 }
 0x4be   :  { %6578 = vmatmul.mubr.msk.f32.gmra.mrb[32].mxu1 %vm3766_vm7, %v3756_v15 }
 0x4bf   :  { %v3563_v6 = vpop.permute.xlu0 %3562  ;;  %v3437_v18 = vpop.permute.xlu1 %3436  ;;  %3945 = vmatprep.mubr.f32.mxu1 %v12508_v22 }
 0x4c0   :  { %v3598_v16 = vmax.f32 %v3534_v52, %v3563_v6  ;;  %v3471_v13 = vmax.f32 %v3407_v1, %v3437_v18  ;;  %v6061_v52 = vsel %vm162_vm5, 1.0, %v12508_v22 }
 0x4c3   :  { %v3375_v62 = vpop.permute.xlu0 %3374  ;;  %v3249_v26 = vpop.permute.xlu1 %3248 }
 0x4c4   :  { %v3408_v0 = vmax.f32 %v3344_v20, %v3375_v62  ;;  %v3281_v63 = vmax.f32 %v11169_v35, %v3249_v26 }
 0x4c7   :  { %v3627_v3 = vpop.permute.xlu0 %3626  ;;  %v3501_v10 = vpop.permute.xlu1 %3500 }
 0x4c8   :  { %v3662_v42 = vmax.f32 %v3598_v16, %v3627_v3  ;;  %v3535_v17 = vmax.f32 %v3471_v13, %v3501_v10  ;;  %v12723_v3 = vld [vmem:[#allocation13_spill] sm:$0xff]  ;;  %v12728_v16 = vld [vmem:[#allocation19_spill] sm:$0xff]  ;;  %v12733_v13 = vld [vmem:[#allocation26_spill] sm:$0xff] }
 0x4c9   :  { %vm159_vm2 = vcmp.eq.s32.totalorder %v8250_v40, %v12723_v3  ;;  %vm164_vm4 = vcmp.eq.s32.totalorder %v8250_v40, %v12728_v16  ;;  %vm169_vm8 = vcmp.eq.s32.totalorder %v8250_v40, %v12733_v13  ;;  %v12737_v3 = vlaneseq }
 0x4ca   :  { %v3678_v49 = vmax.f32 %v3662_v42, %v3195_v27  ;;  %v6058_v10 = vsel %vm159_vm2, 1.0, %v12508_v22  ;;  %v6063_v5 = vsel %vm164_vm4, 1.0, %v12508_v22  ;;  %v12729_v42 = vld [vmem:[#allocation22_spill] sm:$0xff] }
 0x4cb   :  { %v3313_v12 = vpop.permute.xlu0 %3312  ;;  %v3721_v60 = vpop.permute.xlu1 %3720  ;;  %vm165_vm15 = vcmp.eq.s32.totalorder %v8250_v40, %v12729_v42 }
 0x4cc   :  { %v3757_v32 = vmax.f32 %v3677_v23, %v3721_v60  ;;  %v3345_v4 = vmax.f32 %v3281_v63, %v3313_v12  ;;  %v12725_v23 = vld [vmem:[#allocation18_spill] sm:$0xff]  ;;  %v12735_v63 = vld [vmem:[#allocation28_spill] sm:$0xff] }
 0x4cd   :  { %vm161_vm10 = vcmp.eq.s32.totalorder %v8250_v40, %v12725_v23  ;;  %vm171_vm0 = vcmp.eq.s32.totalorder %v8250_v40, %v12735_v63 }
 0x4ce   :  { %6579 = vmatmul.mubr.msk.f32.gmra.mrb[34].mxu1 %vm3766_vm7, %v3757_v32  ;;  %v6060_v12 = vsel %vm161_vm10, 1.0, %v12508_v22 }
 0x4cf   :  { %v3565_v31 = vpop.permute.xlu0 %3564  ;;  %v3439_v8 = vpop.permute.xlu1 %3438  ;;  %3951 = vmatprep.mubr.f32.mxu1 %v12508_v22 }
 0x4d0   :  { %v3599_v61 = vmax.f32 %v3535_v17, %v3565_v31  ;;  %v3472_v25 = vmax.f32 %v3408_v0, %v3439_v8  ;;  %v12727_v31 = vld [vmem:[#allocation20_spill] sm:$0xff]  ;;  %v12734_v17 = vld [vmem:[#allocation25_spill] sm:$0xff] }
 0x4d1   :  { %vm163_vm11 = vcmp.eq.s32.totalorder %v8250_v40, %v12727_v31  ;;  %vm170_vm13 = vcmp.eq.s32.totalorder %v8250_v40, %v12734_v17 }
 0x4d2   :  { %v6062_v8 = vsel %vm163_vm11, 1.0, %v12508_v22 }
 0x4d3   :  { %v3503_v41 = vpop.permute.xlu0 %3502  ;;  %v3377_v33 = vpop.permute.xlu1 %3376 }
 0x4d4   :  { %v3536_v36 = vmax.f32 %v3472_v25, %v3503_v41  ;;  %v3409_v54 = vmax.f32 %v3345_v4, %v3377_v33  ;;  %v6064_v41 = vsel %vm165_vm15, 1.0, %v12508_v22  ;;  %v12736_v25 = vld [vmem:[#allocation27_spill] sm:$0xff] }
 0x4d7   :  { %v3723_v24 = vpop.permute.xlu0 %3722  ;;  %v3629_v39 = vpop.permute.xlu1 %3628 }
 0x4d8   :  { %v3758_v44 = vmax.f32 %v3678_v49, %v3723_v24  ;;  %v3663_v27 = vmax.f32 %v3599_v61, %v3629_v39  ;;  %v12731_v49 = vld [vmem:[#allocation24_spill] sm:$0xff]  ;;  %v12732_v39 = vld [vmem:[#allocation23_spill] sm:$0xff]  ;;  %v6070_v61 = vsel %vm171_vm0, 1.0, %v12508_v22 }
 0x4d9   :  { %vm167_vm12 = vcmp.eq.s32.totalorder %v8250_v40, %v12731_v49  ;;  %vm168_vm14 = vcmp.eq.s32.totalorder %v8250_v40, %v12732_v39 }
 0x4da   :  { %6580 = vmatmul.mubr.msk.f32.gmra.mrb[36].mxu1 %vm3766_vm7, %v3758_v44  ;;  %v3679_v48 = vmax.f32 %v3663_v27, %v3197_v53  ;;  %v6066_v24 = vsel %vm167_vm12, 1.0, %v12508_v22  ;;  %v6067_v20 = vsel %vm168_vm14, 1.0, %v12508_v22  ;;  %v6068_v44 = vsel %vm169_vm8, 1.0, %v12508_v22 }
 0x4db   :  { %v3567_v43 = vpop.permute.xlu0 %3566  ;;  %v3441_v29 = vpop.permute.xlu1 %3440  ;;  %3957 = vmatprep.mubr.f32.mxu1 %v12508_v22 }
 0x4dc   :  { %v3600_v56 = vmax.f32 %v3536_v36, %v3567_v43  ;;  %v3473_v46 = vmax.f32 %v3409_v54, %v3441_v29  ;;  %v6069_v29 = vsel %vm170_vm13, 1.0, %v12508_v22 }
 0x4df   :  { %v3631_v51 = vpop.permute.xlu0 %3630  ;;  %v3505_v55 = vpop.permute.xlu1 %3504 }
 0x4e0   :  { %v3664_v21 = vmax.f32 %v3600_v56, %v3631_v51  ;;  %v3537_v37 = vmax.f32 %v3473_v46, %v3505_v55 }
 0x4e2   :  { %v3680_v35 = vmax.f32 %v3664_v21, %v3199_v58 }
 0x4e3   :  { %v3569_v2 = vpop.permute.xlu0 %3568  ;;  %v3725_v15 = vpop.permute.xlu1 %3724 }
 0x4e4   :  { %v3759_v6 = vmax.f32 %v3679_v48, %v3725_v15  ;;  %v3601_v18 = vmax.f32 %v3537_v37, %v3569_v2 }
 0x4e6   :  { %6581 = vmatmul.mubr.msk.f32.gmra.mrb[38].mxu1 %vm3766_vm7, %v3759_v6  ;;  %v11455_v6 = vld [vmem:[%s12247_s10 + $0x8] sm:$0xff] }
 0x4e7   :  { %v3727_v28 = vpop.permute.xlu0 %3726  ;;  %v3633_v11 = vpop.permute.xlu1 %3632  ;;  %3963 = vmatprep.mubr.f32.mxu1 %v12508_v22 }
 0x4e8   :  { %v3760_v62 = vmax.f32 %v3680_v35, %v3727_v28  ;;  %v3665_v26 = vmax.f32 %v3601_v18, %v3633_v11  ;;  %v11460_v18 = vld [vmem:[%s12247_s10 + $0x10] sm:$0xff]  ;;  %v11465_v35 = vld [vmem:[%s12247_s10 + $0x18] sm:$0xff]  ;;  %v11470_v28 = vld [vmem:[%s12247_s10 + $0x20] sm:$0xff] }
 0x4e9   :  { %v11475_v11 = vld [vmem:[%s12247_s10 + $0x28] sm:$0xff] }
 0x4ea   :  { %6582 = vmatmul.mubr.msk.f32.gmra.mrb[40].mxu1 %vm3766_vm7, %v3760_v62  ;;  %v3681_v30 = vmax.f32 %v3665_v26, %v3201_v59  ;;  %v6057_v59 = vsel %vm158_vm1, 1.0, %v12508_v22  ;;  %vm172_vm1 = vcmp.eq.s32.totalorder %v8250_v40, %v12736_v25  ;;  %v11480_v62 = vld [vmem:[%s12247_s10 + $0x30] sm:$0xff]  ;;  %v11485_v26 = vld [vmem:[%s12247_s10 + $0x38] sm:$0xff] }
 0x4eb   :  { %v3729_v53 = vpop.permute.xlu1 %3728  ;;  %3969 = vmatprep.mubr.f32.mxu1 %v12508_v22  ;;  %v6071_v4 = vsel %vm172_vm1, 1.0, %v12508_v22 }
 0x4ec   :  { %v3761_v45 = vmax.f32 %v3681_v30, %v3729_v53 }
 0x4ee   :  { %6583 = vmatmul.mubr.msk.f32.gmra.mrb[42].mxu1 %vm3766_vm7, %v3761_v45 }
 0x4ef   :  { %4088 = vmatprep.mubr.f32.mxu1 %v12508_v22 }
 0x4f1   :  { %v11355_v58 = vpop.f32.mrb[12].mxu1 }
 0x4f2   :  { %v3883_v14 = vpop.f32.mrb[13].mxu1  ;;  %6584 = vmatmul.mubr.msk.f32.vlgmr.msra.gmra.mrb[44].mxu1 %vm2799_vm6, %v6056_v34 }
 0x4f3   :  { %4094 = vmatprep.mubr.f32.mxu1 %v12508_v22 }
 0x4f6   :  { %6585 = vmatmul.mubr.msk.f32.gmra.mrb[46].mxu1 %vm2799_vm6, %v6057_v59 }
 0x4f7   :  { %4100 = vmatprep.mubr.f32.mxu1 %v12508_v22 }
 0x4fa   :  { %6586 = vmatmul.mubr.msk.f32.gmra.mrb[48].mxu1 %vm2799_vm6, %v6058_v10  ;;  %v11496_v10 = vshrl.u32 %v12737_v3, 7 }
 0x4fb   :  { %4106 = vmatprep.mubr.f32.mxu1 %v12508_v22 }
 0x4fc   :  { %v4189_v23 = vsub.s32 0, %v11496_v10 }
 0x4fe   :  { %6587 = vmatmul.mubr.msk.f32.gmra.mrb[50].mxu1 %vm2799_vm6, %v6059_v50 }
 0x4ff   :  { %4112 = vmatprep.mubr.f32.mxu1 %v12508_v22 }
 0x501   :  { %v3887_v60 = vpop.f32.mrb[14].mxu1 }
 0x502   :  { %v11379_v32 = vpop.f32.mrb[15].mxu1  ;;  %6588 = vmatmul.mubr.msk.f32.gmra.mrb[52].mxu1 %vm2799_vm6, %v6060_v12  ;;  %v4185_v60 = vld [vmem:[%s12248_s11] sm:$0x3]  ;;  %s11549_s11 = smov 0  }
 0x503   :  { %4118 = vmatprep.mubr.f32.mxu1 %v12508_v22 }
 0x506   :  { %6589 = vmatmul.mubr.msk.f32.gmra.mrb[54].mxu1 %vm2799_vm6, %v6061_v52  ;;  %v11506_v52 = vrot.slane %v4185_v60, %v4189_v23 }
 0x507   :  { %4124 = vmatprep.mubr.f32.mxu1 %v12508_v22 }
 0x50a   :  { %6590 = vmatmul.mubr.msk.f32.gmra.mrb[56].mxu1 %vm2799_vm6, %v6062_v8  ;;  %v4193_v8 = vsub.s32 1, %v11496_v10 }
 0x50b   :  { %4130 = vmatprep.mubr.f32.mxu1 %v12508_v22 }
 0x50c   :  { %v11511_v9 = vrot.slane %v4185_v60, %v4193_v8 }
 0x50e   :  { %6591 = vmatmul.mubr.msk.f32.gmra.mrb[58].mxu1 %vm2799_vm6, %v6063_v5 }
 0x50f   :  { %4136 = vmatprep.mubr.f32.mxu1 %v12508_v22 }
 0x511   :  { %v11399_v33 = vpop.f32.mrb[16].mxu1 }
 0x512   :  { %v3895_v1 = vpop.f32.mrb[17].mxu1  ;;  %6592 = vmatmul.mubr.msk.f32.gmra.mrb[60].mxu1 %vm2799_vm6, %v6064_v41 }
 0x513   :  { %4142 = vmatprep.mubr.f32.mxu1 %v12508_v22 }
 0x516   :  { %6593 = vmatmul.mubr.msk.f32.gmra.mrb[62].mxu1 %vm2799_vm6, %v6065_v57 }
 0x517   :  { %4148 = vmatprep.mubr.f32.mxu1 %v12508_v22 }
 0x51a   :  { %6594 = vmatmul.mubr.msk.f32.gmra.mrb[64].mxu1 %vm2799_vm6, %v6066_v24 }
 0x51b   :  { %4154 = vmatprep.mubr.f32.mxu1 %v12508_v22 }
 0x51e   :  { %6595 = vmatmul.mubr.msk.f32.gmra.mrb[66].mxu1 %vm2799_vm6, %v6067_v20 }
 0x51f   :  { %4160 = vmatprep.mubr.f32.mxu1 %v12508_v22 }
 0x521   :  { %v3899_v0 = vpop.f32.mrb[18].mxu1 }
 0x522   :  { %v11423_v43 = vpop.f32.mrb[19].mxu1  ;;  %6596 = vmatmul.mubr.msk.f32.gmra.mrb[68].mxu1 %vm2799_vm6, %v6068_v44 }
 0x523   :  { %4166 = vmatprep.mubr.f32.mxu1 %v12508_v22 }
 0x526   :  { %6597 = vmatmul.mubr.msk.f32.gmra.mrb[70].mxu1 %vm2799_vm6, %v6069_v29 }
 0x527   :  { %4172 = vmatprep.mubr.f32.mxu1 %v12508_v22 }
 0x52a   :  { %6598 = vmatmul.mubr.msk.f32.gmra.mrb[72].mxu1 %vm2799_vm6, %v6070_v61 }
 0x52b   :  { %4178 = vmatprep.mubr.f32.mxu1 %v12508_v22  ;;  %v11450_v22 = vld [vmem:[%s12247_s10] sm:$0xff] }
 0x52e   :  { %6599 = vmatmul.mubr.msk.f32.gmra.mrb[74].mxu1 %vm2799_vm6, %v6071_v4 }
 0x531   :  { %v3905_v36 = vpop.f32.mrb[20].mxu1 }
 0x532   :  { %v3907_v27 = vpop.f32.mrb[21].mxu1 }
 0x541   :  { %v3911_v51 = vpop.f32.mrb[22].mxu1 }
 0x542   :  { %v3913_v55 = vpop.f32.mrb[23].mxu1 }
 0x551   :  { %v11439_v54 = vpop.f32.mrb[24].mxu1 }
 0x552   :  { %v3919_v56 = vpop.f32.mrb[25].mxu1 }
 0x561   :  { %v3923_v46 = vpop.f32.mrb[26].mxu1 }
 0x562   :  { %v11441_v21 = vpop.f32.mrb[27].mxu1 }
 0x571   :  { %v11443_v48 = vpop.f32.mrb[28].mxu1 }
 0x572   :  { %v3931_v2 = vpop.f32.mrb[29].mxu1 }
 0x581   :  { %v3935_v15 = vpop.f32.mrb[30].mxu1 }
 0x582   :  { %v11445_v37 = vpop.f32.mrb[31].mxu1 }
 0x591   :  { %v11487_v30 = vpop.f32.mrb[32].mxu1 }
 0x592   :  { %v3943_v53 = vpop.f32.mrb[33].mxu1 }
 0x5a1   :  { %v3947_v45 = vpop.f32.mrb[34].mxu1 }
 0x5a2   :  { %v11489_v38 = vpop.f32.mrb[35].mxu1 }
 0x5ad   :  { %v11491_v34 = vpop.f32.mrb[36].mxu1 }
 0x5ae   :  { %v3955_v7 = vpop.f32.mrb[37].mxu1 }
 0x5b9   :  { %v3959_v14 = vpop.f32.mrb[38].mxu1 }
 0x5ba   :  { %v11493_v59 = vpop.f32.mrb[39].mxu1 }
 0x5bd   :  { %v11498_v47 = vpop.f32.mrb[40].mxu1 }
 0x5be   :  { %v3967_v50 = vpop.f32.mrb[41].mxu1 }
 0x5c1   :  { %v3971_v12 = vpop.f32.mrb[42].mxu1 }
 0x5c2   :  { %v11504_v19 = vpop.f32.mrb[43].mxu1 }
 0x5c5   :  { %v4090_v31 = vpop.f32.mrb[44].mxu1 }
 0x5c6   :  { %v4091_v16 = vadd.f32 %v4090_v31, %v11355_v58  ;;  %v4092_v5 = vpop.f32.mrb[45].mxu1 }
 0x5c8   :  { %v4197_v42 = vadd.f32 %v11506_v52, %v4091_v16 }
 0x5c9   :  { %v4096_v41 = vpop.f32.mrb[46].mxu1 }
 0x5ca   :  { %4254 = vst [vmem:[#allocation2] sm:$0xff] %v4197_v42  ;;  %v4098_v1 = vpop.f32.mrb[47].mxu1 }
 0x5cb   :  { %v4099_v57 = vadd.f32 %v4098_v1, %v11379_v32 }
 0x5cd   :  { %v4200_v49 = vadd.f32 %v11511_v9, %v4099_v57  ;;  %v4102_v24 = vpop.f32.mrb[48].mxu1 }
 0x5ce   :  { %v4103_v39 = vadd.f32 %v4102_v24, %v11399_v33  ;;  %v4104_v20 = vpop.f32.mrb[49].mxu1 }
 0x5cf   :  { %4255 = vst [vmem:[#allocation2 + $0x8] sm:$0xff] %v4200_v49 }
 0x5d0   :  { %v4201_v13 = vadd.f32 %v11506_v52, %v4103_v39 }
 0x5d1   :  { %v4108_v58 = vpop.f32.mrb[50].mxu1 }
 0x5d2   :  { %4256 = vst [vmem:[#allocation2 + $0x10] sm:$0xff] %v4201_v13  ;;  %v4110_v44 = vpop.f32.mrb[51].mxu1 }
 0x5d3   :  { %v4111_v0 = vadd.f32 %v4110_v44, %v11423_v43 }
 0x5d5   :  { %v4204_v17 = vadd.f32 %v11511_v9, %v4111_v0  ;;  %v4114_v29 = vpop.f32.mrb[52].mxu1 }
 0x5d6   :  { %v4115_v63 = vadd.f32 %v4114_v29, %v3905_v36  ;;  %v4116_v61 = vpop.f32.mrb[53].mxu1  ;;  %v11545_v29 = vmov 0.0  }
 0x5d7   :  { %4257 = vst [vmem:[#allocation2 + $0x18] sm:$0xff] %v4204_v17  ;;  %v11541_v17 = vmov 0.0  }
 0x5d8   :  { %v4205_v32 = vadd.f32 %v11506_v52, %v4115_v63  ;;  %v11547_v63 = vmov 0.0  }
 0x5d9   :  { %v4120_v25 = vpop.f32.mrb[54].mxu1 }
 0x5da   :  { %4258 = vst [vmem:[#allocation2 + $0x20] sm:$0xff] %v4205_v32  ;;  %v4122_v33 = vpop.f32.mrb[55].mxu1 }
 0x5db   :  { %v4123_v4 = vadd.f32 %v4122_v33, %v3913_v55 }
 0x5dd   :  { %v4208_v27 = vadd.f32 %v11511_v9, %v4123_v4  ;;  %v4126_v51 = vpop.f32.mrb[56].mxu1 }
 0x5de   :  { %v4127_v56 = vadd.f32 %v4126_v51, %v11439_v54  ;;  %v4128_v46 = vpop.f32.mrb[57].mxu1 }
 0x5df   :  { %4259 = vst [vmem:[#allocation2 + $0x28] sm:$0xff] %v4208_v27 }
 0x5e0   :  { %v4209_v43 = vadd.f32 %v11506_v52, %v4127_v56 }
 0x5e1   :  { %v4132_v2 = vpop.f32.mrb[58].mxu1 }
 0x5e2   :  { %4260 = vst [vmem:[#allocation2 + $0x30] sm:$0xff] %v4209_v43  ;;  %v4134_v36 = vpop.f32.mrb[59].mxu1 }
 0x5e3   :  { %v4135_v15 = vadd.f32 %v4134_v36, %v11441_v21 }
 0x5e5   :  { %v4212_v53 = vadd.f32 %v11511_v9, %v4135_v15  ;;  %v4138_v45 = vpop.f32.mrb[60].mxu1 }
 0x5e6   :  { %v4139_v7 = vadd.f32 %v4138_v45, %v11443_v48  ;;  %v4140_v55 = vpop.f32.mrb[61].mxu1 }
 0x5e7   :  { %4261 = vst [vmem:[#allocation2 + $0x38] sm:$0xff] %v4212_v53 }
 0x5e8   :  { %v4213_v14 = vadd.f32 %v11506_v52, %v4139_v7 }
 0x5e9   :  { %v4144_v3 = vpop.f32.mrb[62].mxu1 }
 0x5ea   :  { %4262 = vst [vmem:[#allocation2 + $0x40] sm:$0xff] %v4213_v14  ;;  %v4146_v54 = vpop.f32.mrb[63].mxu1 }
 0x5eb   :  { %v4147_v50 = vadd.f32 %v4146_v54, %v11445_v37 }
 0x5ed   :  { %v4216_v23 = vadd.f32 %v11511_v9, %v4147_v50  ;;  %v4150_v12 = vpop.f32.mrb[64].mxu1 }
 0x5ee   :  { %v4151_v60 = vadd.f32 %v4150_v12, %v11487_v30  ;;  %v4152_v21 = vpop.f32.mrb[65].mxu1 }
 0x5ef   :  { %4263 = vst [vmem:[#allocation2 + $0x48] sm:$0xff] %v4216_v23 }
 0x5f0   :  { %v4217_v31 = vadd.f32 %v11506_v52, %v4151_v60 }
 0x5f1   :  { %v4156_v8 = vpop.f32.mrb[66].mxu1 }
 0x5f2   :  { %4264 = vst [vmem:[#allocation2 + $0x50] sm:$0xff] %v4217_v31  ;;  %v4158_v48 = vpop.f32.mrb[67].mxu1 }
 0x5f3   :  { %v4159_v16 = vadd.f32 %v4158_v48, %v11489_v38 }
 0x5f5   :  { %v4220_v5 = vadd.f32 %v11511_v9, %v4159_v16  ;;  %v4162_v42 = vpop.f32.mrb[68].mxu1 }
 0x5f6   :  { %v4163_v41 = vadd.f32 %v4162_v42, %v11491_v34  ;;  %v4164_v37 = vpop.f32.mrb[69].mxu1 }
 0x5f7   :  { %4265 = vst [vmem:[#allocation2 + $0x58] sm:$0xff] %v4220_v5 }
 0x5f8   :  { %v4221_v1 = vadd.f32 %v11506_v52, %v4163_v41 }
 0x5f9   :  { %v4168_v57 = vpop.f32.mrb[70].mxu1 }
 0x5fa   :  { %4266 = vst [vmem:[#allocation2 + $0x60] sm:$0xff] %v4221_v1  ;;  %v4170_v30 = vpop.f32.mrb[71].mxu1 }
 0x5fb   :  { %v4171_v49 = vadd.f32 %v4170_v30, %v11493_v59  ;;  %v11543_v59 = vmov 0.0  }
 0x5fd   :  { %v4224_v24 = vadd.f32 %v11511_v9, %v4171_v49  ;;  %v4174_v39 = vpop.f32.mrb[72].mxu1 }
 0x5fe   :  { %v4175_v20 = vadd.f32 %v4174_v39, %v11498_v47  ;;  %v4176_v38 = vpop.f32.mrb[73].mxu1 }
 0x5ff   :  { %4267 = vst [vmem:[#allocation2 + $0x68] sm:$0xff] %v4224_v24 }
 0x600   :  { %v4225_v13 = vadd.f32 %v11506_v52, %v4175_v20 }
 0x601   :  { %v4180_v58 = vpop.f32.mrb[74].mxu1 }
 0x602   :  { %4268 = vst [vmem:[#allocation2 + $0x70] sm:$0xff] %v4225_v13  ;;  %v4182_v34 = vpop.f32.mrb[75].mxu1 }
 0x603   :  { %v4183_v44 = vadd.f32 %v4182_v34, %v11504_v19 }
 0x605   :  { %v4228_v0 = vadd.f32 %v11511_v9, %v4183_v44 }
 0x607   :  { %4269 = vst [vmem:[#allocation2 + $0x78] sm:$0xff] %v4228_v0 }
 0x608 LB: > { %v6991_v47 = vpack.c.bf16 %v11465_v35, %v11455_v6  ;;  %v6993_v19 = vpack.c.bf16 %v11460_v18, %v11450_v22  ;;  %v6995_v52 = vpack.c.bf16 %v11485_v26, %v11475_v11  ;;  %s7475_s2 = smov 64   ;;  %v6997_v9 = vpack.c.bf16 %v11480_v62, %v11470_v28  ;;  %s6602_s9 = sshll.u32 %s7443_s11, 4  ;;  %s7443_s11 = sphi %s11549_s11, %s4283_s11   ;;  %v7439_v63 = vphi %v11547_v63, %v4426_v63   ;;  %v7435_v29 = vphi %v11545_v29, %v4427_v29   ;;  %v7431_v59 = vphi %v11543_v59, %v12739_v59   ;;  %v7427_v17 = vphi %v11541_v17, %v12738_v17  }
 0x609   : > { %4292 = vrot.lane.b32.xlu0 %v7435_v29, %s7475_s2  ;;  %v7476_v61 = vmov 0.0   ;;  %vm4294_vm2 = vcmask 261120   ;;  %s4377_s6 = scalar_lea.vmem [#allocation2], %s6602_s9  ;;  %s7477_s29 = smov 32  }
 0x60a   : > { %7081 = vmatprep.subr.bf16.mxu1 %v6991_v47  ;;  %6992 = vmatprep.subr.bf16.mxu0 %v6991_v47  ;;  %s4283_s11 = sadd.s32 1, %s7443_s11  }
 0x60b   : > { %7083 = vmatpush1.bf16.msra.mxu1 %v6993_v19  ;;  %6994 = vmatpush1.bf16.msra.mxu0 %v6993_v19  ;;  %p4280_p0 = scmp.ge.s32.totalorder %s4283_s11, 8  }
 0x60c   : > { %7082 = vmatprep.subr.bf16.mxu1 %v6995_v52  ;;  %4369 = vmatprep.mubr.f32.mxu1 %v7476_v61  ;;  %v12740_v30 = vmov (%p4280_p0), 0   ;;  %s12741_s3 = sld [smem:[#allocation126_spill]] (%p4280_p0)  ;;  %v4432_v24 = vld [vmem:[%s12249_s12 + $0x20] sm:$0xff] (%p4280_p0)  ;;  %v4433_v39 = vld [vmem:[%s12249_s12 + $0x28] sm:$0xff] (%p4280_p0)  ;;  %v7478_v20 = vmov (%p4280_p0), 0.0|0.0   ;;  %v4434_v6 = vld [vmem:[%s12249_s12 + $0x30] sm:$0xff] (%p4280_p0) }
 0x60d   : > { %6996 = vmatprep.subr.bf16.mxu0 %v6995_v52  ;;  %4290 = vrot.lane.b32.xlu0 %v7439_v63, %s7475_s2  ;;  %v7000_v22 = vpack.c.bf16 (%p4280_p0), %v4433_v39, %v4432_v24  ;;  %v4435_v18 = vld [vmem:[%s12249_s12 + $0x38] sm:$0xff] (%p4280_p0)  ;;  %v4428_v28 = vld [vmem:[%s12249_s12] sm:$0xff] (%p4280_p0)  ;;  %v4429_v11 = vld [vmem:[%s12249_s12 + $0x8] sm:$0xff] (%p4280_p0)  ;;  %vm7479_vm3 = vmmov (%p4280_p0), 0   ;;  %v12742_v38 = vmov (%p4280_p0), 0.0   ;;  %s12743_s2 = sld [smem:[#allocation129_spill]] (%p4280_p0) }
 0x60e   : > { %4363 = vmatprep.mubr.f32.mxu0 %v7476_v61  ;;  %v4378_v27 = vld [vmem:[%s4377_s6] sm:$0xff]  ;;  %v4379_v51 = vld [vmem:[%s4377_s6 + $0x8] sm:$0xff]  ;;  %7311 = vset.pattern.permute.xlu1 (%p4280_p0), %v12740_v30  ;;  %v7003_v62 = vpack.c.bf16 (%p4280_p0), %v4435_v18, %v4434_v6  ;;  %v7006_v26 = vpack.c.bf16 (%p4280_p0), %v4429_v11, %v4428_v28  ;;  %v4430_v13 = vld [vmem:[%s12249_s12 + $0x10] sm:$0xff] (%p4280_p0)  ;;  %s12746_s30 = sld [smem:[#allocation127_spill]] (%p4280_p0) }
 0x60f   : > { %7084 = vmatpush1.bf16.msra.mxu1 %v6997_v9  ;;  %6998 = vmatpush1.bf16.msra.mxu0 %v6997_v9  ;;  %v4431_v58 = vld [vmem:[%s12249_s12 + $0x18] sm:$0xff] (%p4280_p0)  ;;  %v4706_v9 = vld [vmem:[%s12251_s14] sm:$0xff] (%p4280_p0)  ;;  %v4707_v61 = vld [vmem:[%s12251_s14 + $0x8] sm:$0xff] (%p4280_p0) }
 0x610   :  { %6999 = vmatprep.subr.bf16.mxu0 (%p4280_p0), %v7478_v20  ;;  %7005 = vmatprep.subr.bf16.mxu1 (%p4280_p0), %v7478_v20  ;;  %v7009_v44 = vpack.c.bf16 (%p4280_p0), %v4431_v58, %v4430_v13  ;;  %v4861_v6 = vld [vmem:[%s12253_s16 + $0x8] sm:$0xff] (%p4280_p0) }
 0x611   :  { %7312 = vset.pattern.permute.xlu0 (%p4280_p0), %v12740_v30 }
 0x612   :  { %v4632_v49 = vld [vmem:[%s12741_s3] sm:$0xff] (%p4280_p0)  ;;  %v4633_v35 = vld [vmem:[%s12741_s3 + $0x8] sm:$0xff] (%p4280_p0)  ;;  %v4634_v34 = vld [vmem:[%s12741_s3 + $0x10] sm:$0xff] (%p4280_p0) }
 0x613   :  { %v11634_v0 = vld [vmem:[%s12743_s2] sm:$0xff] (%p4280_p0)   ;;  %v4639_v47 = vld [vmem:[%s12741_s3 + $0x38] sm:$0xff] (%p4280_p0)  ;;  %v4638_v19 = vld [vmem:[%s12741_s3 + $0x30] sm:$0xff] (%p4280_p0) }
 0x614   :  { %v4640_v52 = vld [vmem:[%s12741_s3 + $0x40] sm:$0xff] (%p4280_p0) }
 0x67b   : > { %v4293_v32 = vpop.permute.xlu0 %4292 }
 0x67c   : > { %6601 = vmatmul.mubr.msk.f32.vlgmr.msra.gmra.mrb[0].mxu1 %vm4294_vm2, %v4293_v32  ;;  %v7012_v32 = vpack.c.bf16 (%p4280_p0), %v4707_v61, %v4706_v9 }
 0x67d   :  { %7007 = vmatpush3.bf16.msra.mxu1 (%p4280_p0), %v7006_v26  ;;  %6761 = vmatprep.mubr.msk.f32.mxu1 (%p4280_p0), %vm7479_vm3, %v12742_v38 }
 0x67e   :  { %7008 = vmatprep.subr.bf16.mxu1 (%p4280_p0), %v7478_v20 }
 0x67f   : > { %v4291_v25 = vpop.permute.xlu0 %4290 }
 0x680   : > { %6600 = vmatmul.mubr.msk.f32.vlgmr.msra.gmra.mrb[0].mxu0 %vm4294_vm2, %v4291_v25  ;;  %v4708_v25 = vld [vmem:[%s12251_s14 + $0x10] sm:$0xff] (%p4280_p0) }
 0x681   :  { %7001 = vmatpush3.bf16.msra.mxu0 (%p4280_p0), %v7000_v22  ;;  %6750 = vmatprep.mubr.msk.f32.mxu0 (%p4280_p0), %vm7479_vm3, %v12742_v38  ;;  %v4860_v22 = vld [vmem:[%s12253_s16] sm:$0xff] (%p4280_p0) }
 0x682   :  { %7002 = vmatprep.subr.bf16.mxu0 (%p4280_p0), %v7478_v20  ;;  %7010 = vmatpush3.bf16.msra.mxu1 (%p4280_p0), %v7009_v44  ;;  %v7024_v18 = vpack.c.bf16 (%p4280_p0), %v4861_v6, %v4860_v22 }
 0x683   :  { %7023 = vmatprep.subr.bf16.mxu1 (%p4280_p0), %v7478_v20 }
 0x685   :  { %7004 = vmatpush3.bf16.msra.mxu0 (%p4280_p0), %v7003_v62 }
 0x686   :  { %7011 = vmatprep.subr.bf16.mxu0 (%p4280_p0), %v7478_v20 }
 0x74f   : > { %v4371_v33 = vpop.f32.mrb[0].mxu1 }
 0x750   : > { %v4373_v4 = vpop.f32.mrb[1].mxu1  ;;  %v4709_v33 = vld [vmem:[%s12251_s14 + $0x18] sm:$0xff] (%p4280_p0) }
 0x751   : > { %v4383_v2 = vadd.f32 %v4379_v51, %v4373_v4  ;;  %v4710_v51 = vld [vmem:[%s12251_s14 + $0x20] sm:$0xff] (%p4280_p0) }
 0x753   : > { %v4365_v56 = vpop.f32.mrb[0].mxu0  ;;  %v4385_v45 = vmul.f32 0.5, %v4383_v2 }
 0x754   : > { %v4382_v46 = vadd.f32 %v4378_v27, %v4365_v56  ;;  %v4367_v43 = vpop.f32.mrb[1].mxu0  ;;  %v7015_v27 = vpack.c.bf16 (%p4280_p0), %v4709_v33, %v4708_v25  ;;  %v4711_v56 = vld [vmem:[%s12251_s14 + $0x28] sm:$0xff] (%p4280_p0) }
 0x755   :  { %v7018_v43 = vpack.c.bf16 (%p4280_p0), %v4711_v56, %v4710_v51 }
 0x756   : > { %7299 = vtanh.f32 %v4382_v46  ;;  %v4384_v53 = vmul.f32 0.5, %v4382_v46 }
 0x757   : > { %7301 = vtanh.f32 %v4383_v2  ;;  %v4712_v2 = vld [vmem:[%s12251_s14 + $0x30] sm:$0xff] (%p4280_p0) }
 0x758   : > { %7303 = vtanh.f32 %v4384_v53 }
 0x759   : > { %7305 = vtanh.f32 %v4385_v45 }
 0x760   : > { %v7300_v36 = vpop.eup %7299 }
 0x761   : > { %4398 = vrot.lane.b32.xlu1 %v7300_v36, %s7477_s29  ;;  %v7302_v15 = vpop.eup %7301  ;;  %v4713_v36 = vld [vmem:[%s12251_s14 + $0x38] sm:$0xff] (%p4280_p0) }
 0x762   : > { %v7304_v7 = vpop.eup %7303 }
 0x763   : > { %v4388_v55 = vadd.f32 1.0, %v7304_v7  ;;  %v7306_v14 = vpop.eup %7305 }
 0x764   : > { %v4389_v54 = vadd.f32 1.0, %v7306_v14 }
 0x765   : > { %4400 = vrot.lane.b32.xlu1 %v7302_v15, %s7477_s29  ;;  %v4390_v3 = vmul.f32 0.5, %v4388_v55  ;;  %v7021_v15 = vpack.c.bf16 (%p4280_p0), %v4713_v36, %v4712_v2  ;;  %v4935_v2 = vld [vmem:[%s12252_s15] sm:$0xff] (%p4280_p0)  ;;  %v4936_v36 = vld [vmem:[%s12252_s15 + $0x8] sm:$0xff] (%p4280_p0) }
 0x766   : > { %v4391_v12 = vmul.f32 0.5, %v4389_v54 }
 0x767   : > { %v4394_v31 = vmul.f32 %v7431_v59, %v4390_v3 }
 0x768   : > { %v4395_v16 = vmul.f32 %v7427_v17, %v4391_v12 }
 0x7d3   : > { %v4399_v50 = vpop.permute.xlu1 %4398 }
 0x7d4   : > { %v4404_v23 = vmul.f32 %v4399_v50, %v4390_v3 }
 0x7d6   : > { %4408 = vrot.lane.b32.xlu0 %v4404_v23, %s7477_s29 }
 0x7d7   : > { %v4401_v60 = vpop.permute.xlu1 %4400 }
 0x7d8   : > { %v4405_v21 = vmul.f32 %v4401_v60, %v4391_v12 }
 0x7da   : > { %4410 = vrot.lane.b32.xlu1 %v4405_v21, %s7477_s29 }
 0x848   : > { %v4409_v8 = vpop.permute.xlu0 %4408 }
 0x849   : > { %v4414_v48 = vadd.f32 %v4409_v8, %v4394_v31  }
 0x84b   : > { %7307 = vtanh.f32 %v4414_v48  ;;  %v12739_v59 = vmov %v4414_v48 }
 0x84c   : > { %v4411_v5 = vpop.permute.xlu1 %4410 }
 0x84d   : > { %v4415_v42 = vadd.f32 %v4411_v5, %v4395_v16  }
 0x84f   : > { %7309 = vtanh.f32 %v4415_v42  ;;  %v12738_v17 = vmov %v4415_v42 }
 0x850   :  { %v4635_v17 = vld [vmem:[%s12741_s3 + $0x18] sm:$0xff] (%p4280_p0) }
 0x855   : > { %v7308_v41 = vpop.eup %7307 }
 0x856   : > { %4420 = vrot.lane.b32.xlu0 %v7308_v41, %s7477_s29 }
 0x859   : > { %v7310_v37 = vpop.eup %7309 }
 0x85a   : > { %4422 = vrot.lane.b32.xlu1 %v7310_v37, %s7477_s29  ;;  %4437 = vrot.lane.b32.xlu0 (%p4280_p0), %v4415_v42, %s7469_s8  ;;  %s12744_s29 = sld [smem:[#allocation130_spill]] (%p4280_p0) }
 0x85e   :  { %4653 = vperm.xlu1 (%p4280_p0), %7311, %v4632_v49   ;;  %4513 = vrot.lane.b32.xlu0 (%p4280_p0), %v4414_v48, %s7469_s8 }
 0x860   :  { %v11645_v59 = vld [vmem:[%s12744_s29] sm:$0xff] (%p4280_p0)  }
 0x862   :  { %4656 = vperm.xlu1 (%p4280_p0), %7311, %v4633_v35   ;;  %4659 = vperm.xlu0 (%p4280_p0), %7312, %v4634_v34  }
 0x866   :  { %4662 = vperm.xlu1 (%p4280_p0), %7311, %v4635_v17  }
 0x8c7   :  { %4282 = sbr.rel (!%p4280_p0) target bundleno = 1544 (0x608), region = 145 }
 0x8c8   : > { %v4421_v1 = vpop.permute.xlu0 %4420 }
 0x8c9   : > { %v4426_v63 = vmul.f32 %v4421_v1, %v4390_v3  }
 0x8ca   :  { %v4636_v63 = vld [vmem:[%s12741_s3 + $0x20] sm:$0xff] (%p4280_p0) }
 0x8cb   :  { %4665 = vperm.xlu1 (%p4280_p0), %7311, %v4636_v63  }
 0x8cc   : > { %v4423_v57 = vpop.permute.xlu1 %4422  ;;  %v4438_v4 = vpop.permute.xlu0 (%p4280_p0), %4437 }
 0x8cd   : > { %v4427_v29 = vmul.f32 %v4423_v57, %v4391_v12   ;;  %6751 = vmatmul.mubr.msk.f32.vlgmr.msra.gmra.mrb[0].mxu0 (%p4280_p0), %vm4294_vm2, %v4438_v4  ;;  %v6605_v57 = vld [vmem:[%s12250_s13] ss:$0 sm:$0xff] (%p4280_p0) }
 0x8ce   :  { %v4637_v29 = vld [vmem:[%s12741_s3 + $0x28] sm:$0xff]  ;;  %7013 = vmatpush3.bf16.msra.mxu0 %v7012_v32  ;;  %6780 = vmatprep.mubr.msk.f32.mxu0 %vm7479_vm3, %v12742_v38 }
 0x8cf   :  { %4668 = vperm.xlu0 %7312, %v4637_v29   ;;  %4671 = vperm.xlu1 %7311, %v4638_v19  }
 0x8d0   :  { %7014 = vmatprep.subr.bf16.mxu0 %v7478_v20  ;;  %v4514_v46 = vpop.permute.xlu0 %4513 }
 0x8d1   :  { %6762 = vmatmul.mubr.msk.f32.vlgmr.msra.gmra.mrb[0].mxu1 %vm4294_vm2, %v4514_v46 }
 0x8d2   :  { %7016 = vmatpush3.bf16.msra.mxu0 %v7015_v27  ;;  %6811 = vmatprep.mubr.msk.f32.mxu1 %vm7479_vm3, %v12742_v38 }
 0x8d3   :  { %4674 = vperm.xlu0 %7312, %v4639_v47   ;;  %4677 = vperm.xlu1 %7311, %v4640_v52  }
 0x8d4   :  { %7017 = vmatprep.subr.bf16.mxu0 %v7478_v20  ;;  %7025 = vmatpush3.bf16.msra.mxu1 %v7024_v18  ;;  %v6625_v18 = vld [vmem:[%s12255_s18] ss:$0 sm:$0xff] }
 0x8d5   :  { %7026 = vmatprep.subr.bf16.mxu1 %v7478_v20 }
 0x8d6   :  { %7019 = vmatpush3.bf16.msra.mxu0 %v7018_v43 }
 0x8d7   :  { %7020 = vmatprep.subr.bf16.mxu0 %v7478_v20 }
 0x8da   :  { %7022 = vmatpush3.bf16.msra.mxu0 %v7021_v15 }
 0x8dd   :  { %v4654_v53 = vpop.permute.xlu1 %4653 }
 0x8de   :  { %vm4679_vm10 = vcmp.eq.s32.totalorder %v8250_v40, %v4654_v53  ;;  %v12745_v53 = vld [vmem:[#allocation12_spill] sm:$0xff] }
 0x8df   :  { %v6606_v45 = vsel %vm4679_vm10, 1.0, %v12742_v38 }
 0x8e0   :  { %6781 = vmatmul.mubr.msk.f32.vlgmr.msra.gmra.mrb[2].mxu0 %vm2799_vm6, %v6606_v45 }
 0x8e1   :  { %v4657_v7 = vpop.permute.xlu1 %4656  ;;  %6783 = vmatprep.mubr.msk.f32.mxu0 %vm7479_vm3, %v12742_v38  ;;  %v4660_v14 = vpop.permute.xlu0 %4659 }
 0x8e2   :  { %vm4680_vm5 = vcmp.eq.s32.totalorder %v8250_v40, %v4657_v7  ;;  %vm4681_vm11 = vcmp.eq.s32.totalorder %v8250_v40, %v4660_v14  ;;  %v4641_v7 = vld [vmem:[%s12746_s30] sm:$0xff] }
 0x8e3   :  { %v6607_v55 = vsel %vm4680_vm5, 1.0, %v12742_v38  ;;  %v6608_v54 = vsel %vm4681_vm11, 1.0, %v12742_v38 }
 0x8e4   :  { %6784 = vmatmul.mubr.msk.f32.gmra.mrb[4].mxu0 %vm2799_vm6, %v6607_v55  ;;  %v7027_v55 = vpack.c.bf16 %v4936_v36, %v4935_v2 }
 0x8e5   :  { %6786 = vmatprep.mubr.msk.f32.mxu0 %vm7479_vm3, %v12742_v38  ;;  %v4663_v3 = vpop.permute.xlu1 %4662 }
 0x8e6   :  { %vm4682_vm4 = vcmp.eq.s32.totalorder %v8250_v40, %v4663_v3 }
 0x8e7   :  { %v6609_v50 = vsel %vm4682_vm4, 1.0, %v12742_v38 }
 0x8e8   :  { %6787 = vmatmul.mubr.msk.f32.gmra.mrb[6].mxu0 %vm2799_vm6, %v6608_v54  ;;  %v4642_v54 = vld [vmem:[%s12746_s30 + $0x8] sm:$0xff] }
 0x8e9   :  { %6789 = vmatprep.mubr.msk.f32.mxu0 %vm7479_vm3, %v12742_v38 }
 0x8ec   :  { %6790 = vmatmul.mubr.msk.f32.gmra.mrb[8].mxu0 %vm2799_vm6, %v6609_v50 }
 0x8ed   :  { %6792 = vmatprep.mubr.msk.f32.mxu0 %vm7479_vm3, %v12742_v38 }
 0x94a   :  { %v4666_v23 = vpop.permute.xlu1 %4665 }
 0x94b   :  { %vm4683_vm15 = vcmp.eq.s32.totalorder %v8250_v40, %v4666_v23  ;;  %v4643_v23 = vld [vmem:[%s12746_s30 + $0x10] sm:$0xff] }
 0x94c   :  { %v6610_v60 = vsel %vm4683_vm15, 1.0, %v12742_v38 }
 0x94d   :  { %6793 = vmatmul.mubr.msk.f32.gmra.mrb[10].mxu0 %vm2799_vm6, %v6610_v60  ;;  %v4644_v60 = vld [vmem:[%s12746_s30 + $0x18] sm:$0xff] }
 0x94e   :  { %v4669_v12 = vpop.permute.xlu0 %4668  ;;  %v4672_v21 = vpop.permute.xlu1 %4671  ;;  %6795 = vmatprep.mubr.msk.f32.mxu0 %vm7479_vm3, %v12742_v38 }
 0x94f   :  { %vm4684_vm9 = vcmp.eq.s32.totalorder %v8250_v40, %v4669_v12  ;;  %vm4685_vm12 = vcmp.eq.s32.totalorder %v8250_v40, %v4672_v21 }
 0x950   :  { %v6611_v31 = vsel %vm4684_vm9, 1.0, %v12742_v38  ;;  %v6612_v48 = vsel %vm4685_vm12, 1.0, %v12742_v38 }
 0x951   :  { %6796 = vmatmul.mubr.msk.f32.gmra.mrb[12].mxu0 %vm2799_vm6, %v6611_v31  ;;  %v4645_v31 = vld [vmem:[%s12746_s30 + $0x20] sm:$0xff] }
 0x952   :  { %v4675_v8 = vpop.permute.xlu0 %4674  ;;  %6798 = vmatprep.mubr.msk.f32.mxu0 %vm7479_vm3, %v12742_v38  ;;  %v4678_v16 = vpop.permute.xlu1 %4677 }
 0x953   :  { %vm4686_vm14 = vcmp.eq.s32.totalorder %v8250_v40, %v4675_v8  ;;  %vm4687_vm8 = vcmp.eq.s32.totalorder %v8250_v40, %v4678_v16  ;;  %v4646_v8 = vld [vmem:[%s12746_s30 + $0x28] sm:$0xff] }
 0x954   :  { %v6613_v5 = vsel %vm4686_vm14, 1.0, %v12742_v38  ;;  %v6614_v42 = vsel %vm4687_vm8, 1.0, %v12742_v38 }
 0x955   :  { %6799 = vmatmul.mubr.msk.f32.gmra.mrb[14].mxu0 %vm2799_vm6, %v6612_v48 }
 0x956   :  { %6801 = vmatprep.mubr.msk.f32.mxu0 %vm7479_vm3, %v12742_v38 }
 0x959   :  { %6802 = vmatmul.mubr.msk.f32.gmra.mrb[16].mxu0 %vm2799_vm6, %v6613_v5  ;;  %v4647_v5 = vld [vmem:[%s12746_s30 + $0x30] sm:$0xff] }
 0x95a   :  { %6804 = vmatprep.mubr.msk.f32.mxu0 %vm7479_vm3, %v12742_v38 }
 0x95d   :  { %6805 = vmatmul.mubr.msk.f32.gmra.mrb[18].mxu0 %vm2799_vm6, %v6614_v42  ;;  %vm4630_vm6 = vcmask 0  }
 0x9a0   :  { %v4508_v41 = vpop.f32.mrb[0].mxu0 }
 0x9a1   :  { %v6752_v37 = vpop.f32.mrb[1].mxu0 }
 0x9a4   :  { %v4583_v1 = vpop.f32.mrb[0].mxu1 }
 0x9a5   :  { %v4584_v30 = vadd.f32 %v4583_v1, %v4508_v41  ;;  %v6763_v49 = vpop.f32.mrb[1].mxu1  ;;  %v4648_v41 = vld [vmem:[%s12746_s30 + $0x38] sm:$0xff]  ;;  %v4649_v1 = vld [vmem:[%s12746_s30 + $0x40] sm:$0xff] }
 0x9a7   :  { %v4594_v24 = vadd.f32 %v6605_v57, %v4584_v30 }
 0x9a9   :  { %v4604_v40 = vmul.f32 %v4594_v24, %v4594_v24  ;;  %v4595_v39 = vmul.f32 0.5, %v4594_v24  ;;  %v4610_v4 = vmul.f32 1.442695, %v4594_v24 }
 0x9ab   :  { %4606 = vrot.lane.b32.xlu1 %v4604_v40, %s7474_s28  ;;  %v4596_v35 = vmul.f32 1.442695, %v4595_v39  ;;  %v11824_v40 = vld [vmem:[%s12254_s17 + $0x8] sm:$0xff]  ;;  %v11834_v39 = vld [vmem:[%s12254_s17 + $0x18] sm:$0xff] }
 0x9ad   :  { %7313 = vpow2.f32 %v4596_v35 }
 0x9ae   :  { %7315 = vpow2.f32 %v4610_v4 }
 0x9b3   :  { %v4807_v28 = vpop.f32.mrb[2].mxu0 }
 0x9b4   :  { %v6782_v11 = vpop.f32.mrb[3].mxu0  ;;  %v4851_v3 = vmul.f32 %v4807_v28, %v4641_v7 }
 0x9b7   :  { %v4812_v62 = vpop.f32.mrb[4].mxu0  ;;  %v7314_v13 = vpop.eup %7313 }
 0x9b8   :  { %v6785_v26 = vpop.f32.mrb[5].mxu0  ;;  %4599 = vrot.lane.b32.xlu0 %v7314_v13, %s7468_s0  ;;  %v7316_v56 = vpop.eup %7315  ;;  %v4852_v50 = vmul.f32 %v4812_v62, %v4642_v54 }
 0x9bb   :  { %v4817_v58 = vpop.f32.mrb[6].mxu0 }
 0x9bc   :  { %v6788_v34 = vpop.f32.mrb[7].mxu0  ;;  %v4853_v12 = vmul.f32 %v4817_v58, %v4643_v23 }
 0x9bf   :  { %v4822_v44 = vpop.f32.mrb[8].mxu0 }
 0x9c0   :  { %v6791_v17 = vpop.f32.mrb[9].mxu0  ;;  %v4854_v21 = vmul.f32 %v4822_v44, %v4644_v60 }
 0xa1d   :  { %v4607_v27 = vpop.permute.xlu1 %4606 }
 0xa1e   :  { %v4609_v51 = vsub.f32 %v4594_v24, %v4607_v27 }
 0xa20   :  { %v4827_v29 = vpop.f32.mrb[10].mxu0  ;;  %v4612_v46 = vsub.f32 %v4609_v51, %v7316_v56 }
 0xa21   :  { %v6794_v63 = vpop.f32.mrb[11].mxu0  ;;  %v4855_v48 = vmul.f32 %v4827_v29, %v4645_v31 }
 0xa22   :  { %v4613_v43 = vadd.f32 1.0, %v4612_v46 }
 0xa24   :  { %v4832_v47 = vpop.f32.mrb[12].mxu0  ;;  %4615 = vrot.lane.b32.xlu0 %v4613_v43, %s7468_s0 }
 0xa25   :  { %v6797_v19 = vpop.f32.mrb[13].mxu0  ;;  %v4856_v16 = vmul.f32 %v4832_v47, %v4646_v8 }
 0xa28   :  { %v4837_v52 = vpop.f32.mrb[14].mxu0 }
 0xa29   :  { %v6800_v9 = vpop.f32.mrb[15].mxu0  ;;  %v4857_v42 = vmul.f32 %v4837_v52, %v4647_v5  ;;  %v7445_v5 = vmov %v11645_v59  }
 0xa2a   :  { %v4600_v15 = vpop.permute.xlu0 %4599 }
 0xa2b   :  { %v4602_v45 = vmul.f32 %v4600_v15, %v12745_v53 }
 0xa2c   :  { %v4842_v61 = vpop.f32.mrb[16].mxu0 }
 0xa2d   :  { %v6803_v32 = vpop.f32.mrb[17].mxu0  ;;  %v4603_v14 = vadd.f32 %v4602_v45, %v4594_v24  ;;  %v4858_v37 = vmul.f32 %v4842_v61, %v4648_v41  ;;  %v11819_v24 = vld [vmem:[%s12254_s17] sm:$0xff] }
 0xa2f   :  { %6812 = vmatmul.mubr.msk.f32.vlgmr.msra.gmra.mrb[2].mxu1 %vm3766_vm7, %v4603_v14 }
 0xa30   :  { %v4847_v25 = vpop.f32.mrb[18].mxu0  ;;  %7028 = vmatpush3.bf16.msra.mxu1 %v7027_v55  ;;  %6818 = vmatprep.mubr.msk.f32.mxu1 %vm7479_vm3, %v12742_v38 }
 0xa31   :  { %v6806_v33 = vpop.f32.mrb[19].mxu0  ;;  %v4859_v57 = vmul.f32 %v4847_v25, %v4649_v1 }
 0xa33   :  { %6819 = vmatmul.mubr.msk.f32.vlgmr.msra.gmra.mrb[4].mxu1 %vm3766_vm7, %v4851_v3 }
 0xa34   :  { %6821 = vmatprep.mubr.msk.f32.mxu1 %vm7479_vm3, %v12742_v38 }
 0xa37   :  { %6822 = vmatmul.mubr.msk.f32.gmra.mrb[6].mxu1 %vm3766_vm7, %v4852_v50 }
 0xa38   :  { %6824 = vmatprep.mubr.msk.f32.mxu1 %vm7479_vm3, %v12742_v38 }
 0xa3b   :  { %6825 = vmatmul.mubr.msk.f32.gmra.mrb[8].mxu1 %vm3766_vm7, %v4853_v12 }
 0xa3c   :  { %6827 = vmatprep.mubr.msk.f32.mxu1 %vm7479_vm3, %v12742_v38 }
 0xa3f   :  { %6828 = vmatmul.mubr.msk.f32.gmra.mrb[10].mxu1 %vm3766_vm7, %v4854_v21 }
 0xa40   :  { %6830 = vmatprep.mubr.msk.f32.mxu1 %vm7479_vm3, %v12742_v38 }
 0xa43   :  { %6831 = vmatmul.mubr.msk.f32.gmra.mrb[12].mxu1 %vm3766_vm7, %v4855_v48 }
 0xa44   :  { %6833 = vmatprep.mubr.msk.f32.mxu1 %vm7479_vm3, %v12742_v38 }
 0xa47   :  { %6834 = vmatmul.mubr.msk.f32.gmra.mrb[14].mxu1 %vm3766_vm7, %v4856_v16 }
 0xa48   :  { %6836 = vmatprep.mubr.msk.f32.mxu1 %vm7479_vm3, %v12742_v38 }
 0xa4b   :  { %6837 = vmatmul.mubr.msk.f32.gmra.mrb[16].mxu1 %vm3766_vm7, %v4857_v42  ;;  %v7449_v42 = vmov %v11634_v0  }
 0xa4c   :  { %6839 = vmatprep.mubr.msk.f32.mxu1 %vm7479_vm3, %v12742_v38 }
 0xa4f   :  { %6840 = vmatmul.mubr.msk.f32.gmra.mrb[18].mxu1 %vm3766_vm7, %v4858_v37 }
 0xa50   :  { %6842 = vmatprep.mubr.msk.f32.mxu1 %vm7479_vm3, %v12742_v38  ;;  %v11829_v38 = vld [vmem:[%s12254_s17 + $0x10] sm:$0xff]  ;;  %s11841_s17 = smov 0  }
 0xa53   :  { %6843 = vmatmul.mubr.msk.f32.gmra.mrb[20].mxu1 %vm3766_vm7, %v4859_v57 }
 0xa96   :  { %v4616_v30 = vpop.permute.xlu0 %4615 }
 0xa97   :  { %v4618_v49 = vsel %vm3766_vm7, %v4616_v30, 0.0 }
 0xa98   :  { %4619 = vadd.xlane.f32.xlu1 %v4618_v49 }
 0xb02   :  { %v4931_v22 = vpop.f32.mrb[2].mxu1 }
 0xb03   :  { %v6813_v6 = vpop.f32.mrb[3].mxu1 }
 0xb06   :  { %v5037_v35 = vpop.f32.mrb[4].mxu1 }
 0xb07   :  { %v5038_v28 = vadd.f32 %v6625_v18, %v5037_v35  ;;  %v6820_v11 = vpop.f32.mrb[5].mxu1 }
 0xb09   :  { %v5081_v62 = vadd.f32 %v5038_v28, %v4931_v22 }
 0xb0a   :  { %v5042_v26 = vpop.f32.mrb[6].mxu1 }
 0xb0b   :  { %5090 = vst [vmem:[#allocation3] sm:$0xff] %v5081_v62  ;;  %v5043_v13 = vadd.f32 %v6625_v18, %v5042_v26  ;;  %v6823_v58 = vpop.f32.mrb[7].mxu1 }
 0xb0d   :  { %v5082_v34 = vadd.f32 %v5043_v13, %v4931_v22 }
 0xb0e   :  { %v5047_v44 = vpop.f32.mrb[8].mxu1 }
 0xb0f   :  { %5091 = vst [vmem:[#allocation3 + $0x8] sm:$0xff] %v5082_v34  ;;  %v5048_v17 = vadd.f32 %v6625_v18, %v5047_v44  ;;  %v6826_v29 = vpop.f32.mrb[9].mxu1 }
 0xb11   :  { %v5083_v63 = vadd.f32 %v5048_v17, %v4931_v22 }
 0xb12   :  { %v5052_v47 = vpop.f32.mrb[10].mxu1 }
 0xb13   :  { %5092 = vst [vmem:[#allocation3 + $0x10] sm:$0xff] %v5083_v63  ;;  %v5053_v19 = vadd.f32 %v6625_v18, %v5052_v47  ;;  %v6829_v52 = vpop.f32.mrb[11].mxu1 }
 0xb15   :  { %v5084_v9 = vadd.f32 %v5053_v19, %v4931_v22 }
 0xb16   :  { %v5057_v61 = vpop.f32.mrb[12].mxu1 }
 0xb17   :  { %5093 = vst [vmem:[#allocation3 + $0x18] sm:$0xff] %v5084_v9  ;;  %v5058_v32 = vadd.f32 %v6625_v18, %v5057_v61  ;;  %v6832_v25 = vpop.f32.mrb[13].mxu1 }
 0xb19   :  { %v5085_v33 = vadd.f32 %v5058_v32, %v4931_v22 }
 0xb1a   :  { %v5062_v4 = vpop.f32.mrb[14].mxu1 }
 0xb1b   :  { %5094 = vst [vmem:[#allocation3 + $0x20] sm:$0xff] %v5085_v33  ;;  %v5063_v27 = vadd.f32 %v6625_v18, %v5062_v4  ;;  %v6835_v51 = vpop.f32.mrb[15].mxu1 }
 0xb1d   :  { %v5086_v56 = vadd.f32 %v5063_v27, %v4931_v22 }
 0xb1e   :  { %v5067_v46 = vpop.f32.mrb[16].mxu1 }
 0xb1f   :  { %5095 = vst [vmem:[#allocation3 + $0x28] sm:$0xff] %v5086_v56  ;;  %v5068_v43 = vadd.f32 %v6625_v18, %v5067_v46  ;;  %v6838_v2 = vpop.f32.mrb[17].mxu1 }
 0xb21   :  { %v5087_v36 = vadd.f32 %v5068_v43, %v4931_v22 }
 0xb22   :  { %v5072_v15 = vpop.f32.mrb[18].mxu1 }
 0xb23   :  { %5096 = vst [vmem:[#allocation3 + $0x30] sm:$0xff] %v5087_v36  ;;  %v5073_v53 = vadd.f32 %v6625_v18, %v5072_v15  ;;  %v6841_v45 = vpop.f32.mrb[19].mxu1 }
 0xb25   :  { %v5088_v7 = vadd.f32 %v5073_v53, %v4931_v22  ;;  %v4620_v55 = vpop.xlane.xlu1 %4619 }
 0xb26   :  { %v4621_v14 = vmul.f32 -0.5, %v4620_v55  ;;  %v5077_v3 = vpop.f32.mrb[20].mxu1 }
 0xb27   :  { %5097 = vst [vmem:[#allocation3 + $0x38] sm:$0xff] %v5088_v7  ;;  %v5078_v54 = vadd.f32 %v6625_v18, %v5077_v3  ;;  %v6844_v50 = vpop.f32.mrb[21].mxu1 }
 0xb28   :  { %v4622_v23 = vrot.slane %v4621_v14, 4 }
 0xb29   :  { %v5089_v12 = vadd.f32 %v5078_v54, %v4931_v22 }
 0xb2a   :  { %v4623_v60 = vadd.f32 %v4622_v23, %v4621_v14 }
 0xb2b   :  { %5098 = vst [vmem:[#allocation3 + $0x40] sm:$0xff] %v5089_v12 }
 0xb2c   :  { %v4624_v21 = vrot.slane %v4623_v60, 2 }
 0xb2e   :  { %v4625_v31 = vadd.f32 %v4624_v21, %v4623_v60 }
 0xb30   :  { %v4626_v8 = vrot.slane %v4625_v31, 1 }
 0xb32   :  { %v4627_v48 = vadd.f32 %v4626_v8, %v4625_v31 }
 0xb34   :  { %v4629_v16 = vmul.f32 0.125, %v4627_v48 }
 0xb36   :  { %4631 = vst.msk [vmem:[#allocation9] sm:$0x1] %vm4630_vm6, %v4629_v16 }
 0xb37 LB: > { %v7030_v41 = vpack.c.bf16 %v11824_v40, %v11819_v24  ;;  %v7480_v37 = vmov 0.0|0.0   ;;  %v7033_v0 = vpack.c.bf16 %v11834_v39, %v11829_v38  ;;  %vm7481_vm7 = vmmov 0   ;;  %s6635_s18 = sshll.u32 %s7455_s17, 3  ;;  %s7483_s25 = smov 32   ;;  %s7455_s17 = sphi %s11841_s17, %s5108_s17   ;;  %v7451_v42 = vphi %v7449_v42, %v7450_v42   ;;  %v7447_v5 = vphi %v7445_v5, %v7446_v5  }
 0xb38   : > { %7029 = vmatprep.subr.bf16.mxu0 %v7480_v37  ;;  %v7482_v59 = vmov 0.0   ;;  %s5112_s27 = scalar_lea.vmem [#allocation3], %s6635_s18  ;;  %s7484_s4 = smov 96  }
 0xb39   : > { %7031 = vmatpush3.bf16.msra.mxu0 %v7030_v41  ;;  %6853 = vmatprep.mubr.msk.f32.mxu0 %vm7481_vm7, %v7482_v59  ;;  %v5113_v1 = vld [vmem:[%s5112_s27] sm:$0xff]  ;;  %s7485_s1 = smov 64   ;;  %s5218_s5 = scalar_lea.vmem [#allocation4], %s6635_s18 }
 0xb3a   : > { %7032 = vmatprep.subr.bf16.mxu0 %v7480_v37  ;;  %s5108_s17 = sadd.s32 1, %s7455_s17  }
 0xb3b   : > { %p5105_p1 = scmp.ge.s32.totalorder %s5108_s17, 9  }
 0xb3c   :  { %v5235_v19 = vld [vmem:[%s12256_s19] sm:$0xff] (%p5105_p1)  ;;  %v5236_v52 = vld [vmem:[%s12256_s19 + $0x8] sm:$0xff] (%p5105_p1)  ;;  %7085 = vmatprep.subr.bf16.mxu1 (%p5105_p1), %v7478_v20  ;;  %v5237_v9 = vld [vmem:[%s12256_s19 + $0x10] sm:$0xff] (%p5105_p1)  ;;  %v12747_v38 = vmov (%p5105_p1), 0.0   ;;  %s7487_s16 = smov (%p5105_p1), [#allocation5]  }
 0xb3d   : > { %7034 = vmatpush3.bf16.msra.mxu0 %v7033_v0  ;;  %v7036_v24 = vpack.c.bf16 (%p5105_p1), %v5236_v52, %v5235_v19  ;;  %v5238_v40 = vld [vmem:[%s12256_s19 + $0x18] sm:$0xff] (%p5105_p1)  ;;  %6879 = vmatprep.mubr.msk.f32.mxu1 (%p5105_p1), %vm7479_vm3, %v12747_v38  ;;  %s7486_s19 = smov (%p5105_p1), [#allocation7]   ;;  %s5985_s28 = sshll.u32 (%p5105_p1), %s7487_s16, 4  ;;  %s5986_s28 = int_to_ptr.vmem [resolvable:$true] %s5985_s28 }
 0xb3e   :  { %7035 = vmatprep.subr.bf16.mxu0 (%p5105_p1), %v7478_v20  ;;  %v7039_v39 = vpack.c.bf16 (%p5105_p1), %v5238_v40, %v5237_v9  ;;  %s5995_s13 = sshll.u32 (%p5105_p1), %s7486_s19, 4  ;;  %s5996_s13 = int_to_ptr.vmem [resolvable:$true] %s5995_s13 }
 0xb3f   :  { %7087 = vmatpush3.bf16.msra.mxu1 (%p5105_p1), %v7036_v24  ;;  %s7323_s6 = scalar_lea.vmem (%p5105_p1), %s5996_s13, 128  ;;  %p7328_p3 = scmp.lt.s32.totalorder (%p5105_p1), %s5996_s13, %s5996_s13 }
 0xb40   : > { %6854 = vmatmul.mubr.msk.f32.vlgmr.msra.gmra.mrb[0].mxu0 %vm4294_vm2, %v7451_v42  ;;  %7086 = vmatprep.subr.bf16.mxu1 (%p5105_p1), %v7478_v20  ;;  %p7324_p2 = scmp.ne.s32.totalorder (%p5105_p1), %s5996_s13, %s7323_s6  ;;  %p7329_p4 = scmp.lt.s32.totalorder (%p5105_p1), %s7323_s6, %s7323_s6 }
 0xb41   :  { %6864 = vmatprep.mubr.msk.f32.mxu0 (%p5105_p1), %vm7479_vm3, %v12747_v38  ;;  %7037 = vmatpush3.bf16.msra.mxu0 (%p5105_p1), %v7036_v24 }
 0xb42   :  { %7038 = vmatprep.subr.bf16.mxu0 (%p5105_p1), %v7478_v20  ;;  %p7330_p5 = por (%p5105_p1), %p7329_p4, %p7328_p3 }
 0xb43   :  { %7088 = vmatpush3.bf16.msra.mxu1 (%p5105_p1), %v7039_v39 }
 0xb44   :  { %p7331_p6 = pnand (%p5105_p1), %p7330_p5, %p7324_p2 }
 0xb45   :  { %7040 = vmatpush3.bf16.msra.mxu0 (%p5105_p1), %v7039_v39 }
 0xc13   : > { %v5183_v57 = vpop.f32.mrb[0].mxu0 }
 0xc14   : > { %v5187_v30 = vadd.f32 %v5183_v57, %v5113_v1  ;;  %v6855_v49 = vpop.f32.mrb[1].mxu0 }
 0xc16   : > { %7317 = vtanh.f32 %v5187_v30  ;;  %v5188_v6 = vmul.f32 0.5, %v5187_v30 }
 0xc18   : > { %7319 = vtanh.f32 %v5188_v6 }
 0xc20   : > { %v7318_v22 = vpop.eup %7317 }
 0xc21   : > { %5199 = vrot.lane.b32.xlu0 %v7318_v22, %s7483_s25 }
 0xc22   : > { %v7320_v18 = vpop.eup %7319 }
 0xc23   : > { %v5190_v35 = vadd.f32 1.0, %v7320_v18 }
 0xc25   : > { %5194 = vrot.lane.b32.xlu0 %v7447_v5, %s7483_s25  ;;  %v5191_v28 = vmul.f32 0.5, %v5190_v35 }
 0xc93   : > { %v5200_v11 = vpop.permute.xlu0 %5199 }
 0xc94   : > { %v5202_v62 = vmul.f32 %v5200_v11, %v5191_v28 }
 0xc96   : > { %5204 = vrot.lane.b32.xlu1 %v5202_v62, %s7483_s25 }
 0xc97   : > { %v5195_v26 = vpop.permute.xlu0 %5194 }
 0xc98   : > { %v5197_v13 = vmul.f32 %v5195_v26, %v5191_v28 }
 0xd08   : > { %v5205_v58 = vpop.permute.xlu1 %5204 }
 0xd09   : > { %v5207_v34 = vadd.f32 %v5205_v58, %v5197_v13 }
 0xd0b   : > { %7321 = vtanh.f32 %v5207_v34 }
 0xd15   : > { %v7322_v44 = vpop.eup %7321 }
 0xd16   : > { %5210 = vrot.lane.b32.xlu1 %v7322_v44, %s7483_s25 }
 0xd1a   : > { %5221 = vrot.lane.b32.xlu1 %v5207_v34, %s7484_s4 }
 0xd88   : > { %v5211_v17 = vpop.permute.xlu1 %5210 }
 0xd89   : > { %v5213_v29 = vmul.f32 %v5211_v17, %v5191_v28 }
 0xd8b   : > { %5215 = vrot.lane.b32.xlu0 %v5213_v29, %s7485_s1 }
 0xd8c   : > { %v5222_v63 = vpop.permute.xlu1 %5221  }
 0xd8d   : > { %v7446_v5 = vmov %v5222_v63   ;;  %5225 = vst.msk [vmem:[#allocation7] sm:$0xff] (%p5105_p1), %vm4294_vm2, %v5222_v63 }
 0xdf8   :  { %5107 = sbr.rel (!%p5105_p1) target bundleno = 2871 (0xb37), region = 156 }
 0xdfd   : > { %v5216_v47 = vpop.permute.xlu0 %5215  }
 0xdfe   : > { %5219 = vst.msk [vmem:[%s5218_s5] sm:$0xff] %vm4294_vm2, %v5216_v47  ;;  %v7450_v42 = vmov %v5216_v47   ;;  %5224 = vst.msk [vmem:[#allocation5] sm:$0xff] (%p5105_p1), %vm4294_vm2, %v5216_v47 }
 0xe05   :  { %v5226_v61 = vld [vmem:[#allocation4] sm:$0xff]  ;;  %v5231_v32 = vld [vmem:[#allocation4 + $0x28] sm:$0xff]  ;;  %v5232_v33 = vld [vmem:[#allocation4 + $0x30] sm:$0xff] }
 0xe06   :  { %6865 = vmatmul.mubr.msk.f32.vlgmr.msra.gmra.mrb[0].mxu0 %vm4294_vm2, %v5226_v61  ;;  %6880 = vmatmul.mubr.msk.f32.vlgmr.msra.gmra.mrb[0].mxu1 %vm4294_vm2, %v5231_v32  ;;  %v5227_v25 = vld [vmem:[#allocation4 + $0x8] sm:$0xff]  ;;  %v5228_v20 = vld [vmem:[#allocation4 + $0x10] sm:$0xff]  ;;  %v5233_v4 = vld [vmem:[#allocation4 + $0x38] sm:$0xff] }
 0xe07   :  { %6867 = vmatprep.mubr.msk.f32.mxu0 %vm7479_vm3, %v12747_v38  ;;  %6882 = vmatprep.mubr.msk.f32.mxu1 %vm7479_vm3, %v12747_v38  ;;  %v5229_v27 = vld [vmem:[#allocation4 + $0x18] sm:$0xff]  ;;  %v5234_v51 = vld [vmem:[#allocation4 + $0x40] sm:$0xff] }
 0xe08   :  { %v5230_v56 = vld [vmem:[#allocation4 + $0x20] sm:$0xff] }
 0xe0a   :  { %6868 = vmatmul.mubr.msk.f32.gmra.mrb[2].mxu0 %vm4294_vm2, %v5227_v25  ;;  %6883 = vmatmul.mubr.msk.f32.gmra.mrb[2].mxu1 %vm4294_vm2, %v5232_v33 }
 0xe0b   :  { %6870 = vmatprep.mubr.msk.f32.mxu0 %vm7479_vm3, %v12747_v38  ;;  %6885 = vmatprep.mubr.msk.f32.mxu1 %vm7479_vm3, %v12747_v38 }
 0xe0e   :  { %6871 = vmatmul.mubr.msk.f32.gmra.mrb[4].mxu0 %vm4294_vm2, %v5228_v20  ;;  %6886 = vmatmul.mubr.msk.f32.gmra.mrb[4].mxu1 %vm4294_vm2, %v5233_v4 }
 0xe0f   :  { %6873 = vmatprep.mubr.msk.f32.mxu0 %vm7479_vm3, %v12747_v38  ;;  %6888 = vmatprep.mubr.msk.f32.mxu1 %vm7479_vm3, %v12747_v38 }
 0xe12   :  { %6874 = vmatmul.mubr.msk.f32.gmra.mrb[6].mxu0 %vm4294_vm2, %v5229_v27  ;;  %6889 = vmatmul.mubr.msk.f32.gmra.mrb[6].mxu1 %vm4294_vm2, %v5234_v51 }
 0xe13   :  { %6876 = vmatprep.mubr.msk.f32.mxu0 %vm7479_vm3, %v12747_v38 }
 0xe16   :  { %6877 = vmatmul.mubr.msk.f32.gmra.mrb[8].mxu0 %vm4294_vm2, %v5230_v56 }
 0xe17   :  { %7334 = shalt.err (!%p7331_p6)
}
 0xe18   :  { %s7335_s30 = scalar_lea.hbm %s12260_s23, 128 }
 0xe19   :  { %p7336_p7 = scmp.ne.s32.totalorder %s12260_s23, %s7335_s30  ;;  %p7339_p8 = scmp.lt.u32.totalorder %s7335_s30, %s12260_s23 }
 0xe1b   :  { %p7341_p9 = pnand %p7339_p8, %p7336_p7 }
 0xe1d   :  { %7344 = shalt.err (!%p7341_p9)
}
 0xe1e   :  { %5998 = dma.vmem_to_hbm [thread:$0]  %s5996_s13, 128, %s12260_s23, [#allocation8]  }
 0xe1f   :  { %s7345_s25 = scalar_lea.vmem %s5986_s28, 128  ;;  %p7350_p11 = scmp.lt.s32.totalorder %s5986_s28, %s5986_s28 }
 0xe20   :  { %p7346_p10 = scmp.ne.s32.totalorder %s5986_s28, %s7345_s25  ;;  %p7351_p12 = scmp.lt.s32.totalorder %s7345_s25, %s7345_s25 }
 0xe22   :  { %p7352_p13 = por %p7351_p12, %p7350_p11 }
 0xe24   :  { %p7353_p0 = pnand %p7352_p13, %p7346_p10 }
 0xe26   :  { %7356 = shalt.err (!%p7353_p0)
}
 0xe27   :  { %s7357_s5 = scalar_lea.hbm %s12259_s22, 128 }
 0xe28   :  { %p7358_p1 = scmp.ne.s32.totalorder %s12259_s22, %s7357_s5  ;;  %p7361_p2 = scmp.lt.u32.totalorder %s7357_s5, %s12259_s22 }
 0xe2a   :  { %p7363_p3 = pnand %p7361_p2, %p7358_p1 }
 0xe2c   :  { %7366 = shalt.err (!%p7363_p3)
}
 0xe2d   :  { %5988 = dma.vmem_to_hbm [thread:$0]  %s5986_s28, 128, %s12259_s22, [#allocation6]  }
 0xe2e   :  { %s7488_s12 = smov [#allocation9]  }
 0xe2f   :  { %s6005_s8 = sshll.u32 %s7488_s12, 4  ;;  %s6006_s8 = int_to_ptr.vmem [resolvable:$true] %s6005_s8 }
 0xe30   :  { %s7367_s9 = scalar_lea.vmem %s6006_s8, 16  ;;  %s7371_s19 = scalar_lea.vmem %s6006_s8, 32 }
 0xe31   :  { %p7368_p4 = scmp.ne.s32.totalorder %s6006_s8, %s7367_s9  ;;  %p7372_p5 = scmp.lt.s32.totalorder %s6006_s8, %s6006_s8 }
 0xe32   :  { %p7373_p6 = scmp.lt.s32.totalorder %s7371_s19, %s7367_s9 }
 0xe34   :  { %p7374_p7 = por %p7373_p6, %p7372_p5 }
 0xe36   :  { %p7375_p8 = pnand %p7374_p7, %p7368_p4 }
 0xe38   :  { %7378 = shalt.err (!%p7375_p8)
}
 0xe39   :  { %s7379_s6 = scalar_lea.hbm %s12261_s24, 16 }
 0xe3a   :  { %p7380_p9 = scmp.ne.s32.totalorder %s12261_s24, %s7379_s6  ;;  %p7383_p10 = scmp.lt.u32.totalorder %s7379_s6, %s12261_s24 }
 0xe3c   :  { %p7385_p11 = pnand %p7383_p10, %p7380_p9 }
 0xe3e   :  { %7388 = shalt.err (!%p7385_p11)
}
 0xe3f   :  { %6008 = dma.vmem_to_hbm [thread:$0]  %s6006_s8, 16, %s12261_s24, [#allocation8]   ;;  %v7489_v46 = vmov 1966171168   ;;  %v11944_v36 = vld [vmem:[%s12257_s20] ss:$0 sm:$0xff] }
 0xe40   :  { %v5386_v43 = vunpack.c.l.s4 %v7489_v46 }
 0xe42   :  { %v5387_v2 = vunpack.c.0.s8 %v5386_v43 }
 0xe44   :  { %v11947_v15 = vsub.s32 %v5387_v2, %v11496_v10 }
 0xed9   :  { %v5339_v53 = vpop.f32.mrb[0].mxu0  ;;  %v5364_v45 = vpop.f32.mrb[0].mxu1 }
 0xeda   :  { %v5340_v7 = vadd.f32 %v11944_v36, %v5339_v53  ;;  %v6866_v55 = vpop.f32.mrb[1].mxu0  ;;  %v5365_v14 = vadd.f32 %v11944_v36, %v5364_v45  ;;  %v6881_v3 = vpop.f32.mrb[1].mxu1 }
 0xedc   :  { %v5384_v54 = vcombine.high %v5340_v7, %v5340_v7  ;;  %v5391_v50 = vrot.slane %v5340_v7, %v11947_v15  ;;  %v5714_v23 = vcombine.high %v5365_v14, %v5365_v14  ;;  %v5721_v12 = vrot.slane %v5365_v14, %v11947_v15 }
 0xedd   :  { %v5344_v60 = vpop.f32.mrb[2].mxu0  ;;  %v5369_v21 = vpop.f32.mrb[2].mxu1 }
 0xede   :  { %v5398_v31 = vrot.slane %v5384_v54, %v11947_v15  ;;  %v5399_v10 = vcombine.high %v5391_v50, %v5391_v50  ;;  %v5407_v8 = vrot.slane %v5391_v50, %v11947_v15  ;;  %6647 = vst.sshfl [vmem:[%s12258_s21] sm:$0x1 pattern:$0x73625140] %v5391_v50  ;;  %v5728_v48 = vrot.slane %v5714_v23, %v11947_v15  ;;  %v6869_v16 = vpop.f32.mrb[3].mxu0  ;;  %v6884_v5 = vpop.f32.mrb[3].mxu1 }
 0xedf   :  { %6667 = vst.sshfl [vmem:[%s12258_s21 + $0x5] sm:$0x1 pattern:$0x73625140] %v5721_v12  ;;  %v5729_v42 = vcombine.high %v5721_v12, %v5721_v12  ;;  %v5737_v41 = vrot.slane %v5721_v12, %v11947_v15  ;;  %v5345_v37 = vadd.f32 %v11944_v36, %v5344_v60  ;;  %v5370_v0 = vadd.f32 %v11944_v36, %v5369_v21 }
 0xee0   :  { %v5400_v59 = vcombine.high %v5398_v31, %v5398_v31  ;;  %v5414_v1 = vrot.slane %v5398_v31, %v11947_v15  ;;  %v5421_v57 = vrot.slane %v5399_v10, %v11947_v15  ;;  %v5429_v30 = vcombine.high %v5407_v8, %v5407_v8  ;;  %6648 = vst.sshfl [vmem:[%s12258_s21 + $0x10] sm:$0x1 pattern:$0x73625140] %v5399_v10 }
 0xee1   :  { %6649 = vst.sshfl [vmem:[%s12258_s21 + $0x40] sm:$0x1 pattern:$0x73625140] %v5398_v31  ;;  %v5730_v49 = vcombine.high %v5728_v48, %v5728_v48  ;;  %v5744_v22 = vrot.slane %v5728_v48, %v11947_v15  ;;  %v5751_v6 = vrot.slane %v5729_v42, %v11947_v15  ;;  %v5759_v18 = vcombine.high %v5737_v41, %v5737_v41  ;;  %v5349_v35 = vpop.f32.mrb[4].mxu0  ;;  %v11981_v28 = vpop.f32.mrb[4].mxu1 }
 0xee2   :  { %6669 = vst.sshfl [vmem:[%s12258_s21 + $0x45] sm:$0x1 pattern:$0x73625140] %v5728_v48  ;;  %v5428_v11 = vrot.slane %v5400_v59, %v11947_v15  ;;  %v5430_v62 = vcombine.high %v5414_v1, %v5414_v1  ;;  %v5431_v26 = vcombine.high %v5421_v57, %v5421_v57  ;;  %5443 = vst [vmem:[%s12258_s21 + $0x20] sm:$0x1] %v5429_v30 }
 0xee3   :  { %6668 = vst.sshfl [vmem:[%s12258_s21 + $0x15] sm:$0x1 pattern:$0x73625140] %v5729_v42  ;;  %v5450_v13 = vcombine.high %v5345_v37, %v5345_v37  ;;  %v6872_v58 = vpop.f32.mrb[5].mxu0  ;;  %v6887_v34 = vpop.f32.mrb[5].mxu1  ;;  %v5758_v44 = vrot.slane %v5730_v49, %v11947_v15  ;;  %v5760_v17 = vcombine.high %v5744_v22, %v5744_v22  ;;  %v5761_v29 = vcombine.high %v5751_v6, %v5751_v6 }
 0xee4   :  { %6650 = vst.sshfl [vmem:[%s12258_s21 + $0x50] sm:$0x1 pattern:$0x73625140] %v5400_v59  ;;  %5773 = vst [vmem:[%s12258_s21 + $0x25] sm:$0x1] %v5759_v18  ;;  %v5457_v63 = vrot.slane %v5345_v37, %v11947_v15  ;;  %v5432_v47 = vcombine.high %v5428_v11, %v5428_v11  ;;  %v5780_v52 = vcombine.high %v5370_v0, %v5370_v0 }
 0xee5   :  { %6670 = vst.sshfl [vmem:[%s12258_s21 + $0x55] sm:$0x1 pattern:$0x73625140] %v5730_v49  ;;  %5444 = vst [vmem:[%s12258_s21 + $0x30] sm:$0x1] %v5431_v26  ;;  %v5464_v19 = vrot.slane %v5450_v13, %v11947_v15  ;;  %v5787_v9 = vrot.slane %v5370_v0, %v11947_v15  ;;  %v5762_v24 = vcombine.high %v5758_v44, %v5758_v44 }
 0xee6   :  { %5447 = vst [vmem:[%s12258_s21 + $0x60] sm:$0x1] %v5430_v62  ;;  %5774 = vst [vmem:[%s12258_s21 + $0x35] sm:$0x1] %v5761_v29  ;;  %v5465_v40 = vcombine.high %v5457_v63, %v5457_v63  ;;  %v5473_v38 = vrot.slane %v5457_v63, %v11947_v15  ;;  %v5350_v39 = vadd.f32 %v11944_v36, %v5349_v35  ;;  %v5354_v61 = vpop.f32.mrb[6].mxu0  ;;  %v12017_v32 = vpop.f32.mrb[6].mxu1 }
 0xee7   :  { %5777 = vst [vmem:[%s12258_s21 + $0x65] sm:$0x1] %v5760_v17  ;;  %6651 = vst.sshfl [vmem:[%s12258_s21 + $0x1] sm:$0x1 pattern:$0x73625140] %v5457_v63  ;;  %v5466_v25 = vcombine.high %v5464_v19, %v5464_v19  ;;  %v5480_v33 = vrot.slane %v5464_v19, %v11947_v15  ;;  %v5794_v20 = vrot.slane %v5780_v52, %v11947_v15 }
 0xee8   :  { %5448 = vst [vmem:[%s12258_s21 + $0x70] sm:$0x1] %v5432_v47  ;;  %6653 = vst.sshfl [vmem:[%s12258_s21 + $0x41] sm:$0x1 pattern:$0x73625140] %v5464_v19  ;;  %v5795_v4 = vcombine.high %v5787_v9, %v5787_v9  ;;  %v5487_v56 = vrot.slane %v5465_v40, %v11947_v15  ;;  %v5495_v46 = vcombine.high %v5473_v38, %v5473_v38 }
 0xee9   :  { %6671 = vst.sshfl [vmem:[%s12258_s21 + $0x6] sm:$0x1 pattern:$0x73625140] %v5787_v9  ;;  %v6875_v27 = vpop.f32.mrb[7].mxu0  ;;  %v6890_v51 = vpop.f32.mrb[7].mxu1  ;;  %v5803_v43 = vrot.slane %v5787_v9, %v11947_v15  ;;  %v5516_v2 = vcombine.high %v5350_v39, %v5350_v39  ;;  %v5494_v53 = vrot.slane %v5466_v25, %v11947_v15  ;;  %v5496_v45 = vcombine.high %v5480_v33, %v5480_v33 }
 0xeea   :  { %5778 = vst [vmem:[%s12258_s21 + $0x75] sm:$0x1] %v5762_v24  ;;  %6652 = vst.sshfl [vmem:[%s12258_s21 + $0x11] sm:$0x1 pattern:$0x73625140] %v5465_v40  ;;  %v5796_v7 = vcombine.high %v5794_v20, %v5794_v20  ;;  %v5810_v55 = vrot.slane %v5794_v20, %v11947_v15  ;;  %v5497_v14 = vcombine.high %v5487_v56, %v5487_v56 }
 0xeeb   :  { %6654 = vst.sshfl [vmem:[%s12258_s21 + $0x51] sm:$0x1 pattern:$0x73625140] %v5466_v25  ;;  %5509 = vst [vmem:[%s12258_s21 + $0x21] sm:$0x1] %v5495_v46  ;;  %v5817_v3 = vrot.slane %v5795_v4, %v11947_v15  ;;  %v5825_v54 = vcombine.high %v5803_v43, %v5803_v43  ;;  %v5523_v50 = vrot.slane %v5350_v39, %v11947_v15 }
 0xeec   :  { %6672 = vst.sshfl [vmem:[%s12258_s21 + $0x16] sm:$0x1 pattern:$0x73625140] %v5795_v4  ;;  %v12054_v23 = vpop.f32.mrb[8].mxu0  ;;  %v5498_v12 = vcombine.high %v5494_v53, %v5494_v53  ;;  %v5824_v60 = vrot.slane %v5796_v7, %v11947_v15  ;;  %v5826_v21 = vcombine.high %v5810_v55, %v5810_v55  ;;  %v5530_v31 = vrot.slane %v5516_v2, %v11947_v15 }
 0xeed   :  { %6673 = vst.sshfl [vmem:[%s12258_s21 + $0x46] sm:$0x1 pattern:$0x73625140] %v5794_v20  ;;  %5513 = vst [vmem:[%s12258_s21 + $0x61] sm:$0x1] %v5496_v45  ;;  %v5827_v8 = vcombine.high %v5817_v3, %v5817_v3  ;;  %v5531_v48 = vcombine.high %v5523_v50, %v5523_v50  ;;  %v5539_v16 = vrot.slane %v5523_v50, %v11947_v15 }
 0xeee   :  { %6674 = vst.sshfl [vmem:[%s12258_s21 + $0x56] sm:$0x1 pattern:$0x73625140] %v5796_v7  ;;  %v6878_v10 = vpop.f32.mrb[9].mxu0  ;;  %v5375_v5 = vadd.f32 %v11944_v36, %v11981_v28  ;;  %v5828_v42 = vcombine.high %v5824_v60, %v5824_v60  ;;  %v5532_v41 = vcombine.high %v5530_v31, %v5530_v31  ;;  %v5546_v37 = vrot.slane %v5530_v31, %v11947_v15 }
 0xeef   :  { %5510 = vst [vmem:[%s12258_s21 + $0x31] sm:$0x1] %v5497_v14  ;;  %5839 = vst [vmem:[%s12258_s21 + $0x26] sm:$0x1] %v5825_v54  ;;  %v5355_v0 = vadd.f32 %v11944_v36, %v5354_v61  ;;  %v5553_v59 = vrot.slane %v5531_v48, %v11947_v15  ;;  %v5561_v1 = vcombine.high %v5539_v16, %v5539_v16 }
 0xef0   :  { %6655 = vst.sshfl [vmem:[%s12258_s21 + $0x2] sm:$0x1 pattern:$0x73625140] %v5523_v50  ;;  %5514 = vst [vmem:[%s12258_s21 + $0x71] sm:$0x1] %v5498_v12  ;;  %v5846_v57 = vcombine.high %v5375_v5, %v5375_v5  ;;  %v5853_v30 = vrot.slane %v5375_v5, %v11947_v15  ;;  %v5560_v49 = vrot.slane %v5532_v41, %v11947_v15 }
 0xef1   :  { %5843 = vst [vmem:[%s12258_s21 + $0x66] sm:$0x1] %v5826_v21  ;;  %6657 = vst.sshfl [vmem:[%s12258_s21 + $0x42] sm:$0x1 pattern:$0x73625140] %v5530_v31  ;;  %v5562_v22 = vcombine.high %v5546_v37, %v5546_v37  ;;  %v5582_v6 = vcombine.high %v5355_v0, %v5355_v0  ;;  %v5589_v18 = vrot.slane %v5355_v0, %v11947_v15 }
 0xef2   :  { %5840 = vst [vmem:[%s12258_s21 + $0x36] sm:$0x1] %v5827_v8  ;;  %6656 = vst.sshfl [vmem:[%s12258_s21 + $0x12] sm:$0x1 pattern:$0x73625140] %v5531_v48  ;;  %v5563_v35 = vcombine.high %v5553_v59, %v5553_v59  ;;  %v5860_v28 = vrot.slane %v5846_v57, %v11947_v15  ;;  %v5861_v11 = vcombine.high %v5853_v30, %v5853_v30 }
 0xef3   :  { %5844 = vst [vmem:[%s12258_s21 + $0x76] sm:$0x1] %v5828_v42  ;;  %6658 = vst.sshfl [vmem:[%s12258_s21 + $0x52] sm:$0x1 pattern:$0x73625140] %v5532_v41  ;;  %v5869_v62 = vrot.slane %v5853_v30, %v11947_v15  ;;  %v5564_v26 = vcombine.high %v5560_v49, %v5560_v49  ;;  %v5596_v13 = vrot.slane %v5582_v6, %v11947_v15 }
 0xef4   :  { %5575 = vst [vmem:[%s12258_s21 + $0x22] sm:$0x1] %v5561_v1  ;;  %6675 = vst.sshfl [vmem:[%s12258_s21 + $0x7] sm:$0x1 pattern:$0x73625140] %v5853_v30  ;;  %v5597_v58 = vcombine.high %v5589_v18, %v5589_v18  ;;  %v5605_v34 = vrot.slane %v5589_v18, %v11947_v15  ;;  %v5862_v44 = vcombine.high %v5860_v28, %v5860_v28 }
 0xef5   :  { %5579 = vst [vmem:[%s12258_s21 + $0x62] sm:$0x1] %v5562_v22  ;;  %6659 = vst.sshfl [vmem:[%s12258_s21 + $0x3] sm:$0x1 pattern:$0x73625140] %v5589_v18  ;;  %v5876_v17 = vrot.slane %v5860_v28, %v11947_v15  ;;  %v5883_v29 = vrot.slane %v5861_v11, %v11947_v15  ;;  %v5891_v63 = vcombine.high %v5869_v62, %v5869_v62 }
 0xef6   :  { %5576 = vst [vmem:[%s12258_s21 + $0x32] sm:$0x1] %v5563_v35  ;;  %6676 = vst.sshfl [vmem:[%s12258_s21 + $0x17] sm:$0x1 pattern:$0x73625140] %v5861_v11  ;;  %v5598_v47 = vcombine.high %v5596_v13, %v5596_v13  ;;  %v5612_v19 = vrot.slane %v5596_v13, %v11947_v15  ;;  %v5619_v52 = vrot.slane %v5597_v58, %v11947_v15 }
 0xef7   :  { %6677 = vst.sshfl [vmem:[%s12258_s21 + $0x47] sm:$0x1 pattern:$0x73625140] %v5860_v28  ;;  %5580 = vst [vmem:[%s12258_s21 + $0x72] sm:$0x1] %v5564_v26  ;;  %v5627_v9 = vcombine.high %v5605_v34, %v5605_v34  ;;  %v5890_v24 = vrot.slane %v5862_v44, %v11947_v15  ;;  %v5892_v40 = vcombine.high %v5876_v17, %v5876_v17 }
 0xef8   :  { %6660 = vst.sshfl [vmem:[%s12258_s21 + $0x13] sm:$0x1 pattern:$0x73625140] %v5597_v58  ;;  %v5893_v38 = vcombine.high %v5883_v29, %v5883_v29  ;;  %5905 = vst [vmem:[%s12258_s21 + $0x27] sm:$0x1] %v5891_v63  ;;  %v5380_v39 = vadd.f32 %v11944_v36, %v12017_v32  ;;  %v5626_v61 = vrot.slane %v5598_v47, %v11947_v15 }
 0xef9   :  { %6661 = vst.sshfl [vmem:[%s12258_s21 + $0x43] sm:$0x1 pattern:$0x73625140] %v5596_v13  ;;  %v5628_v25 = vcombine.high %v5612_v19, %v5612_v19  ;;  %v5629_v33 = vcombine.high %v5619_v52, %v5619_v52  ;;  %5641 = vst [vmem:[%s12258_s21 + $0x23] sm:$0x1] %v5627_v9  ;;  %v5360_v20 = vadd.f32 %v11944_v36, %v12054_v23 }
 0xefa   :  { %6678 = vst.sshfl [vmem:[%s12258_s21 + $0x57] sm:$0x1 pattern:$0x73625140] %v5862_v44  ;;  %v5894_v4 = vcombine.high %v5890_v24, %v5890_v24  ;;  %5906 = vst [vmem:[%s12258_s21 + $0x37] sm:$0x1] %v5893_v38  ;;  %v5912_v32 = vcombine.high %v5380_v39, %v5380_v39  ;;  %v5919_v27 = vrot.slane %v5380_v39, %v11947_v15 }
 0xefb   :  { %6662 = vst.sshfl [vmem:[%s12258_s21 + $0x53] sm:$0x1 pattern:$0x73625140] %v5598_v47  ;;  %5909 = vst [vmem:[%s12258_s21 + $0x67] sm:$0x1] %v5892_v40  ;;  %v5630_v51 = vcombine.high %v5626_v61, %v5626_v61  ;;  %v5648_v36 = vcombine.high %v5360_v20, %v5360_v20  ;;  %v5655_v56 = vrot.slane %v5360_v20, %v11947_v15 }
 0xefc   :  { %5642 = vst [vmem:[%s12258_s21 + $0x33] sm:$0x1] %v5629_v33  ;;  %5645 = vst [vmem:[%s12258_s21 + $0x63] sm:$0x1] %v5628_v25  ;;  %v5926_v46 = vrot.slane %v5912_v32, %v11947_v15  ;;  %v5927_v43 = vcombine.high %v5919_v27, %v5919_v27  ;;  %v5935_v2 = vrot.slane %v5919_v27, %v11947_v15 }
 0xefd   :  { %5910 = vst [vmem:[%s12258_s21 + $0x77] sm:$0x1] %v5894_v4  ;;  %6679 = vst.sshfl [vmem:[%s12258_s21 + $0x8] sm:$0x1 pattern:$0x73625140] %v5919_v27  ;;  %v5662_v53 = vrot.slane %v5648_v36, %v11947_v15  ;;  %v5663_v45 = vcombine.high %v5655_v56, %v5655_v56  ;;  %v5671_v7 = vrot.slane %v5655_v56, %v11947_v15 }
 0xefe   :  { %5646 = vst [vmem:[%s12258_s21 + $0x73] sm:$0x1] %v5630_v51  ;;  %6663 = vst.sshfl [vmem:[%s12258_s21 + $0x4] sm:$0x1 pattern:$0x73625140] %v5655_v56  ;;  %v5928_v55 = vcombine.high %v5926_v46, %v5926_v46  ;;  %v5942_v14 = vrot.slane %v5926_v46, %v11947_v15  ;;  %v5949_v3 = vrot.slane %v5927_v43, %v11947_v15 }
 0xeff   :  { %v5957_v54 = vcombine.high %v5935_v2, %v5935_v2  ;;  %6680 = vst.sshfl [vmem:[%s12258_s21 + $0x18] sm:$0x1 pattern:$0x73625140] %v5927_v43  ;;  %v5664_v50 = vcombine.high %v5662_v53, %v5662_v53  ;;  %v5678_v23 = vrot.slane %v5662_v53, %v11947_v15  ;;  %v5685_v12 = vrot.slane %v5663_v45, %v11947_v15 }
 0xf00   :  { %6681 = vst.sshfl [vmem:[%s12258_s21 + $0x48] sm:$0x1 pattern:$0x73625140] %v5926_v46  ;;  %v5693_v60 = vcombine.high %v5671_v7, %v5671_v7  ;;  %v5956_v21 = vrot.slane %v5928_v55, %v11947_v15  ;;  %v5958_v31 = vcombine.high %v5942_v14, %v5942_v14  ;;  %v5959_v10 = vcombine.high %v5949_v3, %v5949_v3 }
 0xf01   :  { %6664 = vst.sshfl [vmem:[%s12258_s21 + $0x14] sm:$0x1 pattern:$0x73625140] %v5663_v45  ;;  %5971 = vst [vmem:[%s12258_s21 + $0x28] sm:$0x1] %v5957_v54  ;;  %v5692_v8 = vrot.slane %v5664_v50, %v11947_v15  ;;  %v5694_v48 = vcombine.high %v5678_v23, %v5678_v23  ;;  %v5695_v16 = vcombine.high %v5685_v12, %v5685_v12 }
 0xf02   :  { %6665 = vst.sshfl [vmem:[%s12258_s21 + $0x44] sm:$0x1 pattern:$0x73625140] %v5662_v53  ;;  %5707 = vst [vmem:[%s12258_s21 + $0x24] sm:$0x1] %v5693_v60  ;;  %v5960_v5 = vcombine.high %v5956_v21, %v5956_v21 }
 0xf03   :  { %6682 = vst.sshfl [vmem:[%s12258_s21 + $0x58] sm:$0x1 pattern:$0x73625140] %v5928_v55  ;;  %5972 = vst [vmem:[%s12258_s21 + $0x38] sm:$0x1] %v5959_v10  ;;  %v5696_v15 = vcombine.high %v5692_v8, %v5692_v8 }
 0xf04   :  { %6666 = vst.sshfl [vmem:[%s12258_s21 + $0x54] sm:$0x1 pattern:$0x73625140] %v5664_v50  ;;  %5975 = vst [vmem:[%s12258_s21 + $0x68] sm:$0x1] %v5958_v31 }
 0xf05   :  { %5708 = vst [vmem:[%s12258_s21 + $0x34] sm:$0x1] %v5695_v16  ;;  %5711 = vst [vmem:[%s12258_s21 + $0x64] sm:$0x1] %v5694_v48 }
 0xf06   :  { %5976 = vst [vmem:[%s12258_s21 + $0x78] sm:$0x1] %v5960_v5  ;;  %5712 = vst [vmem:[%s12258_s21 + $0x74] sm:$0x1] %v5696_v15 }
 0xf07   :  { %7421 = dma.done.wait [#allocation6], 128  }
 0xf08   :  { %7422 = vsyncadd [#allocation6], 4294967168 }
 0xf09   :  { %7423 = dma.done.wait [#allocation8], 144  }
 0xf0a   :  { %7424 = vsyncadd [#allocation8], 4294967152 }
 0xf0b   :  { %6020 = vsyncpa [#allocation6], 1 }
 0xf0c   :  { %6021 = vsyncpa [#allocation8], 1 }

</bundles_post_ra>
